<compile_context>
chip_gen: v6e
topology: v6e:2x2x1
jax: 0.10.0
libtpu: 0.0.40
codegen_flags: <defaults>
</compile_context>

<pallas_src>
import functools
import math

import jax
import jax.numpy as jnp
import numpy as np
from jax.experimental import pallas as pl
from jax.experimental.pallas import tpu as pltpu


def _gelu_tanh(x):
    # TODO(synk): PyTorch nn.GELU() defaults to the exact erf form; the tanh
    # approximation (max abs deviation ~1e-3) is used because lax.erf has no
    # guaranteed Mosaic lowering.  The in-script reference uses the same
    # formula so the comparison is apples-to-apples.
    c = math.sqrt(2.0 / math.pi)
    return 0.5 * x * (1.0 + jnp.tanh(c * (x + 0.044715 * x * x * x)))


def _lkat_kernel(x_ref,                       # (Cp, S)      lane-dense input slab
                 w0_ref, b0_ref,              # (Cp, Cp), (Cp, 1)   conv0 1x1
                 c7_ref, bd7_ref,             # (49, Cp, S), (Cp, 1) dw 7x7 tap coefs
                 c9_ref, bd9_ref,             # (81, Cp, S), (Cp, 1) dw 9x9 (dil 3)
                 wp_ref, bp_ref,              # (Cp, Cp), (Cp, 1)   att 1x1
                 w1_ref, b1_ref,              # (Cp, Cp), (Cp, 1)   conv1 1x1
                 o_ref,                       # (Cp, S)      output slab
                 pbuf_ref,                    # (Cp, 2*max_off + S) VMEM scratch
                 *, W, taps7, taps9, max_off):
    f32 = jnp.float32
    Cp, S = x_ref.shape

    # ---- conv0: 1x1 conv (MXU dot) + GELU ----------------------------------
    x = x_ref[...]
    y0 = _gelu_tanh(
        jnp.dot(w0_ref[...], x, preferred_element_type=f32) + b0_ref[...])

    # ---- depthwise convs, flattened (Cp, S) layout --------------------------
    # pbuf = [zero halo | current dw input | zero halo]; every tap (du, dv) is
    # a static slice read at flat offset du*W + dv.  Contributions whose
    # source pixel falls outside the (H, W) window (or would cross a row /
    # sample boundary) are zeroed by the per-tap coefficient planes, so the
    # halo only has to be finite (we keep it zero).  Interior writes land at
    # lane offset max_off (a multiple of 128) -> unmasked aligned stores.
    zero_halo = jnp.zeros((Cp, max_off), f32)
    pbuf_ref[:, :max_off] = zero_halo
    pbuf_ref[:, max_off + S:] = zero_halo

    def depthwise(src, coef_ref, bias_ref, taps):
        pbuf_ref[:, max_off:max_off + S] = src
        acc = jnp.zeros((Cp, S), f32) + bias_ref[...]
        for t, (du, dv) in enumerate(taps):
            start = max_off + du * W + dv
            acc = acc + coef_ref[t] * pbuf_ref[:, start:start + S]
        return acc

    a = depthwise(y0, c7_ref, bd7_ref, taps7)   # att[0]: 7x7, pad 3
    a = depthwise(a, c9_ref, bd9_ref, taps9)    # att[1]: 9x9, dil 3, pad 12

    # ---- att[2]: 1x1 conv (MXU), gate, conv1 (MXU) ---------------------------
    att = jnp.dot(wp_ref[...], a, preferred_element_type=f32) + bp_ref[...]
    y = y0 * att
    out = jnp.dot(w1_ref[...], y, preferred_element_type=f32) + b1_ref[...]
    o_ref[...] = out.astype(o_ref.dtype)


def _dw_tap_coefs(wd_pad, taps, H, W):
    """coef[t, c, i*W+j] = wd[c, u, v] if output (i, j) reads an in-bounds
    source pixel (i+du, j+dv), else 0.  Masks are compile-time numpy."""
    Cp, K, _ = wd_pad.shape
    ii, jj = np.arange(H), np.arange(W)
    masks = []
    for (du, dv) in taps:
        r = (ii + du >= 0) & (ii + du < H)
        c = (jj + dv >= 0) & (jj + dv < W)
        masks.append(np.outer(r, c).reshape(H * W))
    masks = jnp.asarray(np.stack(masks).astype(np.float32))   # (T, H*W)
    w_flat = wd_pad.reshape(Cp, K * K).T                       # (T, Cp)
    return w_flat[:, :, None] * masks[:, None, :]              # (T, Cp, H*W)


def lkat_forward(x, w0, b0, wd7, bd7, wd9, bd9, wp, bp, w1, b1,
                 *, samples_per_step=None):
    """Pallas implementation of LKAT.forward for NCHW input x.

    samples_per_step: batch samples folded into one grid step.  Default
    (None) folds the whole batch (best on single-TC v5e/v6e); on v7x use
    N // 2 so the 'parallel' grid axis shards samples across TensorCores.
    """
    N, C, H, W = x.shape
    assert w0.shape == (C, C) and w1.shape == (C, C) and wp.shape == (C, C)
    assert wd7.shape == (C, 7, 7) and wd9.shape == (C, 9, 9)

    HW = H * W
    Cp = ((C + 7) // 8) * 8                 # pad channels to a sublane tile
    bn = N if samples_per_step is None else samples_per_step
    assert N % bn == 0
    S = bn * HW                             # lane extent per grid step
    n_steps = N // bn
    # Halo half-width >= largest flat tap offset (12*W + 12 for the dilated
    # 9x9), rounded up to a lane tile so the interior write stays aligned.
    max_off = -(-(12 * W + 12) // 128) * 128

    taps7 = tuple((u - 3, v - 3) for u in range(7) for v in range(7))
    taps9 = tuple((3 * u - 12, 3 * v - 12) for u in range(9) for v in range(9))

    f32 = jnp.float32

    def cpad(a, axes):
        pads = [(0, 0)] * a.ndim
        for ax in axes:
            pads[ax] = (0, Cp - C)
        return jnp.pad(a.astype(f32), pads)

    # Lane-dense channels-on-sublanes layout (Cp, N*H*W); padded channels are
    # all-zero and stay zero through every stage (gelu(0)=0, zero dw weights).
    x_cs = cpad(jnp.transpose(x.reshape(N, C, HW), (1, 0, 2)), (0,))
    x_cs = x_cs.reshape(Cp, N * HW)

    w0p = cpad(w0, (0, 1))
    wpp = cpad(wp, (0, 1))
    w1p = cpad(w1, (0, 1))
    b0p = cpad(b0, (0,)).reshape(Cp, 1)
    bpp = cpad(bp, (0,)).reshape(Cp, 1)
    b1p = cpad(b1, (0,)).reshape(Cp, 1)
    bd7p = cpad(bd7, (0,)).reshape(Cp, 1)
    bd9p = cpad(bd9, (0,)).reshape(Cp, 1)
    coef7 = jnp.tile(_dw_tap_coefs(cpad(wd7, (0,)), taps7, H, W), (1, 1, bn))
    coef9 = jnp.tile(_dw_tap_coefs(cpad(wd9, (0,)), taps9, H, W), (1, 1, bn))

    kernel = functools.partial(_lkat_kernel, W=W, taps7=taps7, taps9=taps9,
                               max_off=max_off)

    def full(shape):
        return pl.BlockSpec(shape, lambda i, _s=len(shape): (0,) * _s)

    out_flat = pl.pallas_call(
        kernel,
        out_shape=jax.ShapeDtypeStruct((Cp, N * HW), f32),
        grid_spec=pltpu.PrefetchScalarGridSpec(
            num_scalar_prefetch=0,
            grid=(n_steps,),
            in_specs=[
                pl.BlockSpec((Cp, S), lambda i: (0, i)),    # x slab
                full((Cp, Cp)), full((Cp, 1)),              # conv0
                full((49, Cp, S)), full((Cp, 1)),           # dw 7x7 coefs/bias
                full((81, Cp, S)), full((Cp, 1)),           # dw 9x9 coefs/bias
                full((Cp, Cp)), full((Cp, 1)),              # att 1x1
                full((Cp, Cp)), full((Cp, 1)),              # conv1
            ],
            out_specs=pl.BlockSpec((Cp, S), lambda i: (0, i)),
            scratch_shapes=[pltpu.VMEM((Cp, 2 * max_off + S), jnp.float32)],
        ),
        compiler_params=pltpu.CompilerParams(
            dimension_semantics=("parallel",)),
    )(x_cs, w0p, b0p, coef7, bd7p, coef9, bd9p, wpp, bpp, w1p, b1p)

    out = out_flat.reshape(Cp, N, HW)[:C]
    return jnp.transpose(out, (1, 0, 2)).reshape(N, C, H, W).astype(x.dtype)


# ----------------------------- pure-JAX reference -----------------------------
def _lkat_reference(x, w0, b0, wd7, bd7, wd9, bd9, wp, bp, w1, b1):
    hi = jax.lax.Precision.HIGHEST

    def conv1x1(t, w, b):
        return (jnp.einsum("oc,nchw->nohw", w, t, precision=hi)
                + b[None, :, None, None])

    def dwconv(t, w, b, dil, pad):
        out = jax.lax.conv_general_dilated(
            t, w[:, None, :, :],
            window_strides=(1, 1),
            padding=((pad, pad), (pad, pad)),
            rhs_dilation=(dil, dil),
            dimension_numbers=("NCHW", "OIHW", "NCHW"),
            feature_group_count=t.shape[1],
            precision=hi)
        return out + b[None, :, None, None]

    y0 = _gelu_tanh(conv1x1(x, w0, b0))
    a = dwconv(y0, wd7, bd7, 1, 3)
    a = dwconv(a, wd9, bd9, 3, 12)
    a = conv1x1(a, wp, bp)
    return conv1x1(y0 * a, w1, b1)


if __name__ == "__main__":
    key = jax.random.PRNGKey(0)
    ks = jax.random.split(key, 11)
    N, C, H, W = 2, 4, 16, 16   # batch=2, n_feats=4, spatial 16x16

    x = jax.random.normal(ks[0], (N, C, H, W), jnp.float32)
    w0 = 0.30 * jax.random.normal(ks[1], (C, C), jnp.float32)
    b0 = 0.10 * jax.random.normal(ks[2], (C,), jnp.float32)
    wd7 = 0.10 * jax.random.normal(ks[3], (C, 7, 7), jnp.float32)
    bd7 = 0.10 * jax.random.normal(ks[4], (C,), jnp.float32)
    wd9 = 0.05 * jax.random.normal(ks[5], (C, 9, 9), jnp.float32)
    bd9 = 0.10 * jax.random.normal(ks[6], (C,), jnp.float32)
    wp = 0.30 * jax.random.normal(ks[7], (C, C), jnp.float32)
    bp = 0.10 * jax.random.normal(ks[8], (C,), jnp.float32)
    w1 = 0.30 * jax.random.normal(ks[9], (C, C), jnp.float32)
    b1 = 0.10 * jax.random.normal(ks[10], (C,), jnp.float32)

    y = lkat_forward(x, w0, b0, wd7, bd7, wd9, bd9, wp, bp, w1, b1)
    y = jax.block_until_ready(y)

    ref = _lkat_reference(x, w0, b0, wd7, bd7, wd9, bd9, wp, bp, w1, b1)
    err = jnp.max(jnp.abs(y - ref))
    assert y.shape == (N, C, H, W)
    assert jnp.allclose(y, ref, atol=2e-3, rtol=2e-3), f"max abs err = {err}"
    print("KERNEL_OK")
</pallas_src>

<mosaic_0001>
module attributes {stable_mosaic.version = 11 : i64} {
  func.func @_lkat_kernel(%arg0: i32, %arg1: memref<8x512xf32, #tpu.memory_space<vmem>>, %arg2: memref<8x8xf32, #tpu.memory_space<vmem>>, %arg3: memref<8x1xf32, #tpu.memory_space<vmem>>, %arg4: memref<49x8x512xf32, #tpu.memory_space<vmem>>, %arg5: memref<8x1xf32, #tpu.memory_space<vmem>>, %arg6: memref<81x8x512xf32, #tpu.memory_space<vmem>>, %arg7: memref<8x1xf32, #tpu.memory_space<vmem>>, %arg8: memref<8x8xf32, #tpu.memory_space<vmem>>, %arg9: memref<8x1xf32, #tpu.memory_space<vmem>>, %arg10: memref<8x8xf32, #tpu.memory_space<vmem>>, %arg11: memref<8x1xf32, #tpu.memory_space<vmem>>, %arg12: memref<8x512xf32, #tpu.memory_space<vmem>>, %arg13: memref<8x1024xf32, #tpu.memory_space<vmem>>) attributes {dimension_semantics = [#tpu.dimension_semantics<parallel>], iteration_bounds = array<i64: 1>, scalar_prefetch = 0 : i64, scratch_operands = 1 : i64, tpu.core_type = #tpu.core_type<tc>, window_params = [{transform_indices = @transform_0, window_bounds = array<i64: 8, 512>}, {pipeline_mode = #tpu.pipeline_mode<synchronous>, transform_indices = @transform_1, window_bounds = array<i64: 8, 8>}, {pipeline_mode = #tpu.pipeline_mode<synchronous>, transform_indices = @transform_2, window_bounds = array<i64: 8, 1>}, {pipeline_mode = #tpu.pipeline_mode<synchronous>, transform_indices = @transform_3, window_bounds = array<i64: 49, 8, 512>}, {pipeline_mode = #tpu.pipeline_mode<synchronous>, transform_indices = @transform_4, window_bounds = array<i64: 8, 1>}, {pipeline_mode = #tpu.pipeline_mode<synchronous>, transform_indices = @transform_5, window_bounds = array<i64: 81, 8, 512>}, {pipeline_mode = #tpu.pipeline_mode<synchronous>, transform_indices = @transform_6, window_bounds = array<i64: 8, 1>}, {pipeline_mode = #tpu.pipeline_mode<synchronous>, transform_indices = @transform_7, window_bounds = array<i64: 8, 8>}, {pipeline_mode = #tpu.pipeline_mode<synchronous>, transform_indices = @transform_8, window_bounds = array<i64: 8, 1>}, {pipeline_mode = #tpu.pipeline_mode<synchronous>, transform_indices = @transform_9, window_bounds = array<i64: 8, 8>}, {pipeline_mode = #tpu.pipeline_mode<synchronous>, transform_indices = @transform_10, window_bounds = array<i64: 8, 1>}, {transform_indices = @transform_11, window_bounds = array<i64: 8, 512>}]} {
    %c0 = arith.constant 0 : index
    %c0_0 = arith.constant 0 : index
    %0 = vector.load %arg1[%c0, %c0_0] : memref<8x512xf32, #tpu.memory_space<vmem>>, vector<8x512xf32>
    %c0_1 = arith.constant 0 : index
    %c0_2 = arith.constant 0 : index
    %1 = vector.load %arg2[%c0_1, %c0_2] : memref<8x8xf32, #tpu.memory_space<vmem>>, vector<8x8xf32>
    %cst = arith.constant dense<0.000000e+00> : vector<8x512xf32>
    %2 = tpu.matmul %1, %0, %cst {dimension_numbers = #tpu.dot_dimension_numbers<[1], [0], [0], [1], [0, 0, 1, 1], [], []>} : vector<8x8xf32>, vector<8x512xf32>, vector<8x512xf32> -> vector<8x512xf32>
    %c0_3 = arith.constant 0 : index
    %c0_4 = arith.constant 0 : index
    %3 = vector.load %arg3[%c0_3, %c0_4] : memref<8x1xf32, #tpu.memory_space<vmem>>, vector<8x1xf32>
    %4 = vector.broadcast %3 : vector<8x1xf32> to vector<8x512xf32>
    %5 = arith.addf %2, %4 : vector<8x512xf32>
    %cst_5 = arith.constant 5.000000e-01 : f32
    %6 = vector.broadcast %cst_5 : f32 to vector<8x512xf32>
    %7 = arith.mulf %6, %5 : vector<8x512xf32>
    %cst_6 = arith.constant 4.471500e-02 : f32
    %8 = vector.broadcast %cst_6 : f32 to vector<8x512xf32>
    %9 = arith.mulf %8, %5 : vector<8x512xf32>
    %10 = arith.mulf %9, %5 : vector<8x512xf32>
    %11 = arith.mulf %10, %5 : vector<8x512xf32>
    %12 = arith.addf %5, %11 : vector<8x512xf32>
    %cst_7 = arith.constant 0.797884583 : f32
    %13 = vector.broadcast %cst_7 : f32 to vector<8x512xf32>
    %14 = arith.mulf %13, %12 : vector<8x512xf32>
    %15 = math.tanh %14 : vector<8x512xf32>
    %cst_8 = arith.constant 1.000000e+00 : f32
    %16 = vector.broadcast %cst_8 : f32 to vector<8x512xf32>
    %17 = arith.addf %16, %15 : vector<8x512xf32>
    %18 = arith.mulf %7, %17 : vector<8x512xf32>
    %cst_9 = arith.constant 0.000000e+00 : f32
    %19 = vector.broadcast %cst_9 : f32 to vector<8x256xf32>
    %c0_10 = arith.constant 0 : index
    %c0_11 = arith.constant 0 : index
    %20 = vector.load %arg13[%c0_10, %c0_11] : memref<8x1024xf32, #tpu.memory_space<vmem>>, vector<8x256xf32>
    tpu.vector_store %arg13[%c0_10, %c0_11], %19 {strides = array<i32>} : memref<8x1024xf32, #tpu.memory_space<vmem>>, vector<8x256xf32>,
    %c0_12 = arith.constant 0 : index
    %c768 = arith.constant 768 : index
    %21 = vector.load %arg13[%c0_12, %c768] : memref<8x1024xf32, #tpu.memory_space<vmem>>, vector<8x256xf32>
    tpu.vector_store %arg13[%c0_12, %c768], %19 {strides = array<i32>} : memref<8x1024xf32, #tpu.memory_space<vmem>>, vector<8x256xf32>,
    %c0_13 = arith.constant 0 : index
    %c256 = arith.constant 256 : index
    %22 = vector.load %arg13[%c0_13, %c256] : memref<8x1024xf32, #tpu.memory_space<vmem>>, vector<8x512xf32>
    tpu.vector_store %arg13[%c0_13, %c256], %18 {strides = array<i32>} : memref<8x1024xf32, #tpu.memory_space<vmem>>, vector<8x512xf32>,
    %cst_14 = arith.constant 0.000000e+00 : f32
    %23 = vector.broadcast %cst_14 : f32 to vector<8x512xf32>
    %c0_15 = arith.constant 0 : index
    %c0_16 = arith.constant 0 : index
    %24 = vector.load %arg5[%c0_15, %c0_16] : memref<8x1xf32, #tpu.memory_space<vmem>>, vector<8x1xf32>
    %25 = vector.broadcast %24 : vector<8x1xf32> to vector<8x512xf32>
    %26 = arith.addf %23, %25 : vector<8x512xf32>
    %c0_17 = arith.constant 0 : index
    %c0_18 = arith.constant 0 : index
    %c0_19 = arith.constant 0 : index
    %27 = vector.load %arg4[%c0_17, %c0_18, %c0_19] : memref<49x8x512xf32, #tpu.memory_space<vmem>>, vector<1x8x512xf32>
    %28 = vector.shape_cast %27 : vector<1x8x512xf32> to vector<8x512xf32>
    %c0_20 = arith.constant 0 : index
    %c205 = arith.constant 205 : index
    %29 = vector.load %arg13[%c0_20, %c205] : memref<8x1024xf32, #tpu.memory_space<vmem>>, vector<8x512xf32>
    %30 = arith.mulf %28, %29 : vector<8x512xf32>
    %31 = arith.addf %26, %30 : vector<8x512xf32>
    %c1 = arith.constant 1 : index
    %c0_21 = arith.constant 0 : index
    %c0_22 = arith.constant 0 : index
    %32 = vector.load %arg4[%c1, %c0_21, %c0_22] : memref<49x8x512xf32, #tpu.memory_space<vmem>>, vector<1x8x512xf32>
    %33 = vector.shape_cast %32 : vector<1x8x512xf32> to vector<8x512xf32>
    %c0_23 = arith.constant 0 : index
    %c206 = arith.constant 206 : index
    %34 = vector.load %arg13[%c0_23, %c206] : memref<8x1024xf32, #tpu.memory_space<vmem>>, vector<8x512xf32>
    %35 = arith.mulf %33, %34 : vector<8x512xf32>
    %36 = arith.addf %31, %35 : vector<8x512xf32>
    %c2 = arith.constant 2 : index
    %c0_24 = arith.constant 0 : index
    %c0_25 = arith.constant 0 : index
    %37 = vector.load %arg4[%c2, %c0_24, %c0_25] : memref<49x8x512xf32, #tpu.memory_space<vmem>>, vector<1x8x512xf32>
    %38 = vector.shape_cast %37 : vector<1x8x512xf32> to vector<8x512xf32>
    %c0_26 = arith.constant 0 : index
    %c207 = arith.constant 207 : index
    %39 = vector.load %arg13[%c0_26, %c207] : memref<8x1024xf32, #tpu.memory_space<vmem>>, vector<8x512xf32>
    %40 = arith.mulf %38, %39 : vector<8x512xf32>
    %41 = arith.addf %36, %40 : vector<8x512xf32>
    %c3 = arith.constant 3 : index
    %c0_27 = arith.constant 0 : index
    %c0_28 = arith.constant 0 : index
    %42 = vector.load %arg4[%c3, %c0_27, %c0_28] : memref<49x8x512xf32, #tpu.memory_space<vmem>>, vector<1x8x512xf32>
    %43 = vector.shape_cast %42 : vector<1x8x512xf32> to vector<8x512xf32>
    %c0_29 = arith.constant 0 : index
    %c208 = arith.constant 208 : index
    %44 = vector.load %arg13[%c0_29, %c208] : memref<8x1024xf32, #tpu.memory_space<vmem>>, vector<8x512xf32>
    %45 = arith.mulf %43, %44 : vector<8x512xf32>
    %46 = arith.addf %41, %45 : vector<8x512xf32>
    %c4 = arith.constant 4 : index
    %c0_30 = arith.constant 0 : index
    %c0_31 = arith.constant 0 : index
    %47 = vector.load %arg4[%c4, %c0_30, %c0_31] : memref<49x8x512xf32, #tpu.memory_space<vmem>>, vector<1x8x512xf32>
    %48 = vector.shape_cast %47 : vector<1x8x512xf32> to vector<8x512xf32>
    %c0_32 = arith.constant 0 : index
    %c209 = arith.constant 209 : index
    %49 = vector.load %arg13[%c0_32, %c209] : memref<8x1024xf32, #tpu.memory_space<vmem>>, vector<8x512xf32>
    %50 = arith.mulf %48, %49 : vector<8x512xf32>
    %51 = arith.addf %46, %50 : vector<8x512xf32>
    %c5 = arith.constant 5 : index
    %c0_33 = arith.constant 0 : index
    %c0_34 = arith.constant 0 : index
    %52 = vector.load %arg4[%c5, %c0_33, %c0_34] : memref<49x8x512xf32, #tpu.memory_space<vmem>>, vector<1x8x512xf32>
    %53 = vector.shape_cast %52 : vector<1x8x512xf32> to vector<8x512xf32>
    %c0_35 = arith.constant 0 : index
    %c210 = arith.constant 210 : index
    %54 = vector.load %arg13[%c0_35, %c210] : memref<8x1024xf32, #tpu.memory_space<vmem>>, vector<8x512xf32>
    %55 = arith.mulf %53, %54 : vector<8x512xf32>
    %56 = arith.addf %51, %55 : vector<8x512xf32>
    %c6 = arith.constant 6 : index
    %c0_36 = arith.constant 0 : index
    %c0_37 = arith.constant 0 : index
    %57 = vector.load %arg4[%c6, %c0_36, %c0_37] : memref<49x8x512xf32, #tpu.memory_space<vmem>>, vector<1x8x512xf32>
    %58 = vector.shape_cast %57 : vector<1x8x512xf32> to vector<8x512xf32>
    %c0_38 = arith.constant 0 : index
    %c211 = arith.constant 211 : index
    %59 = vector.load %arg13[%c0_38, %c211] : memref<8x1024xf32, #tpu.memory_space<vmem>>, vector<8x512xf32>
    %60 = arith.mulf %58, %59 : vector<8x512xf32>
    %61 = arith.addf %56, %60 : vector<8x512xf32>
    %c7 = arith.constant 7 : index
    %c0_39 = arith.constant 0 : index
    %c0_40 = arith.constant 0 : index
    %62 = vector.load %arg4[%c7, %c0_39, %c0_40] : memref<49x8x512xf32, #tpu.memory_space<vmem>>, vector<1x8x512xf32>
    %63 = vector.shape_cast %62 : vector<1x8x512xf32> to vector<8x512xf32>
    %c0_41 = arith.constant 0 : index
    %c221 = arith.constant 221 : index
    %64 = vector.load %arg13[%c0_41, %c221] : memref<8x1024xf32, #tpu.memory_space<vmem>>, vector<8x512xf32>
    %65 = arith.mulf %63, %64 : vector<8x512xf32>
    %66 = arith.addf %61, %65 : vector<8x512xf32>
    %c8 = arith.constant 8 : index
    %c0_42 = arith.constant 0 : index
    %c0_43 = arith.constant 0 : index
    %67 = vector.load %arg4[%c8, %c0_42, %c0_43] : memref<49x8x512xf32, #tpu.memory_space<vmem>>, vector<1x8x512xf32>
    %68 = vector.shape_cast %67 : vector<1x8x512xf32> to vector<8x512xf32>
    %c0_44 = arith.constant 0 : index
    %c222 = arith.constant 222 : index
    %69 = vector.load %arg13[%c0_44, %c222] : memref<8x1024xf32, #tpu.memory_space<vmem>>, vector<8x512xf32>
    %70 = arith.mulf %68, %69 : vector<8x512xf32>
    %71 = arith.addf %66, %70 : vector<8x512xf32>
    %c9 = arith.constant 9 : index
    %c0_45 = arith.constant 0 : index
    %c0_46 = arith.constant 0 : index
    %72 = vector.load %arg4[%c9, %c0_45, %c0_46] : memref<49x8x512xf32, #tpu.memory_space<vmem>>, vector<1x8x512xf32>
    %73 = vector.shape_cast %72 : vector<1x8x512xf32> to vector<8x512xf32>
    %c0_47 = arith.constant 0 : index
    %c223 = arith.constant 223 : index
    %74 = vector.load %arg13[%c0_47, %c223] : memref<8x1024xf32, #tpu.memory_space<vmem>>, vector<8x512xf32>
    %75 = arith.mulf %73, %74 : vector<8x512xf32>
    %76 = arith.addf %71, %75 : vector<8x512xf32>
    %c10 = arith.constant 10 : index
    %c0_48 = arith.constant 0 : index
    %c0_49 = arith.constant 0 : index
    %77 = vector.load %arg4[%c10, %c0_48, %c0_49] : memref<49x8x512xf32, #tpu.memory_space<vmem>>, vector<1x8x512xf32>
    %78 = vector.shape_cast %77 : vector<1x8x512xf32> to vector<8x512xf32>
    %c0_50 = arith.constant 0 : index
    %c224 = arith.constant 224 : index
    %79 = vector.load %arg13[%c0_50, %c224] : memref<8x1024xf32, #tpu.memory_space<vmem>>, vector<8x512xf32>
    %80 = arith.mulf %78, %79 : vector<8x512xf32>
    %81 = arith.addf %76, %80 : vector<8x512xf32>
    %c11 = arith.constant 11 : index
    %c0_51 = arith.constant 0 : index
    %c0_52 = arith.constant 0 : index
    %82 = vector.load %arg4[%c11, %c0_51, %c0_52] : memref<49x8x512xf32, #tpu.memory_space<vmem>>, vector<1x8x512xf32>
    %83 = vector.shape_cast %82 : vector<1x8x512xf32> to vector<8x512xf32>
    %c0_53 = arith.constant 0 : index
    %c225 = arith.constant 225 : index
    %84 = vector.load %arg13[%c0_53, %c225] : memref<8x1024xf32, #tpu.memory_space<vmem>>, vector<8x512xf32>
    %85 = arith.mulf %83, %84 : vector<8x512xf32>
    %86 = arith.addf %81, %85 : vector<8x512xf32>
    %c12 = arith.constant 12 : index
    %c0_54 = arith.constant 0 : index
    %c0_55 = arith.constant 0 : index
    %87 = vector.load %arg4[%c12, %c0_54, %c0_55] : memref<49x8x512xf32, #tpu.memory_space<vmem>>, vector<1x8x512xf32>
    %88 = vector.shape_cast %87 : vector<1x8x512xf32> to vector<8x512xf32>
    %c0_56 = arith.constant 0 : index
    %c226 = arith.constant 226 : index
    %89 = vector.load %arg13[%c0_56, %c226] : memref<8x1024xf32, #tpu.memory_space<vmem>>, vector<8x512xf32>
    %90 = arith.mulf %88, %89 : vector<8x512xf32>
    %91 = arith.addf %86, %90 : vector<8x512xf32>
    %c13 = arith.constant 13 : index
    %c0_57 = arith.constant 0 : index
    %c0_58 = arith.constant 0 : index
    %92 = vector.load %arg4[%c13, %c0_57, %c0_58] : memref<49x8x512xf32, #tpu.memory_space<vmem>>, vector<1x8x512xf32>
    %93 = vector.shape_cast %92 : vector<1x8x512xf32> to vector<8x512xf32>
    %c0_59 = arith.constant 0 : index
    %c227 = arith.constant 227 : index
    %94 = vector.load %arg13[%c0_59, %c227] : memref<8x1024xf32, #tpu.memory_space<vmem>>, vector<8x512xf32>
    %95 = arith.mulf %93, %94 : vector<8x512xf32>
    %96 = arith.addf %91, %95 : vector<8x512xf32>
    %c14 = arith.constant 14 : index
    %c0_60 = arith.constant 0 : index
    %c0_61 = arith.constant 0 : index
    %97 = vector.load %arg4[%c14, %c0_60, %c0_61] : memref<49x8x512xf32, #tpu.memory_space<vmem>>, vector<1x8x512xf32>
    %98 = vector.shape_cast %97 : vector<1x8x512xf32> to vector<8x512xf32>
    %c0_62 = arith.constant 0 : index
    %c237 = arith.constant 237 : index
    %99 = vector.load %arg13[%c0_62, %c237] : memref<8x1024xf32, #tpu.memory_space<vmem>>, vector<8x512xf32>
    %100 = arith.mulf %98, %99 : vector<8x512xf32>
    %101 = arith.addf %96, %100 : vector<8x512xf32>
    %c15 = arith.constant 15 : index
    %c0_63 = arith.constant 0 : index
    %c0_64 = arith.constant 0 : index
    %102 = vector.load %arg4[%c15, %c0_63, %c0_64] : memref<49x8x512xf32, #tpu.memory_space<vmem>>, vector<1x8x512xf32>
    %103 = vector.shape_cast %102 : vector<1x8x512xf32> to vector<8x512xf32>
    %c0_65 = arith.constant 0 : index
    %c238 = arith.constant 238 : index
    %104 = vector.load %arg13[%c0_65, %c238] : memref<8x1024xf32, #tpu.memory_space<vmem>>, vector<8x512xf32>
    %105 = arith.mulf %103, %104 : vector<8x512xf32>
    %106 = arith.addf %101, %105 : vector<8x512xf32>
    %c16 = arith.constant 16 : index
    %c0_66 = arith.constant 0 : index
    %c0_67 = arith.constant 0 : index
    %107 = vector.load %arg4[%c16, %c0_66, %c0_67] : memref<49x8x512xf32, #tpu.memory_space<vmem>>, vector<1x8x512xf32>
    %108 = vector.shape_cast %107 : vector<1x8x512xf32> to vector<8x512xf32>
    %c0_68 = arith.constant 0 : index
    %c239 = arith.constant 239 : index
    %109 = vector.load %arg13[%c0_68, %c239] : memref<8x1024xf32, #tpu.memory_space<vmem>>, vector<8x512xf32>
    %110 = arith.mulf %108, %109 : vector<8x512xf32>
    %111 = arith.addf %106, %110 : vector<8x512xf32>
    %c17 = arith.constant 17 : index
    %c0_69 = arith.constant 0 : index
    %c0_70 = arith.constant 0 : index
    %112 = vector.load %arg4[%c17, %c0_69, %c0_70] : memref<49x8x512xf32, #tpu.memory_space<vmem>>, vector<1x8x512xf32>
    %113 = vector.shape_cast %112 : vector<1x8x512xf32> to vector<8x512xf32>
    %c0_71 = arith.constant 0 : index
    %c240 = arith.constant 240 : index
    %114 = vector.load %arg13[%c0_71, %c240] : memref<8x1024xf32, #tpu.memory_space<vmem>>, vector<8x512xf32>
    %115 = arith.mulf %113, %114 : vector<8x512xf32>
    %116 = arith.addf %111, %115 : vector<8x512xf32>
    %c18 = arith.constant 18 : index
    %c0_72 = arith.constant 0 : index
    %c0_73 = arith.constant 0 : index
    %117 = vector.load %arg4[%c18, %c0_72, %c0_73] : memref<49x8x512xf32, #tpu.memory_space<vmem>>, vector<1x8x512xf32>
    %118 = vector.shape_cast %117 : vector<1x8x512xf32> to vector<8x512xf32>
    %c0_74 = arith.constant 0 : index
    %c241 = arith.constant 241 : index
    %119 = vector.load %arg13[%c0_74, %c241] : memref<8x1024xf32, #tpu.memory_space<vmem>>, vector<8x512xf32>
    %120 = arith.mulf %118, %119 : vector<8x512xf32>
    %121 = arith.addf %116, %120 : vector<8x512xf32>
    %c19 = arith.constant 19 : index
    %c0_75 = arith.constant 0 : index
    %c0_76 = arith.constant 0 : index
    %122 = vector.load %arg4[%c19, %c0_75, %c0_76] : memref<49x8x512xf32, #tpu.memory_space<vmem>>, vector<1x8x512xf32>
    %123 = vector.shape_cast %122 : vector<1x8x512xf32> to vector<8x512xf32>
    %c0_77 = arith.constant 0 : index
    %c242 = arith.constant 242 : index
    %124 = vector.load %arg13[%c0_77, %c242] : memref<8x1024xf32, #tpu.memory_space<vmem>>, vector<8x512xf32>
    %125 = arith.mulf %123, %124 : vector<8x512xf32>
    %126 = arith.addf %121, %125 : vector<8x512xf32>
    %c20 = arith.constant 20 : index
    %c0_78 = arith.constant 0 : index
    %c0_79 = arith.constant 0 : index
    %127 = vector.load %arg4[%c20, %c0_78, %c0_79] : memref<49x8x512xf32, #tpu.memory_space<vmem>>, vector<1x8x512xf32>
    %128 = vector.shape_cast %127 : vector<1x8x512xf32> to vector<8x512xf32>
    %c0_80 = arith.constant 0 : index
    %c243 = arith.constant 243 : index
    %129 = vector.load %arg13[%c0_80, %c243] : memref<8x1024xf32, #tpu.memory_space<vmem>>, vector<8x512xf32>
    %130 = arith.mulf %128, %129 : vector<8x512xf32>
    %131 = arith.addf %126, %130 : vector<8x512xf32>
    %c21 = arith.constant 21 : index
    %c0_81 = arith.constant 0 : index
    %c0_82 = arith.constant 0 : index
    %132 = vector.load %arg4[%c21, %c0_81, %c0_82] : memref<49x8x512xf32, #tpu.memory_space<vmem>>, vector<1x8x512xf32>
    %133 = vector.shape_cast %132 : vector<1x8x512xf32> to vector<8x512xf32>
    %c0_83 = arith.constant 0 : index
    %c253 = arith.constant 253 : index
    %134 = vector.load %arg13[%c0_83, %c253] : memref<8x1024xf32, #tpu.memory_space<vmem>>, vector<8x512xf32>
    %135 = arith.mulf %133, %134 : vector<8x512xf32>
    %136 = arith.addf %131, %135 : vector<8x512xf32>
    %c22 = arith.constant 22 : index
    %c0_84 = arith.constant 0 : index
    %c0_85 = arith.constant 0 : index
    %137 = vector.load %arg4[%c22, %c0_84, %c0_85] : memref<49x8x512xf32, #tpu.memory_space<vmem>>, vector<1x8x512xf32>
    %138 = vector.shape_cast %137 : vector<1x8x512xf32> to vector<8x512xf32>
    %c0_86 = arith.constant 0 : index
    %c254 = arith.constant 254 : index
    %139 = vector.load %arg13[%c0_86, %c254] : memref<8x1024xf32, #tpu.memory_space<vmem>>, vector<8x512xf32>
    %140 = arith.mulf %138, %139 : vector<8x512xf32>
    %141 = arith.addf %136, %140 : vector<8x512xf32>
    %c23 = arith.constant 23 : index
    %c0_87 = arith.constant 0 : index
    %c0_88 = arith.constant 0 : index
    %142 = vector.load %arg4[%c23, %c0_87, %c0_88] : memref<49x8x512xf32, #tpu.memory_space<vmem>>, vector<1x8x512xf32>
    %143 = vector.shape_cast %142 : vector<1x8x512xf32> to vector<8x512xf32>
    %c0_89 = arith.constant 0 : index
    %c255 = arith.constant 255 : index
    %144 = vector.load %arg13[%c0_89, %c255] : memref<8x1024xf32, #tpu.memory_space<vmem>>, vector<8x512xf32>
    %145 = arith.mulf %143, %144 : vector<8x512xf32>
    %146 = arith.addf %141, %145 : vector<8x512xf32>
    %c24 = arith.constant 24 : index
    %c0_90 = arith.constant 0 : index
    %c0_91 = arith.constant 0 : index
    %147 = vector.load %arg4[%c24, %c0_90, %c0_91] : memref<49x8x512xf32, #tpu.memory_space<vmem>>, vector<1x8x512xf32>
    %148 = vector.shape_cast %147 : vector<1x8x512xf32> to vector<8x512xf32>
    %c0_92 = arith.constant 0 : index
    %c256_93 = arith.constant 256 : index
    %149 = vector.load %arg13[%c0_92, %c256_93] : memref<8x1024xf32, #tpu.memory_space<vmem>>, vector<8x512xf32>
    %150 = arith.mulf %148, %149 : vector<8x512xf32>
    %151 = arith.addf %146, %150 : vector<8x512xf32>
    %c25 = arith.constant 25 : index
    %c0_94 = arith.constant 0 : index
    %c0_95 = arith.constant 0 : index
    %152 = vector.load %arg4[%c25, %c0_94, %c0_95] : memref<49x8x512xf32, #tpu.memory_space<vmem>>, vector<1x8x512xf32>
    %153 = vector.shape_cast %152 : vector<1x8x512xf32> to vector<8x512xf32>
    %c0_96 = arith.constant 0 : index
    %c257 = arith.constant 257 : index
    %154 = vector.load %arg13[%c0_96, %c257] : memref<8x1024xf32, #tpu.memory_space<vmem>>, vector<8x512xf32>
    %155 = arith.mulf %153, %154 : vector<8x512xf32>
    %156 = arith.addf %151, %155 : vector<8x512xf32>
    %c26 = arith.constant 26 : index
    %c0_97 = arith.constant 0 : index
    %c0_98 = arith.constant 0 : index
    %157 = vector.load %arg4[%c26, %c0_97, %c0_98] : memref<49x8x512xf32, #tpu.memory_space<vmem>>, vector<1x8x512xf32>
    %158 = vector.shape_cast %157 : vector<1x8x512xf32> to vector<8x512xf32>
    %c0_99 = arith.constant 0 : index
    %c258 = arith.constant 258 : index
    %159 = vector.load %arg13[%c0_99, %c258] : memref<8x1024xf32, #tpu.memory_space<vmem>>, vector<8x512xf32>
    %160 = arith.mulf %158, %159 : vector<8x512xf32>
    %161 = arith.addf %156, %160 : vector<8x512xf32>
    %c27 = arith.constant 27 : index
    %c0_100 = arith.constant 0 : index
    %c0_101 = arith.constant 0 : index
    %162 = vector.load %arg4[%c27, %c0_100, %c0_101] : memref<49x8x512xf32, #tpu.memory_space<vmem>>, vector<1x8x512xf32>
    %163 = vector.shape_cast %162 : vector<1x8x512xf32> to vector<8x512xf32>
    %c0_102 = arith.constant 0 : index
    %c259 = arith.constant 259 : index
    %164 = vector.load %arg13[%c0_102, %c259] : memref<8x1024xf32, #tpu.memory_space<vmem>>, vector<8x512xf32>
    %165 = arith.mulf %163, %164 : vector<8x512xf32>
    %166 = arith.addf %161, %165 : vector<8x512xf32>
    %c28 = arith.constant 28 : index
    %c0_103 = arith.constant 0 : index
    %c0_104 = arith.constant 0 : index
    %167 = vector.load %arg4[%c28, %c0_103, %c0_104] : memref<49x8x512xf32, #tpu.memory_space<vmem>>, vector<1x8x512xf32>
    %168 = vector.shape_cast %167 : vector<1x8x512xf32> to vector<8x512xf32>
    %c0_105 = arith.constant 0 : index
    %c269 = arith.constant 269 : index
    %169 = vector.load %arg13[%c0_105, %c269] : memref<8x1024xf32, #tpu.memory_space<vmem>>, vector<8x512xf32>
    %170 = arith.mulf %168, %169 : vector<8x512xf32>
    %171 = arith.addf %166, %170 : vector<8x512xf32>
    %c29 = arith.constant 29 : index
    %c0_106 = arith.constant 0 : index
    %c0_107 = arith.constant 0 : index
    %172 = vector.load %arg4[%c29, %c0_106, %c0_107] : memref<49x8x512xf32, #tpu.memory_space<vmem>>, vector<1x8x512xf32>
    %173 = vector.shape_cast %172 : vector<1x8x512xf32> to vector<8x512xf32>
    %c0_108 = arith.constant 0 : index
    %c270 = arith.constant 270 : index
    %174 = vector.load %arg13[%c0_108, %c270] : memref<8x1024xf32, #tpu.memory_space<vmem>>, vector<8x512xf32>
    %175 = arith.mulf %173, %174 : vector<8x512xf32>
    %176 = arith.addf %171, %175 : vector<8x512xf32>
    %c30 = arith.constant 30 : index
    %c0_109 = arith.constant 0 : index
    %c0_110 = arith.constant 0 : index
    %177 = vector.load %arg4[%c30, %c0_109, %c0_110] : memref<49x8x512xf32, #tpu.memory_space<vmem>>, vector<1x8x512xf32>
    %178 = vector.shape_cast %177 : vector<1x8x512xf32> to vector<8x512xf32>
    %c0_111 = arith.constant 0 : index
    %c271 = arith.constant 271 : index
    %179 = vector.load %arg13[%c0_111, %c271] : memref<8x1024xf32, #tpu.memory_space<vmem>>, vector<8x512xf32>
    %180 = arith.mulf %178, %179 : vector<8x512xf32>
    %181 = arith.addf %176, %180 : vector<8x512xf32>
    %c31 = arith.constant 31 : index
    %c0_112 = arith.constant 0 : index
    %c0_113 = arith.constant 0 : index
    %182 = vector.load %arg4[%c31, %c0_112, %c0_113] : memref<49x8x512xf32, #tpu.memory_space<vmem>>, vector<1x8x512xf32>
    %183 = vector.shape_cast %182 : vector<1x8x512xf32> to vector<8x512xf32>
    %c0_114 = arith.constant 0 : index
    %c272 = arith.constant 272 : index
    %184 = vector.load %arg13[%c0_114, %c272] : memref<8x1024xf32, #tpu.memory_space<vmem>>, vector<8x512xf32>
    %185 = arith.mulf %183, %184 : vector<8x512xf32>
    %186 = arith.addf %181, %185 : vector<8x512xf32>
    %c32 = arith.constant 32 : index
    %c0_115 = arith.constant 0 : index
    %c0_116 = arith.constant 0 : index
    %187 = vector.load %arg4[%c32, %c0_115, %c0_116] : memref<49x8x512xf32, #tpu.memory_space<vmem>>, vector<1x8x512xf32>
    %188 = vector.shape_cast %187 : vector<1x8x512xf32> to vector<8x512xf32>
    %c0_117 = arith.constant 0 : index
    %c273 = arith.constant 273 : index
    %189 = vector.load %arg13[%c0_117, %c273] : memref<8x1024xf32, #tpu.memory_space<vmem>>, vector<8x512xf32>
    %190 = arith.mulf %188, %189 : vector<8x512xf32>
    %191 = arith.addf %186, %190 : vector<8x512xf32>
    %c33 = arith.constant 33 : index
    %c0_118 = arith.constant 0 : index
    %c0_119 = arith.constant 0 : index
    %192 = vector.load %arg4[%c33, %c0_118, %c0_119] : memref<49x8x512xf32, #tpu.memory_space<vmem>>, vector<1x8x512xf32>
    %193 = vector.shape_cast %192 : vector<1x8x512xf32> to vector<8x512xf32>
    %c0_120 = arith.constant 0 : index
    %c274 = arith.constant 274 : index
    %194 = vector.load %arg13[%c0_120, %c274] : memref<8x1024xf32, #tpu.memory_space<vmem>>, vector<8x512xf32>
    %195 = arith.mulf %193, %194 : vector<8x512xf32>
    %196 = arith.addf %191, %195 : vector<8x512xf32>
    %c34 = arith.constant 34 : index
    %c0_121 = arith.constant 0 : index
    %c0_122 = arith.constant 0 : index
    %197 = vector.load %arg4[%c34, %c0_121, %c0_122] : memref<49x8x512xf32, #tpu.memory_space<vmem>>, vector<1x8x512xf32>
    %198 = vector.shape_cast %197 : vector<1x8x512xf32> to vector<8x512xf32>
    %c0_123 = arith.constant 0 : index
    %c275 = arith.constant 275 : index
    %199 = vector.load %arg13[%c0_123, %c275] : memref<8x1024xf32, #tpu.memory_space<vmem>>, vector<8x512xf32>
    %200 = arith.mulf %198, %199 : vector<8x512xf32>
    %201 = arith.addf %196, %200 : vector<8x512xf32>
    %c35 = arith.constant 35 : index
    %c0_124 = arith.constant 0 : index
    %c0_125 = arith.constant 0 : index
    %202 = vector.load %arg4[%c35, %c0_124, %c0_125] : memref<49x8x512xf32, #tpu.memory_space<vmem>>, vector<1x8x512xf32>
    %203 = vector.shape_cast %202 : vector<1x8x512xf32> to vector<8x512xf32>
    %c0_126 = arith.constant 0 : index
    %c285 = arith.constant 285 : index
    %204 = vector.load %arg13[%c0_126, %c285] : memref<8x1024xf32, #tpu.memory_space<vmem>>, vector<8x512xf32>
    %205 = arith.mulf %203, %204 : vector<8x512xf32>
    %206 = arith.addf %201, %205 : vector<8x512xf32>
    %c36 = arith.constant 36 : index
    %c0_127 = arith.constant 0 : index
    %c0_128 = arith.constant 0 : index
    %207 = vector.load %arg4[%c36, %c0_127, %c0_128] : memref<49x8x512xf32, #tpu.memory_space<vmem>>, vector<1x8x512xf32>
    %208 = vector.shape_cast %207 : vector<1x8x512xf32> to vector<8x512xf32>
    %c0_129 = arith.constant 0 : index
    %c286 = arith.constant 286 : index
    %209 = vector.load %arg13[%c0_129, %c286] : memref<8x1024xf32, #tpu.memory_space<vmem>>, vector<8x512xf32>
    %210 = arith.mulf %208, %209 : vector<8x512xf32>
    %211 = arith.addf %206, %210 : vector<8x512xf32>
    %c37 = arith.constant 37 : index
    %c0_130 = arith.constant 0 : index
    %c0_131 = arith.constant 0 : index
    %212 = vector.load %arg4[%c37, %c0_130, %c0_131] : memref<49x8x512xf32, #tpu.memory_space<vmem>>, vector<1x8x512xf32>
    %213 = vector.shape_cast %212 : vector<1x8x512xf32> to vector<8x512xf32>
    %c0_132 = arith.constant 0 : index
    %c287 = arith.constant 287 : index
    %214 = vector.load %arg13[%c0_132, %c287] : memref<8x1024xf32, #tpu.memory_space<vmem>>, vector<8x512xf32>
    %215 = arith.mulf %213, %214 : vector<8x512xf32>
    %216 = arith.addf %211, %215 : vector<8x512xf32>
    %c38 = arith.constant 38 : index
    %c0_133 = arith.constant 0 : index
    %c0_134 = arith.constant 0 : index
    %217 = vector.load %arg4[%c38, %c0_133, %c0_134] : memref<49x8x512xf32, #tpu.memory_space<vmem>>, vector<1x8x512xf32>
    %218 = vector.shape_cast %217 : vector<1x8x512xf32> to vector<8x512xf32>
    %c0_135 = arith.constant 0 : index
    %c288 = arith.constant 288 : index
    %219 = vector.load %arg13[%c0_135, %c288] : memref<8x1024xf32, #tpu.memory_space<vmem>>, vector<8x512xf32>
    %220 = arith.mulf %218, %219 : vector<8x512xf32>
    %221 = arith.addf %216, %220 : vector<8x512xf32>
    %c39 = arith.constant 39 : index
    %c0_136 = arith.constant 0 : index
    %c0_137 = arith.constant 0 : index
    %222 = vector.load %arg4[%c39, %c0_136, %c0_137] : memref<49x8x512xf32, #tpu.memory_space<vmem>>, vector<1x8x512xf32>
    %223 = vector.shape_cast %222 : vector<1x8x512xf32> to vector<8x512xf32>
    %c0_138 = arith.constant 0 : index
    %c289 = arith.constant 289 : index
    %224 = vector.load %arg13[%c0_138, %c289] : memref<8x1024xf32, #tpu.memory_space<vmem>>, vector<8x512xf32>
    %225 = arith.mulf %223, %224 : vector<8x512xf32>
    %226 = arith.addf %221, %225 : vector<8x512xf32>
    %c40 = arith.constant 40 : index
    %c0_139 = arith.constant 0 : index
    %c0_140 = arith.constant 0 : index
    %227 = vector.load %arg4[%c40, %c0_139, %c0_140] : memref<49x8x512xf32, #tpu.memory_space<vmem>>, vector<1x8x512xf32>
    %228 = vector.shape_cast %227 : vector<1x8x512xf32> to vector<8x512xf32>
    %c0_141 = arith.constant 0 : index
    %c290 = arith.constant 290 : index
    %229 = vector.load %arg13[%c0_141, %c290] : memref<8x1024xf32, #tpu.memory_space<vmem>>, vector<8x512xf32>
    %230 = arith.mulf %228, %229 : vector<8x512xf32>
    %231 = arith.addf %226, %230 : vector<8x512xf32>
    %c41 = arith.constant 41 : index
    %c0_142 = arith.constant 0 : index
    %c0_143 = arith.constant 0 : index
    %232 = vector.load %arg4[%c41, %c0_142, %c0_143] : memref<49x8x512xf32, #tpu.memory_space<vmem>>, vector<1x8x512xf32>
    %233 = vector.shape_cast %232 : vector<1x8x512xf32> to vector<8x512xf32>
    %c0_144 = arith.constant 0 : index
    %c291 = arith.constant 291 : index
    %234 = vector.load %arg13[%c0_144, %c291] : memref<8x1024xf32, #tpu.memory_space<vmem>>, vector<8x512xf32>
    %235 = arith.mulf %233, %234 : vector<8x512xf32>
    %236 = arith.addf %231, %235 : vector<8x512xf32>
    %c42 = arith.constant 42 : index
    %c0_145 = arith.constant 0 : index
    %c0_146 = arith.constant 0 : index
    %237 = vector.load %arg4[%c42, %c0_145, %c0_146] : memref<49x8x512xf32, #tpu.memory_space<vmem>>, vector<1x8x512xf32>
    %238 = vector.shape_cast %237 : vector<1x8x512xf32> to vector<8x512xf32>
    %c0_147 = arith.constant 0 : index
    %c301 = arith.constant 301 : index
    %239 = vector.load %arg13[%c0_147, %c301] : memref<8x1024xf32, #tpu.memory_space<vmem>>, vector<8x512xf32>
    %240 = arith.mulf %238, %239 : vector<8x512xf32>
    %241 = arith.addf %236, %240 : vector<8x512xf32>
    %c43 = arith.constant 43 : index
    %c0_148 = arith.constant 0 : index
    %c0_149 = arith.constant 0 : index
    %242 = vector.load %arg4[%c43, %c0_148, %c0_149] : memref<49x8x512xf32, #tpu.memory_space<vmem>>, vector<1x8x512xf32>
    %243 = vector.shape_cast %242 : vector<1x8x512xf32> to vector<8x512xf32>
    %c0_150 = arith.constant 0 : index
    %c302 = arith.constant 302 : index
    %244 = vector.load %arg13[%c0_150, %c302] : memref<8x1024xf32, #tpu.memory_space<vmem>>, vector<8x512xf32>
    %245 = arith.mulf %243, %244 : vector<8x512xf32>
    %246 = arith.addf %241, %245 : vector<8x512xf32>
    %c44 = arith.constant 44 : index
    %c0_151 = arith.constant 0 : index
    %c0_152 = arith.constant 0 : index
    %247 = vector.load %arg4[%c44, %c0_151, %c0_152] : memref<49x8x512xf32, #tpu.memory_space<vmem>>, vector<1x8x512xf32>
    %248 = vector.shape_cast %247 : vector<1x8x512xf32> to vector<8x512xf32>
    %c0_153 = arith.constant 0 : index
    %c303 = arith.constant 303 : index
    %249 = vector.load %arg13[%c0_153, %c303] : memref<8x1024xf32, #tpu.memory_space<vmem>>, vector<8x512xf32>
    %250 = arith.mulf %248, %249 : vector<8x512xf32>
    %251 = arith.addf %246, %250 : vector<8x512xf32>
    %c45 = arith.constant 45 : index
    %c0_154 = arith.constant 0 : index
    %c0_155 = arith.constant 0 : index
    %252 = vector.load %arg4[%c45, %c0_154, %c0_155] : memref<49x8x512xf32, #tpu.memory_space<vmem>>, vector<1x8x512xf32>
    %253 = vector.shape_cast %252 : vector<1x8x512xf32> to vector<8x512xf32>
    %c0_156 = arith.constant 0 : index
    %c304 = arith.constant 304 : index
    %254 = vector.load %arg13[%c0_156, %c304] : memref<8x1024xf32, #tpu.memory_space<vmem>>, vector<8x512xf32>
    %255 = arith.mulf %253, %254 : vector<8x512xf32>
    %256 = arith.addf %251, %255 : vector<8x512xf32>
    %c46 = arith.constant 46 : index
    %c0_157 = arith.constant 0 : index
    %c0_158 = arith.constant 0 : index
    %257 = vector.load %arg4[%c46, %c0_157, %c0_158] : memref<49x8x512xf32, #tpu.memory_space<vmem>>, vector<1x8x512xf32>
    %258 = vector.shape_cast %257 : vector<1x8x512xf32> to vector<8x512xf32>
    %c0_159 = arith.constant 0 : index
    %c305 = arith.constant 305 : index
    %259 = vector.load %arg13[%c0_159, %c305] : memref<8x1024xf32, #tpu.memory_space<vmem>>, vector<8x512xf32>
    %260 = arith.mulf %258, %259 : vector<8x512xf32>
    %261 = arith.addf %256, %260 : vector<8x512xf32>
    %c47 = arith.constant 47 : index
    %c0_160 = arith.constant 0 : index
    %c0_161 = arith.constant 0 : index
    %262 = vector.load %arg4[%c47, %c0_160, %c0_161] : memref<49x8x512xf32, #tpu.memory_space<vmem>>, vector<1x8x512xf32>
    %263 = vector.shape_cast %262 : vector<1x8x512xf32> to vector<8x512xf32>
    %c0_162 = arith.constant 0 : index
    %c306 = arith.constant 306 : index
    %264 = vector.load %arg13[%c0_162, %c306] : memref<8x1024xf32, #tpu.memory_space<vmem>>, vector<8x512xf32>
    %265 = arith.mulf %263, %264 : vector<8x512xf32>
    %266 = arith.addf %261, %265 : vector<8x512xf32>
    %c48 = arith.constant 48 : index
    %c0_163 = arith.constant 0 : index
    %c0_164 = arith.constant 0 : index
    %267 = vector.load %arg4[%c48, %c0_163, %c0_164] : memref<49x8x512xf32, #tpu.memory_space<vmem>>, vector<1x8x512xf32>
    %268 = vector.shape_cast %267 : vector<1x8x512xf32> to vector<8x512xf32>
    %c0_165 = arith.constant 0 : index
    %c307 = arith.constant 307 : index
    %269 = vector.load %arg13[%c0_165, %c307] : memref<8x1024xf32, #tpu.memory_space<vmem>>, vector<8x512xf32>
    %270 = arith.mulf %268, %269 : vector<8x512xf32>
    %271 = arith.addf %266, %270 : vector<8x512xf32>
    %c0_166 = arith.constant 0 : index
    %c256_167 = arith.constant 256 : index
    %272 = vector.load %arg13[%c0_166, %c256_167] : memref<8x1024xf32, #tpu.memory_space<vmem>>, vector<8x512xf32>
    tpu.vector_store %arg13[%c0_166, %c256_167], %271 {strides = array<i32>} : memref<8x1024xf32, #tpu.memory_space<vmem>>, vector<8x512xf32>,
    %cst_168 = arith.constant 0.000000e+00 : f32
    %273 = vector.broadcast %cst_168 : f32 to vector<8x512xf32>
    %c0_169 = arith.constant 0 : index
    %c0_170 = arith.constant 0 : index
    %274 = vector.load %arg7[%c0_169, %c0_170] : memref<8x1xf32, #tpu.memory_space<vmem>>, vector<8x1xf32>
    %275 = vector.broadcast %274 : vector<8x1xf32> to vector<8x512xf32>
    %276 = arith.addf %273, %275 : vector<8x512xf32>
    %c0_171 = arith.constant 0 : index
    %c0_172 = arith.constant 0 : index
    %c0_173 = arith.constant 0 : index
    %277 = vector.load %arg6[%c0_171, %c0_172, %c0_173] : memref<81x8x512xf32, #tpu.memory_space<vmem>>, vector<1x8x512xf32>
    %278 = vector.shape_cast %277 : vector<1x8x512xf32> to vector<8x512xf32>
    %c0_174 = arith.constant 0 : index
    %c52 = arith.constant 52 : index
    %279 = vector.load %arg13[%c0_174, %c52] : memref<8x1024xf32, #tpu.memory_space<vmem>>, vector<8x512xf32>
    %280 = arith.mulf %278, %279 : vector<8x512xf32>
    %281 = arith.addf %276, %280 : vector<8x512xf32>
    %c1_175 = arith.constant 1 : index
    %c0_176 = arith.constant 0 : index
    %c0_177 = arith.constant 0 : index
    %282 = vector.load %arg6[%c1_175, %c0_176, %c0_177] : memref<81x8x512xf32, #tpu.memory_space<vmem>>, vector<1x8x512xf32>
    %283 = vector.shape_cast %282 : vector<1x8x512xf32> to vector<8x512xf32>
    %c0_178 = arith.constant 0 : index
    %c55 = arith.constant 55 : index
    %284 = vector.load %arg13[%c0_178, %c55] : memref<8x1024xf32, #tpu.memory_space<vmem>>, vector<8x512xf32>
    %285 = arith.mulf %283, %284 : vector<8x512xf32>
    %286 = arith.addf %281, %285 : vector<8x512xf32>
    %c2_179 = arith.constant 2 : index
    %c0_180 = arith.constant 0 : index
    %c0_181 = arith.constant 0 : index
    %287 = vector.load %arg6[%c2_179, %c0_180, %c0_181] : memref<81x8x512xf32, #tpu.memory_space<vmem>>, vector<1x8x512xf32>
    %288 = vector.shape_cast %287 : vector<1x8x512xf32> to vector<8x512xf32>
    %c0_182 = arith.constant 0 : index
    %c58 = arith.constant 58 : index
    %289 = vector.load %arg13[%c0_182, %c58] : memref<8x1024xf32, #tpu.memory_space<vmem>>, vector<8x512xf32>
    %290 = arith.mulf %288, %289 : vector<8x512xf32>
    %291 = arith.addf %286, %290 : vector<8x512xf32>
    %c3_183 = arith.constant 3 : index
    %c0_184 = arith.constant 0 : index
    %c0_185 = arith.constant 0 : index
    %292 = vector.load %arg6[%c3_183, %c0_184, %c0_185] : memref<81x8x512xf32, #tpu.memory_space<vmem>>, vector<1x8x512xf32>
    %293 = vector.shape_cast %292 : vector<1x8x512xf32> to vector<8x512xf32>
    %c0_186 = arith.constant 0 : index
    %c61 = arith.constant 61 : index
    %294 = vector.load %arg13[%c0_186, %c61] : memref<8x1024xf32, #tpu.memory_space<vmem>>, vector<8x512xf32>
    %295 = arith.mulf %293, %294 : vector<8x512xf32>
    %296 = arith.addf %291, %295 : vector<8x512xf32>
    %c4_187 = arith.constant 4 : index
    %c0_188 = arith.constant 0 : index
    %c0_189 = arith.constant 0 : index
    %297 = vector.load %arg6[%c4_187, %c0_188, %c0_189] : memref<81x8x512xf32, #tpu.memory_space<vmem>>, vector<1x8x512xf32>
    %298 = vector.shape_cast %297 : vector<1x8x512xf32> to vector<8x512xf32>
    %c0_190 = arith.constant 0 : index
    %c64 = arith.constant 64 : index
    %299 = vector.load %arg13[%c0_190, %c64] : memref<8x1024xf32, #tpu.memory_space<vmem>>, vector<8x512xf32>
    %300 = arith.mulf %298, %299 : vector<8x512xf32>
    %301 = arith.addf %296, %300 : vector<8x512xf32>
    %c5_191 = arith.constant 5 : index
    %c0_192 = arith.constant 0 : index
    %c0_193 = arith.constant 0 : index
    %302 = vector.load %arg6[%c5_191, %c0_192, %c0_193] : memref<81x8x512xf32, #tpu.memory_space<vmem>>, vector<1x8x512xf32>
    %303 = vector.shape_cast %302 : vector<1x8x512xf32> to vector<8x512xf32>
    %c0_194 = arith.constant 0 : index
    %c67 = arith.constant 67 : index
    %304 = vector.load %arg13[%c0_194, %c67] : memref<8x1024xf32, #tpu.memory_space<vmem>>, vector<8x512xf32>
    %305 = arith.mulf %303, %304 : vector<8x512xf32>
    %306 = arith.addf %301, %305 : vector<8x512xf32>
    %c6_195 = arith.constant 6 : index
    %c0_196 = arith.constant 0 : index
    %c0_197 = arith.constant 0 : index
    %307 = vector.load %arg6[%c6_195, %c0_196, %c0_197] : memref<81x8x512xf32, #tpu.memory_space<vmem>>, vector<1x8x512xf32>
    %308 = vector.shape_cast %307 : vector<1x8x512xf32> to vector<8x512xf32>
    %c0_198 = arith.constant 0 : index
    %c70 = arith.constant 70 : index
    %309 = vector.load %arg13[%c0_198, %c70] : memref<8x1024xf32, #tpu.memory_space<vmem>>, vector<8x512xf32>
    %310 = arith.mulf %308, %309 : vector<8x512xf32>
    %311 = arith.addf %306, %310 : vector<8x512xf32>
    %c7_199 = arith.constant 7 : index
    %c0_200 = arith.constant 0 : index
    %c0_201 = arith.constant 0 : index
    %312 = vector.load %arg6[%c7_199, %c0_200, %c0_201] : memref<81x8x512xf32, #tpu.memory_space<vmem>>, vector<1x8x512xf32>
    %313 = vector.shape_cast %312 : vector<1x8x512xf32> to vector<8x512xf32>
    %c0_202 = arith.constant 0 : index
    %c73 = arith.constant 73 : index
    %314 = vector.load %arg13[%c0_202, %c73] : memref<8x1024xf32, #tpu.memory_space<vmem>>, vector<8x512xf32>
    %315 = arith.mulf %313, %314 : vector<8x512xf32>
    %316 = arith.addf %311, %315 : vector<8x512xf32>
    %c8_203 = arith.constant 8 : index
    %c0_204 = arith.constant 0 : index
    %c0_205 = arith.constant 0 : index
    %317 = vector.load %arg6[%c8_203, %c0_204, %c0_205] : memref<81x8x512xf32, #tpu.memory_space<vmem>>, vector<1x8x512xf32>
    %318 = vector.shape_cast %317 : vector<1x8x512xf32> to vector<8x512xf32>
    %c0_206 = arith.constant 0 : index
    %c76 = arith.constant 76 : index
    %319 = vector.load %arg13[%c0_206, %c76] : memref<8x1024xf32, #tpu.memory_space<vmem>>, vector<8x512xf32>
    %320 = arith.mulf %318, %319 : vector<8x512xf32>
    %321 = arith.addf %316, %320 : vector<8x512xf32>
    %c9_207 = arith.constant 9 : index
    %c0_208 = arith.constant 0 : index
    %c0_209 = arith.constant 0 : index
    %322 = vector.load %arg6[%c9_207, %c0_208, %c0_209] : memref<81x8x512xf32, #tpu.memory_space<vmem>>, vector<1x8x512xf32>
    %323 = vector.shape_cast %322 : vector<1x8x512xf32> to vector<8x512xf32>
    %c0_210 = arith.constant 0 : index
    %c100 = arith.constant 100 : index
    %324 = vector.load %arg13[%c0_210, %c100] : memref<8x1024xf32, #tpu.memory_space<vmem>>, vector<8x512xf32>
    %325 = arith.mulf %323, %324 : vector<8x512xf32>
    %326 = arith.addf %321, %325 : vector<8x512xf32>
    %c10_211 = arith.constant 10 : index
    %c0_212 = arith.constant 0 : index
    %c0_213 = arith.constant 0 : index
    %327 = vector.load %arg6[%c10_211, %c0_212, %c0_213] : memref<81x8x512xf32, #tpu.memory_space<vmem>>, vector<1x8x512xf32>
    %328 = vector.shape_cast %327 : vector<1x8x512xf32> to vector<8x512xf32>
    %c0_214 = arith.constant 0 : index
    %c103 = arith.constant 103 : index
    %329 = vector.load %arg13[%c0_214, %c103] : memref<8x1024xf32, #tpu.memory_space<vmem>>, vector<8x512xf32>
    %330 = arith.mulf %328, %329 : vector<8x512xf32>
    %331 = arith.addf %326, %330 : vector<8x512xf32>
    %c11_215 = arith.constant 11 : index
    %c0_216 = arith.constant 0 : index
    %c0_217 = arith.constant 0 : index
    %332 = vector.load %arg6[%c11_215, %c0_216, %c0_217] : memref<81x8x512xf32, #tpu.memory_space<vmem>>, vector<1x8x512xf32>
    %333 = vector.shape_cast %332 : vector<1x8x512xf32> to vector<8x512xf32>
    %c0_218 = arith.constant 0 : index
    %c106 = arith.constant 106 : index
    %334 = vector.load %arg13[%c0_218, %c106] : memref<8x1024xf32, #tpu.memory_space<vmem>>, vector<8x512xf32>
    %335 = arith.mulf %333, %334 : vector<8x512xf32>
    %336 = arith.addf %331, %335 : vector<8x512xf32>
    %c12_219 = arith.constant 12 : index
    %c0_220 = arith.constant 0 : index
    %c0_221 = arith.constant 0 : index
    %337 = vector.load %arg6[%c12_219, %c0_220, %c0_221] : memref<81x8x512xf32, #tpu.memory_space<vmem>>, vector<1x8x512xf32>
    %338 = vector.shape_cast %337 : vector<1x8x512xf32> to vector<8x512xf32>
    %c0_222 = arith.constant 0 : index
    %c109 = arith.constant 109 : index
    %339 = vector.load %arg13[%c0_222, %c109] : memref<8x1024xf32, #tpu.memory_space<vmem>>, vector<8x512xf32>
    %340 = arith.mulf %338, %339 : vector<8x512xf32>
    %341 = arith.addf %336, %340 : vector<8x512xf32>
    %c13_223 = arith.constant 13 : index
    %c0_224 = arith.constant 0 : index
    %c0_225 = arith.constant 0 : index
    %342 = vector.load %arg6[%c13_223, %c0_224, %c0_225] : memref<81x8x512xf32, #tpu.memory_space<vmem>>, vector<1x8x512xf32>
    %343 = vector.shape_cast %342 : vector<1x8x512xf32> to vector<8x512xf32>
    %c0_226 = arith.constant 0 : index
    %c112 = arith.constant 112 : index
    %344 = vector.load %arg13[%c0_226, %c112] : memref<8x1024xf32, #tpu.memory_space<vmem>>, vector<8x512xf32>
    %345 = arith.mulf %343, %344 : vector<8x512xf32>
    %346 = arith.addf %341, %345 : vector<8x512xf32>
    %c14_227 = arith.constant 14 : index
    %c0_228 = arith.constant 0 : index
    %c0_229 = arith.constant 0 : index
    %347 = vector.load %arg6[%c14_227, %c0_228, %c0_229] : memref<81x8x512xf32, #tpu.memory_space<vmem>>, vector<1x8x512xf32>
    %348 = vector.shape_cast %347 : vector<1x8x512xf32> to vector<8x512xf32>
    %c0_230 = arith.constant 0 : index
    %c115 = arith.constant 115 : index
    %349 = vector.load %arg13[%c0_230, %c115] : memref<8x1024xf32, #tpu.memory_space<vmem>>, vector<8x512xf32>
    %350 = arith.mulf %348, %349 : vector<8x512xf32>
    %351 = arith.addf %346, %350 : vector<8x512xf32>
    %c15_231 = arith.constant 15 : index
    %c0_232 = arith.constant 0 : index
    %c0_233 = arith.constant 0 : index
    %352 = vector.load %arg6[%c15_231, %c0_232, %c0_233] : memref<81x8x512xf32, #tpu.memory_space<vmem>>, vector<1x8x512xf32>
    %353 = vector.shape_cast %352 : vector<1x8x512xf32> to vector<8x512xf32>
    %c0_234 = arith.constant 0 : index
    %c118 = arith.constant 118 : index
    %354 = vector.load %arg13[%c0_234, %c118] : memref<8x1024xf32, #tpu.memory_space<vmem>>, vector<8x512xf32>
    %355 = arith.mulf %353, %354 : vector<8x512xf32>
    %356 = arith.addf %351, %355 : vector<8x512xf32>
    %c16_235 = arith.constant 16 : index
    %c0_236 = arith.constant 0 : index
    %c0_237 = arith.constant 0 : index
    %357 = vector.load %arg6[%c16_235, %c0_236, %c0_237] : memref<81x8x512xf32, #tpu.memory_space<vmem>>, vector<1x8x512xf32>
    %358 = vector.shape_cast %357 : vector<1x8x512xf32> to vector<8x512xf32>
    %c0_238 = arith.constant 0 : index
    %c121 = arith.constant 121 : index
    %359 = vector.load %arg13[%c0_238, %c121] : memref<8x1024xf32, #tpu.memory_space<vmem>>, vector<8x512xf32>
    %360 = arith.mulf %358, %359 : vector<8x512xf32>
    %361 = arith.addf %356, %360 : vector<8x512xf32>
    %c17_239 = arith.constant 17 : index
    %c0_240 = arith.constant 0 : index
    %c0_241 = arith.constant 0 : index
    %362 = vector.load %arg6[%c17_239, %c0_240, %c0_241] : memref<81x8x512xf32, #tpu.memory_space<vmem>>, vector<1x8x512xf32>
    %363 = vector.shape_cast %362 : vector<1x8x512xf32> to vector<8x512xf32>
    %c0_242 = arith.constant 0 : index
    %c124 = arith.constant 124 : index
    %364 = vector.load %arg13[%c0_242, %c124] : memref<8x1024xf32, #tpu.memory_space<vmem>>, vector<8x512xf32>
    %365 = arith.mulf %363, %364 : vector<8x512xf32>
    %366 = arith.addf %361, %365 : vector<8x512xf32>
    %c18_243 = arith.constant 18 : index
    %c0_244 = arith.constant 0 : index
    %c0_245 = arith.constant 0 : index
    %367 = vector.load %arg6[%c18_243, %c0_244, %c0_245] : memref<81x8x512xf32, #tpu.memory_space<vmem>>, vector<1x8x512xf32>
    %368 = vector.shape_cast %367 : vector<1x8x512xf32> to vector<8x512xf32>
    %c0_246 = arith.constant 0 : index
    %c148 = arith.constant 148 : index
    %369 = vector.load %arg13[%c0_246, %c148] : memref<8x1024xf32, #tpu.memory_space<vmem>>, vector<8x512xf32>
    %370 = arith.mulf %368, %369 : vector<8x512xf32>
    %371 = arith.addf %366, %370 : vector<8x512xf32>
    %c19_247 = arith.constant 19 : index
    %c0_248 = arith.constant 0 : index
    %c0_249 = arith.constant 0 : index
    %372 = vector.load %arg6[%c19_247, %c0_248, %c0_249] : memref<81x8x512xf32, #tpu.memory_space<vmem>>, vector<1x8x512xf32>
    %373 = vector.shape_cast %372 : vector<1x8x512xf32> to vector<8x512xf32>
    %c0_250 = arith.constant 0 : index
    %c151 = arith.constant 151 : index
    %374 = vector.load %arg13[%c0_250, %c151] : memref<8x1024xf32, #tpu.memory_space<vmem>>, vector<8x512xf32>
    %375 = arith.mulf %373, %374 : vector<8x512xf32>
    %376 = arith.addf %371, %375 : vector<8x512xf32>
    %c20_251 = arith.constant 20 : index
    %c0_252 = arith.constant 0 : index
    %c0_253 = arith.constant 0 : index
    %377 = vector.load %arg6[%c20_251, %c0_252, %c0_253] : memref<81x8x512xf32, #tpu.memory_space<vmem>>, vector<1x8x512xf32>
    %378 = vector.shape_cast %377 : vector<1x8x512xf32> to vector<8x512xf32>
    %c0_254 = arith.constant 0 : index
    %c154 = arith.constant 154 : index
    %379 = vector.load %arg13[%c0_254, %c154] : memref<8x1024xf32, #tpu.memory_space<vmem>>, vector<8x512xf32>
    %380 = arith.mulf %378, %379 : vector<8x512xf32>
    %381 = arith.addf %376, %380 : vector<8x512xf32>
    %c21_255 = arith.constant 21 : index
    %c0_256 = arith.constant 0 : index
    %c0_257 = arith.constant 0 : index
    %382 = vector.load %arg6[%c21_255, %c0_256, %c0_257] : memref<81x8x512xf32, #tpu.memory_space<vmem>>, vector<1x8x512xf32>
    %383 = vector.shape_cast %382 : vector<1x8x512xf32> to vector<8x512xf32>
    %c0_258 = arith.constant 0 : index
    %c157 = arith.constant 157 : index
    %384 = vector.load %arg13[%c0_258, %c157] : memref<8x1024xf32, #tpu.memory_space<vmem>>, vector<8x512xf32>
    %385 = arith.mulf %383, %384 : vector<8x512xf32>
    %386 = arith.addf %381, %385 : vector<8x512xf32>
    %c22_259 = arith.constant 22 : index
    %c0_260 = arith.constant 0 : index
    %c0_261 = arith.constant 0 : index
    %387 = vector.load %arg6[%c22_259, %c0_260, %c0_261] : memref<81x8x512xf32, #tpu.memory_space<vmem>>, vector<1x8x512xf32>
    %388 = vector.shape_cast %387 : vector<1x8x512xf32> to vector<8x512xf32>
    %c0_262 = arith.constant 0 : index
    %c160 = arith.constant 160 : index
    %389 = vector.load %arg13[%c0_262, %c160] : memref<8x1024xf32, #tpu.memory_space<vmem>>, vector<8x512xf32>
    %390 = arith.mulf %388, %389 : vector<8x512xf32>
    %391 = arith.addf %386, %390 : vector<8x512xf32>
    %c23_263 = arith.constant 23 : index
    %c0_264 = arith.constant 0 : index
    %c0_265 = arith.constant 0 : index
    %392 = vector.load %arg6[%c23_263, %c0_264, %c0_265] : memref<81x8x512xf32, #tpu.memory_space<vmem>>, vector<1x8x512xf32>
    %393 = vector.shape_cast %392 : vector<1x8x512xf32> to vector<8x512xf32>
    %c0_266 = arith.constant 0 : index
    %c163 = arith.constant 163 : index
    %394 = vector.load %arg13[%c0_266, %c163] : memref<8x1024xf32, #tpu.memory_space<vmem>>, vector<8x512xf32>
    %395 = arith.mulf %393, %394 : vector<8x512xf32>
    %396 = arith.addf %391, %395 : vector<8x512xf32>
    %c24_267 = arith.constant 24 : index
    %c0_268 = arith.constant 0 : index
    %c0_269 = arith.constant 0 : index
    %397 = vector.load %arg6[%c24_267, %c0_268, %c0_269] : memref<81x8x512xf32, #tpu.memory_space<vmem>>, vector<1x8x512xf32>
    %398 = vector.shape_cast %397 : vector<1x8x512xf32> to vector<8x512xf32>
    %c0_270 = arith.constant 0 : index
    %c166 = arith.constant 166 : index
    %399 = vector.load %arg13[%c0_270, %c166] : memref<8x1024xf32, #tpu.memory_space<vmem>>, vector<8x512xf32>
    %400 = arith.mulf %398, %399 : vector<8x512xf32>
    %401 = arith.addf %396, %400 : vector<8x512xf32>
    %c25_271 = arith.constant 25 : index
    %c0_272 = arith.constant 0 : index
    %c0_273 = arith.constant 0 : index
    %402 = vector.load %arg6[%c25_271, %c0_272, %c0_273] : memref<81x8x512xf32, #tpu.memory_space<vmem>>, vector<1x8x512xf32>
    %403 = vector.shape_cast %402 : vector<1x8x512xf32> to vector<8x512xf32>
    %c0_274 = arith.constant 0 : index
    %c169 = arith.constant 169 : index
    %404 = vector.load %arg13[%c0_274, %c169] : memref<8x1024xf32, #tpu.memory_space<vmem>>, vector<8x512xf32>
    %405 = arith.mulf %403, %404 : vector<8x512xf32>
    %406 = arith.addf %401, %405 : vector<8x512xf32>
    %c26_275 = arith.constant 26 : index
    %c0_276 = arith.constant 0 : index
    %c0_277 = arith.constant 0 : index
    %407 = vector.load %arg6[%c26_275, %c0_276, %c0_277] : memref<81x8x512xf32, #tpu.memory_space<vmem>>, vector<1x8x512xf32>
    %408 = vector.shape_cast %407 : vector<1x8x512xf32> to vector<8x512xf32>
    %c0_278 = arith.constant 0 : index
    %c172 = arith.constant 172 : index
    %409 = vector.load %arg13[%c0_278, %c172] : memref<8x1024xf32, #tpu.memory_space<vmem>>, vector<8x512xf32>
    %410 = arith.mulf %408, %409 : vector<8x512xf32>
    %411 = arith.addf %406, %410 : vector<8x512xf32>
    %c27_279 = arith.constant 27 : index
    %c0_280 = arith.constant 0 : index
    %c0_281 = arith.constant 0 : index
    %412 = vector.load %arg6[%c27_279, %c0_280, %c0_281] : memref<81x8x512xf32, #tpu.memory_space<vmem>>, vector<1x8x512xf32>
    %413 = vector.shape_cast %412 : vector<1x8x512xf32> to vector<8x512xf32>
    %c0_282 = arith.constant 0 : index
    %c196 = arith.constant 196 : index
    %414 = vector.load %arg13[%c0_282, %c196] : memref<8x1024xf32, #tpu.memory_space<vmem>>, vector<8x512xf32>
    %415 = arith.mulf %413, %414 : vector<8x512xf32>
    %416 = arith.addf %411, %415 : vector<8x512xf32>
    %c28_283 = arith.constant 28 : index
    %c0_284 = arith.constant 0 : index
    %c0_285 = arith.constant 0 : index
    %417 = vector.load %arg6[%c28_283, %c0_284, %c0_285] : memref<81x8x512xf32, #tpu.memory_space<vmem>>, vector<1x8x512xf32>
    %418 = vector.shape_cast %417 : vector<1x8x512xf32> to vector<8x512xf32>
    %c0_286 = arith.constant 0 : index
    %c199 = arith.constant 199 : index
    %419 = vector.load %arg13[%c0_286, %c199] : memref<8x1024xf32, #tpu.memory_space<vmem>>, vector<8x512xf32>
    %420 = arith.mulf %418, %419 : vector<8x512xf32>
    %421 = arith.addf %416, %420 : vector<8x512xf32>
    %c29_287 = arith.constant 29 : index
    %c0_288 = arith.constant 0 : index
    %c0_289 = arith.constant 0 : index
    %422 = vector.load %arg6[%c29_287, %c0_288, %c0_289] : memref<81x8x512xf32, #tpu.memory_space<vmem>>, vector<1x8x512xf32>
    %423 = vector.shape_cast %422 : vector<1x8x512xf32> to vector<8x512xf32>
    %c0_290 = arith.constant 0 : index
    %c202 = arith.constant 202 : index
    %424 = vector.load %arg13[%c0_290, %c202] : memref<8x1024xf32, #tpu.memory_space<vmem>>, vector<8x512xf32>
    %425 = arith.mulf %423, %424 : vector<8x512xf32>
    %426 = arith.addf %421, %425 : vector<8x512xf32>
    %c30_291 = arith.constant 30 : index
    %c0_292 = arith.constant 0 : index
    %c0_293 = arith.constant 0 : index
    %427 = vector.load %arg6[%c30_291, %c0_292, %c0_293] : memref<81x8x512xf32, #tpu.memory_space<vmem>>, vector<1x8x512xf32>
    %428 = vector.shape_cast %427 : vector<1x8x512xf32> to vector<8x512xf32>
    %c0_294 = arith.constant 0 : index
    %c205_295 = arith.constant 205 : index
    %429 = vector.load %arg13[%c0_294, %c205_295] : memref<8x1024xf32, #tpu.memory_space<vmem>>, vector<8x512xf32>
    %430 = arith.mulf %428, %429 : vector<8x512xf32>
    %431 = arith.addf %426, %430 : vector<8x512xf32>
    %c31_296 = arith.constant 31 : index
    %c0_297 = arith.constant 0 : index
    %c0_298 = arith.constant 0 : index
    %432 = vector.load %arg6[%c31_296, %c0_297, %c0_298] : memref<81x8x512xf32, #tpu.memory_space<vmem>>, vector<1x8x512xf32>
    %433 = vector.shape_cast %432 : vector<1x8x512xf32> to vector<8x512xf32>
    %c0_299 = arith.constant 0 : index
    %c208_300 = arith.constant 208 : index
    %434 = vector.load %arg13[%c0_299, %c208_300] : memref<8x1024xf32, #tpu.memory_space<vmem>>, vector<8x512xf32>
    %435 = arith.mulf %433, %434 : vector<8x512xf32>
    %436 = arith.addf %431, %435 : vector<8x512xf32>
    %c32_301 = arith.constant 32 : index
    %c0_302 = arith.constant 0 : index
    %c0_303 = arith.constant 0 : index
    %437 = vector.load %arg6[%c32_301, %c0_302, %c0_303] : memref<81x8x512xf32, #tpu.memory_space<vmem>>, vector<1x8x512xf32>
    %438 = vector.shape_cast %437 : vector<1x8x512xf32> to vector<8x512xf32>
    %c0_304 = arith.constant 0 : index
    %c211_305 = arith.constant 211 : index
    %439 = vector.load %arg13[%c0_304, %c211_305] : memref<8x1024xf32, #tpu.memory_space<vmem>>, vector<8x512xf32>
    %440 = arith.mulf %438, %439 : vector<8x512xf32>
    %441 = arith.addf %436, %440 : vector<8x512xf32>
    %c33_306 = arith.constant 33 : index
    %c0_307 = arith.constant 0 : index
    %c0_308 = arith.constant 0 : index
    %442 = vector.load %arg6[%c33_306, %c0_307, %c0_308] : memref<81x8x512xf32, #tpu.memory_space<vmem>>, vector<1x8x512xf32>
    %443 = vector.shape_cast %442 : vector<1x8x512xf32> to vector<8x512xf32>
    %c0_309 = arith.constant 0 : index
    %c214 = arith.constant 214 : index
    %444 = vector.load %arg13[%c0_309, %c214] : memref<8x1024xf32, #tpu.memory_space<vmem>>, vector<8x512xf32>
    %445 = arith.mulf %443, %444 : vector<8x512xf32>
    %446 = arith.addf %441, %445 : vector<8x512xf32>
    %c34_310 = arith.constant 34 : index
    %c0_311 = arith.constant 0 : index
    %c0_312 = arith.constant 0 : index
    %447 = vector.load %arg6[%c34_310, %c0_311, %c0_312] : memref<81x8x512xf32, #tpu.memory_space<vmem>>, vector<1x8x512xf32>
    %448 = vector.shape_cast %447 : vector<1x8x512xf32> to vector<8x512xf32>
    %c0_313 = arith.constant 0 : index
    %c217 = arith.constant 217 : index
    %449 = vector.load %arg13[%c0_313, %c217] : memref<8x1024xf32, #tpu.memory_space<vmem>>, vector<8x512xf32>
    %450 = arith.mulf %448, %449 : vector<8x512xf32>
    %451 = arith.addf %446, %450 : vector<8x512xf32>
    %c35_314 = arith.constant 35 : index
    %c0_315 = arith.constant 0 : index
    %c0_316 = arith.constant 0 : index
    %452 = vector.load %arg6[%c35_314, %c0_315, %c0_316] : memref<81x8x512xf32, #tpu.memory_space<vmem>>, vector<1x8x512xf32>
    %453 = vector.shape_cast %452 : vector<1x8x512xf32> to vector<8x512xf32>
    %c0_317 = arith.constant 0 : index
    %c220 = arith.constant 220 : index
    %454 = vector.load %arg13[%c0_317, %c220] : memref<8x1024xf32, #tpu.memory_space<vmem>>, vector<8x512xf32>
    %455 = arith.mulf %453, %454 : vector<8x512xf32>
    %456 = arith.addf %451, %455 : vector<8x512xf32>
    %c36_318 = arith.constant 36 : index
    %c0_319 = arith.constant 0 : index
    %c0_320 = arith.constant 0 : index
    %457 = vector.load %arg6[%c36_318, %c0_319, %c0_320] : memref<81x8x512xf32, #tpu.memory_space<vmem>>, vector<1x8x512xf32>
    %458 = vector.shape_cast %457 : vector<1x8x512xf32> to vector<8x512xf32>
    %c0_321 = arith.constant 0 : index
    %c244 = arith.constant 244 : index
    %459 = vector.load %arg13[%c0_321, %c244] : memref<8x1024xf32, #tpu.memory_space<vmem>>, vector<8x512xf32>
    %460 = arith.mulf %458, %459 : vector<8x512xf32>
    %461 = arith.addf %456, %460 : vector<8x512xf32>
    %c37_322 = arith.constant 37 : index
    %c0_323 = arith.constant 0 : index
    %c0_324 = arith.constant 0 : index
    %462 = vector.load %arg6[%c37_322, %c0_323, %c0_324] : memref<81x8x512xf32, #tpu.memory_space<vmem>>, vector<1x8x512xf32>
    %463 = vector.shape_cast %462 : vector<1x8x512xf32> to vector<8x512xf32>
    %c0_325 = arith.constant 0 : index
    %c247 = arith.constant 247 : index
    %464 = vector.load %arg13[%c0_325, %c247] : memref<8x1024xf32, #tpu.memory_space<vmem>>, vector<8x512xf32>
    %465 = arith.mulf %463, %464 : vector<8x512xf32>
    %466 = arith.addf %461, %465 : vector<8x512xf32>
    %c38_326 = arith.constant 38 : index
    %c0_327 = arith.constant 0 : index
    %c0_328 = arith.constant 0 : index
    %467 = vector.load %arg6[%c38_326, %c0_327, %c0_328] : memref<81x8x512xf32, #tpu.memory_space<vmem>>, vector<1x8x512xf32>
    %468 = vector.shape_cast %467 : vector<1x8x512xf32> to vector<8x512xf32>
    %c0_329 = arith.constant 0 : index
    %c250 = arith.constant 250 : index
    %469 = vector.load %arg13[%c0_329, %c250] : memref<8x1024xf32, #tpu.memory_space<vmem>>, vector<8x512xf32>
    %470 = arith.mulf %468, %469 : vector<8x512xf32>
    %471 = arith.addf %466, %470 : vector<8x512xf32>
    %c39_330 = arith.constant 39 : index
    %c0_331 = arith.constant 0 : index
    %c0_332 = arith.constant 0 : index
    %472 = vector.load %arg6[%c39_330, %c0_331, %c0_332] : memref<81x8x512xf32, #tpu.memory_space<vmem>>, vector<1x8x512xf32>
    %473 = vector.shape_cast %472 : vector<1x8x512xf32> to vector<8x512xf32>
    %c0_333 = arith.constant 0 : index
    %c253_334 = arith.constant 253 : index
    %474 = vector.load %arg13[%c0_333, %c253_334] : memref<8x1024xf32, #tpu.memory_space<vmem>>, vector<8x512xf32>
    %475 = arith.mulf %473, %474 : vector<8x512xf32>
    %476 = arith.addf %471, %475 : vector<8x512xf32>
    %c40_335 = arith.constant 40 : index
    %c0_336 = arith.constant 0 : index
    %c0_337 = arith.constant 0 : index
    %477 = vector.load %arg6[%c40_335, %c0_336, %c0_337] : memref<81x8x512xf32, #tpu.memory_space<vmem>>, vector<1x8x512xf32>
    %478 = vector.shape_cast %477 : vector<1x8x512xf32> to vector<8x512xf32>
    %c0_338 = arith.constant 0 : index
    %c256_339 = arith.constant 256 : index
    %479 = vector.load %arg13[%c0_338, %c256_339] : memref<8x1024xf32, #tpu.memory_space<vmem>>, vector<8x512xf32>
    %480 = arith.mulf %478, %479 : vector<8x512xf32>
    %481 = arith.addf %476, %480 : vector<8x512xf32>
    %c41_340 = arith.constant 41 : index
    %c0_341 = arith.constant 0 : index
    %c0_342 = arith.constant 0 : index
    %482 = vector.load %arg6[%c41_340, %c0_341, %c0_342] : memref<81x8x512xf32, #tpu.memory_space<vmem>>, vector<1x8x512xf32>
    %483 = vector.shape_cast %482 : vector<1x8x512xf32> to vector<8x512xf32>
    %c0_343 = arith.constant 0 : index
    %c259_344 = arith.constant 259 : index
    %484 = vector.load %arg13[%c0_343, %c259_344] : memref<8x1024xf32, #tpu.memory_space<vmem>>, vector<8x512xf32>
    %485 = arith.mulf %483, %484 : vector<8x512xf32>
    %486 = arith.addf %481, %485 : vector<8x512xf32>
    %c42_345 = arith.constant 42 : index
    %c0_346 = arith.constant 0 : index
    %c0_347 = arith.constant 0 : index
    %487 = vector.load %arg6[%c42_345, %c0_346, %c0_347] : memref<81x8x512xf32, #tpu.memory_space<vmem>>, vector<1x8x512xf32>
    %488 = vector.shape_cast %487 : vector<1x8x512xf32> to vector<8x512xf32>
    %c0_348 = arith.constant 0 : index
    %c262 = arith.constant 262 : index
    %489 = vector.load %arg13[%c0_348, %c262] : memref<8x1024xf32, #tpu.memory_space<vmem>>, vector<8x512xf32>
    %490 = arith.mulf %488, %489 : vector<8x512xf32>
    %491 = arith.addf %486, %490 : vector<8x512xf32>
    %c43_349 = arith.constant 43 : index
    %c0_350 = arith.constant 0 : index
    %c0_351 = arith.constant 0 : index
    %492 = vector.load %arg6[%c43_349, %c0_350, %c0_351] : memref<81x8x512xf32, #tpu.memory_space<vmem>>, vector<1x8x512xf32>
    %493 = vector.shape_cast %492 : vector<1x8x512xf32> to vector<8x512xf32>
    %c0_352 = arith.constant 0 : index
    %c265 = arith.constant 265 : index
    %494 = vector.load %arg13[%c0_352, %c265] : memref<8x1024xf32, #tpu.memory_space<vmem>>, vector<8x512xf32>
    %495 = arith.mulf %493, %494 : vector<8x512xf32>
    %496 = arith.addf %491, %495 : vector<8x512xf32>
    %c44_353 = arith.constant 44 : index
    %c0_354 = arith.constant 0 : index
    %c0_355 = arith.constant 0 : index
    %497 = vector.load %arg6[%c44_353, %c0_354, %c0_355] : memref<81x8x512xf32, #tpu.memory_space<vmem>>, vector<1x8x512xf32>
    %498 = vector.shape_cast %497 : vector<1x8x512xf32> to vector<8x512xf32>
    %c0_356 = arith.constant 0 : index
    %c268 = arith.constant 268 : index
    %499 = vector.load %arg13[%c0_356, %c268] : memref<8x1024xf32, #tpu.memory_space<vmem>>, vector<8x512xf32>
    %500 = arith.mulf %498, %499 : vector<8x512xf32>
    %501 = arith.addf %496, %500 : vector<8x512xf32>
    %c45_357 = arith.constant 45 : index
    %c0_358 = arith.constant 0 : index
    %c0_359 = arith.constant 0 : index
    %502 = vector.load %arg6[%c45_357, %c0_358, %c0_359] : memref<81x8x512xf32, #tpu.memory_space<vmem>>, vector<1x8x512xf32>
    %503 = vector.shape_cast %502 : vector<1x8x512xf32> to vector<8x512xf32>
    %c0_360 = arith.constant 0 : index
    %c292 = arith.constant 292 : index
    %504 = vector.load %arg13[%c0_360, %c292] : memref<8x1024xf32, #tpu.memory_space<vmem>>, vector<8x512xf32>
    %505 = arith.mulf %503, %504 : vector<8x512xf32>
    %506 = arith.addf %501, %505 : vector<8x512xf32>
    %c46_361 = arith.constant 46 : index
    %c0_362 = arith.constant 0 : index
    %c0_363 = arith.constant 0 : index
    %507 = vector.load %arg6[%c46_361, %c0_362, %c0_363] : memref<81x8x512xf32, #tpu.memory_space<vmem>>, vector<1x8x512xf32>
    %508 = vector.shape_cast %507 : vector<1x8x512xf32> to vector<8x512xf32>
    %c0_364 = arith.constant 0 : index
    %c295 = arith.constant 295 : index
    %509 = vector.load %arg13[%c0_364, %c295] : memref<8x1024xf32, #tpu.memory_space<vmem>>, vector<8x512xf32>
    %510 = arith.mulf %508, %509 : vector<8x512xf32>
    %511 = arith.addf %506, %510 : vector<8x512xf32>
    %c47_365 = arith.constant 47 : index
    %c0_366 = arith.constant 0 : index
    %c0_367 = arith.constant 0 : index
    %512 = vector.load %arg6[%c47_365, %c0_366, %c0_367] : memref<81x8x512xf32, #tpu.memory_space<vmem>>, vector<1x8x512xf32>
    %513 = vector.shape_cast %512 : vector<1x8x512xf32> to vector<8x512xf32>
    %c0_368 = arith.constant 0 : index
    %c298 = arith.constant 298 : index
    %514 = vector.load %arg13[%c0_368, %c298] : memref<8x1024xf32, #tpu.memory_space<vmem>>, vector<8x512xf32>
    %515 = arith.mulf %513, %514 : vector<8x512xf32>
    %516 = arith.addf %511, %515 : vector<8x512xf32>
    %c48_369 = arith.constant 48 : index
    %c0_370 = arith.constant 0 : index
    %c0_371 = arith.constant 0 : index
    %517 = vector.load %arg6[%c48_369, %c0_370, %c0_371] : memref<81x8x512xf32, #tpu.memory_space<vmem>>, vector<1x8x512xf32>
    %518 = vector.shape_cast %517 : vector<1x8x512xf32> to vector<8x512xf32>
    %c0_372 = arith.constant 0 : index
    %c301_373 = arith.constant 301 : index
    %519 = vector.load %arg13[%c0_372, %c301_373] : memref<8x1024xf32, #tpu.memory_space<vmem>>, vector<8x512xf32>
    %520 = arith.mulf %518, %519 : vector<8x512xf32>
    %521 = arith.addf %516, %520 : vector<8x512xf32>
    %c49 = arith.constant 49 : index
    %c0_374 = arith.constant 0 : index
    %c0_375 = arith.constant 0 : index
    %522 = vector.load %arg6[%c49, %c0_374, %c0_375] : memref<81x8x512xf32, #tpu.memory_space<vmem>>, vector<1x8x512xf32>
    %523 = vector.shape_cast %522 : vector<1x8x512xf32> to vector<8x512xf32>
    %c0_376 = arith.constant 0 : index
    %c304_377 = arith.constant 304 : index
    %524 = vector.load %arg13[%c0_376, %c304_377] : memref<8x1024xf32, #tpu.memory_space<vmem>>, vector<8x512xf32>
    %525 = arith.mulf %523, %524 : vector<8x512xf32>
    %526 = arith.addf %521, %525 : vector<8x512xf32>
    %c50 = arith.constant 50 : index
    %c0_378 = arith.constant 0 : index
    %c0_379 = arith.constant 0 : index
    %527 = vector.load %arg6[%c50, %c0_378, %c0_379] : memref<81x8x512xf32, #tpu.memory_space<vmem>>, vector<1x8x512xf32>
    %528 = vector.shape_cast %527 : vector<1x8x512xf32> to vector<8x512xf32>
    %c0_380 = arith.constant 0 : index
    %c307_381 = arith.constant 307 : index
    %529 = vector.load %arg13[%c0_380, %c307_381] : memref<8x1024xf32, #tpu.memory_space<vmem>>, vector<8x512xf32>
    %530 = arith.mulf %528, %529 : vector<8x512xf32>
    %531 = arith.addf %526, %530 : vector<8x512xf32>
    %c51 = arith.constant 51 : index
    %c0_382 = arith.constant 0 : index
    %c0_383 = arith.constant 0 : index
    %532 = vector.load %arg6[%c51, %c0_382, %c0_383] : memref<81x8x512xf32, #tpu.memory_space<vmem>>, vector<1x8x512xf32>
    %533 = vector.shape_cast %532 : vector<1x8x512xf32> to vector<8x512xf32>
    %c0_384 = arith.constant 0 : index
    %c310 = arith.constant 310 : index
    %534 = vector.load %arg13[%c0_384, %c310] : memref<8x1024xf32, #tpu.memory_space<vmem>>, vector<8x512xf32>
    %535 = arith.mulf %533, %534 : vector<8x512xf32>
    %536 = arith.addf %531, %535 : vector<8x512xf32>
    %c52_385 = arith.constant 52 : index
    %c0_386 = arith.constant 0 : index
    %c0_387 = arith.constant 0 : index
    %537 = vector.load %arg6[%c52_385, %c0_386, %c0_387] : memref<81x8x512xf32, #tpu.memory_space<vmem>>, vector<1x8x512xf32>
    %538 = vector.shape_cast %537 : vector<1x8x512xf32> to vector<8x512xf32>
    %c0_388 = arith.constant 0 : index
    %c313 = arith.constant 313 : index
    %539 = vector.load %arg13[%c0_388, %c313] : memref<8x1024xf32, #tpu.memory_space<vmem>>, vector<8x512xf32>
    %540 = arith.mulf %538, %539 : vector<8x512xf32>
    %541 = arith.addf %536, %540 : vector<8x512xf32>
    %c53 = arith.constant 53 : index
    %c0_389 = arith.constant 0 : index
    %c0_390 = arith.constant 0 : index
    %542 = vector.load %arg6[%c53, %c0_389, %c0_390] : memref<81x8x512xf32, #tpu.memory_space<vmem>>, vector<1x8x512xf32>
    %543 = vector.shape_cast %542 : vector<1x8x512xf32> to vector<8x512xf32>
    %c0_391 = arith.constant 0 : index
    %c316 = arith.constant 316 : index
    %544 = vector.load %arg13[%c0_391, %c316] : memref<8x1024xf32, #tpu.memory_space<vmem>>, vector<8x512xf32>
    %545 = arith.mulf %543, %544 : vector<8x512xf32>
    %546 = arith.addf %541, %545 : vector<8x512xf32>
    %c54 = arith.constant 54 : index
    %c0_392 = arith.constant 0 : index
    %c0_393 = arith.constant 0 : index
    %547 = vector.load %arg6[%c54, %c0_392, %c0_393] : memref<81x8x512xf32, #tpu.memory_space<vmem>>, vector<1x8x512xf32>
    %548 = vector.shape_cast %547 : vector<1x8x512xf32> to vector<8x512xf32>
    %c0_394 = arith.constant 0 : index
    %c340 = arith.constant 340 : index
    %549 = vector.load %arg13[%c0_394, %c340] : memref<8x1024xf32, #tpu.memory_space<vmem>>, vector<8x512xf32>
    %550 = arith.mulf %548, %549 : vector<8x512xf32>
    %551 = arith.addf %546, %550 : vector<8x512xf32>
    %c55_395 = arith.constant 55 : index
    %c0_396 = arith.constant 0 : index
    %c0_397 = arith.constant 0 : index
    %552 = vector.load %arg6[%c55_395, %c0_396, %c0_397] : memref<81x8x512xf32, #tpu.memory_space<vmem>>, vector<1x8x512xf32>
    %553 = vector.shape_cast %552 : vector<1x8x512xf32> to vector<8x512xf32>
    %c0_398 = arith.constant 0 : index
    %c343 = arith.constant 343 : index
    %554 = vector.load %arg13[%c0_398, %c343] : memref<8x1024xf32, #tpu.memory_space<vmem>>, vector<8x512xf32>
    %555 = arith.mulf %553, %554 : vector<8x512xf32>
    %556 = arith.addf %551, %555 : vector<8x512xf32>
    %c56 = arith.constant 56 : index
    %c0_399 = arith.constant 0 : index
    %c0_400 = arith.constant 0 : index
    %557 = vector.load %arg6[%c56, %c0_399, %c0_400] : memref<81x8x512xf32, #tpu.memory_space<vmem>>, vector<1x8x512xf32>
    %558 = vector.shape_cast %557 : vector<1x8x512xf32> to vector<8x512xf32>
    %c0_401 = arith.constant 0 : index
    %c346 = arith.constant 346 : index
    %559 = vector.load %arg13[%c0_401, %c346] : memref<8x1024xf32, #tpu.memory_space<vmem>>, vector<8x512xf32>
    %560 = arith.mulf %558, %559 : vector<8x512xf32>
    %561 = arith.addf %556, %560 : vector<8x512xf32>
    %c57 = arith.constant 57 : index
    %c0_402 = arith.constant 0 : index
    %c0_403 = arith.constant 0 : index
    %562 = vector.load %arg6[%c57, %c0_402, %c0_403] : memref<81x8x512xf32, #tpu.memory_space<vmem>>, vector<1x8x512xf32>
    %563 = vector.shape_cast %562 : vector<1x8x512xf32> to vector<8x512xf32>
    %c0_404 = arith.constant 0 : index
    %c349 = arith.constant 349 : index
    %564 = vector.load %arg13[%c0_404, %c349] : memref<8x1024xf32, #tpu.memory_space<vmem>>, vector<8x512xf32>
    %565 = arith.mulf %563, %564 : vector<8x512xf32>
    %566 = arith.addf %561, %565 : vector<8x512xf32>
    %c58_405 = arith.constant 58 : index
    %c0_406 = arith.constant 0 : index
    %c0_407 = arith.constant 0 : index
    %567 = vector.load %arg6[%c58_405, %c0_406, %c0_407] : memref<81x8x512xf32, #tpu.memory_space<vmem>>, vector<1x8x512xf32>
    %568 = vector.shape_cast %567 : vector<1x8x512xf32> to vector<8x512xf32>
    %c0_408 = arith.constant 0 : index
    %c352 = arith.constant 352 : index
    %569 = vector.load %arg13[%c0_408, %c352] : memref<8x1024xf32, #tpu.memory_space<vmem>>, vector<8x512xf32>
    %570 = arith.mulf %568, %569 : vector<8x512xf32>
    %571 = arith.addf %566, %570 : vector<8x512xf32>
    %c59 = arith.constant 59 : index
    %c0_409 = arith.constant 0 : index
    %c0_410 = arith.constant 0 : index
    %572 = vector.load %arg6[%c59, %c0_409, %c0_410] : memref<81x8x512xf32, #tpu.memory_space<vmem>>, vector<1x8x512xf32>
    %573 = vector.shape_cast %572 : vector<1x8x512xf32> to vector<8x512xf32>
    %c0_411 = arith.constant 0 : index
    %c355 = arith.constant 355 : index
    %574 = vector.load %arg13[%c0_411, %c355] : memref<8x1024xf32, #tpu.memory_space<vmem>>, vector<8x512xf32>
    %575 = arith.mulf %573, %574 : vector<8x512xf32>
    %576 = arith.addf %571, %575 : vector<8x512xf32>
    %c60 = arith.constant 60 : index
    %c0_412 = arith.constant 0 : index
    %c0_413 = arith.constant 0 : index
    %577 = vector.load %arg6[%c60, %c0_412, %c0_413] : memref<81x8x512xf32, #tpu.memory_space<vmem>>, vector<1x8x512xf32>
    %578 = vector.shape_cast %577 : vector<1x8x512xf32> to vector<8x512xf32>
    %c0_414 = arith.constant 0 : index
    %c358 = arith.constant 358 : index
    %579 = vector.load %arg13[%c0_414, %c358] : memref<8x1024xf32, #tpu.memory_space<vmem>>, vector<8x512xf32>
    %580 = arith.mulf %578, %579 : vector<8x512xf32>
    %581 = arith.addf %576, %580 : vector<8x512xf32>
    %c61_415 = arith.constant 61 : index
    %c0_416 = arith.constant 0 : index
    %c0_417 = arith.constant 0 : index
    %582 = vector.load %arg6[%c61_415, %c0_416, %c0_417] : memref<81x8x512xf32, #tpu.memory_space<vmem>>, vector<1x8x512xf32>
    %583 = vector.shape_cast %582 : vector<1x8x512xf32> to vector<8x512xf32>
    %c0_418 = arith.constant 0 : index
    %c361 = arith.constant 361 : index
    %584 = vector.load %arg13[%c0_418, %c361] : memref<8x1024xf32, #tpu.memory_space<vmem>>, vector<8x512xf32>
    %585 = arith.mulf %583, %584 : vector<8x512xf32>
    %586 = arith.addf %581, %585 : vector<8x512xf32>
    %c62 = arith.constant 62 : index
    %c0_419 = arith.constant 0 : index
    %c0_420 = arith.constant 0 : index
    %587 = vector.load %arg6[%c62, %c0_419, %c0_420] : memref<81x8x512xf32, #tpu.memory_space<vmem>>, vector<1x8x512xf32>
    %588 = vector.shape_cast %587 : vector<1x8x512xf32> to vector<8x512xf32>
    %c0_421 = arith.constant 0 : index
    %c364 = arith.constant 364 : index
    %589 = vector.load %arg13[%c0_421, %c364] : memref<8x1024xf32, #tpu.memory_space<vmem>>, vector<8x512xf32>
    %590 = arith.mulf %588, %589 : vector<8x512xf32>
    %591 = arith.addf %586, %590 : vector<8x512xf32>
    %c63 = arith.constant 63 : index
    %c0_422 = arith.constant 0 : index
    %c0_423 = arith.constant 0 : index
    %592 = vector.load %arg6[%c63, %c0_422, %c0_423] : memref<81x8x512xf32, #tpu.memory_space<vmem>>, vector<1x8x512xf32>
    %593 = vector.shape_cast %592 : vector<1x8x512xf32> to vector<8x512xf32>
    %c0_424 = arith.constant 0 : index
    %c388 = arith.constant 388 : index
    %594 = vector.load %arg13[%c0_424, %c388] : memref<8x1024xf32, #tpu.memory_space<vmem>>, vector<8x512xf32>
    %595 = arith.mulf %593, %594 : vector<8x512xf32>
    %596 = arith.addf %591, %595 : vector<8x512xf32>
    %c64_425 = arith.constant 64 : index
    %c0_426 = arith.constant 0 : index
    %c0_427 = arith.constant 0 : index
    %597 = vector.load %arg6[%c64_425, %c0_426, %c0_427] : memref<81x8x512xf32, #tpu.memory_space<vmem>>, vector<1x8x512xf32>
    %598 = vector.shape_cast %597 : vector<1x8x512xf32> to vector<8x512xf32>
    %c0_428 = arith.constant 0 : index
    %c391 = arith.constant 391 : index
    %599 = vector.load %arg13[%c0_428, %c391] : memref<8x1024xf32, #tpu.memory_space<vmem>>, vector<8x512xf32>
    %600 = arith.mulf %598, %599 : vector<8x512xf32>
    %601 = arith.addf %596, %600 : vector<8x512xf32>
    %c65 = arith.constant 65 : index
    %c0_429 = arith.constant 0 : index
    %c0_430 = arith.constant 0 : index
    %602 = vector.load %arg6[%c65, %c0_429, %c0_430] : memref<81x8x512xf32, #tpu.memory_space<vmem>>, vector<1x8x512xf32>
    %603 = vector.shape_cast %602 : vector<1x8x512xf32> to vector<8x512xf32>
    %c0_431 = arith.constant 0 : index
    %c394 = arith.constant 394 : index
    %604 = vector.load %arg13[%c0_431, %c394] : memref<8x1024xf32, #tpu.memory_space<vmem>>, vector<8x512xf32>
    %605 = arith.mulf %603, %604 : vector<8x512xf32>
    %606 = arith.addf %601, %605 : vector<8x512xf32>
    %c66 = arith.constant 66 : index
    %c0_432 = arith.constant 0 : index
    %c0_433 = arith.constant 0 : index
    %607 = vector.load %arg6[%c66, %c0_432, %c0_433] : memref<81x8x512xf32, #tpu.memory_space<vmem>>, vector<1x8x512xf32>
    %608 = vector.shape_cast %607 : vector<1x8x512xf32> to vector<8x512xf32>
    %c0_434 = arith.constant 0 : index
    %c397 = arith.constant 397 : index
    %609 = vector.load %arg13[%c0_434, %c397] : memref<8x1024xf32, #tpu.memory_space<vmem>>, vector<8x512xf32>
    %610 = arith.mulf %608, %609 : vector<8x512xf32>
    %611 = arith.addf %606, %610 : vector<8x512xf32>
    %c67_435 = arith.constant 67 : index
    %c0_436 = arith.constant 0 : index
    %c0_437 = arith.constant 0 : index
    %612 = vector.load %arg6[%c67_435, %c0_436, %c0_437] : memref<81x8x512xf32, #tpu.memory_space<vmem>>, vector<1x8x512xf32>
    %613 = vector.shape_cast %612 : vector<1x8x512xf32> to vector<8x512xf32>
    %c0_438 = arith.constant 0 : index
    %c400 = arith.constant 400 : index
    %614 = vector.load %arg13[%c0_438, %c400] : memref<8x1024xf32, #tpu.memory_space<vmem>>, vector<8x512xf32>
    %615 = arith.mulf %613, %614 : vector<8x512xf32>
    %616 = arith.addf %611, %615 : vector<8x512xf32>
    %c68 = arith.constant 68 : index
    %c0_439 = arith.constant 0 : index
    %c0_440 = arith.constant 0 : index
    %617 = vector.load %arg6[%c68, %c0_439, %c0_440] : memref<81x8x512xf32, #tpu.memory_space<vmem>>, vector<1x8x512xf32>
    %618 = vector.shape_cast %617 : vector<1x8x512xf32> to vector<8x512xf32>
    %c0_441 = arith.constant 0 : index
    %c403 = arith.constant 403 : index
    %619 = vector.load %arg13[%c0_441, %c403] : memref<8x1024xf32, #tpu.memory_space<vmem>>, vector<8x512xf32>
    %620 = arith.mulf %618, %619 : vector<8x512xf32>
    %621 = arith.addf %616, %620 : vector<8x512xf32>
    %c69 = arith.constant 69 : index
    %c0_442 = arith.constant 0 : index
    %c0_443 = arith.constant 0 : index
    %622 = vector.load %arg6[%c69, %c0_442, %c0_443] : memref<81x8x512xf32, #tpu.memory_space<vmem>>, vector<1x8x512xf32>
    %623 = vector.shape_cast %622 : vector<1x8x512xf32> to vector<8x512xf32>
    %c0_444 = arith.constant 0 : index
    %c406 = arith.constant 406 : index
    %624 = vector.load %arg13[%c0_444, %c406] : memref<8x1024xf32, #tpu.memory_space<vmem>>, vector<8x512xf32>
    %625 = arith.mulf %623, %624 : vector<8x512xf32>
    %626 = arith.addf %621, %625 : vector<8x512xf32>
    %c70_445 = arith.constant 70 : index
    %c0_446 = arith.constant 0 : index
    %c0_447 = arith.constant 0 : index
    %627 = vector.load %arg6[%c70_445, %c0_446, %c0_447] : memref<81x8x512xf32, #tpu.memory_space<vmem>>, vector<1x8x512xf32>
    %628 = vector.shape_cast %627 : vector<1x8x512xf32> to vector<8x512xf32>
    %c0_448 = arith.constant 0 : index
    %c409 = arith.constant 409 : index
    %629 = vector.load %arg13[%c0_448, %c409] : memref<8x1024xf32, #tpu.memory_space<vmem>>, vector<8x512xf32>
    %630 = arith.mulf %628, %629 : vector<8x512xf32>
    %631 = arith.addf %626, %630 : vector<8x512xf32>
    %c71 = arith.constant 71 : index
    %c0_449 = arith.constant 0 : index
    %c0_450 = arith.constant 0 : index
    %632 = vector.load %arg6[%c71, %c0_449, %c0_450] : memref<81x8x512xf32, #tpu.memory_space<vmem>>, vector<1x8x512xf32>
    %633 = vector.shape_cast %632 : vector<1x8x512xf32> to vector<8x512xf32>
    %c0_451 = arith.constant 0 : index
    %c412 = arith.constant 412 : index
    %634 = vector.load %arg13[%c0_451, %c412] : memref<8x1024xf32, #tpu.memory_space<vmem>>, vector<8x512xf32>
    %635 = arith.mulf %633, %634 : vector<8x512xf32>
    %636 = arith.addf %631, %635 : vector<8x512xf32>
    %c72 = arith.constant 72 : index
    %c0_452 = arith.constant 0 : index
    %c0_453 = arith.constant 0 : index
    %637 = vector.load %arg6[%c72, %c0_452, %c0_453] : memref<81x8x512xf32, #tpu.memory_space<vmem>>, vector<1x8x512xf32>
    %638 = vector.shape_cast %637 : vector<1x8x512xf32> to vector<8x512xf32>
    %c0_454 = arith.constant 0 : index
    %c436 = arith.constant 436 : index
    %639 = vector.load %arg13[%c0_454, %c436] : memref<8x1024xf32, #tpu.memory_space<vmem>>, vector<8x512xf32>
    %640 = arith.mulf %638, %639 : vector<8x512xf32>
    %641 = arith.addf %636, %640 : vector<8x512xf32>
    %c73_455 = arith.constant 73 : index
    %c0_456 = arith.constant 0 : index
    %c0_457 = arith.constant 0 : index
    %642 = vector.load %arg6[%c73_455, %c0_456, %c0_457] : memref<81x8x512xf32, #tpu.memory_space<vmem>>, vector<1x8x512xf32>
    %643 = vector.shape_cast %642 : vector<1x8x512xf32> to vector<8x512xf32>
    %c0_458 = arith.constant 0 : index
    %c439 = arith.constant 439 : index
    %644 = vector.load %arg13[%c0_458, %c439] : memref<8x1024xf32, #tpu.memory_space<vmem>>, vector<8x512xf32>
    %645 = arith.mulf %643, %644 : vector<8x512xf32>
    %646 = arith.addf %641, %645 : vector<8x512xf32>
    %c74 = arith.constant 74 : index
    %c0_459 = arith.constant 0 : index
    %c0_460 = arith.constant 0 : index
    %647 = vector.load %arg6[%c74, %c0_459, %c0_460] : memref<81x8x512xf32, #tpu.memory_space<vmem>>, vector<1x8x512xf32>
    %648 = vector.shape_cast %647 : vector<1x8x512xf32> to vector<8x512xf32>
    %c0_461 = arith.constant 0 : index
    %c442 = arith.constant 442 : index
    %649 = vector.load %arg13[%c0_461, %c442] : memref<8x1024xf32, #tpu.memory_space<vmem>>, vector<8x512xf32>
    %650 = arith.mulf %648, %649 : vector<8x512xf32>
    %651 = arith.addf %646, %650 : vector<8x512xf32>
    %c75 = arith.constant 75 : index
    %c0_462 = arith.constant 0 : index
    %c0_463 = arith.constant 0 : index
    %652 = vector.load %arg6[%c75, %c0_462, %c0_463] : memref<81x8x512xf32, #tpu.memory_space<vmem>>, vector<1x8x512xf32>
    %653 = vector.shape_cast %652 : vector<1x8x512xf32> to vector<8x512xf32>
    %c0_464 = arith.constant 0 : index
    %c445 = arith.constant 445 : index
    %654 = vector.load %arg13[%c0_464, %c445] : memref<8x1024xf32, #tpu.memory_space<vmem>>, vector<8x512xf32>
    %655 = arith.mulf %653, %654 : vector<8x512xf32>
    %656 = arith.addf %651, %655 : vector<8x512xf32>
    %c76_465 = arith.constant 76 : index
    %c0_466 = arith.constant 0 : index
    %c0_467 = arith.constant 0 : index
    %657 = vector.load %arg6[%c76_465, %c0_466, %c0_467] : memref<81x8x512xf32, #tpu.memory_space<vmem>>, vector<1x8x512xf32>
    %658 = vector.shape_cast %657 : vector<1x8x512xf32> to vector<8x512xf32>
    %c0_468 = arith.constant 0 : index
    %c448 = arith.constant 448 : index
    %659 = vector.load %arg13[%c0_468, %c448] : memref<8x1024xf32, #tpu.memory_space<vmem>>, vector<8x512xf32>
    %660 = arith.mulf %658, %659 : vector<8x512xf32>
    %661 = arith.addf %656, %660 : vector<8x512xf32>
    %c77 = arith.constant 77 : index
    %c0_469 = arith.constant 0 : index
    %c0_470 = arith.constant 0 : index
    %662 = vector.load %arg6[%c77, %c0_469, %c0_470] : memref<81x8x512xf32, #tpu.memory_space<vmem>>, vector<1x8x512xf32>
    %663 = vector.shape_cast %662 : vector<1x8x512xf32> to vector<8x512xf32>
    %c0_471 = arith.constant 0 : index
    %c451 = arith.constant 451 : index
    %664 = vector.load %arg13[%c0_471, %c451] : memref<8x1024xf32, #tpu.memory_space<vmem>>, vector<8x512xf32>
    %665 = arith.mulf %663, %664 : vector<8x512xf32>
    %666 = arith.addf %661, %665 : vector<8x512xf32>
    %c78 = arith.constant 78 : index
    %c0_472 = arith.constant 0 : index
    %c0_473 = arith.constant 0 : index
    %667 = vector.load %arg6[%c78, %c0_472, %c0_473] : memref<81x8x512xf32, #tpu.memory_space<vmem>>, vector<1x8x512xf32>
    %668 = vector.shape_cast %667 : vector<1x8x512xf32> to vector<8x512xf32>
    %c0_474 = arith.constant 0 : index
    %c454 = arith.constant 454 : index
    %669 = vector.load %arg13[%c0_474, %c454] : memref<8x1024xf32, #tpu.memory_space<vmem>>, vector<8x512xf32>
    %670 = arith.mulf %668, %669 : vector<8x512xf32>
    %671 = arith.addf %666, %670 : vector<8x512xf32>
    %c79 = arith.constant 79 : index
    %c0_475 = arith.constant 0 : index
    %c0_476 = arith.constant 0 : index
    %672 = vector.load %arg6[%c79, %c0_475, %c0_476] : memref<81x8x512xf32, #tpu.memory_space<vmem>>, vector<1x8x512xf32>
    %673 = vector.shape_cast %672 : vector<1x8x512xf32> to vector<8x512xf32>
    %c0_477 = arith.constant 0 : index
    %c457 = arith.constant 457 : index
    %674 = vector.load %arg13[%c0_477, %c457] : memref<8x1024xf32, #tpu.memory_space<vmem>>, vector<8x512xf32>
    %675 = arith.mulf %673, %674 : vector<8x512xf32>
    %676 = arith.addf %671, %675 : vector<8x512xf32>
    %c80 = arith.constant 80 : index
    %c0_478 = arith.constant 0 : index
    %c0_479 = arith.constant 0 : index
    %677 = vector.load %arg6[%c80, %c0_478, %c0_479] : memref<81x8x512xf32, #tpu.memory_space<vmem>>, vector<1x8x512xf32>
    %678 = vector.shape_cast %677 : vector<1x8x512xf32> to vector<8x512xf32>
    %c0_480 = arith.constant 0 : index
    %c460 = arith.constant 460 : index
    %679 = vector.load %arg13[%c0_480, %c460] : memref<8x1024xf32, #tpu.memory_space<vmem>>, vector<8x512xf32>
    %680 = arith.mulf %678, %679 : vector<8x512xf32>
    %681 = arith.addf %676, %680 : vector<8x512xf32>
    %c0_481 = arith.constant 0 : index
    %c0_482 = arith.constant 0 : index
    %682 = vector.load %arg8[%c0_481, %c0_482] : memref<8x8xf32, #tpu.memory_space<vmem>>, vector<8x8xf32>
    %cst_483 = arith.constant dense<0.000000e+00> : vector<8x512xf32>
    %683 = tpu.matmul %682, %681, %cst_483 {dimension_numbers = #tpu.dot_dimension_numbers<[1], [0], [0], [1], [0, 0, 1, 1], [], []>} : vector<8x8xf32>, vector<8x512xf32>, vector<8x512xf32> -> vector<8x512xf32>
    %c0_484 = arith.constant 0 : index
    %c0_485 = arith.constant 0 : index
    %684 = vector.load %arg9[%c0_484, %c0_485] : memref<8x1xf32, #tpu.memory_space<vmem>>, vector<8x1xf32>
    %685 = vector.broadcast %684 : vector<8x1xf32> to vector<8x512xf32>
    %686 = arith.addf %683, %685 : vector<8x512xf32>
    %687 = arith.mulf %18, %686 : vector<8x512xf32>
    %c0_486 = arith.constant 0 : index
    %c0_487 = arith.constant 0 : index
    %688 = vector.load %arg10[%c0_486, %c0_487] : memref<8x8xf32, #tpu.memory_space<vmem>>, vector<8x8xf32>
    %cst_488 = arith.constant dense<0.000000e+00> : vector<8x512xf32>
    %689 = tpu.matmul %688, %687, %cst_488 {dimension_numbers = #tpu.dot_dimension_numbers<[1], [0], [0], [1], [0, 0, 1, 1], [], []>} : vector<8x8xf32>, vector<8x512xf32>, vector<8x512xf32> -> vector<8x512xf32>
    %c0_489 = arith.constant 0 : index
    %c0_490 = arith.constant 0 : index
    %690 = vector.load %arg11[%c0_489, %c0_490] : memref<8x1xf32, #tpu.memory_space<vmem>>, vector<8x1xf32>
    %691 = vector.broadcast %690 : vector<8x1xf32> to vector<8x512xf32>
    %692 = arith.addf %689, %691 : vector<8x512xf32>
    %c0_491 = arith.constant 0 : index
    %c0_492 = arith.constant 0 : index
    %693 = vector.load %arg12[%c0_491, %c0_492] : memref<8x512xf32, #tpu.memory_space<vmem>>, vector<8x512xf32>
    tpu.vector_store %arg12[%c0_491, %c0_492], %692 {strides = array<i32>} : memref<8x512xf32, #tpu.memory_space<vmem>>, vector<8x512xf32>,
    return
  }
  func.func @transform_0(%arg0: i32) -> (i32, i32) {
    %c0_i32 = arith.constant 0 : i32
    %c0_i32_0 = arith.constant 0 : i32
    return %c0_i32, %arg0 : i32, i32
  }
  func.func @transform_1(%arg0: i32) -> (i32, i32) {
    %c0_i32 = arith.constant 0 : i32
    %c0_i32_0 = arith.constant 0 : i32
    %c0_i32_1 = arith.constant 0 : i32
    return %c0_i32, %c0_i32_0 : i32, i32
  }
  func.func @transform_2(%arg0: i32) -> (i32, i32) {
    %c0_i32 = arith.constant 0 : i32
    %c0_i32_0 = arith.constant 0 : i32
    %c0_i32_1 = arith.constant 0 : i32
    return %c0_i32, %c0_i32_0 : i32, i32
  }
  func.func @transform_3(%arg0: i32) -> (i32, i32, i32) {
    %c0_i32 = arith.constant 0 : i32
    %c0_i32_0 = arith.constant 0 : i32
    %c0_i32_1 = arith.constant 0 : i32
    %c0_i32_2 = arith.constant 0 : i32
    return %c0_i32, %c0_i32_0, %c0_i32_1 : i32, i32, i32
  }
  func.func @transform_4(%arg0: i32) -> (i32, i32) {
    %c0_i32 = arith.constant 0 : i32
    %c0_i32_0 = arith.constant 0 : i32
    %c0_i32_1 = arith.constant 0 : i32
    return %c0_i32, %c0_i32_0 : i32, i32
  }
  func.func @transform_5(%arg0: i32) -> (i32, i32, i32) {
    %c0_i32 = arith.constant 0 : i32
    %c0_i32_0 = arith.constant 0 : i32
    %c0_i32_1 = arith.constant 0 : i32
    %c0_i32_2 = arith.constant 0 : i32
    return %c0_i32, %c0_i32_0, %c0_i32_1 : i32, i32, i32
  }
  func.func @transform_6(%arg0: i32) -> (i32, i32) {
    %c0_i32 = arith.constant 0 : i32
    %c0_i32_0 = arith.constant 0 : i32
    %c0_i32_1 = arith.constant 0 : i32
    return %c0_i32, %c0_i32_0 : i32, i32
  }
  func.func @transform_7(%arg0: i32) -> (i32, i32) {
    %c0_i32 = arith.constant 0 : i32
    %c0_i32_0 = arith.constant 0 : i32
    %c0_i32_1 = arith.constant 0 : i32
    return %c0_i32, %c0_i32_0 : i32, i32
  }
  func.func @transform_8(%arg0: i32) -> (i32, i32) {
    %c0_i32 = arith.constant 0 : i32
    %c0_i32_0 = arith.constant 0 : i32
    %c0_i32_1 = arith.constant 0 : i32
    return %c0_i32, %c0_i32_0 : i32, i32
  }
  func.func @transform_9(%arg0: i32) -> (i32, i32) {
    %c0_i32 = arith.constant 0 : i32
    %c0_i32_0 = arith.constant 0 : i32
    %c0_i32_1 = arith.constant 0 : i32
    return %c0_i32, %c0_i32_0 : i32, i32
  }
  func.func @transform_10(%arg0: i32) -> (i32, i32) {
    %c0_i32 = arith.constant 0 : i32
    %c0_i32_0 = arith.constant 0 : i32
    %c0_i32_1 = arith.constant 0 : i32
    return %c0_i32, %c0_i32_0 : i32, i32
  }
  func.func @transform_11(%arg0: i32) -> (i32, i32) {
    %c0_i32 = arith.constant 0 : i32
    %c0_i32_0 = arith.constant 0 : i32
    return %c0_i32, %arg0 : i32, i32
  }
}

</mosaic_0001>

<bundles_post_ra>
// kernel: tpu_custom_call.1
= control target key start
LH: loop header
LB: loop body
LE: loop exit
PB: predicated region body
PF: predicated region fallthrough
CT: control target
= control target key end

     0   :  { %16 = vsyncpa [#allocation4], 0  ;;  %s8874_s0 = inlined_call_operand.hbm [shape: f32[8,512], index: 0, kind: input, shape index: {}]   ;;  %s8875_s1 = inlined_call_operand.hbm [shape: f32[8,8], index: 1, kind: input, shape index: {}]   ;;  %s8876_s2 = inlined_call_operand.vmem [shape: f32[8,1], index: 2, kind: input, shape index: {}]   ;;  %s8877_s3 = inlined_call_operand.hbm [shape: f32[49,8,512], index: 3, kind: input, shape index: {}]   ;;  %s8878_s4 = inlined_call_operand.vmem [shape: f32[8,1], index: 4, kind: input, shape index: {}]   ;;  %s8879_s5 = inlined_call_operand.hbm [shape: f32[81,8,512], index: 5, kind: input, shape index: {}]   ;;  %s8880_s6 = inlined_call_operand.vmem [shape: f32[8,1], index: 6, kind: input, shape index: {}]   ;;  %s8881_s7 = inlined_call_operand.hbm [shape: f32[8,8], index: 7, kind: input, shape index: {}]   ;;  %s8882_s8 = inlined_call_operand.vmem [shape: f32[8,1], index: 8, kind: input, shape index: {}]   ;;  %s8883_s9 = inlined_call_operand.hbm [shape: f32[8,8], index: 9, kind: input, shape index: {}]   ;;  %s8884_s10 = inlined_call_operand.vmem [shape: f32[8,1], index: 10, kind: input, shape index: {}]   ;;  %s8885_s11 = inlined_call_operand.hbm [shape: f32[8,512], index: 11, kind: output, shape index: {}]  }
   0x1   :  { %17 = vsyncpa [#allocation7], 0 }
   0x2   :  { %18 = vsyncpa [#allocation10], 0 }
   0x3   :  { %19 = vsyncpa [#allocation13], 0 }
   0x4   :  { %20 = vsyncpa [#allocation5], 0  ;;  %s5299_s17 = smov [#allocation6]  }
   0x5   :  { %s37_s18 = sshll.u32 %s5299_s17, 4  ;;  %s38_s18 = int_to_ptr.vmem [resolvable:$true] %s37_s18 }
   0x6   :  { %s5157_s19 = scalar_lea.vmem %s38_s18, 128  ;;  %p5162_p1 = scmp.lt.s32.totalorder %s38_s18, %s38_s18 }
   0x7   :  { %p5158_p0 = scmp.ne.s32.totalorder %s38_s18, %s5157_s19  ;;  %p5163_p2 = scmp.lt.s32.totalorder %s5157_s19, %s5157_s19 }
   0x9   :  { %p5164_p3 = por %p5163_p2, %p5162_p1 }
   0xb   :  { %p5165_p4 = pnand %p5164_p3, %p5158_p0 }
   0xd   :  { %5168 = shalt.err (!%p5165_p4)
}
   0xe   :  { %40 = dma.hbm_to_vmem [thread:$0]  %s8875_s1, 128, %s38_s18, [#allocation7]  }
   0xf   :  { %s5300_s22 = smov [#allocation9]   ;;  %s5301_s24 = smov [#allocation3]  }
  0x10   :  { %s62_s23 = sshll.u32 %s5300_s22, 4  ;;  %s27_s25 = sshll.u32 %s5301_s24, 4  ;;  %s63_s23 = int_to_ptr.vmem [resolvable:$true] %s62_s23  ;;  %s28_s25 = int_to_ptr.vmem [resolvable:$true] %s27_s25 }
  0x11   :  { %s5177_s26 = scalar_lea.vmem %s63_s23, 41472  ;;  %p5182_p6 = scmp.lt.s32.totalorder %s63_s23, %s63_s23 }
  0x12   :  { %p5178_p5 = scmp.ne.s32.totalorder %s63_s23, %s5177_s26  ;;  %p5183_p7 = scmp.lt.s32.totalorder %s5177_s26, %s5177_s26 }
  0x14   :  { %p5184_p8 = por %p5183_p7, %p5182_p6 }
  0x16   :  { %p5185_p9 = pnand %p5184_p8, %p5178_p5 }
  0x18   :  { %5188 = shalt.err (!%p5185_p9)
}
  0x19   :  { %s5302_s27 = smov 512   ;;  %s5303_s28 = smov 32  }
  0x1a   :  { %68 = dma.hbm_to_vmem [thread:$0]  %s8879_s5, 41472, %s63_s23, [#allocation10], %s5302_s27, %s5302_s27, %s5303_s28  }
  0x1b   :  { %s5197_s1 = scalar_lea.vmem %s28_s25, 512  ;;  %p5202_p11 = scmp.lt.s32.totalorder %s28_s25, %s28_s25 }
  0x1c   :  { %p5198_p10 = scmp.ne.s32.totalorder %s28_s25, %s5197_s1  ;;  %p5203_p12 = scmp.lt.s32.totalorder %s5197_s1, %s5197_s1 }
  0x1e   :  { %p5204_p13 = por %p5203_p12, %p5202_p11 }
  0x20   :  { %p5205_p0 = pnand %p5204_p13, %p5198_p10 }
  0x22   :  { %5208 = shalt.err (!%p5205_p0)
}
  0x23   :  { %30 = dma.hbm_to_vmem [thread:$0]  %s8874_s0, 512, %s28_s25, [#allocation4]  }
  0x24   :  { %s5304_s14 = smov [#allocation8]   ;;  %s5305_s16 = smov [#allocation11]  }
  0x25   :  { %s48_s15 = sshll.u32 %s5304_s14, 4  ;;  %s77_s17 = sshll.u32 %s5305_s16, 4  ;;  %s49_s15 = int_to_ptr.vmem [resolvable:$true] %s48_s15  ;;  %s78_s17 = int_to_ptr.vmem [resolvable:$true] %s77_s17 }
  0x26   :  { %s5217_s18 = scalar_lea.vmem %s49_s15, 25088  ;;  %p5222_p2 = scmp.lt.s32.totalorder %s49_s15, %s49_s15 }
  0x27   :  { %p5218_p1 = scmp.ne.s32.totalorder %s49_s15, %s5217_s18  ;;  %p5223_p3 = scmp.lt.s32.totalorder %s5217_s18, %s5217_s18 }
  0x29   :  { %p5224_p4 = por %p5223_p3, %p5222_p2 }
  0x2b   :  { %p5225_p5 = pnand %p5224_p4, %p5218_p1 }
  0x2d   :  { %5228 = shalt.err (!%p5225_p5)
}
  0x2e   :  { %54 = dma.hbm_to_vmem [thread:$0]  %s8877_s3, 25088, %s49_s15, [#allocation7], %s5302_s27, %s5302_s27, %s5303_s28  }
  0x2f   :  { %s5237_s20 = scalar_lea.vmem %s78_s17, 128  ;;  %p5242_p7 = scmp.lt.s32.totalorder %s78_s17, %s78_s17 }
  0x30   :  { %p5238_p6 = scmp.ne.s32.totalorder %s78_s17, %s5237_s20  ;;  %p5243_p8 = scmp.lt.s32.totalorder %s5237_s20, %s5237_s20 }
  0x32   :  { %p5244_p9 = por %p5243_p8, %p5242_p7 }
  0x34   :  { %p5245_p10 = pnand %p5244_p9, %p5238_p6 }
  0x36   :  { %5248 = shalt.err (!%p5245_p10)
}
  0x37   :  { %80 = dma.hbm_to_vmem [thread:$0]  %s8881_s7, 128, %s78_s17, [#allocation10]  }
  0x38   :  { %s5306_s22 = smov [#allocation12]  }
  0x39   :  { %s89_s23 = sshll.u32 %s5306_s22, 4  ;;  %s90_s23 = int_to_ptr.vmem [resolvable:$true] %s89_s23 }
  0x3a   :  { %s5257_s24 = scalar_lea.vmem %s90_s23, 128  ;;  %p5262_p12 = scmp.lt.s32.totalorder %s90_s23, %s90_s23 }
  0x3b   :  { %p5258_p11 = scmp.ne.s32.totalorder %s90_s23, %s5257_s24  ;;  %p5263_p13 = scmp.lt.s32.totalorder %s5257_s24, %s5257_s24 }
  0x3d   :  { %p5264_p0 = por %p5263_p13, %p5262_p12 }
  0x3f   :  { %p5265_p1 = pnand %p5264_p0, %p5258_p11 }
  0x41   :  { %5268 = shalt.err (!%p5265_p1)
}
  0x42   :  { %92 = dma.hbm_to_vmem [thread:$0]  %s8883_s9, 128, %s90_s23, [#allocation13]  }
  0x43   :  { %5289 = dma.done.wait [#allocation4], 512  }
  0x44   :  { %5290 = vsyncadd [#allocation4], 4294966784 }
  0x45   :  { %5291 = dma.done.wait [#allocation7], 25216  }
  0x46   :  { %5292 = vsyncadd [#allocation7], 4294942080 }
  0x47   :  { %5293 = dma.done.wait [#allocation10], 41600  }
  0x48   :  { %5294 = vsyncadd [#allocation10], 4294925696 }
  0x49   :  { %5295 = dma.done.wait [#allocation13], 128  }
  0x4a   :  { %5296 = vsyncadd [#allocation13], 4294967168  ;;  %v8886_v0 = vmov 0.0   ;;  %s5308_s7 = smov 49   ;;  %v5309_v1 = vmov 0   ;;  %s5310_s9 = smov 51  }
  0x4b   :  { %192 = vmatprep.mubr.f32.mxu0 %v8886_v0  ;;  %263 = vmatprep.mubr.f32.mxu1 %v8886_v0  ;;  %v114_v2 = vld [vmem:[#allocation3 + $0x8] sm:$0xff]  ;;  %v116_v3 = vld [vmem:[#allocation3 + $0x18] sm:$0xff]  ;;  %v113_v4 = vld [vmem:[#allocation3] sm:$0xff]  ;;  %vm8921_vm0 = vcmask 64512   ;;  %s5311_s26 = smov 50   ;;  %s5312_s30 = smov 48  }
  0x4c   :  { %399 = vrot.lane.b32.xlu0 %v8886_v0, %s5308_s7  ;;  %5140 = vset.pattern.permute.xlu1 %v5309_v1  ;;  %v115_v5 = vld [vmem:[#allocation3 + $0x10] sm:$0xff]  ;;  %v117_v6 = vld [vmem:[#allocation6] sm:$0xff]  ;;  %s5314_s13 = smov 47   ;;  %s5315_s14 = smov 35   ;;  %vm345_vm1 = vcmask 416768   ;;  %vm377_vm2 = vcmask 408576  }
  0x4d   :  { %4914 = vset.pattern.permute.xlu0 %v5309_v1  ;;  %4905 = vrot.lane.b32.xlu1 %v8886_v0, %s5310_s9  ;;  %v118_v7 = vld [vmem:[%s8876_s2] sm:$0xff]  ;;  %s5313_s2 = smov 46   ;;  %s5316_s15 = smov 45   ;;  %vm9007_vm3 = vcmask 392192   ;;  %vm409_vm4 = vcmask 400384   ;;  %vm505_vm5 = vcmask 375808  }
  0x4e   :  { %158 = vmatprep.subr.mxu0 %v114_v2  ;;  %229 = vmatprep.subr.mxu1 %v116_v3  ;;  %v314_v8 = vld [vmem:[%s8878_s4] sm:$0xff]  ;;  %s5317_s4 = smov 33   ;;  %s5318_s16 = smov 34   ;;  %vm473_vm6 = vcmask 384000   ;;  %vm8990_vm7 = vcmask 285696   ;;  %vm8996_vm8 = vcmask 367616  }
  0x4f   :  { %159 = vmatpush1.msra.mxu0 %v113_v4  ;;  %230 = vmatpush1.msra.mxu1 %v115_v5  ;;  %s5319_s17 = smov 31   ;;  %s5320_s18 = smov 29   ;;  %vm633_vm9 = vcmask 269312   ;;  %vm601_vm10 = vcmask 277504   ;;  %vm697_vm11 = vcmask 252928   ;;  %vm8989_vm12 = vcmask 261120  }
  0x50   :  { %4789 = vmatmul.mubr.msk.f32.vlgmr.msra.gmra.mxu0 %vm8921_vm0, %v117_v6  ;;  %4790 = vmatmul.mubr.msk.f32.vlgmr.msra.gmra.mxu1 %vm8921_vm0, %v117_v6  ;;  %s5321_s5 = smov 30   ;;  %s5322_s19 = smov 18   ;;  %vm8926_vm13 = vcmask 236544   ;;  %vm8928_vm14 = vcmask 244736   ;;  %vm8927_vm15 = vcmask 146432   ;;  %vm8925_vm0 = vcmask 154624  }
  0x51   :  { %367 = vrot.lane.b32.xlu1 %v8886_v0, %s5311_s26  ;;  %121 = vperm.xlu0 %4914, %v118_v7   ;;  %s5323_s20 = smov 19   ;;  %s5324_s0 = smov 16  }
  0x52   :  { %4533 = vmatprep.mubr.f32.mxu0 %v8886_v0  ;;  %4604 = vmatprep.mubr.f32.mxu1 %v8886_v0  ;;  %s5325_s21 = smov 17   ;;  %s5326_s22 = smov 14  }
  0x53   :  { %s5327_s23 = smov 15   ;;  %s5328_s24 = smov 3  }
  0x54   :  { %s5329_s3 = smov 13   ;;  %s5330_s25 = smov 1  }
  0x55   :  { %4910 = vrot.lane.b32.xlu1 %v8886_v0, %s5312_s30  ;;  %317 = vperm.xlu0 %4914, %v314_v8   ;;  %s5331_s27 = smov 2   ;;  %s5334_s29 = smov 125  }
  0x56   :  { %s5335_s1 = smov 115   ;;  %s5336_s12 = smov 114  }
  0x59   :  { %495 = vrot.lane.b32.xlu1 %v8886_v0, %s5313_s2  ;;  %463 = vrot.lane.b32.xlu0 %v8886_v0, %s5314_s13 }
  0x5d   :  { %559 = vrot.lane.b32.xlu1 %v8886_v0, %s5315_s14  ;;  %4916 = vrot.lane.b32.xlu0 %v8886_v0, %s5316_s15 }
  0x61   :  { %623 = vrot.lane.b32.xlu1 %v8886_v0, %s5317_s4  ;;  %591 = vrot.lane.b32.xlu0 %v8886_v0, %s5318_s16 }
  0x65   :  { %655 = vrot.lane.b32.xlu0 %v8886_v0, %s5303_s28  ;;  %687 = vrot.lane.b32.xlu1 %v8886_v0, %s5319_s17 }
  0x69   :  { %751 = vrot.lane.b32.xlu1 %v8886_v0, %s5320_s18  ;;  %719 = vrot.lane.b32.xlu0 %v8886_v0, %s5321_s5 }
  0x6d   :  { %815 = vrot.lane.b32.xlu1 %v8886_v0, %s5322_s19  ;;  %4921 = vrot.lane.b32.xlu0 %v8886_v0, %s5323_s20 }
  0x71   :  { %4926 = vrot.lane.b32.xlu1 %v8886_v0, %s5324_s0  ;;  %847 = vrot.lane.b32.xlu0 %v8886_v0, %s5325_s21 }
  0x75   :  { %943 = vrot.lane.b32.xlu1 %v8886_v0, %s5326_s22  ;;  %911 = vrot.lane.b32.xlu0 %v8886_v0, %s5327_s23 }
  0x79   :  { %4936 = vrot.lane.b32.xlu1 %v8886_v0, %s5328_s24  ;;  %4931 = vrot.lane.b32.xlu0 %v8886_v0, %s5329_s3 }
  0x7d   :  { %1071 = vrot.lane.b32.xlu1 %v8886_v0, %s5330_s25  ;;  %1039 = vrot.lane.b32.xlu0 %v8886_v0, %s5331_s27 }
  0xbe   :  { %v5548_v9 = vpop.permute.xlu0 %399 }
  0xbf   :  { %v5594_v33 = vpop.permute.xlu1 %4905 }
  0xc0   :  { %9144 = vst [vmem:[#allocation22_spill] sm:$0xff] %v5594_v33 }
  0xc3   :  { %v5600_v36 = vpop.permute.xlu1 %367 }
  0xc7   :  { %v5610_v40 = vpop.permute.xlu1 %4910 }
  0xc8   :  { %9145 = vst [vmem:[#allocation23_spill] sm:$0xff] %v5610_v40 }
  0xcb   :  { %v5618_v46 = vpop.permute.xlu1 %495 }
  0xcc   :  { %v122_v10 = vpop.permute.xlu0 %121  ;;  %9146 = vst [vmem:[#allocation24_spill] sm:$0xff] %v5618_v46 }
  0xcf   :  { %v5630_v50 = vpop.permute.xlu1 %559 }
  0xd0   :  { %v5612_v41 = vpop.permute.xlu0 %317  ;;  %9147 = vst [vmem:[#allocation25_spill] sm:$0xff] %v5630_v50  ;;  %v366_v50 = vld [vmem:[#allocation8 + $0x38] sm:$0xff] }
  0xd3   :  { %v5638_v55 = vpop.permute.xlu1 %623 }
  0xd4   :  { %v5620_v47 = vpop.permute.xlu0 %463  ;;  %9149 = vst [vmem:[#allocation27_spill] sm:$0xff] %v5638_v55 }
  0xd7   :  { %v5650_v57 = vpop.permute.xlu1 %687 }
  0xd8   :  { %v5632_v51 = vpop.permute.xlu0 %4916  ;;  %9151 = vst [vmem:[#allocation29_spill] sm:$0xff] %v5650_v57 }
  0xd9   :  { %9148 = vst [vmem:[#allocation26_spill] sm:$0xff] %v5632_v51 }
  0xdb   :  { %v5658_v59 = vpop.permute.xlu1 %751 }
  0xdc   :  { %v5640_v56 = vpop.permute.xlu0 %591  ;;  %9153 = vst [vmem:[#allocation31_spill] sm:$0xff] %v5658_v59 }
  0xdd   :  { %9150 = vst [vmem:[#allocation28_spill] sm:$0xff] %v5640_v56 }
  0xdf   :  { %v5670_v2 = vpop.permute.xlu1 %815 }
  0xe0   :  { %v5652_v58 = vpop.permute.xlu0 %655  ;;  %9155 = vst [vmem:[#allocation33_spill] sm:$0xff] %v5670_v2 }
  0xe1   :  { %9152 = vst [vmem:[#allocation30_spill] sm:$0xff] %v5652_v58 }
  0xe3   :  { %v5682_v8 = vpop.permute.xlu1 %4926 }
  0xe4   :  { %v5660_v60 = vpop.permute.xlu0 %719  ;;  %9159 = vst [vmem:[#allocation37_spill] sm:$0xff] %v5682_v8  ;;  %v9185_v8 = vmov 0.0  }
  0xe5   :  { %9154 = vst [vmem:[#allocation32_spill] sm:$0xff] %v5660_v60 }
  0xe8   :  { %v5672_v3 = vpop.permute.xlu0 %4921 }
  0xe9   :  { %9156 = vst [vmem:[#allocation34_spill] sm:$0xff] %v5672_v3 }
 0x110   :  { %v194_v11 = vpop.f32.mrf.mxu0  ;;  %v265_v12 = vpop.f32.mrf.mxu1 }
 0x111   :  { %v195_v13 = vadd.f32 %v194_v11, %v122_v10  ;;  %v266_v14 = vadd.f32 %v265_v12, %v122_v10  ;;  %v5694_v11 = vpop.permute.xlu1 %943 }
 0x112   :  { %v196_v34 = vpop.f32.mrf.mxu0  ;;  %v267_v37 = vpop.f32.mrf.mxu1  ;;  %9161 = vst [vmem:[#allocation39_spill] sm:$0xff] %v5694_v11 }
 0x113   :  { %v274_v15 = vmul.f32 0.044715, %v195_v13  ;;  %v276_v16 = vmul.f32 0.044715, %v266_v14  ;;  %v270_v27 = vmul.f32 0.5, %v195_v13  ;;  %v272_v31 = vmul.f32 0.5, %v266_v14 }
 0x114   :  { %v197_v35 = vadd.f32 %v196_v34, %v122_v10  ;;  %v268_v39 = vadd.f32 %v267_v37, %v122_v10  ;;  %v5684_v10 = vpop.permute.xlu0 %847 }
 0x115   :  { %v278_v17 = vmul.f32 %v274_v15, %v195_v13  ;;  %v280_v18 = vmul.f32 %v276_v16, %v266_v14  ;;  %9160 = vst [vmem:[#allocation38_spill] sm:$0xff] %v5684_v10 }
 0x116   :  { %v275_v38 = vmul.f32 0.044715, %v197_v35  ;;  %v277_v43 = vmul.f32 0.044715, %v268_v39  ;;  %v271_v1 = vmul.f32 0.5, %v197_v35  ;;  %v273_v6 = vmul.f32 0.5, %v268_v39 }
 0x117   :  { %v282_v19 = vmul.f32 %v278_v17, %v195_v13  ;;  %v284_v20 = vmul.f32 %v280_v18, %v266_v14 }
 0x118   :  { %v279_v42 = vmul.f32 %v275_v38, %v197_v35  ;;  %v281_v45 = vmul.f32 %v277_v43, %v268_v39  ;;  %v5696_v12 = vpop.permute.xlu0 %911 }
 0x119   :  { %v286_v21 = vadd.f32 %v282_v19, %v195_v13  ;;  %v288_v22 = vadd.f32 %v284_v20, %v266_v14  ;;  %9162 = vst [vmem:[#allocation40_spill] sm:$0xff] %v5696_v12  ;;  %v5702_v13 = vpop.permute.xlu1 %4936 }
 0x11a   :  { %v283_v44 = vmul.f32 %v279_v42, %v197_v35  ;;  %v285_v49 = vmul.f32 %v281_v45, %v268_v39  ;;  %9163 = vst [vmem:[#allocation41_spill] sm:$0xff] %v5702_v13 }
 0x11b   :  { %v290_v23 = vmul.f32 0.7978846, %v286_v21  ;;  %v292_v24 = vmul.f32 0.7978846, %v288_v22 }
 0x11c   :  { %v287_v48 = vadd.f32 %v283_v44, %v197_v35  ;;  %v289_v53 = vadd.f32 %v285_v49, %v268_v39  ;;  %v5704_v14 = vpop.permute.xlu0 %4931 }
 0x11d   :  { %5141 = vtanh.f32 %v290_v23  ;;  %9164 = vst [vmem:[#allocation42_spill] sm:$0xff] %v5704_v14  ;;  %v5714_v15 = vpop.permute.xlu1 %1071 }
 0x11e   :  { %5143 = vtanh.f32 %v292_v24  ;;  %v291_v52 = vmul.f32 0.7978846, %v287_v48  ;;  %v293_v54 = vmul.f32 0.7978846, %v289_v53  ;;  %9165 = vst [vmem:[#allocation43_spill] sm:$0xff] %v5714_v15 }
 0x120   :  { %5145 = vtanh.f32 %v291_v52  ;;  %v5716_v16 = vpop.permute.xlu0 %1039 }
 0x121   :  { %5147 = vtanh.f32 %v293_v54  ;;  %9166 = vst [vmem:[#allocation44_spill] sm:$0xff] %v5716_v16 }
 0x12a   :  { %v5142_v25 = vpop.eup %5141 }
 0x12b   :  { %v5144_v26 = vpop.eup %5143  ;;  %v298_v28 = vadd.f32 1.0, %v5142_v25 }
 0x12c   :  { %v300_v30 = vadd.f32 1.0, %v5144_v26 }
 0x12d   :  { %v5550_v29 = vmul.f32 %v298_v28, %v270_v27  ;;  %v5146_v61 = vpop.eup %5145 }
 0x12e   :  { %v5556_v32 = vmul.f32 %v300_v30, %v272_v31  ;;  %v299_v62 = vadd.f32 1.0, %v5146_v61  ;;  %v5148_v63 = vpop.eup %5147 }
 0x12f   :  { %9142 = vst [vmem:[#allocation20_spill] sm:$0xff] %v5550_v29  ;;  %369 = vrot.lane.b32.xlu0 %v5550_v29, %s5311_s26  ;;  %337 = vrot.lane.b32.xlu1 %v5550_v29, %s5310_s9  ;;  %v301_v5 = vadd.f32 1.0, %v5148_v63 }
 0x130   :  { %9143 = vst [vmem:[#allocation21_spill] sm:$0xff] %v5556_v32  ;;  %v5674_v4 = vmul.f32 %v299_v62, %v271_v1 }
 0x131   :  { %v5680_v7 = vmul.f32 %v301_v5, %v273_v6 }
 0x132   :  { %9157 = vst [vmem:[#allocation35_spill] sm:$0xff] %v5674_v4 }
 0x133   :  { %373 = vrot.lane.b32.xlu0 %v5556_v32, %s5311_s26  ;;  %341 = vrot.lane.b32.xlu1 %v5556_v32, %s5310_s9  ;;  %9158 = vst [vmem:[#allocation36_spill] sm:$0xff] %v5680_v7 }
 0x137   :  { %433 = vrot.lane.b32.xlu0 %v5550_v29, %s5312_s30  ;;  %401 = vrot.lane.b32.xlu1 %v5550_v29, %s5308_s7 }
 0x13b   :  { %437 = vrot.lane.b32.xlu0 %v5556_v32, %s5312_s30  ;;  %405 = vrot.lane.b32.xlu1 %v5556_v32, %s5308_s7 }
 0x13f   :  { %497 = vrot.lane.b32.xlu0 %v5550_v29, %s5313_s2  ;;  %465 = vrot.lane.b32.xlu1 %v5550_v29, %s5314_s13 }
 0x143   :  { %501 = vrot.lane.b32.xlu0 %v5556_v32, %s5313_s2  ;;  %469 = vrot.lane.b32.xlu1 %v5556_v32, %s5314_s13 }
 0x147   :  { %561 = vrot.lane.b32.xlu0 %v5550_v29, %s5315_s14  ;;  %529 = vrot.lane.b32.xlu1 %v5550_v29, %s5316_s15 }
 0x14b   :  { %565 = vrot.lane.b32.xlu0 %v5556_v32, %s5315_s14  ;;  %533 = vrot.lane.b32.xlu1 %v5556_v32, %s5316_s15 }
 0x14f   :  { %625 = vrot.lane.b32.xlu0 %v5550_v29, %s5317_s4  ;;  %593 = vrot.lane.b32.xlu1 %v5550_v29, %s5318_s16 }
 0x153   :  { %629 = vrot.lane.b32.xlu0 %v5556_v32, %s5317_s4  ;;  %597 = vrot.lane.b32.xlu1 %v5556_v32, %s5318_s16 }
 0x157   :  { %689 = vrot.lane.b32.xlu0 %v5550_v29, %s5319_s17  ;;  %657 = vrot.lane.b32.xlu1 %v5550_v29, %s5303_s28 }
 0x15b   :  { %693 = vrot.lane.b32.xlu0 %v5556_v32, %s5319_s17  ;;  %661 = vrot.lane.b32.xlu1 %v5556_v32, %s5303_s28 }
 0x15f   :  { %753 = vrot.lane.b32.xlu0 %v5550_v29, %s5320_s18  ;;  %721 = vrot.lane.b32.xlu1 %v5550_v29, %s5321_s5 }
 0x163   :  { %757 = vrot.lane.b32.xlu0 %v5556_v32, %s5320_s18  ;;  %725 = vrot.lane.b32.xlu1 %v5556_v32, %s5321_s5 }
 0x167   :  { %817 = vrot.lane.b32.xlu0 %v5550_v29, %s5322_s19  ;;  %785 = vrot.lane.b32.xlu1 %v5550_v29, %s5323_s20 }
 0x16b   :  { %821 = vrot.lane.b32.xlu0 %v5556_v32, %s5322_s19  ;;  %789 = vrot.lane.b32.xlu1 %v5556_v32, %s5323_s20 }
 0x16f   :  { %881 = vrot.lane.b32.xlu0 %v5550_v29, %s5324_s0  ;;  %849 = vrot.lane.b32.xlu1 %v5550_v29, %s5325_s21 }
 0x173   :  { %885 = vrot.lane.b32.xlu0 %v5556_v32, %s5324_s0  ;;  %853 = vrot.lane.b32.xlu1 %v5556_v32, %s5325_s21 }
 0x177   :  { %945 = vrot.lane.b32.xlu0 %v5550_v29, %s5326_s22  ;;  %913 = vrot.lane.b32.xlu1 %v5550_v29, %s5327_s23 }
 0x17b   :  { %949 = vrot.lane.b32.xlu0 %v5556_v32, %s5326_s22  ;;  %917 = vrot.lane.b32.xlu1 %v5556_v32, %s5327_s23 }
 0x17f   :  { %1009 = vrot.lane.b32.xlu0 %v5550_v29, %s5328_s24  ;;  %977 = vrot.lane.b32.xlu1 %v5550_v29, %s5329_s3 }
 0x183   :  { %1013 = vrot.lane.b32.xlu0 %v5556_v32, %s5328_s24  ;;  %981 = vrot.lane.b32.xlu1 %v5556_v32, %s5329_s3 }
 0x187   :  { %339 = vrot.lane.b32.xlu0 %v5674_v4, %s5310_s9  ;;  %1041 = vrot.lane.b32.xlu1 %v5550_v29, %s5331_s27 }
 0x18b   :  { %343 = vrot.lane.b32.xlu0 %v5680_v7, %s5310_s9  ;;  %1045 = vrot.lane.b32.xlu1 %v5556_v32, %s5331_s27 }
 0x18f   :  { %403 = vrot.lane.b32.xlu0 %v5674_v4, %s5308_s7  ;;  %371 = vrot.lane.b32.xlu1 %v5674_v4, %s5311_s26 }
 0x193   :  { %407 = vrot.lane.b32.xlu0 %v5680_v7, %s5308_s7  ;;  %375 = vrot.lane.b32.xlu1 %v5680_v7, %s5311_s26  ;;  %s5332_s7 = smov 127   ;;  %s5333_s26 = smov 126  }
 0x197   :  { %467 = vrot.lane.b32.xlu0 %v5674_v4, %s5314_s13  ;;  %435 = vrot.lane.b32.xlu1 %v5674_v4, %s5312_s30 }
 0x19b   :  { %471 = vrot.lane.b32.xlu0 %v5680_v7, %s5314_s13  ;;  %439 = vrot.lane.b32.xlu1 %v5680_v7, %s5312_s30  ;;  %s5338_s13 = smov 112  }
 0x19f   :  { %531 = vrot.lane.b32.xlu0 %v5674_v4, %s5316_s15  ;;  %499 = vrot.lane.b32.xlu1 %v5674_v4, %s5313_s2 }
 0x1a1   :  { %v5722_v17 = vpop.permute.xlu0 %369  ;;  %v5724_v18 = vpop.permute.xlu1 %337 }
 0x1a3   :  { %535 = vrot.lane.b32.xlu0 %v5680_v7, %s5316_s15  ;;  %503 = vrot.lane.b32.xlu1 %v5680_v7, %s5313_s2  ;;  %s5337_s2 = smov 113  }
 0x1a5   :  { %v5730_v19 = vpop.permute.xlu0 %373  ;;  %v5732_v20 = vpop.permute.xlu1 %341 }
 0x1a7   :  { %595 = vrot.lane.b32.xlu0 %v5674_v4, %s5318_s16  ;;  %563 = vrot.lane.b32.xlu1 %v5674_v4, %s5315_s14 }
 0x1a9   :  { %v5738_v21 = vpop.permute.xlu0 %433  ;;  %v5740_v22 = vpop.permute.xlu1 %401 }
 0x1ab   :  { %599 = vrot.lane.b32.xlu0 %v5680_v7, %s5318_s16  ;;  %567 = vrot.lane.b32.xlu1 %v5680_v7, %s5315_s14  ;;  %s5340_s16 = smov 110  }
 0x1ad   :  { %v5746_v23 = vpop.permute.xlu0 %437  ;;  %v5748_v24 = vpop.permute.xlu1 %405 }
 0x1ae   :  { %9167 = vst [vmem:[#allocation45_spill] sm:$0xff] %v5748_v24 }
 0x1af   :  { %659 = vrot.lane.b32.xlu0 %v5674_v4, %s5303_s28  ;;  %627 = vrot.lane.b32.xlu1 %v5674_v4, %s5317_s4 }
 0x1b1   :  { %v5754_v25 = vpop.permute.xlu0 %497  ;;  %v5756_v26 = vpop.permute.xlu1 %465 }
 0x1b2   :  { %9168 = vst [vmem:[#allocation46_spill] sm:$0xff] %v5754_v25 }
 0x1b3   :  { %663 = vrot.lane.b32.xlu0 %v5680_v7, %s5303_s28  ;;  %631 = vrot.lane.b32.xlu1 %v5680_v7, %s5317_s4  ;;  %s5339_s4 = smov 111  }
 0x1b5   :  { %v5762_v27 = vpop.permute.xlu0 %501  ;;  %v5764_v28 = vpop.permute.xlu1 %469 }
 0x1b7   :  { %723 = vrot.lane.b32.xlu0 %v5674_v4, %s5321_s5  ;;  %691 = vrot.lane.b32.xlu1 %v5674_v4, %s5319_s17 }
 0x1b9   :  { %v5770_v30 = vpop.permute.xlu0 %561  ;;  %v5772_v31 = vpop.permute.xlu1 %529 }
 0x1ba   :  { %9169 = vst [vmem:[#allocation47_spill] sm:$0xff] %v5770_v30  ;;  %9170 = vst [vmem:[#allocation48_spill] sm:$0xff] %v5772_v31  ;;  %v398_v31 = vld [vmem:[#allocation8 + $0x58] sm:$0xff] }
 0x1bb   :  { %727 = vrot.lane.b32.xlu0 %v5680_v7, %s5321_s5  ;;  %695 = vrot.lane.b32.xlu1 %v5680_v7, %s5319_s17  ;;  %s5341_s17 = smov 109   ;;  %s5342_s5 = smov 99  }
 0x1bd   :  { %v5778_v34 = vpop.permute.xlu0 %565  ;;  %v5780_v35 = vpop.permute.xlu1 %533 }
 0x1bf   :  { %787 = vrot.lane.b32.xlu0 %v5674_v4, %s5323_s20  ;;  %755 = vrot.lane.b32.xlu1 %v5674_v4, %s5320_s18 }
 0x1c1   :  { %v5786_v37 = vpop.permute.xlu0 %625  ;;  %v5788_v38 = vpop.permute.xlu1 %593 }
 0x1c2   :  { %9171 = vst [vmem:[#allocation49_spill] sm:$0xff] %v5786_v37  ;;  %9172 = vst [vmem:[#allocation50_spill] sm:$0xff] %v5788_v38  ;;  %v324_v37 = vld [vmem:[#allocation8 + $0x18] sm:$0xff] }
 0x1c3   :  { %791 = vrot.lane.b32.xlu0 %v5680_v7, %s5323_s20  ;;  %759 = vrot.lane.b32.xlu1 %v5680_v7, %s5320_s18 }
 0x1c5   :  { %v5794_v39 = vpop.permute.xlu0 %629  ;;  %v5796_v42 = vpop.permute.xlu1 %597 }
 0x1c7   :  { %851 = vrot.lane.b32.xlu0 %v5674_v4, %s5325_s21  ;;  %819 = vrot.lane.b32.xlu1 %v5674_v4, %s5322_s19 }
 0x1c9   :  { %v5802_v43 = vpop.permute.xlu0 %689  ;;  %v5804_v44 = vpop.permute.xlu1 %657 }
 0x1ca   :  { %9173 = vst [vmem:[#allocation51_spill] sm:$0xff] %v5802_v43  ;;  %9174 = vst [vmem:[#allocation52_spill] sm:$0xff] %v5804_v44 }
 0x1cb   :  { %855 = vrot.lane.b32.xlu0 %v5680_v7, %s5325_s21  ;;  %823 = vrot.lane.b32.xlu1 %v5680_v7, %s5322_s19  ;;  %s5343_s19 = smov 98   ;;  %s5344_s21 = smov 97  }
 0x1cd   :  { %v5810_v45 = vpop.permute.xlu0 %693  ;;  %v5812_v48 = vpop.permute.xlu1 %661 }
 0x1cf   :  { %915 = vrot.lane.b32.xlu0 %v5674_v4, %s5327_s23  ;;  %883 = vrot.lane.b32.xlu1 %v5674_v4, %s5324_s0 }
 0x1d1   :  { %v5818_v49 = vpop.permute.xlu0 %753  ;;  %v5820_v52 = vpop.permute.xlu1 %721 }
 0x1d2   :  { %9175 = vst [vmem:[#allocation53_spill] sm:$0xff] %v5818_v49  ;;  %9176 = vst [vmem:[#allocation54_spill] sm:$0xff] %v5820_v52 }
 0x1d3   :  { %919 = vrot.lane.b32.xlu0 %v5680_v7, %s5327_s23  ;;  %887 = vrot.lane.b32.xlu1 %v5680_v7, %s5324_s0  ;;  %s5346_s23 = smov 95  }
 0x1d5   :  { %v5826_v53 = vpop.permute.xlu0 %757  ;;  %v5828_v54 = vpop.permute.xlu1 %725 }
 0x1d7   :  { %979 = vrot.lane.b32.xlu0 %v5674_v4, %s5329_s3  ;;  %947 = vrot.lane.b32.xlu1 %v5674_v4, %s5326_s22 }
 0x1d9   :  { %v5834_v61 = vpop.permute.xlu0 %817  ;;  %v5836_v62 = vpop.permute.xlu1 %785 }
 0x1da   :  { %9177 = vst [vmem:[#allocation55_spill] sm:$0xff] %v5834_v61  ;;  %9178 = vst [vmem:[#allocation56_spill] sm:$0xff] %v5836_v62 }
 0x1db   :  { %983 = vrot.lane.b32.xlu0 %v5680_v7, %s5329_s3  ;;  %951 = vrot.lane.b32.xlu1 %v5680_v7, %s5326_s22  ;;  %s5345_s22 = smov 96  }
 0x1dd   :  { %v5842_v63 = vpop.permute.xlu0 %821  ;;  %v5844_v1 = vpop.permute.xlu1 %789 }
 0x1df   :  { %1043 = vrot.lane.b32.xlu0 %v5674_v4, %s5331_s27  ;;  %1011 = vrot.lane.b32.xlu1 %v5674_v4, %s5328_s24 }
 0x1e1   :  { %v5850_v5 = vpop.permute.xlu0 %881  ;;  %v5852_v6 = vpop.permute.xlu1 %849 }
 0x1e2   :  { %9179 = vst [vmem:[#allocation57_spill] sm:$0xff] %v5850_v5  ;;  %9180 = vst [vmem:[#allocation58_spill] sm:$0xff] %v5852_v6 }
 0x1e3   :  { %1047 = vrot.lane.b32.xlu0 %v5680_v7, %s5331_s27  ;;  %1015 = vrot.lane.b32.xlu1 %v5680_v7, %s5328_s24  ;;  %s5348_s27 = smov 93  }
 0x1e5   :  { %v5858_v0 = vpop.permute.xlu0 %885  ;;  %v5860_v15 = vpop.permute.xlu1 %853 }
 0x1e7   :  { %1073 = vrot.lane.b32.xlu0 %v5550_v29, %s5330_s25  ;;  %1075 = vrot.lane.b32.xlu1 %v5674_v4, %s5330_s25 }
 0x1e9   :  { %v5866_v16 = vpop.permute.xlu0 %945  ;;  %v5868_v13 = vpop.permute.xlu1 %913 }
 0x1ea   :  { %9181 = vst [vmem:[#allocation59_spill] sm:$0xff] %v5866_v16  ;;  %9182 = vst [vmem:[#allocation60_spill] sm:$0xff] %v5868_v13 }
 0x1eb   :  { %1077 = vrot.lane.b32.xlu0 %v5556_v32, %s5330_s25  ;;  %1079 = vrot.lane.b32.xlu1 %v5680_v7, %s5330_s25  ;;  %s5347_s25 = smov 94  }
 0x1ed   :  { %v5874_v11 = vpop.permute.xlu0 %949  ;;  %v5876_v14 = vpop.permute.xlu1 %917 }
 0x1ef   :  { %1118 = vrot.lane.b32.xlu0 %v5550_v29, %s5332_s7  ;;  %1120 = vrot.lane.b32.xlu1 %v5674_v4, %s5332_s7 }
 0x1f1   :  { %v5880_v12 = vpop.permute.xlu0 %1009  ;;  %v5882_v16 = vpop.permute.xlu1 %977 }
 0x1f2   :  { %9183 = vst [vmem:[#allocation61_spill] sm:$0xff] %v5880_v12  ;;  %9184 = vst [vmem:[#allocation62_spill] sm:$0xff] %v5882_v16 }
 0x1f3   :  { %1122 = vrot.lane.b32.xlu0 %v5556_v32, %s5332_s7  ;;  %1124 = vrot.lane.b32.xlu1 %v5680_v7, %s5332_s7 }
 0x1f5   :  { %v5886_v13 = vpop.permute.xlu0 %1013  ;;  %v5888_v5 = vpop.permute.xlu1 %981 }
 0x1f7   :  { %1126 = vrot.lane.b32.xlu0 %v9185_v8, %s5332_s7  ;;  %1150 = vrot.lane.b32.xlu1 %v5550_v29, %s5333_s26  ;;  %s5349_s7 = smov 83  }
 0x1f9   :  { %v5892_v10 = vpop.permute.xlu0 %339  ;;  %v5894_v6 = vpop.permute.xlu1 %1041 }
 0x1fa   :  { %9186 = vst [vmem:[#allocation63_spill] sm:$0xff] %v5894_v6 }
 0x1fb   :  { %1152 = vrot.lane.b32.xlu0 %v5674_v4, %s5333_s26  ;;  %1154 = vrot.lane.b32.xlu1 %v5556_v32, %s5333_s26 }
 0x1fd   :  { %v344_v12 = vpop.permute.xlu0 %343  ;;  %v5898_v16 = vpop.permute.xlu1 %1045 }
 0x1fe   :  { %9187 = vst [vmem:[#allocation64_spill] sm:$0xff] %v5898_v16 }
 0x1ff   :  { %1156 = vrot.lane.b32.xlu0 %v5680_v7, %s5333_s26  ;;  %1158 = vrot.lane.b32.xlu1 %v9185_v8, %s5333_s26  ;;  %s5350_s26 = smov 82  }
 0x201   :  { %v5902_v2 = vpop.permute.xlu0 %403  ;;  %v5904_v61 = vpop.permute.xlu1 %371 }
 0x203   :  { %1182 = vrot.lane.b32.xlu0 %v5550_v29, %s5334_s29  ;;  %1184 = vrot.lane.b32.xlu1 %v5674_v4, %s5334_s29 }
 0x205   :  { %v408_v6 = vpop.permute.xlu0 %407  ;;  %v376_v62 = vpop.permute.xlu1 %375 }
 0x206   :  { %v381_v30 = vsel %vm377_vm2, %v5730_v19, %v376_v62 }
 0x207   :  { %1186 = vrot.lane.b32.xlu0 %v5556_v32, %s5334_s29  ;;  %1188 = vrot.lane.b32.xlu1 %v5680_v7, %s5334_s29 }
 0x209   :  { %v5914_v59 = vpop.permute.xlu0 %467  ;;  %v5916_v49 = vpop.permute.xlu1 %435 }
 0x20a   :  { %9188 = vst [vmem:[#allocation65_spill] sm:$0xff] %v5914_v59 }
 0x20b   :  { %4941 = vrot.lane.b32.xlu0 %v9185_v8, %s5334_s29  ;;  %1214 = vrot.lane.b32.xlu1 %v5550_v29, %s5335_s1 }
 0x20d   :  { %v472_v3 = vpop.permute.xlu0 %471  ;;  %v440_v60 = vpop.permute.xlu1 %439 }
 0x20e   :  { %v445_v62 = vsel %vm9007_vm3, %v5746_v23, %v440_v60  ;;  %v477_v60 = vsel %vm473_vm6, %v5764_v28, %v472_v3  ;;  %v526_v3 = vld [vmem:[#allocation8 + $0xd8] sm:$0xff] }
 0x20f   :  { %1216 = vrot.lane.b32.xlu0 %v5674_v4, %s5335_s1  ;;  %1218 = vrot.lane.b32.xlu1 %v5556_v32, %s5335_s1 }
 0x211   :  { %v5926_v52 = vpop.permute.xlu0 %531  ;;  %v5928_v57 = vpop.permute.xlu1 %499 }
 0x212   :  { %9189 = vst [vmem:[#allocation66_spill] sm:$0xff] %v5926_v52  ;;  %9190 = vst [vmem:[#allocation67_spill] sm:$0xff] %v5928_v57  ;;  %v349_v52 = vsel %vm345_vm1, %v5732_v20, %v344_v12 }
 0x213   :  { %1220 = vrot.lane.b32.xlu0 %v5680_v7, %s5335_s1  ;;  %1222 = vrot.lane.b32.xlu1 %v9185_v8, %s5335_s1 }
 0x215   :  { %v5934_v43 = vpop.permute.xlu0 %535  ;;  %v504_v58 = vpop.permute.xlu1 %503 }
 0x217   :  { %1246 = vrot.lane.b32.xlu0 %v5550_v29, %s5336_s12  ;;  %1248 = vrot.lane.b32.xlu1 %v5674_v4, %s5336_s12 }
 0x219   :  { %v5938_v44 = vpop.permute.xlu0 %595  ;;  %v5940_v55 = vpop.permute.xlu1 %563 }
 0x21a   :  { %9191 = vst [vmem:[#allocation68_spill] sm:$0xff] %v5938_v44  ;;  %9192 = vst [vmem:[#allocation69_spill] sm:$0xff] %v5940_v55  ;;  %v357_v44 = vmul.f32 %v349_v52, %v324_v37  ;;  %v389_v55 = vmul.f32 %v381_v30, %v366_v50  ;;  %v413_v37 = vsel %vm409_vm4, %v5748_v24, %v408_v6  ;;  %v430_v52 = vld [vmem:[#allocation8 + $0x78] sm:$0xff] }
 0x21b   :  { %1250 = vrot.lane.b32.xlu0 %v5556_v32, %s5336_s12  ;;  %1252 = vrot.lane.b32.xlu1 %v5680_v7, %s5336_s12  ;;  %v453_v46 = vmul.f32 %v445_v62, %v430_v52  ;;  %v462_v24 = vld [vmem:[#allocation8 + $0x98] sm:$0xff] }
 0x21c   :  { %v361_v59 = vadd.f32 %v357_v44, %v5612_v41 }
 0x21d   :  { %v5946_v56 = vpop.permute.xlu0 %599  ;;  %v568_v38 = vpop.permute.xlu1 %567 }
 0x21e   :  { %v393_v50 = vadd.f32 %v389_v55, %v361_v59  ;;  %v494_v55 = vld [vmem:[#allocation8 + $0xb8] sm:$0xff]  ;;  %v509_v59 = vsel %vm505_vm5, %v5762_v27, %v504_v58 }
 0x21f   :  { %1254 = vrot.lane.b32.xlu0 %v9185_v8, %s5336_s12  ;;  %1278 = vrot.lane.b32.xlu1 %v5550_v29, %s5337_s2  ;;  %v558_v58 = vld [vmem:[#allocation8 + $0xf8] sm:$0xff]  ;;  %s5351_s12 = smov 81  }
 0x221   :  { %v5952_v57 = vpop.permute.xlu0 %659  ;;  %v5954_v12 = vpop.permute.xlu1 %627 }
 0x222   :  { %9193 = vst [vmem:[#allocation70_spill] sm:$0xff] %v5952_v57  ;;  %9194 = vst [vmem:[#allocation71_spill] sm:$0xff] %v5954_v12  ;;  %v421_v12 = vmul.f32 %v413_v37, %v398_v31  ;;  %v517_v37 = vmul.f32 %v509_v59, %v494_v55 }
 0x223   :  { %1280 = vrot.lane.b32.xlu0 %v5674_v4, %s5337_s2  ;;  %1282 = vrot.lane.b32.xlu1 %v5556_v32, %s5337_s2 }
 0x224   :  { %v425_v44 = vadd.f32 %v421_v12, %v393_v50  ;;  %v485_v12 = vmul.f32 %v477_v60, %v462_v24 }
 0x225   :  { %v664_v30 = vpop.permute.xlu0 %663  ;;  %v632_v57 = vpop.permute.xlu1 %631 }
 0x226   :  { %v457_v31 = vadd.f32 %v453_v46, %v425_v44  ;;  %v541_v46 = vsel %vm8996_vm8, %v5780_v35, %v5934_v43  ;;  %v573_v44 = vsel %vm8990_vm7, %v5778_v34, %v568_v38 }
 0x227   :  { %1284 = vrot.lane.b32.xlu0 %v5680_v7, %s5337_s2  ;;  %1286 = vrot.lane.b32.xlu1 %v9185_v8, %s5337_s2  ;;  %v549_v59 = vmul.f32 %v541_v46, %v526_v3  ;;  %v637_v3 = vsel %vm633_vm9, %v5794_v39, %v632_v57  ;;  %v669_v57 = vsel %vm8989_vm12, %v5812_v48, %v664_v30  ;;  %s5352_s2 = smov 80  }
 0x228   :  { %v489_v50 = vadd.f32 %v485_v12, %v457_v31  ;;  %v581_v31 = vmul.f32 %v573_v44, %v558_v58 }
 0x229   :  { %v5965_v25 = vpop.permute.xlu0 %723  ;;  %v5967_v6 = vpop.permute.xlu1 %691 }
 0x22a   :  { %9195 = vst [vmem:[#allocation72_spill] sm:$0xff] %v5965_v25  ;;  %v521_v24 = vadd.f32 %v517_v37, %v489_v50  ;;  %v590_v25 = vld [vmem:[#allocation8 + $0x118] sm:$0xff]  ;;  %v605_v37 = vsel %vm601_vm10, %v5796_v42, %v5946_v56 }
 0x22b   :  { %1310 = vrot.lane.b32.xlu0 %v5550_v29, %s5338_s13  ;;  %1312 = vrot.lane.b32.xlu1 %v5674_v4, %s5338_s13  ;;  %v622_v50 = vld [vmem:[#allocation8 + $0x138] sm:$0xff]  ;;  %v613_v58 = vmul.f32 %v605_v37, %v590_v25 }
 0x22c   :  { %v553_v43 = vadd.f32 %v549_v59, %v521_v24  ;;  %v645_v44 = vmul.f32 %v637_v3, %v622_v50  ;;  %v654_v56 = vld [vmem:[#allocation8 + $0x158] sm:$0xff] }
 0x22d   :  { %v728_v52 = vpop.permute.xlu0 %727  ;;  %v696_v62 = vpop.permute.xlu1 %695  ;;  %v677_v3 = vmul.f32 %v669_v57, %v654_v56 }
 0x22e   :  { %v585_v46 = vadd.f32 %v581_v31, %v553_v43  ;;  %v686_v31 = vld [vmem:[#allocation8 + $0x178] sm:$0xff]  ;;  %v701_v43 = vsel %vm697_vm11, %v5810_v45, %v696_v62 }
 0x22f   :  { %1314 = vrot.lane.b32.xlu0 %v5556_v32, %s5338_s13  ;;  %1316 = vrot.lane.b32.xlu1 %v5680_v7, %s5338_s13  ;;  %v718_v62 = vld [vmem:[#allocation8 + $0x198] sm:$0xff] }
 0x230   :  { %v617_v59 = vadd.f32 %v613_v58, %v585_v46 }
 0x231   :  { %v5986_v60 = vpop.permute.xlu0 %787  ;;  %v5988_v55 = vpop.permute.xlu1 %755 }
 0x232   :  { %9196 = vst [vmem:[#allocation73_spill] sm:$0xff] %v5986_v60  ;;  %v649_v25 = vadd.f32 %v645_v44, %v617_v59  ;;  %v733_v44 = vsel %vm8928_vm14, %v5828_v54, %v728_v52  ;;  %v750_v59 = vld [vmem:[#allocation8 + $0x1b8] sm:$0xff]  ;;  %vm8930_vm14 = vcmask 121856  }
 0x233   :  { %1318 = vrot.lane.b32.xlu0 %v9185_v8, %s5338_s13  ;;  %1342 = vrot.lane.b32.xlu1 %v5550_v29, %s5339_s4 }
 0x234   :  { %v681_v46 = vadd.f32 %v677_v3, %v649_v25 }
 0x235   :  { %v792_v38 = vpop.permute.xlu0 %791  ;;  %v760_v12 = vpop.permute.xlu1 %759 }
 0x236   :  { %v765_v56 = vsel %vm8926_vm13, %v5826_v53, %v760_v12  ;;  %v797_v52 = vsel %vm8925_vm0, %v5844_v1, %v792_v38  ;;  %vm8929_vm0 = vcmask 130048   ;;  %vm8934_vm13 = vcmask 138240  }
 0x237   :  { %1344 = vrot.lane.b32.xlu0 %v5674_v4, %s5339_s4  ;;  %1346 = vrot.lane.b32.xlu1 %v5556_v32, %s5339_s4 }
 0x239   :  { %v6000_v60 = vpop.permute.xlu0 %851  ;;  %v6002_v24 = vpop.permute.xlu1 %819 }
 0x23a   :  { %9197 = vst [vmem:[#allocation74_spill] sm:$0xff] %v6000_v60  ;;  %9198 = vst [vmem:[#allocation75_spill] sm:$0xff] %v6002_v24  ;;  %v709_v60 = vmul.f32 %v701_v43, %v686_v31  ;;  %v741_v31 = vmul.f32 %v733_v44, %v718_v62  ;;  %v773_v43 = vmul.f32 %v765_v56, %v750_v59  ;;  %v814_v24 = vld [vmem:[#allocation8 + $0x1f8] sm:$0xff] }
 0x23b   :  { %1348 = vrot.lane.b32.xlu0 %v5680_v7, %s5339_s4  ;;  %1350 = vrot.lane.b32.xlu1 %v9185_v8, %s5339_s4  ;;  %s5353_s4 = smov 79  }
 0x23c   :  { %v713_v57 = vadd.f32 %v709_v60, %v681_v46 }
 0x23d   :  { %v856_v37 = vpop.permute.xlu0 %855  ;;  %v824_v50 = vpop.permute.xlu1 %823 }
 0x23e   :  { %v829_v60 = vsel %vm8927_vm15, %v5842_v63, %v824_v50  ;;  %vm8932_vm15 = vcmask 113664  }
 0x23f   :  { %1374 = vrot.lane.b32.xlu0 %v5550_v29, %s5340_s16  ;;  %1376 = vrot.lane.b32.xlu1 %v5674_v4, %s5340_s16  ;;  %v837_v59 = vmul.f32 %v829_v60, %v814_v24 }
 0x241   :  { %v6012_v30 = vpop.permute.xlu0 %915  ;;  %v6014_v58 = vpop.permute.xlu1 %883 }
 0x242   :  { %9199 = vst [vmem:[#allocation76_spill] sm:$0xff] %v6012_v30  ;;  %9200 = vst [vmem:[#allocation77_spill] sm:$0xff] %v6014_v58  ;;  %v745_v30 = vadd.f32 %v741_v31, %v713_v57  ;;  %v782_v58 = vld [vmem:[#allocation8 + $0x1d8] sm:$0xff] }
 0x243   :  { %1378 = vrot.lane.b32.xlu0 %v5556_v32, %s5340_s16  ;;  %1380 = vrot.lane.b32.xlu1 %v5680_v7, %s5340_s16  ;;  %v805_v44 = vmul.f32 %v797_v52, %v782_v58  ;;  %v846_v57 = vld [vmem:[#allocation8 + $0x218] sm:$0xff] }
 0x244   :  { %v777_v12 = vadd.f32 %v773_v43, %v745_v30  ;;  %v861_v30 = vsel %vm8934_vm13, %v5860_v15, %v856_v37  ;;  %v878_v31 = vld [vmem:[#allocation8 + $0x238] sm:$0xff]  ;;  %vm8937_vm13 = vcmask 7168  }
 0x245   :  { %v920_v25 = vpop.permute.xlu0 %919  ;;  %v888_v3 = vpop.permute.xlu1 %887  ;;  %v869_v43 = vmul.f32 %v861_v30, %v846_v57 }
 0x246   :  { %v809_v38 = vadd.f32 %v805_v44, %v777_v12  ;;  %v893_v58 = vsel %vm8929_vm0, %v5858_v0, %v888_v3  ;;  %v910_v3 = vld [vmem:[#allocation8 + $0x258] sm:$0xff]  ;;  %v925_v44 = vsel %vm8930_vm14, %v5876_v14, %v920_v25  ;;  %vm8994_vm0 = vcmask 23552  }
 0x247   :  { %1382 = vrot.lane.b32.xlu0 %v9185_v8, %s5340_s16  ;;  %1406 = vrot.lane.b32.xlu1 %v5550_v29, %s5341_s17  ;;  %v901_v52 = vmul.f32 %v893_v58, %v878_v31  ;;  %v933_v58 = vmul.f32 %v925_v44, %v910_v3  ;;  %vm985_vm14 = vcmask 105472   ;;  %s5354_s16 = smov 78  }
 0x248   :  { %v841_v24 = vadd.f32 %v837_v59, %v809_v38  ;;  %v942_v59 = vld [vmem:[#allocation8 + $0x278] sm:$0xff] }
 0x249   :  { %v6029_v46 = vpop.permute.xlu0 %979  ;;  %v6031_v62 = vpop.permute.xlu1 %947 }
 0x24a   :  { %v873_v37 = vadd.f32 %v869_v43, %v841_v24 }
 0x24b   :  { %1408 = vrot.lane.b32.xlu0 %v5674_v4, %s5341_s17  ;;  %1410 = vrot.lane.b32.xlu1 %v5556_v32, %s5341_s17 }
 0x24c   :  { %v905_v57 = vadd.f32 %v901_v52, %v873_v37  ;;  %v1006_v37 = vld [vmem:[#allocation8 + $0x2b8] sm:$0xff] }
 0x24d   :  { %v984_v50 = vpop.permute.xlu0 %983  ;;  %v952_v56 = vpop.permute.xlu1 %951 }
 0x24e   :  { %v957_v38 = vsel %vm8932_vm15, %v5874_v11, %v952_v56  ;;  %v937_v25 = vadd.f32 %v933_v58, %v905_v57  ;;  %v989_v52 = vsel %vm985_vm14, %v5888_v5, %v984_v50  ;;  %vm8938_vm15 = vcmask 15360   ;;  %v1038_v50 = vld [vmem:[#allocation8 + $0x2d8] sm:$0xff] }
 0x24f   :  { %1412 = vrot.lane.b32.xlu0 %v5680_v7, %s5341_s17  ;;  %1414 = vrot.lane.b32.xlu1 %v9185_v8, %s5341_s17  ;;  %v965_v24 = vmul.f32 %v957_v38, %v942_v59 }
 0x251   :  { %v6045_v60 = vpop.permute.xlu0 %1043  ;;  %v6047_v12 = vpop.permute.xlu1 %1011  ;;  %v969_v44 = vadd.f32 %v965_v24, %v937_v25  ;;  %v1070_v24 = vld [vmem:[#allocation8 + $0x2f8] sm:$0xff] }
 0x252   :  { %9201 = vst [vmem:[#allocation78_spill] sm:$0xff] %v6045_v60  ;;  %v974_v60 = vld [vmem:[#allocation8 + $0x298] sm:$0xff] }
 0x253   :  { %1438 = vrot.lane.b32.xlu0 %v5550_v29, %s5342_s5  ;;  %1440 = vrot.lane.b32.xlu1 %v5674_v4, %s5342_s5  ;;  %v997_v59 = vmul.f32 %v989_v52, %v974_v60 }
 0x255   :  { %v1048_v30 = vpop.permute.xlu0 %1047  ;;  %v1016_v31 = vpop.permute.xlu1 %1015 }
 0x256   :  { %v1021_v3 = vsel %vm8994_vm0, %v5886_v13, %v1016_v31  ;;  %v1053_v31 = vsel %vm8938_vm15, %v5898_v16, %v1048_v30  ;;  %v1102_v16 = vld [vmem:[#allocation8 + $0x318] sm:$0xff]  ;;  %vm8942_vm15 = vcmask 1031168  }
 0x257   :  { %1442 = vrot.lane.b32.xlu0 %v5556_v32, %s5342_s5  ;;  %1444 = vrot.lane.b32.xlu1 %v5680_v7, %s5342_s5  ;;  %v1029_v38 = vmul.f32 %v1021_v3, %v1006_v37  ;;  %v1061_v3 = vmul.f32 %v1053_v31, %v1038_v50 }
 0x259   :  { %v6061_v43 = vpop.permute.xlu0 %1073  ;;  %v6063_v56 = vpop.permute.xlu1 %1075 }
 0x25a   :  { %9202 = vst [vmem:[#allocation79_spill] sm:$0xff] %v6061_v43  ;;  %9203 = vst [vmem:[#allocation80_spill] sm:$0xff] %v6063_v56  ;;  %v1001_v56 = vadd.f32 %v997_v59, %v969_v44 }
 0x25b   :  { %4946 = vrot.lane.b32.xlu0 %v9185_v8, %s5342_s5  ;;  %1470 = vrot.lane.b32.xlu1 %v5550_v29, %s5343_s19 }
 0x25c   :  { %v1033_v60 = vadd.f32 %v1029_v38, %v1001_v56  ;;  %v1115_v56 = vld [vmem:[#allocation8 + $0x338] sm:$0xff]  ;;  %v1106_v38 = vmul.f32 %v1102_v16, %v5680_v7 }
 0x25d   :  { %v6072_v57 = vpop.permute.xlu0 %1077  ;;  %v1080_v58 = vpop.permute.xlu1 %1079  ;;  %v1149_v16 = vld [vmem:[#allocation8 + $0x358] sm:$0xff] }
 0x25e   :  { %v1085_v25 = vsel %vm8937_vm13, %v6072_v57, %v1080_v58  ;;  %v1065_v59 = vadd.f32 %v1061_v3, %v1033_v60  ;;  %vm8946_vm13 = vcmask 1039360  }
 0x25f   :  { %1472 = vrot.lane.b32.xlu0 %v5674_v4, %s5343_s19  ;;  %1474 = vrot.lane.b32.xlu1 %v5556_v32, %s5343_s19  ;;  %v1093_v44 = vmul.f32 %v1085_v25, %v1070_v24 }
 0x261   :  { %v6080_v52 = vpop.permute.xlu0 %1118  ;;  %v6082_v37 = vpop.permute.xlu1 %1120  ;;  %v1097_v58 = vadd.f32 %v1093_v44, %v1065_v59 }
 0x262   :  { %9204 = vst [vmem:[#allocation81_spill] sm:$0xff] %v6080_v52  ;;  %9205 = vst [vmem:[#allocation82_spill] sm:$0xff] %v6082_v37 }
 0x263   :  { %1476 = vrot.lane.b32.xlu0 %v5680_v7, %s5343_s19  ;;  %1478 = vrot.lane.b32.xlu1 %v9185_v8, %s5343_s19  ;;  %v1110_v25 = vadd.f32 %v1106_v38, %v1097_v58  ;;  %s5355_s19 = smov 77  }
 0x265   :  { %v6086_v43 = vpop.permute.xlu0 %1122  ;;  %v6088_v30 = vpop.permute.xlu1 %1124 }
 0x266   :  { %9206 = vst [vmem:[#allocation83_spill] sm:$0xff] %v6086_v43  ;;  %9207 = vst [vmem:[#allocation84_spill] sm:$0xff] %v6088_v30 }
 0x267   :  { %1502 = vrot.lane.b32.xlu0 %v5550_v29, %s5344_s21  ;;  %1504 = vrot.lane.b32.xlu1 %v5674_v4, %s5344_s21 }
 0x269   :  { %v1127_v50 = vpop.permute.xlu0 %1126  ;;  %v6093_v31 = vpop.permute.xlu1 %1150 }
 0x26a   :  { %9208 = vst [vmem:[#allocation85_spill] sm:$0xff] %v6093_v31  ;;  %v1132_v24 = vsel %vm8946_vm13, %v6088_v30, %v1127_v50  ;;  %vm8962_vm13 = vcmask 941056   ;;  %v1213_v31 = vld [vmem:[#allocation8 + $0x398] sm:$0xff] }
 0x26b   :  { %v1140_v60 = vmul.f32 %v1132_v24, %v1115_v56  ;;  %1506 = vrot.lane.b32.xlu0 %v5556_v32, %s5344_s21  ;;  %1508 = vrot.lane.b32.xlu1 %v5680_v7, %s5344_s21 }
 0x26d   :  { %v1144_v3 = vadd.f32 %v1140_v60, %v1110_v25  ;;  %v6099_v44 = vpop.permute.xlu0 %1152  ;;  %v6101_v59 = vpop.permute.xlu1 %1154 }
 0x26e   :  { %9209 = vst [vmem:[#allocation86_spill] sm:$0xff] %v6099_v44  ;;  %9210 = vst [vmem:[#allocation87_spill] sm:$0xff] %v6101_v59 }
 0x26f   :  { %1510 = vrot.lane.b32.xlu0 %v9185_v8, %s5344_s21  ;;  %1534 = vrot.lane.b32.xlu1 %v5550_v29, %s5345_s22  ;;  %s9011_s21 = smov 58  }
 0x271   :  { %v6106_v50 = vpop.permute.xlu0 %1156  ;;  %v1159_v58 = vpop.permute.xlu1 %1158 }
 0x272   :  { %9211 = vst [vmem:[#allocation88_spill] sm:$0xff] %v6106_v50  ;;  %v1164_v56 = vsel %vm8942_vm15, %v6106_v50, %v1159_v58  ;;  %vm8953_vm15 = vcmask 1022976  }
 0x273   :  { %v1172_v38 = vmul.f32 %v1164_v56, %v1149_v16  ;;  %1536 = vrot.lane.b32.xlu0 %v5674_v4, %s5345_s22  ;;  %1538 = vrot.lane.b32.xlu1 %v5556_v32, %s5345_s22 }
 0x275   :  { %v1176_v24 = vadd.f32 %v1172_v38, %v1144_v3  ;;  %v6114_v25 = vpop.permute.xlu0 %1182  ;;  %v6116_v60 = vpop.permute.xlu1 %1184 }
 0x276   :  { %9212 = vst [vmem:[#allocation89_spill] sm:$0xff] %v6114_v25  ;;  %9213 = vst [vmem:[#allocation90_spill] sm:$0xff] %v6116_v60 }
 0x277   :  { %1540 = vrot.lane.b32.xlu0 %v5680_v7, %s5345_s22  ;;  %4951 = vrot.lane.b32.xlu1 %v9185_v8, %s5345_s22 }
 0x279   :  { %v6122_v59 = vpop.permute.xlu0 %1186  ;;  %v6124_v16 = vpop.permute.xlu1 %1188 }
 0x27a   :  { %9214 = vst [vmem:[#allocation91_spill] sm:$0xff] %v6122_v59  ;;  %9215 = vst [vmem:[#allocation92_spill] sm:$0xff] %v6124_v16 }
 0x27b   :  { %1566 = vrot.lane.b32.xlu0 %v5550_v29, %s5346_s23  ;;  %1568 = vrot.lane.b32.xlu1 %v5674_v4, %s5346_s23 }
 0x27d   :  { %v6128_v3 = vpop.permute.xlu0 %4941  ;;  %v6130_v58 = vpop.permute.xlu1 %1214 }
 0x27e   :  { %9216 = vst [vmem:[#allocation93_spill] sm:$0xff] %v6128_v3  ;;  %9217 = vst [vmem:[#allocation94_spill] sm:$0xff] %v6130_v58  ;;  %v4943_v25 = vunpack.i.l.bf16 %v6128_v3 }
 0x27f   :  { %1570 = vrot.lane.b32.xlu0 %v5556_v32, %s5346_s23  ;;  %1572 = vrot.lane.b32.xlu1 %v5680_v7, %s5346_s23 }
 0x281   :  { %v6134_v56 = vpop.permute.xlu0 %1216  ;;  %v6136_v38 = vpop.permute.xlu1 %1218 }
 0x282   :  { %9218 = vst [vmem:[#allocation95_spill] sm:$0xff] %v6134_v56  ;;  %9219 = vst [vmem:[#allocation96_spill] sm:$0xff] %v6136_v38  ;;  %v1196_v38 = vsel %vm8953_vm15, %v6124_v16, %v4943_v25  ;;  %v1181_v56 = vld [vmem:[#allocation8 + $0x378] sm:$0xff]  ;;  %vm8957_vm15 = vcmask 932864  }
 0x283   :  { %1574 = vrot.lane.b32.xlu0 %v9185_v8, %s5346_s23  ;;  %1598 = vrot.lane.b32.xlu1 %v5550_v29, %s5347_s25  ;;  %v1204_v44 = vmul.f32 %v1196_v38, %v1181_v56  ;;  %v1245_v25 = vld [vmem:[#allocation8 + $0x3b8] sm:$0xff]  ;;  %s9013_s23 = smov 55  }
 0x285   :  { %v6140_v59 = vpop.permute.xlu0 %1220  ;;  %v1223_v60 = vpop.permute.xlu1 %1222 }
 0x286   :  { %9220 = vst [vmem:[#allocation97_spill] sm:$0xff] %v6140_v59  ;;  %v1228_v3 = vsel %vm8962_vm13, %v6140_v59, %v1223_v60  ;;  %vm8969_vm13 = vcmask 908288  }
 0x287   :  { %1600 = vrot.lane.b32.xlu0 %v5674_v4, %s5347_s25  ;;  %1602 = vrot.lane.b32.xlu1 %v5556_v32, %s5347_s25 }
 0x289   :  { %v6145_v58 = vpop.permute.xlu0 %1246  ;;  %v6149_v50 = vpop.permute.xlu1 %1248 }
 0x28a   :  { %9221 = vst [vmem:[#allocation98_spill] sm:$0xff] %v6145_v58  ;;  %9222 = vst [vmem:[#allocation99_spill] sm:$0xff] %v6149_v50  ;;  %v1236_v58 = vmul.f32 %v1228_v3, %v1213_v31  ;;  %v1208_v50 = vadd.f32 %v1204_v44, %v1176_v24 }
 0x28b   :  { %1604 = vrot.lane.b32.xlu0 %v5680_v7, %s5347_s25  ;;  %1606 = vrot.lane.b32.xlu1 %v9185_v8, %s5347_s25  ;;  %s5357_s25 = smov 73  }
 0x28c   :  { %v1240_v38 = vadd.f32 %v1236_v58, %v1208_v50  ;;  %v1277_v50 = vld [vmem:[#allocation8 + $0x3d8] sm:$0xff] }
 0x28d   :  { %v6155_v30 = vpop.permute.xlu0 %1250  ;;  %v6157_v43 = vpop.permute.xlu1 %1252 }
 0x28e   :  { %9223 = vst [vmem:[#allocation100_spill] sm:$0xff] %v6155_v30  ;;  %9224 = vst [vmem:[#allocation101_spill] sm:$0xff] %v6157_v43 }
 0x28f   :  { %1630 = vrot.lane.b32.xlu0 %v5550_v29, %s5348_s27  ;;  %1632 = vrot.lane.b32.xlu1 %v5674_v4, %s5348_s27 }
 0x291   :  { %v1255_v16 = vpop.permute.xlu0 %1254  ;;  %v6165_v56 = vpop.permute.xlu1 %1278 }
 0x292   :  { %v1260_v60 = vsel %vm8957_vm15, %v6157_v43, %v1255_v16  ;;  %9225 = vst [vmem:[#allocation102_spill] sm:$0xff] %v6165_v56  ;;  %vm8958_vm15 = vcmask 924672  }
 0x293   :  { %v1268_v30 = vmul.f32 %v1260_v60, %v1245_v25  ;;  %1634 = vrot.lane.b32.xlu0 %v5556_v32, %s5348_s27  ;;  %1636 = vrot.lane.b32.xlu1 %v5680_v7, %s5348_s27 }
 0x295   :  { %v1272_v31 = vadd.f32 %v1268_v30, %v1240_v38  ;;  %v6171_v3 = vpop.permute.xlu0 %1280  ;;  %v6173_v59 = vpop.permute.xlu1 %1282 }
 0x296   :  { %9226 = vst [vmem:[#allocation103_spill] sm:$0xff] %v6171_v3  ;;  %9227 = vst [vmem:[#allocation104_spill] sm:$0xff] %v6173_v59  ;;  %v321_v3 = vld [vmem:[#allocation8] sm:$0xff] }
 0x297   :  { %4956 = vrot.lane.b32.xlu0 %v9185_v8, %s5348_s27  ;;  %1662 = vrot.lane.b32.xlu1 %v5550_v29, %s5349_s7 }
 0x299   :  { %v6179_v44 = vpop.permute.xlu0 %1284  ;;  %v1287_v24 = vpop.permute.xlu1 %1286 }
 0x29a   :  { %9228 = vst [vmem:[#allocation105_spill] sm:$0xff] %v6179_v44  ;;  %v1292_v16 = vsel %vm8958_vm15, %v6179_v44, %v1287_v24  ;;  %vm9006_vm15 = vcmask 916480   ;;  %v1341_v44 = vld [vmem:[#allocation8 + $0x418] sm:$0xff] }
 0x29b   :  { %1664 = vrot.lane.b32.xlu0 %v5674_v4, %s5349_s7  ;;  %v1300_v30 = vmul.f32 %v1292_v16, %v1277_v50  ;;  %1666 = vrot.lane.b32.xlu1 %v5556_v32, %s5349_s7 }
 0x29d   :  { %v6187_v58 = vpop.permute.xlu0 %1310  ;;  %v1304_v25 = vadd.f32 %v1300_v30, %v1272_v31  ;;  %v6189_v60 = vpop.permute.xlu1 %1312  ;;  %v1309_v31 = vld [vmem:[#allocation8 + $0x3f8] sm:$0xff] }
 0x29e   :  { %9229 = vst [vmem:[#allocation106_spill] sm:$0xff] %v6187_v58  ;;  %9230 = vst [vmem:[#allocation107_spill] sm:$0xff] %v6189_v60 }
 0x29f   :  { %1668 = vrot.lane.b32.xlu0 %v5680_v7, %s5349_s7  ;;  %4961 = vrot.lane.b32.xlu1 %v9185_v8, %s5349_s7 }
 0x2a1   :  { %v6195_v38 = vpop.permute.xlu0 %1314  ;;  %v6197_v24 = vpop.permute.xlu1 %1316 }
 0x2a2   :  { %9231 = vst [vmem:[#allocation108_spill] sm:$0xff] %v6195_v38  ;;  %9232 = vst [vmem:[#allocation109_spill] sm:$0xff] %v6197_v24 }
 0x2a3   :  { %1694 = vrot.lane.b32.xlu0 %v5550_v29, %s5350_s26  ;;  %1696 = vrot.lane.b32.xlu1 %v5674_v4, %s5350_s26 }
 0x2a5   :  { %v1319_v50 = vpop.permute.xlu0 %1318  ;;  %v6201_v16 = vpop.permute.xlu1 %1342 }
 0x2a6   :  { %9233 = vst [vmem:[#allocation110_spill] sm:$0xff] %v6201_v16  ;;  %v1324_v30 = vsel %vm9006_vm15, %v6197_v24, %v1319_v50 }
 0x2a7   :  { %1698 = vrot.lane.b32.xlu0 %v5556_v32, %s5350_s26  ;;  %1700 = vrot.lane.b32.xlu1 %v5680_v7, %s5350_s26  ;;  %v1332_v60 = vmul.f32 %v1324_v30, %v1309_v31  ;;  %v4907_v31 = vunpack.i.l.bf16 %v5594_v33 }
 0x2a9   :  { %v6207_v38 = vpop.permute.xlu0 %1344  ;;  %v6209_v58 = vpop.permute.xlu1 %1346  ;;  %v1336_v50 = vadd.f32 %v1332_v60, %v1304_v25  ;;  %v346_v43 = vsel %vm345_vm1, %v4907_v31, %v5724_v18  ;;  %v1373_v25 = vld [vmem:[#allocation8 + $0x438] sm:$0xff]  ;;  %v395_v31 = vld [vmem:[#allocation8 + $0x40] sm:$0xff] }
 0x2aa   :  { %9234 = vst [vmem:[#allocation111_spill] sm:$0xff] %v6207_v38  ;;  %9235 = vst [vmem:[#allocation112_spill] sm:$0xff] %v6209_v58 }
 0x2ab   :  { %1702 = vrot.lane.b32.xlu0 %v9185_v8, %s5350_s26  ;;  %1726 = vrot.lane.b32.xlu1 %v5550_v29, %s5351_s12  ;;  %s5358_s26 = smov 70  }
 0x2ad   :  { %v6213_v16 = vpop.permute.xlu0 %1348  ;;  %v1351_v59 = vpop.permute.xlu1 %1350 }
 0x2ae   :  { %9236 = vst [vmem:[#allocation113_spill] sm:$0xff] %v6213_v16  ;;  %v1356_v56 = vsel %vm8969_vm13, %v6213_v16, %v1351_v59  ;;  %vm1384_vm13 = vcmask 900096   ;;  %v322_v16 = vld [vmem:[#allocation8 + $0x8] sm:$0xff] }
 0x2af   :  { %1728 = vrot.lane.b32.xlu0 %v5674_v4, %s5351_s12  ;;  %v1364_v38 = vmul.f32 %v1356_v56, %v1341_v44  ;;  %1730 = vrot.lane.b32.xlu1 %v5556_v32, %s5351_s12  ;;  %v354_v44 = vmul.f32 %v346_v43, %v321_v3  ;;  %v410_v43 = vsel %vm409_vm4, %v5548_v9, %v5740_v22 }
 0x2b0   :  { %v347_v9 = vsel %vm345_vm1, %v5724_v18, %v5892_v10 }
 0x2b1   :  { %v6219_v58 = vpop.permute.xlu0 %1374  ;;  %v1368_v30 = vadd.f32 %v1364_v38, %v1336_v50  ;;  %v6222_v24 = vpop.permute.xlu1 %1376  ;;  %v363_v38 = vld [vmem:[#allocation8 + $0x20] sm:$0xff]  ;;  %v378_v50 = vsel %vm377_vm2, %v5600_v36, %v5722_v17 }
 0x2b2   :  { %9237 = vst [vmem:[#allocation114_spill] sm:$0xff] %v6219_v58  ;;  %9238 = vst [vmem:[#allocation115_spill] sm:$0xff] %v6222_v24  ;;  %v386_v36 = vmul.f32 %v378_v50, %v363_v38  ;;  %v418_v24 = vmul.f32 %v410_v43, %v395_v31  ;;  %v379_v38 = vsel %vm377_vm2, %v5722_v17, %v5904_v61  ;;  %v427_v50 = vld [vmem:[#allocation8 + $0x60] sm:$0xff]  ;;  %v323_v31 = vld [vmem:[#allocation8 + $0x10] sm:$0xff] }
 0x2b3   :  { %1732 = vrot.lane.b32.xlu0 %v5680_v7, %s5351_s12  ;;  %1734 = vrot.lane.b32.xlu1 %v9185_v8, %s5351_s12  ;;  %v355_v43 = vmul.f32 %v347_v9, %v322_v16  ;;  %v396_v16 = vld [vmem:[#allocation8 + $0x48] sm:$0xff]  ;;  %v443_v9 = vsel %vm9007_vm3, %v5738_v21, %v5916_v49  ;;  %s5359_s12 = smov 67  }
 0x2b5   :  { %v6228_v59 = vpop.permute.xlu0 %1378  ;;  %v6230_v56 = vpop.permute.xlu1 %1380 }
 0x2b6   :  { %9239 = vst [vmem:[#allocation116_spill] sm:$0xff] %v6228_v59  ;;  %9240 = vst [vmem:[#allocation117_spill] sm:$0xff] %v6230_v56  ;;  %v358_v59 = vadd.f32 %v354_v44, %v5612_v41  ;;  %v4912_v44 = vunpack.i.l.bf16 %v5610_v40  ;;  %v365_v40 = vld [vmem:[#allocation8 + $0x30] sm:$0xff] }
 0x2b7   :  { %1758 = vrot.lane.b32.xlu0 %v5550_v29, %s5352_s2  ;;  %1760 = vrot.lane.b32.xlu1 %v5674_v4, %s5352_s2 }
 0x2b8   :  { %v442_v18 = vsel %vm9007_vm3, %v4912_v44, %v5738_v21  ;;  %v380_v44 = vsel %vm377_vm2, %v5904_v61, %v5730_v19  ;;  %v428_v61 = vld [vmem:[#allocation8 + $0x68] sm:$0xff]  ;;  %v523_v21 = vld [vmem:[#allocation8 + $0xc0] sm:$0xff]  ;;  %vm1416_vm2 = vcmask 891904  }
 0x2b9   :  { %v1383_v60 = vpop.permute.xlu0 %1382  ;;  %v6244_v33 = vpop.permute.xlu1 %1406  ;;  %v388_v19 = vmul.f32 %v380_v44, %v365_v40 }
 0x2ba   :  { %v1388_v3 = vsel %vm1384_vm13, %v6230_v56, %v1383_v60  ;;  %9241 = vst [vmem:[#allocation118_spill] sm:$0xff] %v6244_v33  ;;  %v364_v33 = vld [vmem:[#allocation8 + $0x28] sm:$0xff] }
 0x2bb   :  { %v1396_v58 = vmul.f32 %v1388_v3, %v1373_v25  ;;  %1762 = vrot.lane.b32.xlu0 %v5556_v32, %s5352_s2  ;;  %1764 = vrot.lane.b32.xlu1 %v5680_v7, %s5352_s2  ;;  %v390_v3 = vadd.f32 %v386_v36, %v358_v59  ;;  %v348_v59 = vsel %vm345_vm1, %v5892_v10, %v5732_v20  ;;  %v4918_v10 = vunpack.i.l.bf16 %v5632_v51  ;;  %v460_v51 = vld [vmem:[#allocation8 + $0x88] sm:$0xff] }
 0x2bc   :  { %v356_v37 = vmul.f32 %v348_v59, %v323_v31  ;;  %v359_v20 = vadd.f32 %v355_v43, %v5612_v41  ;;  %v9248_v59 = vld [vmem:[#allocation48_spill] sm:$0xff] }
 0x2bd   :  { %v6254_v52 = vadd.f32 %v1396_v58, %v1368_v30  ;;  %v6256_v60 = vpop.permute.xlu0 %1408  ;;  %v6259_v25 = vpop.permute.xlu1 %1410  ;;  %v459_v58 = vld [vmem:[#allocation8 + $0x80] sm:$0xff]  ;;  %v474_v30 = vsel %vm473_vm6, %v5620_v47, %v5756_v26  ;;  %v422_v17 = vadd.f32 %v418_v24, %v390_v3  ;;  %v397_v43 = vld [vmem:[#allocation8 + $0x50] sm:$0xff] }
 0x2be   :  { %9242 = vst [vmem:[#allocation119_spill] sm:$0xff] %v6256_v60  ;;  %9243 = vst [vmem:[#allocation120_spill] sm:$0xff] %v6259_v25  ;;  %v387_v25 = vmul.f32 %v379_v38, %v364_v33  ;;  %v450_v60 = vmul.f32 %v442_v18, %v427_v50  ;;  %v482_v56 = vmul.f32 %v474_v30, %v459_v58  ;;  %v491_v18 = vld [vmem:[#allocation8 + $0xa0] sm:$0xff]  ;;  %v9247_v30 = vld [vmem:[#allocation24_spill] sm:$0xff] }
 0x2bf   :  { %4966 = vrot.lane.b32.xlu0 %v9185_v8, %s5352_s2  ;;  %1790 = vrot.lane.b32.xlu1 %v5550_v29, %s5353_s4  ;;  %v411_v33 = vsel %vm409_vm4, %v5740_v22, %v5902_v2  ;;  %v9246_v58 = vld [vmem:[#allocation46_spill] sm:$0xff]  ;;  %v538_v22 = vsel %vm8996_vm8, %v4918_v10, %v9248_v59  ;;  %v360_v40 = vadd.f32 %v356_v37, %v5612_v41 }
 0x2c0   :  { %v454_v24 = vadd.f32 %v450_v60, %v422_v17  ;;  %v391_v38 = vadd.f32 %v387_v25, %v359_v20  ;;  %v506_v60 = vsel %vm505_vm5, %v9247_v30, %v9246_v58  ;;  %v9249_v17 = vld [vmem:[#allocation45_spill] sm:$0xff]  ;;  %v419_v44 = vmul.f32 %v411_v33, %v396_v16  ;;  %v429_v20 = vld [vmem:[#allocation8 + $0x70] sm:$0xff] }
 0x2c1   :  { %v6276_v36 = vpop.permute.xlu0 %1412  ;;  %v6281_v47 = vpop.permute.xlu1 %1414  ;;  %v412_v25 = vsel %vm409_vm4, %v5902_v2, %v9249_v17  ;;  %v392_v41 = vadd.f32 %v388_v19, %v360_v40  ;;  %v514_v10 = vmul.f32 %v506_v60, %v491_v18  ;;  %v546_v33 = vmul.f32 %v538_v22, %v523_v21  ;;  %v9255_v18 = vld [vmem:[#allocation25_spill] sm:$0xff]  ;;  %v587_v22 = vld [vmem:[#allocation8 + $0x100] sm:$0xff]  ;;  %v9257_v21 = vld [vmem:[#allocation28_spill] sm:$0xff] }
 0x2c2   :  { %v486_v31 = vadd.f32 %v482_v56, %v454_v24  ;;  %v444_v56 = vsel %vm9007_vm3, %v5916_v49, %v5746_v23  ;;  %v451_v24 = vmul.f32 %v443_v9, %v428_v61  ;;  %v423_v30 = vadd.f32 %v419_v44, %v391_v38  ;;  %v492_v23 = vld [vmem:[#allocation8 + $0xa8] sm:$0xff]  ;;  %v555_v9 = vld [vmem:[#allocation8 + $0xe0] sm:$0xff] }
 0x2c3   :  { %1792 = vrot.lane.b32.xlu0 %v5674_v4, %s5353_s4  ;;  %1794 = vrot.lane.b32.xlu1 %v5556_v32, %s5353_s4  ;;  %v420_v17 = vmul.f32 %v412_v25, %v397_v43  ;;  %v9253_v49 = vld [vmem:[#allocation67_spill] sm:$0xff]  ;;  %v9256_v40 = vld [vmem:[#allocation50_spill] sm:$0xff]  ;;  %v461_v25 = vld [vmem:[#allocation8 + $0x90] sm:$0xff]  ;;  %vm1448_vm4 = vcmask 809984  }
 0x2c4   :  { %v507_v61 = vsel %vm505_vm5, %v9246_v58, %v9253_v49  ;;  %v518_v19 = vadd.f32 %v514_v10, %v486_v31  ;;  %v9254_v38 = vld [vmem:[#allocation47_spill] sm:$0xff]  ;;  %v455_v60 = vadd.f32 %v451_v24, %v423_v30  ;;  %v602_v43 = vsel %vm601_vm10, %v9257_v21, %v9256_v40 }
 0x2c5   :  { %v6295_v3 = vpop.permute.xlu0 %1438  ;;  %v6297_v50 = vpop.permute.xlu1 %1440  ;;  %v424_v58 = vadd.f32 %v420_v17, %v392_v41  ;;  %v508_v24 = vsel %vm505_vm5, %v9253_v49, %v5762_v27  ;;  %v515_v10 = vmul.f32 %v507_v61, %v492_v23  ;;  %v9260_v23 = vld [vmem:[#allocation66_spill] sm:$0xff]  ;;  %v556_v49 = vld [vmem:[#allocation8 + $0xe8] sm:$0xff]  ;;  %v9261_v61 = vld [vmem:[#allocation69_spill] sm:$0xff]  ;;  %vm1480_vm5 = vcmask 801792  }
 0x2c6   :  { %9244 = vst [vmem:[#allocation121_spill] sm:$0xff] %v6295_v3  ;;  %9245 = vst [vmem:[#allocation122_spill] sm:$0xff] %v6297_v50  ;;  %v9251_v3 = vld [vmem:[#allocation65_spill] sm:$0xff]  ;;  %v452_v50 = vmul.f32 %v444_v56, %v429_v20  ;;  %v493_v56 = vld [vmem:[#allocation8 + $0xb0] sm:$0xff]  ;;  %v550_v17 = vadd.f32 %v546_v33, %v518_v19 }
 0x2c7   :  { %1796 = vrot.lane.b32.xlu0 %v5680_v7, %s5353_s4  ;;  %1798 = vrot.lane.b32.xlu1 %v9185_v8, %s5353_s4  ;;  %v475_v2 = vsel %vm473_vm6, %v5756_v26, %v9251_v3  ;;  %v570_v26 = vsel %vm8990_vm7, %v9255_v18, %v9254_v38  ;;  %v476_v31 = vsel %vm473_vm6, %v9251_v3, %v5764_v28  ;;  %vm9273_vm6 = vcmask 244736   ;;  %s9015_s4 = smov 64  }
 0x2c8   :  { %v483_v44 = vmul.f32 %v475_v2, %v460_v51  ;;  %v578_v41 = vmul.f32 %v570_v26, %v555_v9  ;;  %v456_v21 = vadd.f32 %v452_v50, %v424_v58  ;;  %v1420_v51 = vsel %vm1416_vm2, %v6276_v36, %v6281_v47  ;;  %v524_v2 = vld [vmem:[#allocation8 + $0xc8] sm:$0xff]  ;;  %v1437_v26 = vld [vmem:[#allocation8 + $0x478] sm:$0xff] }
 0x2c9   :  { %v6315_v37 = vpop.permute.xlu0 %1442  ;;  %v6320_v16 = vpop.permute.xlu1 %1444  ;;  %v610_v28 = vmul.f32 %v602_v43, %v587_v22  ;;  %v484_v3 = vmul.f32 %v476_v31, %v461_v25  ;;  %v539_v50 = vsel %vm8996_vm8, %v9248_v59, %v9260_v23  ;;  %v516_v33 = vmul.f32 %v508_v24, %v493_v56  ;;  %v9263_v22 = vld [vmem:[#allocation49_spill] sm:$0xff]  ;;  %v9264_v43 = vld [vmem:[#allocation27_spill] sm:$0xff]  ;;  %v651_v25 = vld [vmem:[#allocation8 + $0x140] sm:$0xff] }
 0x2ca   :  { %9250 = vst [vmem:[#allocation46_spill] sm:$0xff] %v6315_v37  ;;  %9252 = vst [vmem:[#allocation24_spill] sm:$0xff] %v6320_v16  ;;  %v1405_v37 = vld [vmem:[#allocation8 + $0x458] sm:$0xff]  ;;  %v487_v27 = vadd.f32 %v483_v44, %v455_v60  ;;  %v571_v47 = vsel %vm8990_vm7, %v9254_v38, %v9261_v61  ;;  %v619_v60 = vld [vmem:[#allocation8 + $0x120] sm:$0xff]  ;;  %v634_v58 = vsel %vm633_vm9, %v9264_v43, %v9263_v22 }
 0x2cb   :  { %1822 = vrot.lane.b32.xlu0 %v5550_v29, %s5354_s16  ;;  %1824 = vrot.lane.b32.xlu1 %v5674_v4, %s5354_s16  ;;  %v9265_v31 = vld [vmem:[#allocation52_spill] sm:$0xff]  ;;  %v9266_v59 = vld [vmem:[#allocation30_spill] sm:$0xff]  ;;  %v1428_v24 = vmul.f32 %v1420_v51, %v1405_v37  ;;  %v582_v38 = vadd.f32 %v578_v41, %v550_v17  ;;  %v547_v43 = vmul.f32 %v539_v50, %v524_v2 }
 0x2cc   :  { %v666_v44 = vsel %vm8989_vm12, %v9266_v59, %v9265_v31  ;;  %v519_v56 = vadd.f32 %v515_v10, %v487_v27  ;;  %v572_v59 = vsel %vm8990_vm7, %v9261_v61, %v5778_v34  ;;  %v579_v10 = vmul.f32 %v571_v47, %v556_v49  ;;  %v588_v34 = vld [vmem:[#allocation8 + $0x108] sm:$0xff]  ;;  %v9267_v49 = vld [vmem:[#allocation68_spill] sm:$0xff] }
 0x2cd   :  { %v6338_v20 = vpop.permute.xlu0 %4946  ;;  %v6344_v18 = vpop.permute.xlu1 %1470  ;;  %v642_v41 = vmul.f32 %v634_v58, %v619_v60  ;;  %v614_v17 = vadd.f32 %v610_v28, %v582_v38  ;;  %v603_v61 = vsel %vm601_vm10, %v9256_v40, %v9267_v49 }
 0x2ce   :  { %9258 = vst [vmem:[#allocation48_spill] sm:$0xff] %v6338_v20  ;;  %v4948_v30 = vunpack.i.l.bf16 %v6338_v20  ;;  %9259 = vst [vmem:[#allocation45_spill] sm:$0xff] %v6344_v18  ;;  %v488_v18 = vadd.f32 %v484_v3, %v456_v21  ;;  %v674_v21 = vmul.f32 %v666_v44, %v651_v25  ;;  %v1469_v3 = vld [vmem:[#allocation8 + $0x498] sm:$0xff]  ;;  %v551_v2 = vadd.f32 %v547_v43, %v519_v56  ;;  %v621_v44 = vld [vmem:[#allocation8 + $0x130] sm:$0xff] }
 0x2cf   :  { %1826 = vrot.lane.b32.xlu0 %v5556_v32, %s5354_s16  ;;  %1828 = vrot.lane.b32.xlu1 %v5680_v7, %s5354_s16  ;;  %v646_v60 = vadd.f32 %v642_v41, %v614_v17  ;;  %v611_v25 = vmul.f32 %v603_v61, %v588_v34  ;;  %v9269_v43 = vld [vmem:[#allocation51_spill] sm:$0xff]  ;;  %v9271_v17 = vld [vmem:[#allocation54_spill] sm:$0xff] }
 0x2d0   :  { %v1452_v19 = vsel %vm1448_vm4, %v6320_v16, %v4948_v30  ;;  %v525_v30 = vld [vmem:[#allocation8 + $0xd0] sm:$0xff]  ;;  %v520_v51 = vadd.f32 %v516_v33, %v488_v18  ;;  %v9274_v34 = vld [vmem:[#allocation70_spill] sm:$0xff]  ;;  %v684_v61 = vld [vmem:[#allocation8 + $0x168] sm:$0xff] }
 0x2d1   :  { %v6361_v9 = vpop.permute.xlu0 %1472  ;;  %v6369_v20 = vpop.permute.xlu1 %1474  ;;  %v557_v16 = vld [vmem:[#allocation8 + $0xf0] sm:$0xff]  ;;  %v1460_v37 = vmul.f32 %v1452_v19, %v1437_v26  ;;  %v620_v19 = vld [vmem:[#allocation8 + $0x128] sm:$0xff]  ;;  %v678_v41 = vadd.f32 %v674_v21, %v646_v60 }
 0x2d2   :  { %9262 = vst [vmem:[#allocation65_spill] sm:$0xff] %v6361_v9  ;;  %v540_v9 = vsel %vm8996_vm8, %v9260_v23, %v5780_v35  ;;  %v1432_v23 = vadd.f32 %v1428_v24, %v6254_v52  ;;  %v580_v47 = vmul.f32 %v572_v59, %v557_v16  ;;  %v9268_v26 = vld [vmem:[#allocation71_spill] sm:$0xff]  ;;  %v583_v52 = vadd.f32 %v579_v10, %v551_v2  ;;  %v9270_v59 = vld [vmem:[#allocation29_spill] sm:$0xff]  ;;  %v715_v2 = vld [vmem:[#allocation8 + $0x180] sm:$0xff] }
 0x2d3   :  { %1830 = vrot.lane.b32.xlu0 %v9185_v8, %s5354_s16  ;;  %1854 = vrot.lane.b32.xlu1 %v5550_v29, %s5355_s19  ;;  %v548_v27 = vmul.f32 %v540_v9, %v525_v30  ;;  %v635_v18 = vsel %vm633_vm9, %v9263_v22, %v9268_v26  ;;  %v604_v16 = vsel %vm601_vm10, %v9267_v49, %v5796_v42  ;;  %v589_v22 = vld [vmem:[#allocation8 + $0x110] sm:$0xff]  ;;  %v683_v42 = vld [vmem:[#allocation8 + $0x160] sm:$0xff]  ;;  %vm9278_vm10 = vcmask 236544   ;;  %s9009_s16 = smov 61  }
 0x2d4   :  { %v1464_v33 = vadd.f32 %v1460_v37, %v1432_v23  ;;  %v636_v56 = vsel %vm633_vm9, %v9268_v26, %v5794_v39  ;;  %v643_v24 = vmul.f32 %v635_v18, %v620_v19  ;;  %v698_v10 = vsel %vm697_vm11, %v9270_v59, %v9269_v43  ;;  %v1885_v39 = vld [vmem:[%s8880_s6] sm:$0xff]  ;;  %s5356_s6 = smov 76   ;;  %v747_v59 = vld [vmem:[#allocation8 + $0x1a0] sm:$0xff] }
 0x2d5   :  { %v6381_v35 = vpop.permute.xlu0 %1476  ;;  %v1479_v50 = vpop.permute.xlu1 %1478  ;;  %v552_v40 = vadd.f32 %v548_v27, %v520_v51  ;;  %v9272_v51 = vld [vmem:[#allocation32_spill] sm:$0xff]  ;;  %v615_v27 = vadd.f32 %v611_v25, %v583_v52  ;;  %v612_v23 = vmul.f32 %v604_v16, %v589_v22  ;;  %v667_v49 = vsel %vm8989_vm12, %v9265_v31, %v9274_v34  ;;  %v1501_v25 = vld [vmem:[#allocation8 + $0x4b8] sm:$0xff] }
 0x2d6   :  { %v1484_v28 = vsel %vm1480_vm5, %v6381_v35, %v1479_v50  ;;  %v652_v50 = vld [vmem:[#allocation8 + $0x148] sm:$0xff]  ;;  %v644_v21 = vmul.f32 %v636_v56, %v621_v44  ;;  %v700_v16 = vsel %vm697_vm11, %v5967_v6, %v5810_v45  ;;  %v9275_v44 = vld [vmem:[#allocation34_spill] sm:$0xff]  ;;  %vm1512_vm9 = vcmask 793600  }
 0x2d7   :  { %1856 = vrot.lane.b32.xlu0 %v5674_v4, %s5355_s19  ;;  %v1492_v9 = vmul.f32 %v1484_v28, %v1469_v3  ;;  %1858 = vrot.lane.b32.xlu1 %v5556_v32, %s5355_s19  ;;  %v584_v37 = vadd.f32 %v580_v47, %v552_v40  ;;  %v730_v3 = vsel %vm9273_vm6, %v9272_v51, %v9271_v17  ;;  %v685_v40 = vld [vmem:[#allocation8 + $0x170] sm:$0xff]  ;;  %v4923_v56 = vunpack.i.l.bf16 %v9275_v44 }
 0x2d8   :  { %v699_v47 = vsel %vm697_vm11, %v9269_v43, %v5967_v6  ;;  %v647_v26 = vadd.f32 %v643_v24, %v615_v27  ;;  %v706_v28 = vmul.f32 %v698_v10, %v683_v42  ;;  %v738_v31 = vmul.f32 %v730_v3, %v715_v2  ;;  %v9276_v10 = vld [vmem:[#allocation53_spill] sm:$0xff]  ;;  %v716_v27 = vld [vmem:[#allocation8 + $0x188] sm:$0xff]  ;;  %vm9280_vm11 = vmmov %vm9273_vm6 }
 0x2d9   :  { %v6399_v58 = vpop.permute.xlu0 %1502  ;;  %v1496_v38 = vadd.f32 %v1492_v9, %v1464_v33  ;;  %v6404_v30 = vpop.permute.xlu1 %1504  ;;  %v616_v52 = vadd.f32 %v612_v23, %v584_v37  ;;  %v653_v33 = vld [vmem:[#allocation8 + $0x150] sm:$0xff]  ;;  %v668_v9 = vsel %vm8989_vm12, %v9274_v34, %v5812_v48  ;;  %v675_v60 = vmul.f32 %v667_v49, %v652_v50  ;;  %v9277_v37 = vld [vmem:[#allocation31_spill] sm:$0xff]  ;;  %vm9281_vm6 = vmmov %vm9278_vm10 }
 0x2da   :  { %v707_v22 = vmul.f32 %v699_v47, %v684_v61  ;;  %v710_v24 = vadd.f32 %v706_v28, %v678_v41  ;;  %v762_v42 = vsel %vm9278_vm10, %v9277_v37, %v9276_v10  ;;  %v676_v51 = vmul.f32 %v668_v9, %v653_v33  ;;  %v748_v23 = vld [vmem:[#allocation8 + $0x1a8] sm:$0xff]  ;;  %v9282_v61 = vld [vmem:[#allocation56_spill] sm:$0xff] }
 0x2db   :  { %1860 = vrot.lane.b32.xlu0 %v5680_v7, %s5355_s19  ;;  %4971 = vrot.lane.b32.xlu1 %v9185_v8, %s5355_s19  ;;  %v648_v43 = vadd.f32 %v644_v21, %v616_v52  ;;  %v679_v3 = vadd.f32 %v675_v60, %v647_v26  ;;  %v708_v2 = vmul.f32 %v700_v16, %v685_v40  ;;  %v779_v21 = vld [vmem:[#allocation8 + $0x1c0] sm:$0xff]  ;;  %vm9283_vm10 = vcmask 154624   ;;  %v749_v16 = vld [vmem:[#allocation8 + $0x1b0] sm:$0xff] }
 0x2dc   :  { %v763_v50 = vsel %vm9281_vm6, %v9276_v10, %v5988_v55  ;;  %v742_v49 = vadd.f32 %v738_v31, %v710_v24  ;;  %v794_v47 = vsel %vm9283_vm10, %v4923_v56, %v9282_v61  ;;  %v770_v28 = vmul.f32 %v762_v42, %v747_v59  ;;  %v780_v59 = vld [vmem:[#allocation8 + $0x1c8] sm:$0xff]  ;;  %v9284_v10 = vld [vmem:[#allocation73_spill] sm:$0xff] }
 0x2dd   :  { %v6425_v19 = vpop.permute.xlu0 %1506  ;;  %v6427_v18 = vpop.permute.xlu1 %1508  ;;  %v711_v26 = vadd.f32 %v707_v22, %v679_v3  ;;  %v680_v52 = vadd.f32 %v676_v51, %v648_v43  ;;  %v764_v31 = vsel %vm9281_vm6, %v5988_v55, %v5826_v53  ;;  %v802_v22 = vmul.f32 %v794_v47, %v779_v21  ;;  %v812_v42 = vld [vmem:[#allocation8 + $0x1e8] sm:$0xff]  ;;  %v9288_v55 = vld [vmem:[#allocation33_spill] sm:$0xff] }
 0x2de   :  { %v795_v37 = vsel %vm9283_vm10, %v9282_v61, %v9284_v10  ;;  %v9285_v51 = vld [vmem:[#allocation75_spill] sm:$0xff]  ;;  %vm9293_vm10 = vcmask 138240   ;;  %v781_v61 = vld [vmem:[#allocation8 + $0x1d0] sm:$0xff] }
 0x2df   :  { %1888 = vperm.xlu0 %4914, %v1885_v39   ;;  %4976 = vrot.lane.b32.xlu1 %v9185_v8, %s5356_s6  ;;  %v9279_v39 = vld [vmem:[#allocation72_spill] sm:$0xff]  ;;  %v712_v24 = vadd.f32 %v708_v2, %v680_v52  ;;  %v9286_v3 = vld [vmem:[#allocation55_spill] sm:$0xff]  ;;  %v811_v2 = vld [vmem:[#allocation8 + $0x1e0] sm:$0xff] }
 0x2e0   :  { %v731_v41 = vsel %vm9280_vm11, %v9271_v17, %v9279_v39  ;;  %v717_v17 = vld [vmem:[#allocation8 + $0x190] sm:$0xff]  ;;  %v732_v60 = vsel %vm9280_vm11, %v9279_v39, %v5828_v54  ;;  %v772_v54 = vmul.f32 %v764_v31, %v749_v16  ;;  %vm9287_vm11 = vcmask 146432   ;;  %v9295_v16 = vld [vmem:[#allocation37_spill] sm:$0xff]  ;;  %v1338_v8 = vld [vmem:[#allocation8 + $0x400] sm:$0xff] }
 0x2e1   :  { %v1511_v48 = vpop.permute.xlu0 %1510  ;;  %v6443_v6 = vpop.permute.xlu1 %1534  ;;  %v739_v40 = vmul.f32 %v731_v41, %v716_v27  ;;  %vm9289_vm6 = vmmov %vm9287_vm11  ;;  %v813_v52 = vld [vmem:[#allocation8 + $0x1f0] sm:$0xff]  ;;  %v4928_v31 = vunpack.i.l.bf16 %v9295_v16 }
 0x2e2   :  { %v1516_v45 = vsel %vm1512_vm9, %v6427_v18, %v1511_v48  ;;  %v740_v48 = vmul.f32 %v732_v60, %v717_v17  ;;  %v826_v27 = vsel %vm9289_vm6, %v9288_v55, %v9286_v3  ;;  %v828_v17 = vsel %vm9289_vm6, %v9285_v51, %v5842_v63 }
 0x2e3   :  { %v1524_v34 = vmul.f32 %v1516_v45, %v1501_v25  ;;  %v771_v25 = vmul.f32 %v763_v50, %v748_v23  ;;  %v743_v43 = vadd.f32 %v739_v40, %v711_v26  ;;  %v827_v45 = vsel %vm9287_vm11, %v9286_v3, %v9285_v51  ;;  %v843_v50 = vld [vmem:[#allocation8 + $0x200] sm:$0xff] }
 0x2e4   :  { %vm9294_vm11 = vcmask 154624   ;;  %v744_v26 = vadd.f32 %v740_v48, %v712_v24  ;;  %v835_v60 = vmul.f32 %v827_v45, %v812_v42  ;;  %v844_v24 = vld [vmem:[#allocation8 + $0x208] sm:$0xff]  ;;  %v9296_v48 = vld [vmem:[#allocation74_spill] sm:$0xff]  ;;  %v836_v63 = vmul.f32 %v828_v17, %v813_v52  ;;  %v9298_v42 = vld [vmem:[#allocation57_spill] sm:$0xff] }
 0x2e5   :  { %v6453_v33 = vadd.f32 %v1524_v34, %v1496_v38  ;;  %v6455_v9 = vpop.permute.xlu0 %1536  ;;  %v6463_v56 = vpop.permute.xlu1 %1538  ;;  %v774_v38 = vadd.f32 %v770_v28, %v742_v49  ;;  %v775_v39 = vadd.f32 %v771_v25, %v743_v43  ;;  %v9291_v34 = vld [vmem:[#allocation58_spill] sm:$0xff]  ;;  %v796_v47 = vsel %vm9294_vm11, %v9284_v10, %v5844_v1  ;;  %v876_v10 = vld [vmem:[#allocation8 + $0x228] sm:$0xff] }
 0x2e6   :  { %v9292_v49 = vld [vmem:[#allocation38_spill] sm:$0xff]  ;;  %v803_v28 = vmul.f32 %v795_v37, %v780_v59  ;;  %v776_v25 = vadd.f32 %v772_v54, %v744_v26  ;;  %v804_v3 = vmul.f32 %v796_v47, %v781_v61  ;;  %v859_v59 = vsel %vm9293_vm10, %v9291_v34, %v9296_v48  ;;  %v9297_v37 = vld [vmem:[#allocation77_spill] sm:$0xff]  ;;  %v845_v47 = vld [vmem:[#allocation8 + $0x210] sm:$0xff] }
 0x2e7   :  { %v806_v23 = vadd.f32 %v802_v22, %v774_v38  ;;  %v858_v21 = vsel %vm9293_vm10, %v9292_v49, %v9291_v34  ;;  %v834_v38 = vmul.f32 %v826_v27, %v811_v2  ;;  %vm9299_vm11 = vcmask 130048   ;;  %v875_v2 = vld [vmem:[#allocation8 + $0x220] sm:$0xff]  ;;  %v9302_v34 = vld [vmem:[#allocation40_spill] sm:$0xff] }
 0x2e8   :  { %v866_v43 = vmul.f32 %v858_v21, %v843_v50  ;;  %v807_v55 = vadd.f32 %v803_v28, %v775_v39  ;;  %v891_v51 = vsel %vm9299_vm11, %v9298_v42, %v9297_v37  ;;  %vm1544_vm6 = vcmask 785408   ;;  %v1533_v39 = vld [vmem:[#allocation8 + $0x4d8] sm:$0xff]  ;;  %vm9300_vm12 = vmmov %vm9299_vm11  ;;  %v907_v49 = vld [vmem:[#allocation8 + $0x240] sm:$0xff] }
 0x2e9   :  { %v6471_v53 = vpop.permute.xlu0 %1540  ;;  %v6476_v41 = vpop.permute.xlu1 %4951  ;;  %v838_v54 = vadd.f32 %v834_v38, %v806_v23  ;;  %v890_v50 = vsel %vm9300_vm12, %v4928_v31, %v9298_v42  ;;  %v9301_v21 = vld [vmem:[#allocation60_spill] sm:$0xff]  ;;  %vm9303_vm10 = vcmask 121856   ;;  %vm9304_vm11 = vcmask 138240   ;;  %vm9305_vm7 = vmmov %vm9300_vm12 }
 0x2ea   :  { %9290 = vst [vmem:[#allocation67_spill] sm:$0xff] %v6476_v41  ;;  %v4953_v40 = vunpack.i.l.bf16 %v6476_v41  ;;  %v839_v45 = vadd.f32 %v835_v60, %v807_v55  ;;  %v922_v61 = vsel %vm9303_vm10, %v9302_v34, %v9301_v21  ;;  %v860_v26 = vsel %vm9304_vm11, %v9296_v48, %v5860_v15  ;;  %v877_v60 = vld [vmem:[#allocation8 + $0x230] sm:$0xff]  ;;  %v9306_v55 = vld [vmem:[#allocation42_spill] sm:$0xff]  ;;  %v908_v48 = vld [vmem:[#allocation8 + $0x248] sm:$0xff] }
 0x2eb   :  { %v808_v23 = vadd.f32 %v804_v3, %v776_v25  ;;  %v870_v52 = vadd.f32 %v866_v43, %v838_v54  ;;  %v867_v17 = vmul.f32 %v859_v59, %v844_v24  ;;  %v899_v31 = vmul.f32 %v891_v51, %v876_v10  ;;  %v1565_v3 = vld [vmem:[#allocation8 + $0x4f8] sm:$0xff]  ;;  %v9307_v43 = vld [vmem:[#allocation76_spill] sm:$0xff]  ;;  %vm9308_vm12 = vmmov %vm9303_vm10 }
 0x2ec   :  { %v1548_v27 = vsel %vm1544_vm6, %v6471_v53, %v4953_v40  ;;  %v892_v40 = vsel %vm9305_vm7, %v9297_v37, %v5858_v0  ;;  %v4933_v42 = vunpack.i.l.bf16 %v9306_v55  ;;  %v898_v41 = vmul.f32 %v890_v50, %v875_v2  ;;  %v940_v54 = vld [vmem:[#allocation8 + $0x268] sm:$0xff]  ;;  %v939_v50 = vld [vmem:[#allocation8 + $0x260] sm:$0xff] }
 0x2ed   :  { %v6489_v22 = vpop.permute.xlu0 %1566  ;;  %v6491_v1 = vpop.permute.xlu1 %1568  ;;  %v840_v34 = vadd.f32 %v836_v63, %v808_v23  ;;  %v1556_v7 = vmul.f32 %v1548_v27, %v1533_v39  ;;  %v930_v16 = vmul.f32 %v922_v61, %v907_v49  ;;  %v868_v15 = vmul.f32 %v860_v26, %v845_v47  ;;  %v9309_v0 = vld [vmem:[#allocation59_spill] sm:$0xff]  ;;  %v971_v49 = vld [vmem:[#allocation8 + $0x280] sm:$0xff] }
 0x2ee   :  { %v871_v25 = vadd.f32 %v867_v17, %v839_v45  ;;  %v923_v24 = vsel %vm9308_vm12, %v9301_v21, %v9307_v43  ;;  %v900_v59 = vmul.f32 %v892_v40, %v877_v60  ;;  %vm9310_vm7 = vcmask 113664   ;;  %v9311_v63 = vld [vmem:[#allocation39_spill] sm:$0xff]  ;;  %v9313_v21 = vld [vmem:[#allocation62_spill] sm:$0xff]  ;;  %v909_v17 = vld [vmem:[#allocation8 + $0x250] sm:$0xff] }
 0x2ef   :  { %v955_v10 = vsel %vm9310_vm7, %v9309_v0, %v6031_v62  ;;  %vm1576_vm10 = vcmask 777216   ;;  %vm9312_vm11 = vmmov %vm9310_vm7  ;;  %v902_v27 = vadd.f32 %v898_v41, %v870_v52  ;;  %v986_v61 = vsel %vm985_vm14, %v4933_v42, %v9313_v21  ;;  %v941_v60 = vld [vmem:[#allocation8 + $0x270] sm:$0xff] }
 0x2f0   :  { %v954_v51 = vsel %vm9312_vm11, %v9311_v63, %v9309_v0  ;;  %v903_v45 = vadd.f32 %v899_v31, %v871_v25  ;;  %v872_v47 = vadd.f32 %v868_v15, %v840_v34  ;;  %v1560_v26 = vadd.f32 %v1556_v7, %v6453_v33  ;;  %v9314_v34 = vld [vmem:[#allocation41_spill] sm:$0xff] }
 0x2f1   :  { %v6509_v28 = vpop.permute.xlu0 %1570  ;;  %v6514_v38 = vpop.permute.xlu1 %1572  ;;  %v924_v41 = vsel %vm9308_vm12, %v9307_v43, %v5876_v14  ;;  %v931_v52 = vmul.f32 %v923_v24, %v908_v48  ;;  %v956_v40 = vsel %vm9310_vm7, %v6031_v62, %v5874_v11  ;;  %v963_v31 = vmul.f32 %v955_v10, %v940_v54  ;;  %v972_v48 = vld [vmem:[#allocation8 + $0x288] sm:$0xff]  ;;  %v1003_v54 = vld [vmem:[#allocation8 + $0x2a0] sm:$0xff] }
 0x2f2   :  { %v934_v25 = vadd.f32 %v930_v16, %v902_v27  ;;  %v904_v0 = vadd.f32 %v900_v59, %v872_v47  ;;  %v4938_v7 = vunpack.i.l.bf16 %v9314_v34  ;;  %v962_v33 = vmul.f32 %v954_v51, %v939_v50  ;;  %v1004_v62 = vld [vmem:[#allocation8 + $0x2a8] sm:$0xff]  ;;  %v9315_v16 = vld [vmem:[#allocation61_spill] sm:$0xff]  ;;  %v973_v27 = vld [vmem:[#allocation8 + $0x290] sm:$0xff] }
 0x2f3   :  { %v994_v15 = vmul.f32 %v986_v61, %v971_v49  ;;  %v932_v14 = vmul.f32 %v924_v41, %v909_v17  ;;  %v987_v43 = vsel %vm985_vm14, %v9313_v21, %v6029_v46  ;;  %v964_v11 = vmul.f32 %v956_v40, %v941_v60  ;;  %v1597_v49 = vld [vmem:[#allocation8 + $0x518] sm:$0xff]  ;;  %v1005_v61 = vld [vmem:[#allocation8 + $0x2b0] sm:$0xff]  ;;  %v1035_v41 = vld [vmem:[#allocation8 + $0x2c0] sm:$0xff] }
 0x2f4   :  { %v1019_v24 = vsel %vm8994_vm0, %v9315_v16, %v6047_v12  ;;  %v1018_v10 = vsel %vm8994_vm0, %v4938_v7, %v9315_v16  ;;  %v966_v51 = vadd.f32 %v962_v33, %v934_v25  ;;  %v995_v21 = vmul.f32 %v987_v43, %v972_v48  ;;  %v9317_v60 = vld [vmem:[#allocation44_spill] sm:$0xff]  ;;  %v1036_v33 = vld [vmem:[#allocation8 + $0x2c8] sm:$0xff] }
 0x2f5   :  { %v1575_v37 = vpop.permute.xlu0 %1574  ;;  %v6528_v2 = vpop.permute.xlu1 %1598  ;;  %v1020_v47 = vsel %vm8994_vm0, %v6047_v12, %v5886_v13  ;;  %vm1608_vm11 = vcmask 769024   ;;  %vm9318_vm12 = vcmask 15360   ;;  %v9322_v48 = vld [vmem:[#allocation43_spill] sm:$0xff]  ;;  %vm9323_vm0 = vcmask 7168  }
 0x2f6   :  { %v1580_v39 = vsel %vm1576_vm10, %v6514_v38, %v1575_v37  ;;  %v998_v17 = vadd.f32 %v994_v15, %v966_v51  ;;  %vm9320_vm7 = vmmov %vm9318_vm12  ;;  %v1028_v12 = vmul.f32 %v1020_v47, %v1005_v61  ;;  %v1067_v15 = vld [vmem:[#allocation8 + $0x2e0] sm:$0xff]  ;;  %v1275_v34 = vld [vmem:[#allocation8 + $0x3c8] sm:$0xff] }
 0x2f7   :  { %v1588_v23 = vmul.f32 %v1580_v39, %v1565_v3  ;;  %v935_v3 = vadd.f32 %v931_v52, %v903_v45  ;;  %v988_v45 = vsel %vm985_vm14, %v6029_v46, %v5888_v5  ;;  %v936_v39 = vadd.f32 %v932_v14, %v904_v0  ;;  %v9316_v52 = vld [vmem:[#allocation63_spill] sm:$0xff] }
 0x2f8   :  { %v1050_v40 = vsel %vm9318_vm12, %v9317_v60, %v9316_v52  ;;  %v996_v25 = vmul.f32 %v988_v45, %v973_v27  ;;  %v9321_v14 = vld [vmem:[#allocation79_spill] sm:$0xff]  ;;  %vm9325_vm12 = vmmov %vm9323_vm0  ;;  %v9326_v45 = vld [vmem:[#allocation64_spill] sm:$0xff] }
 0x2f9   :  { %v1592_v37 = vadd.f32 %v1588_v23, %v1560_v26  ;;  %v6539_v42 = vpop.permute.xlu0 %1600  ;;  %v6542_v63 = vpop.permute.xlu1 %1602  ;;  %v967_v59 = vadd.f32 %v963_v31, %v935_v3  ;;  %v1027_v26 = vmul.f32 %v1019_v24, %v1004_v62  ;;  %v968_v5 = vadd.f32 %v964_v11, %v936_v39  ;;  %v9319_v3 = vld [vmem:[#allocation78_spill] sm:$0xff]  ;;  %v1068_v62 = vld [vmem:[#allocation8 + $0x2e8] sm:$0xff]  ;;  %v9324_v11 = vld [vmem:[#allocation80_spill] sm:$0xff] }
 0x2fa   :  { %v1026_v31 = vmul.f32 %v1018_v10, %v1003_v54  ;;  %v1051_v13 = vsel %vm9320_vm7, %v9316_v52, %v9319_v3  ;;  %v1082_v43 = vsel %vm9323_vm0, %v9322_v48, %v9321_v14  ;;  %v1083_v16 = vsel %vm9325_vm12, %v9321_v14, %v9324_v11  ;;  %v1069_v52 = vld [vmem:[#allocation8 + $0x2f0] sm:$0xff]  ;;  %v1113_v14 = vld [vmem:[#allocation8 + $0x328] sm:$0xff] }
 0x2fb   :  { %v999_v0 = vadd.f32 %v995_v21, %v967_v59  ;;  %v1058_v59 = vmul.f32 %v1050_v40, %v1035_v41  ;;  %v1052_v39 = vsel %vm9320_vm7, %v9319_v3, %v9326_v45  ;;  %v1037_v21 = vld [vmem:[#allocation8 + $0x2d0] sm:$0xff]  ;;  %v1059_v61 = vmul.f32 %v1051_v13, %v1036_v33  ;;  %v1112_v33 = vld [vmem:[#allocation8 + $0x320] sm:$0xff]  ;;  %v9328_v13 = vld [vmem:[#allocation81_spill] sm:$0xff] }
 0x2fc   :  { %v1030_v27 = vadd.f32 %v1026_v31, %v998_v17  ;;  %v1090_v47 = vmul.f32 %v1082_v43, %v1067_v15  ;;  %v1084_v41 = vsel %vm9323_vm0, %v9324_v11, %v6072_v57  ;;  %v9327_v3 = vld [vmem:[#allocation82_spill] sm:$0xff]  ;;  %vm9329_vm12 = vcmask 1039360   ;;  %v9330_v57 = vld [vmem:[#allocation83_spill] sm:$0xff]  ;;  %v1101_v43 = vld [vmem:[#allocation8 + $0x310] sm:$0xff] }
 0x2fd   :  { %v6555_v50 = vpop.permute.xlu0 %1604  ;;  %v1607_v23 = vpop.permute.xlu1 %1606  ;;  %v1031_v54 = vadd.f32 %v1027_v26, %v999_v0  ;;  %v1092_v31 = vmul.f32 %v1084_v41, %v1069_v52  ;;  %v1099_v0 = vld [vmem:[#allocation8 + $0x300] sm:$0xff]  ;;  %v1129_v15 = vsel %vm9329_vm12, %v9328_v13, %v9327_v3  ;;  %vm9331_vm7 = vmmov %vm9329_vm12  ;;  %vm9337_vm12 = vcmask 1031168   ;;  %v1147_v41 = vld [vmem:[#allocation8 + $0x348] sm:$0xff] }
 0x2fe   :  { %v1612_v46 = vsel %vm1608_vm11, %v6555_v50, %v1607_v23  ;;  %v1091_v23 = vmul.f32 %v1083_v16, %v1068_v62  ;;  %v1062_v60 = vadd.f32 %v1058_v59, %v1030_v27  ;;  %v1103_v11 = vmul.f32 %v1099_v0, %v5550_v29  ;;  %v1114_v59 = vld [vmem:[#allocation8 + $0x330] sm:$0xff]  ;;  %vm9334_vm0 = vmmov %vm9331_vm7  ;;  %v1146_v45 = vld [vmem:[#allocation8 + $0x340] sm:$0xff] }
 0x2ff   :  { %v1620_v7 = vmul.f32 %v1612_v46, %v1597_v49  ;;  %v1000_v49 = vadd.f32 %v996_v25, %v968_v5  ;;  %v1063_v40 = vadd.f32 %v1059_v61, %v1031_v54  ;;  %v1060_v46 = vmul.f32 %v1052_v39, %v1037_v21  ;;  %v1100_v5 = vld [vmem:[#allocation8 + $0x308] sm:$0xff]  ;;  %v9333_v54 = vld [vmem:[#allocation84_spill] sm:$0xff]  ;;  %v9335_v39 = vld [vmem:[#allocation86_spill] sm:$0xff] }
 0x300   :  { %v1094_v25 = vadd.f32 %v1090_v47, %v1062_v60  ;;  %v1104_v16 = vmul.f32 %v1100_v5, %v5674_v4  ;;  %v1131_v27 = vsel %vm9334_vm0, %v9330_v57, %v9333_v54  ;;  %v1105_v0 = vmul.f32 %v1101_v43, %v5556_v32  ;;  %v1148_v13 = vld [vmem:[#allocation8 + $0x350] sm:$0xff]  ;;  %v9355_v32 = vld [vmem:[#allocation97_spill] sm:$0xff]  ;;  %v9364_v29 = vld [vmem:[#allocation103_spill] sm:$0xff] }
 0x301   :  { %v6574_v24 = vpop.permute.xlu0 %1630  ;;  %v6576_v10 = vadd.f32 %v1620_v7, %v1592_v37  ;;  %v6578_v51 = vpop.permute.xlu1 %1632  ;;  %v1032_v26 = vadd.f32 %v1028_v12, %v1000_v49  ;;  %v1095_v7 = vadd.f32 %v1091_v23, %v1063_v40  ;;  %v1130_v12 = vsel %vm9331_vm7, %v9327_v3, %v9330_v57  ;;  %v9336_v49 = vld [vmem:[#allocation85_spill] sm:$0xff]  ;;  %vm9339_vm7 = vmmov %vm9337_vm12  ;;  %v9340_v57 = vld [vmem:[#allocation88_spill] sm:$0xff] }
 0x302   :  { %v1161_v21 = vsel %vm9337_vm12, %v9336_v49, %v9335_v39  ;;  %v1137_v23 = vmul.f32 %v1129_v15, %v1112_v33  ;;  %v1138_v52 = vmul.f32 %v1130_v12, %v1113_v14  ;;  %v1107_v40 = vadd.f32 %v1103_v11, %v1094_v25  ;;  %vm9341_vm0 = vmmov %vm9339_vm7  ;;  %v1178_v49 = vld [vmem:[#allocation8 + $0x360] sm:$0xff]  ;;  %v9343_v33 = vld [vmem:[#allocation89_spill] sm:$0xff] }
 0x303   :  { %v1064_v48 = vadd.f32 %v1060_v46, %v1032_v26  ;;  %v9338_v26 = vld [vmem:[#allocation87_spill] sm:$0xff]  ;;  %v1108_v46 = vadd.f32 %v1104_v16, %v1095_v7  ;;  %v1139_v5 = vmul.f32 %v1131_v27, %v1114_v59  ;;  %v1169_v3 = vmul.f32 %v1161_v21, %v1146_v45  ;;  %v9347_v21 = vld [vmem:[#allocation92_spill] sm:$0xff]  ;;  %v9365_v4 = vld [vmem:[#allocation102_spill] sm:$0xff] }
 0x304   :  { %v1162_v60 = vsel %vm9339_vm7, %v9335_v39, %v9338_v26  ;;  %v1163_v54 = vsel %vm9341_vm0, %v9338_v26, %v9340_v57  ;;  %vm9344_vm12 = vcmask 1022976   ;;  %v1141_v25 = vadd.f32 %v1137_v23, %v1107_v40  ;;  %v1179_v11 = vld [vmem:[#allocation8 + $0x368] sm:$0xff]  ;;  %v1180_v39 = vld [vmem:[#allocation8 + $0x370] sm:$0xff]  ;;  %v1210_v57 = vld [vmem:[#allocation8 + $0x380] sm:$0xff] }
 0x305   :  { %v6586_v37 = vpop.permute.xlu0 %1634  ;;  %v6588_v17 = vpop.permute.xlu1 %1636  ;;  %v1096_v47 = vadd.f32 %v1092_v31, %v1064_v48  ;;  %v9342_v31 = vld [vmem:[#allocation90_spill] sm:$0xff]  ;;  %v1170_v12 = vmul.f32 %v1162_v60, %v1147_v41  ;;  %v1142_v7 = vadd.f32 %v1138_v52, %v1108_v46  ;;  %v9345_v16 = vld [vmem:[#allocation91_spill] sm:$0xff]  ;;  %vm9346_vm7 = vmmov %vm9344_vm12  ;;  %v1171_v27 = vmul.f32 %v1163_v54, %v1148_v13 }
 0x306   :  { %v1193_v15 = vsel %vm9344_vm12, %v9343_v33, %v9342_v31  ;;  %v1194_v59 = vsel %vm9346_vm7, %v9342_v31, %v9345_v16  ;;  %vm9348_vm0 = vmmov %vm9346_vm7  ;;  %v9349_v33 = vld [vmem:[#allocation95_spill] sm:$0xff]  ;;  %v9350_v41 = vld [vmem:[#allocation94_spill] sm:$0xff]  ;;  %vm9351_vm12 = vcmask 941056   ;;  %v1173_v52 = vadd.f32 %v1169_v3, %v1141_v25 }
 0x307   :  { %v1109_v43 = vadd.f32 %v1105_v0, %v1096_v47  ;;  %v1201_v45 = vmul.f32 %v1193_v15, %v1178_v49  ;;  %v1195_v26 = vsel %vm9348_vm0, %v9345_v16, %v9347_v21  ;;  %v1225_v60 = vsel %vm9351_vm12, %v9350_v41, %v9349_v33  ;;  %v1211_v0 = vld [vmem:[#allocation8 + $0x388] sm:$0xff]  ;;  %v9352_v31 = vld [vmem:[#allocation96_spill] sm:$0xff]  ;;  %vm9353_vm7 = vmmov %vm9351_vm12 }
 0x308   :  { %v1174_v40 = vadd.f32 %v1170_v12, %v1142_v7  ;;  %v1202_v46 = vmul.f32 %v1194_v59, %v1179_v11  ;;  %v1226_v13 = vsel %vm9353_vm7, %v9349_v33, %v9352_v31  ;;  %v1203_v15 = vmul.f32 %v1195_v26, %v1180_v39  ;;  %v1212_v21 = vld [vmem:[#allocation8 + $0x390] sm:$0xff]  ;;  %vm9356_vm0 = vmmov %vm9353_vm7  ;;  %v1242_v3 = vld [vmem:[#allocation8 + $0x3a0] sm:$0xff] }
 0x309   :  { %v6596_v62 = vpop.permute.xlu0 %4956  ;;  %v6606_v61 = vpop.permute.xlu1 %1662  ;;  %v1143_v23 = vadd.f32 %v1139_v5, %v1109_v43  ;;  %v1233_v16 = vmul.f32 %v1225_v60, %v1210_v57  ;;  %v1227_v5 = vsel %vm9356_vm0, %v9352_v31, %v9355_v32  ;;  %v9357_v25 = vld [vmem:[#allocation99_spill] sm:$0xff]  ;;  %v9358_v12 = vld [vmem:[#allocation98_spill] sm:$0xff]  ;;  %vm9359_vm12 = vcmask 932864   ;;  %v9360_v33 = vld [vmem:[#allocation100_spill] sm:$0xff] }
 0x30a   :  { %9332 = vst [vmem:[#allocation47_spill] sm:$0xff] %v6596_v62  ;;  %v4958_v54 = vunpack.i.l.bf16 %v6596_v62  ;;  %v1257_v7 = vsel %vm9359_vm12, %v9358_v12, %v9357_v25  ;;  %v1205_v11 = vadd.f32 %v1201_v45, %v1173_v52  ;;  %v1243_v59 = vld [vmem:[#allocation8 + $0x3a8] sm:$0xff]  ;;  %vm9361_vm7 = vmmov %vm9359_vm12  ;;  %v1234_v26 = vmul.f32 %v1226_v13, %v1211_v0  ;;  %v1244_v57 = vld [vmem:[#allocation8 + $0x3b0] sm:$0xff] }
 0x30b   :  { %v1175_v43 = vadd.f32 %v1171_v27, %v1143_v23  ;;  %v1258_v41 = vsel %vm9361_vm7, %v9357_v25, %v9360_v33  ;;  %v9362_v60 = vld [vmem:[#allocation101_spill] sm:$0xff]  ;;  %vm9363_vm8 = vmmov %vm9361_vm7  ;;  %v1274_v31 = vld [vmem:[#allocation8 + $0x3c0] sm:$0xff]  ;;  %vm9366_vm0 = vcmask 924672   ;;  %vm1640_vm12 = vcmask 760832  }
 0x30c   :  { %v1259_v32 = vsel %vm9363_vm8, %v9360_v33, %v9362_v60  ;;  %v1289_v12 = vsel %vm9366_vm0, %v9365_v4, %v9364_v29  ;;  %v1206_v45 = vadd.f32 %v1202_v46, %v1174_v40  ;;  %v1235_v23 = vmul.f32 %v1227_v5, %v1212_v21  ;;  %v1629_v25 = vld [vmem:[#allocation8 + $0x538] sm:$0xff]  ;;  %v9369_v4 = vld [vmem:[#allocation104_spill] sm:$0xff]  ;;  %vm9370_vm7 = vmmov %vm9366_vm0 }
 0x30d   :  { %v6618_v14 = vpop.permute.xlu0 %1664  ;;  %v6620_v48 = vpop.permute.xlu1 %1666  ;;  %v1265_v52 = vmul.f32 %v1257_v7, %v1242_v3  ;;  %v1644_v0 = vsel %vm1640_vm12, %v6588_v17, %v4958_v54  ;;  %v1237_v62 = vadd.f32 %v1233_v16, %v1205_v11  ;;  %v1266_v33 = vmul.f32 %v1258_v41, %v1243_v59  ;;  %v1661_v46 = vld [vmem:[#allocation8 + $0x558] sm:$0xff]  ;;  %v1276_v5 = vld [vmem:[#allocation8 + $0x3d0] sm:$0xff]  ;;  %v1306_v11 = vld [vmem:[#allocation8 + $0x3e0] sm:$0xff] }
 0x30e   :  { %vm1672_vm8 = vcmask 678912   ;;  %v1267_v60 = vmul.f32 %v1259_v32, %v1244_v57  ;;  %v1297_v55 = vmul.f32 %v1289_v12, %v1274_v31  ;;  %v1290_v44 = vsel %vm9370_vm7, %v9364_v29, %v9369_v4  ;;  %v9371_v54 = vld [vmem:[#allocation105_spill] sm:$0xff]  ;;  %v9373_v59 = vld [vmem:[#allocation107_spill] sm:$0xff]  ;;  %v9374_v41 = vld [vmem:[#allocation106_spill] sm:$0xff] }
 0x30f   :  { %v1238_v21 = vadd.f32 %v1234_v26, %v1206_v45  ;;  %v1652_v16 = vmul.f32 %v1644_v0, %v1629_v25  ;;  %v1321_v29 = vsel %vm9006_vm15, %v9374_v41, %v9373_v59  ;;  %v1307_v57 = vld [vmem:[#allocation8 + $0x3e8] sm:$0xff]  ;;  %v9375_v32 = vld [vmem:[#allocation108_spill] sm:$0xff]  ;;  %v1298_v12 = vmul.f32 %v1290_v44, %v1275_v34  ;;  %v9377_v25 = vld [vmem:[#allocation109_spill] sm:$0xff] }
 0x310   :  { %v1308_v45 = vld [vmem:[#allocation8 + $0x3f0] sm:$0xff]  ;;  %vm1704_vm7 = vcmask 670720  }
 0x311   :  { %v6631_v47 = vpop.permute.xlu0 %1668  ;;  %v6637_v49 = vpop.permute.xlu1 %4961  ;;  %v1270_v31 = vadd.f32 %v1266_v33, %v1238_v21  ;;  %v1656_v44 = vadd.f32 %v1652_v16, %v6576_v10  ;;  %v1339_v21 = vld [vmem:[#allocation8 + $0x408] sm:$0xff]  ;;  %v9387_v10 = vld [vmem:[#allocation114_spill] sm:$0xff] }
 0x312   :  { %9354 = vst [vmem:[#allocation25_spill] sm:$0xff] %v6637_v49  ;;  %v4963_v39 = vunpack.i.l.bf16 %v6637_v49  ;;  %v1207_v49 = vadd.f32 %v1203_v15, %v1175_v43  ;;  %v1291_v15 = vsel %vm9366_vm0, %v9369_v4, %v9371_v54  ;;  %v1269_v43 = vadd.f32 %v1265_v52, %v1237_v62  ;;  %v1693_v4 = vld [vmem:[#allocation8 + $0x578] sm:$0xff] }
 0x313   :  { %v1299_v0 = vmul.f32 %v1291_v15, %v1276_v5  ;;  %v1329_v54 = vmul.f32 %v1321_v29, %v1306_v11  ;;  %vm9380_vm0 = vcmask 908288   ;;  %v9386_v11 = vld [vmem:[#allocation115_spill] sm:$0xff] }
 0x314   :  { %v1676_v40 = vsel %vm1672_vm8, %v6631_v47, %v4963_v39  ;;  %v1239_v7 = vadd.f32 %v1235_v23, %v1207_v49  ;;  %v1322_v39 = vsel %vm9006_vm15, %v9373_v59, %v9375_v32  ;;  %v1323_v49 = vsel %vm9006_vm15, %v9375_v32, %v9377_v25  ;;  %v9379_v59 = vld [vmem:[#allocation110_spill] sm:$0xff]  ;;  %vm9382_vm15 = vmmov %vm9380_vm0  ;;  %v1372_v25 = vld [vmem:[#allocation8 + $0x430] sm:$0xff] }
 0x315   :  { %v6655_v27 = vpop.permute.xlu0 %1694  ;;  %v6659_v13 = vpop.permute.xlu1 %1696  ;;  %v1684_v62 = vmul.f32 %v1676_v40, %v1661_v46  ;;  %v1301_v52 = vadd.f32 %v1297_v55, %v1269_v43  ;;  %v1330_v41 = vmul.f32 %v1322_v39, %v1307_v57  ;;  %v1331_v34 = vmul.f32 %v1323_v49, %v1308_v45  ;;  %v1340_v55 = vld [vmem:[#allocation8 + $0x410] sm:$0xff]  ;;  %v9383_v40 = vld [vmem:[#allocation113_spill] sm:$0xff]  ;;  %vm9384_vm3 = vmmov %vm9380_vm0 }
 0x316   :  { %9367 = vst [vmem:[#allocation50_spill] sm:$0xff] %v6655_v27  ;;  %9368 = vst [vmem:[#allocation28_spill] sm:$0xff] %v6659_v13  ;;  %v1271_v23 = vadd.f32 %v1267_v60, %v1239_v7  ;;  %v9381_v13 = vld [vmem:[#allocation112_spill] sm:$0xff]  ;;  %v1302_v7 = vadd.f32 %v1298_v12, %v1270_v31  ;;  %v1370_v43 = vld [vmem:[#allocation8 + $0x420] sm:$0xff]  ;;  %v1385_v16 = vsel %vm1384_vm13, %v9387_v10, %v9386_v11 }
 0x317   :  { %v1355_v46 = vsel %vm9384_vm3, %v9381_v13, %v9383_v40  ;;  %v1688_v29 = vadd.f32 %v1684_v62, %v1656_v44  ;;  %v1371_v39 = vld [vmem:[#allocation8 + $0x428] sm:$0xff]  ;;  %v9388_v45 = vld [vmem:[#allocation116_spill] sm:$0xff]  ;;  %v9389_v49 = vld [vmem:[#allocation117_spill] sm:$0xff]  ;;  %v1333_v31 = vadd.f32 %v1329_v54, %v1301_v52  ;;  %vm1736_vm3 = vcmask 662528  }
 0x318   :  { %v1303_v32 = vadd.f32 %v1299_v0, %v1271_v23  ;;  %v1334_v62 = vadd.f32 %v1330_v41, %v1302_v7  ;;  %v1393_v23 = vmul.f32 %v1385_v16, %v1370_v43  ;;  %v9391_v0 = vld [vmem:[#allocation118_spill] sm:$0xff]  ;;  %v1404_v54 = vld [vmem:[#allocation8 + $0x450] sm:$0xff]  ;;  %v9394_v43 = vld [vmem:[#allocation121_spill] sm:$0xff] }
 0x319   :  { %v6669_v3 = vpop.permute.xlu0 %1698  ;;  %v6677_v26 = vpop.permute.xlu1 %1700  ;;  %v9393_v7 = vld [vmem:[#allocation122_spill] sm:$0xff] }
 0x31a   :  { %9372 = vst [vmem:[#allocation66_spill] sm:$0xff] %v6669_v3  ;;  %9376 = vst [vmem:[#allocation69_spill] sm:$0xff] %v6677_v26  ;;  %v9378_v3 = vld [vmem:[#allocation111_spill] sm:$0xff]  ;;  %v1449_v16 = vsel %vm1448_vm4, %v9394_v43, %v9393_v7  ;;  %v1513_v43 = vsel %vm1512_vm9, %v6399_v58, %v6404_v30 }
 0x31b   :  { %v1353_v27 = vsel %vm9380_vm0, %v9379_v59, %v9378_v3  ;;  %v1354_v60 = vsel %vm9382_vm15, %v9378_v3, %v9381_v13  ;;  %v1386_v13 = vsel %vm1384_vm13, %v9386_v11, %v9388_v45  ;;  %v1387_v59 = vsel %vm1384_vm13, %v9388_v45, %v9389_v49  ;;  %v9392_v45 = vld [vmem:[#allocation120_spill] sm:$0xff] }
 0x31c   :  { %v1361_v3 = vmul.f32 %v1353_v27, %v1338_v8  ;;  %v1362_v12 = vmul.f32 %v1354_v60, %v1339_v21  ;;  %v1402_v8 = vld [vmem:[#allocation8 + $0x440] sm:$0xff]  ;;  %v9390_v27 = vld [vmem:[#allocation119_spill] sm:$0xff]  ;;  %v1394_v11 = vmul.f32 %v1386_v13, %v1371_v39  ;;  %v1395_v10 = vmul.f32 %v1387_v59, %v1372_v25  ;;  %v9396_v49 = vld [vmem:[#allocation24_spill] sm:$0xff] }
 0x31d   :  { %v1703_v33 = vpop.permute.xlu0 %1702  ;;  %v6694_v15 = vpop.permute.xlu1 %1726  ;;  %v1417_v44 = vsel %vm1416_vm2, %v9391_v0, %v9390_v27  ;;  %v1418_v52 = vsel %vm1416_vm2, %v9390_v27, %v9392_v45  ;;  %v1419_v41 = vsel %vm1416_vm2, %v9392_v45, %v6276_v36  ;;  %v1435_v13 = vld [vmem:[#allocation8 + $0x468] sm:$0xff]  ;;  %v9395_v25 = vld [vmem:[#allocation46_spill] sm:$0xff]  ;;  %v9397_v27 = vld [vmem:[#allocation65_spill] sm:$0xff]  ;;  %vm1768_vm13 = vcmask 654336  }
 0x31e   :  { %v1708_v5 = vsel %vm1704_vm7, %v6677_v26, %v1703_v33  ;;  %9385 = vst [vmem:[#allocation49_spill] sm:$0xff] %v6694_v15  ;;  %v1363_v33 = vmul.f32 %v1355_v46, %v1340_v55  ;;  %v1403_v26 = vld [vmem:[#allocation8 + $0x448] sm:$0xff]  ;;  %v1366_v21 = vadd.f32 %v1362_v12, %v1334_v62  ;;  %v1425_v55 = vmul.f32 %v1417_v44, %v1402_v8  ;;  %v1434_v46 = vld [vmem:[#allocation8 + $0x460] sm:$0xff]  ;;  %v9398_v0 = vld [vmem:[#allocation45_spill] sm:$0xff] }
 0x31f   :  { %v1716_v57 = vmul.f32 %v1708_v5, %v1693_v4  ;;  %v1335_v4 = vadd.f32 %v1331_v34, %v1303_v32  ;;  %v1365_v34 = vadd.f32 %v1361_v3, %v1333_v31  ;;  %v1426_v32 = vmul.f32 %v1418_v52, %v1403_v26  ;;  %v1436_v3 = vld [vmem:[#allocation8 + $0x470] sm:$0xff]  ;;  %v1466_v26 = vld [vmem:[#allocation8 + $0x480] sm:$0xff]  ;;  %v1467_v45 = vld [vmem:[#allocation8 + $0x488] sm:$0xff] }
 0x320   :  { %v1427_v39 = vmul.f32 %v1419_v41, %v1404_v54  ;;  %v1450_v36 = vsel %vm1448_vm4, %v9393_v7, %v9395_v25  ;;  %v1451_v59 = vsel %vm1448_vm4, %v9395_v25, %v9396_v49  ;;  %v1457_v8 = vmul.f32 %v1449_v16, %v1434_v46  ;;  %v1498_v46 = vld [vmem:[#allocation8 + $0x4a0] sm:$0xff]  ;;  %v1499_v25 = vld [vmem:[#allocation8 + $0x4a8] sm:$0xff] }
 0x321   :  { %v1720_v40 = vadd.f32 %v1716_v57, %v1688_v29  ;;  %v6705_v15 = vpop.permute.xlu0 %1728  ;;  %v6710_v5 = vpop.permute.xlu1 %1730  ;;  %v1367_v60 = vadd.f32 %v1363_v33, %v1335_v4  ;;  %v1725_v57 = vld [vmem:[#allocation8 + $0x598] sm:$0xff]  ;;  %v1397_v12 = vadd.f32 %v1393_v23, %v1365_v34  ;;  %v1398_v33 = vadd.f32 %v1394_v11, %v1366_v21  ;;  %v1468_v11 = vld [vmem:[#allocation8 + $0x490] sm:$0xff]  ;;  %v1530_v49 = vld [vmem:[#allocation8 + $0x4c0] sm:$0xff] }
 0x322   :  { %v1481_v44 = vsel %vm1480_vm5, %v9398_v0, %v9397_v27  ;;  %v1482_v52 = vsel %vm1480_vm5, %v9397_v27, %v6369_v20  ;;  %v1458_v7 = vmul.f32 %v1450_v36, %v1435_v13  ;;  %v1459_v23 = vmul.f32 %v1451_v59, %v1436_v3  ;;  %v1562_v0 = vld [vmem:[#allocation8 + $0x4e0] sm:$0xff] }
 0x323   :  { %v1399_v62 = vadd.f32 %v1395_v10, %v1367_v60  ;;  %v1429_v41 = vadd.f32 %v1425_v55, %v1397_v12  ;;  %v1483_v10 = vsel %vm1480_vm5, %v6369_v20, %v6381_v35  ;;  %v1430_v21 = vadd.f32 %v1426_v32, %v1398_v33  ;;  %v1500_v35 = vld [vmem:[#allocation8 + $0x4b0] sm:$0xff] }
 0x324   :  { %v1489_v55 = vmul.f32 %v1481_v44, %v1466_v26  ;;  %v1490_v13 = vmul.f32 %v1482_v52, %v1467_v45  ;;  %v1514_v20 = vsel %vm1512_vm9, %v6404_v30, %v6425_v19  ;;  %v1515_v32 = vsel %vm1512_vm9, %v6425_v19, %v6427_v18  ;;  %v1531_v30 = vld [vmem:[#allocation8 + $0x4c8] sm:$0xff]  ;;  %v1532_v19 = vld [vmem:[#allocation8 + $0x4d0] sm:$0xff] }
 0x325   :  { %v6721_v29 = vpop.permute.xlu0 %1732  ;;  %v1735_v31 = vpop.permute.xlu1 %1734  ;;  %v1431_v60 = vadd.f32 %v1427_v39, %v1399_v62  ;;  %v1461_v39 = vadd.f32 %v1457_v8, %v1429_v41  ;;  %v1491_v36 = vmul.f32 %v1483_v10, %v1468_v11  ;;  %v1462_v3 = vadd.f32 %v1458_v7, %v1430_v21  ;;  %v1563_v45 = vld [vmem:[#allocation8 + $0x4e8] sm:$0xff]  ;;  %v1594_v10 = vld [vmem:[#allocation8 + $0x500] sm:$0xff] }
 0x326   :  { %v1740_v4 = vsel %vm1736_vm3, %v6721_v29, %v1735_v31  ;;  %v1545_v59 = vsel %vm1544_vm6, %v6443_v6, %v6455_v9  ;;  %v1522_v12 = vmul.f32 %v1514_v20, %v1499_v25  ;;  %v1523_v33 = vmul.f32 %v1515_v32, %v1500_v35 }
 0x327   :  { %v1748_v54 = vmul.f32 %v1740_v4, %v1725_v57  ;;  %v1463_v58 = vadd.f32 %v1459_v23, %v1431_v60  ;;  %v1546_v62 = vsel %vm1544_vm6, %v6455_v9, %v6463_v56  ;;  %v1547_v18 = vsel %vm1544_vm6, %v6463_v56, %v6471_v53  ;;  %v1564_v56 = vld [vmem:[#allocation8 + $0x4f0] sm:$0xff] }
 0x328   :  { %v1493_v8 = vadd.f32 %v1489_v55, %v1461_v39  ;;  %v1494_v26 = vadd.f32 %v1490_v13, %v1462_v3  ;;  %v1553_v6 = vmul.f32 %v1545_v59, %v1530_v49  ;;  %v1577_v44 = vsel %vm1576_vm10, %v6489_v22, %v6491_v1 }
 0x329   :  { %v6740_v34 = vpop.permute.xlu0 %1758  ;;  %v6745_v16 = vadd.f32 %v1748_v54, %v1720_v40  ;;  %v6747_v57 = vpop.permute.xlu1 %1760  ;;  %v1521_v40 = vmul.f32 %v1513_v43, %v1498_v46  ;;  %v1495_v27 = vadd.f32 %v1491_v36, %v1463_v58  ;;  %v1578_v9 = vsel %vm1576_vm10, %v6491_v1, %v6509_v28  ;;  %v1595_v43 = vld [vmem:[#allocation8 + $0x508] sm:$0xff]  ;;  %v1757_v36 = vld [vmem:[#allocation8 + $0x5b8] sm:$0xff] }
 0x32a   :  { %v1554_v54 = vmul.f32 %v1546_v62, %v1531_v30  ;;  %v1555_v41 = vmul.f32 %v1547_v18, %v1532_v19  ;;  %v1579_v53 = vsel %vm1576_vm10, %v6509_v28, %v6514_v38  ;;  %v1526_v23 = vadd.f32 %v1522_v12, %v1494_v26  ;;  %v1596_v38 = vld [vmem:[#allocation8 + $0x510] sm:$0xff]  ;;  %v1658_v19 = vld [vmem:[#allocation8 + $0x540] sm:$0xff] }
 0x32b   :  { %v1525_v52 = vadd.f32 %v1521_v40, %v1493_v8  ;;  %v1527_v11 = vadd.f32 %v1523_v33, %v1495_v27  ;;  %v1609_v22 = vsel %vm1608_vm11, %v6528_v2, %v6539_v42  ;;  %v1585_v60 = vmul.f32 %v1577_v44, %v1562_v0  ;;  %v1628_v30 = vld [vmem:[#allocation8 + $0x530] sm:$0xff]  ;;  %v1659_v27 = vld [vmem:[#allocation8 + $0x548] sm:$0xff]  ;;  %v1789_v0 = vld [vmem:[#allocation8 + $0x5d8] sm:$0xff] }
 0x32c   :  { %v1586_v46 = vmul.f32 %v1578_v9, %v1563_v45  ;;  %v1610_v28 = vsel %vm1608_vm11, %v6539_v42, %v6542_v63  ;;  %v1611_v55 = vsel %vm1608_vm11, %v6542_v63, %v6555_v50  ;;  %v1587_v25 = vmul.f32 %v1579_v53, %v1564_v56  ;;  %v1626_v42 = vld [vmem:[#allocation8 + $0x520] sm:$0xff]  ;;  %v1627_v63 = vld [vmem:[#allocation8 + $0x528] sm:$0xff]  ;;  %v9400_v56 = vld [vmem:[#allocation28_spill] sm:$0xff] }
 0x32d   :  { %v6758_v31 = vpop.permute.xlu0 %1762  ;;  %v6766_v4 = vpop.permute.xlu1 %1764  ;;  %v1557_v13 = vadd.f32 %v1553_v6, %v1525_v52  ;;  %v1558_v2 = vadd.f32 %v1554_v54, %v1526_v23  ;;  %v1559_v20 = vadd.f32 %v1555_v41, %v1527_v11  ;;  %v1617_v35 = vmul.f32 %v1609_v22, %v1594_v10  ;;  %v1690_v41 = vld [vmem:[#allocation8 + $0x560] sm:$0xff]  ;;  %v1691_v10 = vld [vmem:[#allocation8 + $0x568] sm:$0xff] }
 0x32e   :  { %v1618_v3 = vmul.f32 %v1610_v28, %v1595_v43  ;;  %v1619_v58 = vmul.f32 %v1611_v55, %v1596_v38  ;;  %v1641_v40 = vsel %vm1640_vm12, %v6574_v24, %v6578_v51  ;;  %v1642_v50 = vsel %vm1640_vm12, %v6578_v51, %v6586_v37  ;;  %v9401_v53 = vld [vmem:[#allocation50_spill] sm:$0xff]  ;;  %v1692_v28 = vld [vmem:[#allocation8 + $0x570] sm:$0xff]  ;;  %v9403_v38 = vld [vmem:[#allocation69_spill] sm:$0xff] }
 0x32f   :  { %v1589_v59 = vadd.f32 %v1585_v60, %v1557_v13  ;;  %v1590_v12 = vadd.f32 %v1586_v46, %v1558_v2  ;;  %v1591_v33 = vadd.f32 %v1587_v25, %v1559_v20  ;;  %v1643_v62 = vsel %vm1640_vm12, %v6586_v37, %v6588_v17  ;;  %v1660_v17 = vld [vmem:[#allocation8 + $0x550] sm:$0xff]  ;;  %v9402_v22 = vld [vmem:[#allocation66_spill] sm:$0xff]  ;;  %v9404_v20 = vld [vmem:[#allocation49_spill] sm:$0xff] }
 0x330   :  { %v1673_v24 = vsel %vm1672_vm8, %v6606_v61, %v6618_v14  ;;  %v1649_v8 = vmul.f32 %v1641_v40, %v1626_v42  ;;  %v1650_v26 = vmul.f32 %v1642_v50, %v1627_v63  ;;  %v1674_v51 = vsel %vm1672_vm8, %v6618_v14, %v6620_v48  ;;  %v1722_v2 = vld [vmem:[#allocation8 + $0x580] sm:$0xff] }
 0x331   :  { %v6777_v7 = vpop.permute.xlu0 %4966  ;;  %v6783_v1 = vpop.permute.xlu1 %1790  ;;  %vm1800_vm15 = vcmask 646144   ;;  %v1621_v44 = vadd.f32 %v1617_v35, %v1589_v59  ;;  %v1622_v45 = vadd.f32 %v1618_v3, %v1590_v12  ;;  %v1623_v37 = vadd.f32 %v1619_v58, %v1591_v33  ;;  %v1754_v59 = vld [vmem:[#allocation8 + $0x5a0] sm:$0xff] }
 0x332   :  { %9399 = vst [vmem:[#allocation27_spill] sm:$0xff] %v6777_v7  ;;  %v4968_v21 = vunpack.i.l.bf16 %v6777_v7  ;;  %v1675_v61 = vsel %vm1672_vm8, %v6620_v48, %v6631_v47  ;;  %v1651_v52 = vmul.f32 %v1643_v62, %v1628_v30  ;;  %v1681_v54 = vmul.f32 %v1673_v24, %v1658_v19  ;;  %v1724_v62 = vld [vmem:[#allocation8 + $0x590] sm:$0xff]  ;;  %v1755_v19 = vld [vmem:[#allocation8 + $0x5a8] sm:$0xff] }
 0x333   :  { %v1705_v14 = vsel %vm1704_vm7, %v9401_v53, %v9400_v56  ;;  %v1682_v11 = vmul.f32 %v1674_v51, %v1659_v27  ;;  %v1653_v47 = vadd.f32 %v1649_v8, %v1621_v44  ;;  %v1654_v46 = vadd.f32 %v1650_v26, %v1622_v45  ;;  %v1786_v27 = vld [vmem:[#allocation8 + $0x5c0] sm:$0xff]  ;;  %v1756_v45 = vld [vmem:[#allocation8 + $0x5b0] sm:$0xff]  ;;  %v1819_v53 = vld [vmem:[#allocation8 + $0x5e8] sm:$0xff] }
 0x334   :  { %v1772_v32 = vsel %vm1768_vm13, %v6766_v4, %v4968_v21  ;;  %v1706_v21 = vsel %vm1704_vm7, %v9400_v56, %v9402_v22  ;;  %v1683_v43 = vmul.f32 %v1675_v61, %v1660_v17  ;;  %v1707_v55 = vsel %vm1704_vm7, %v9402_v22, %v9403_v38 }
 0x335   :  { %v6793_v39 = vpop.permute.xlu0 %1792  ;;  %v6801_v49 = vpop.permute.xlu1 %1794  ;;  %v1780_v18 = vmul.f32 %v1772_v32, %v1757_v36  ;;  %v1713_v25 = vmul.f32 %v1705_v14, %v1690_v41  ;;  %v1737_v35 = vsel %vm1736_vm3, %v9404_v20, %v6705_v15  ;;  %v1723_v32 = vld [vmem:[#allocation8 + $0x588] sm:$0xff]  ;;  %v1655_v58 = vadd.f32 %v1651_v52, %v1623_v37 }
 0x336   :  { %v1714_v42 = vmul.f32 %v1706_v21, %v1691_v10  ;;  %vm1832_vm5 = vcmask 637952   ;;  %v1685_v40 = vadd.f32 %v1681_v54, %v1653_v47  ;;  %v1686_v63 = vadd.f32 %v1682_v11, %v1654_v46  ;;  %v1788_v11 = vld [vmem:[#allocation8 + $0x5d0] sm:$0xff] }
 0x337   :  { %v1784_v60 = vadd.f32 %v1780_v18, %v6745_v16  ;;  %v1738_v16 = vsel %vm1736_vm3, %v6705_v15, %v6710_v5  ;;  %v1715_v50 = vmul.f32 %v1707_v55, %v1692_v28  ;;  %v1769_v12 = vsel %vm1768_vm13, %v6740_v34, %v6747_v57  ;;  %v1820_v28 = vld [vmem:[#allocation8 + $0x5f0] sm:$0xff]  ;;  %v1850_v55 = vld [vmem:[#allocation8 + $0x600] sm:$0xff] }
 0x338   :  { %v1745_v33 = vmul.f32 %v1737_v35, %v1722_v2  ;;  %v1746_v30 = vmul.f32 %v1738_v16, %v1723_v32  ;;  %v1739_v15 = vsel %vm1736_vm3, %v6710_v5, %v6721_v29  ;;  %v1770_v24 = vsel %vm1768_vm13, %v6747_v57, %v6758_v31  ;;  %v1787_v29 = vld [vmem:[#allocation8 + $0x5c8] sm:$0xff] }
 0x339   :  { %v6812_v6 = vpop.permute.xlu0 %1796  ;;  %v1799_v9 = vpop.permute.xlu1 %1798  ;;  %v1687_v8 = vadd.f32 %v1683_v43, %v1655_v58  ;;  %v1717_v26 = vadd.f32 %v1713_v25, %v1685_v40  ;;  %v1801_v34 = vsel %vm1800_vm15, %v6783_v1, %v6793_v39  ;;  %v1777_v44 = vmul.f32 %v1769_v12, %v1754_v59  ;;  %v1821_v1 = vld [vmem:[#allocation8 + $0x5f8] sm:$0xff]  ;;  %v1852_v59 = vld [vmem:[#allocation8 + $0x610] sm:$0xff] }
 0x33a   :  { %v1804_v23 = vsel %vm1800_vm15, %v6812_v6, %v1799_v9  ;;  %v1771_v5 = vsel %vm1768_vm13, %v6758_v31, %v6766_v4  ;;  %v1802_v57 = vsel %vm1800_vm15, %v6793_v39, %v6801_v49  ;;  %v1747_v17 = vmul.f32 %v1739_v15, %v1724_v62  ;;  %v1818_v9 = vld [vmem:[#allocation8 + $0x5e0] sm:$0xff] }
 0x33b   :  { %v1812_v48 = vmul.f32 %v1804_v23, %v1789_v0  ;;  %v1718_v0 = vadd.f32 %v1714_v42, %v1686_v63  ;;  %v1719_v37 = vadd.f32 %v1715_v50, %v1687_v8  ;;  %v1778_v61 = vmul.f32 %v1770_v24, %v1755_v19 }
 0x33c   :  { %v1749_v54 = vadd.f32 %v1745_v33, %v1717_v26  ;;  %v1809_v56 = vmul.f32 %v1801_v34, %v1786_v27  ;;  %v1779_v31 = vmul.f32 %v1771_v5, %v1756_v45  ;;  %v1810_v4 = vmul.f32 %v1802_v57, %v1787_v29 }
 0x33d   :  { %v1823_v13 = vpop.permute.xlu0 %1822  ;;  %v1816_v36 = vadd.f32 %v1812_v48, %v1784_v60  ;;  %v1825_v3 = vpop.permute.xlu1 %1824  ;;  %v1750_v41 = vadd.f32 %v1746_v30, %v1718_v0  ;;  %v1803_v39 = vsel %vm1800_vm15, %v6801_v49, %v6812_v6  ;;  %vm1864_vm9 = vcmask 629760   ;;  %v1851_v49 = vld [vmem:[#allocation8 + $0x608] sm:$0xff] }
 0x33e   :  { %v1833_v52 = vsel %vm1832_vm5, %v1823_v13, %v1825_v3  ;;  %v1781_v21 = vadd.f32 %v1777_v44, %v1749_v54  ;;  %v1751_v47 = vadd.f32 %v1747_v17, %v1719_v37  ;;  %v1811_v25 = vmul.f32 %v1803_v39, %v1788_v11 }
 0x33f   :  { %v1841_v60 = vmul.f32 %v1833_v52, %v1818_v9  ;;  %v1782_v46 = vadd.f32 %v1778_v61, %v1750_v41  ;;  %v1853_v41 = vld [vmem:[#allocation8 + $0x618] sm:$0xff]  ;;  %vm1916_vm10 = vcmask 621568   ;;  %vm9115_vm11 = vcmask 596992  }
 0x340   :  { %v1813_v13 = vadd.f32 %v1809_v56, %v1781_v21  ;;  %v1783_v6 = vadd.f32 %v1779_v31, %v1751_v47  ;;  %vm9111_vm7 = vcmask 572416   ;;  %vm9112_vm0 = vcmask 547840  }
 0x341   :  { %v1827_v18 = vpop.permute.xlu0 %1826  ;;  %v1829_v51 = vpop.permute.xlu1 %1828  ;;  %v1814_v35 = vadd.f32 %v1810_v4, %v1782_v46  ;;  %vm9114_vm3 = vcmask 523264   ;;  %vm9113_vm15 = vcmask 498688  }
 0x342   :  { %v1834_v14 = vsel %vm1832_vm5, %v1825_v3, %v1827_v18  ;;  %v1835_v38 = vsel %vm1832_vm5, %v1827_v18, %v1829_v51  ;;  %v1845_v3 = vadd.f32 %v1841_v60, %v1813_v13  ;;  %v1815_v12 = vadd.f32 %v1811_v25, %v1783_v6 }
 0x343   :  { %v1842_v43 = vmul.f32 %v1834_v14, %v1819_v53  ;;  %v1843_v58 = vmul.f32 %v1835_v38, %v1820_v28  ;;  %v9405_v18 = vmov 0.0  }
 0x345   :  { %v1831_v23 = vpop.permute.xlu0 %1830  ;;  %v1855_v22 = vpop.permute.xlu1 %1854  ;;  %v1846_v63 = vadd.f32 %v1842_v43, %v1814_v35  ;;  %v1847_v15 = vadd.f32 %v1843_v58, %v1815_v12 }
 0x346   :  { %v1836_v10 = vsel %vm1832_vm5, %v1829_v51, %v1831_v23  ;;  %vm2108_vm5 = vcmask 474112  }
 0x347   :  { %v1844_v48 = vmul.f32 %v1836_v10, %v1821_v1 }
 0x349   :  { %v6860_v2 = vadd.f32 %v1844_v48, %v1816_v36  ;;  %v1857_v20 = vpop.permute.xlu0 %1856  ;;  %v1859_v16 = vpop.permute.xlu1 %1858 }
 0x34a   :  { %v1865_v32 = vsel %vm1864_vm9, %v1855_v22, %v1857_v20  ;;  %v1866_v40 = vsel %vm1864_vm9, %v1857_v20, %v1859_v16 }
 0x34b   :  { %v1873_v42 = vmul.f32 %v1865_v32, %v1850_v55  ;;  %v1874_v50 = vmul.f32 %v1866_v40, %v1851_v49 }
 0x34d   :  { %v6864_v33 = vadd.f32 %v1873_v42, %v1845_v3  ;;  %v6866_v36 = vpop.permute.xlu0 %1860  ;;  %v6868_v30 = vadd.f32 %v1874_v50, %v1846_v63  ;;  %v6970_v8 = vpop.permute.xlu1 %4971 }
 0x34e   :  { %v1867_v62 = vsel %vm1864_vm9, %v1859_v16, %v6866_v36  ;;  %9406 = vst [vmem:[#allocation52_spill] sm:$0xff] %v6970_v8  ;;  %v4973_v52 = vunpack.i.l.bf16 %v6970_v8 }
 0x34f   :  { %v1875_v19 = vmul.f32 %v1867_v62, %v1852_v59  ;;  %1910 = vrot.lane.b32.xlu0 %v6864_v33, %s5356_s6  ;;  %1912 = vrot.lane.b32.xlu1 %v6868_v30, %s5356_s6 }
 0x350   :  { %v1868_v56 = vsel %vm1864_vm9, %v6866_v36, %v4973_v52 }
 0x351   :  { %v6876_v24 = vadd.f32 %v1875_v19, %v1847_v15  ;;  %v6978_v27 = vpop.permute.xlu1 %4976  ;;  %v1876_v14 = vmul.f32 %v1868_v56, %v1853_v41 }
 0x353   :  { %1914 = vrot.lane.b32.xlu0 %v6876_v24, %s5356_s6  ;;  %4981 = vrot.lane.b32.xlu1 %v9405_v18, %s5357_s25  ;;  %v7039_v4 = vadd.f32 %v1876_v14, %v6860_v2 }
 0x357   :  { %1942 = vrot.lane.b32.xlu0 %v6864_v33, %s5357_s25  ;;  %1944 = vrot.lane.b32.xlu1 %v6868_v30, %s5357_s25 }
 0x35a   :  { %v6976_v26 = vpop.permute.xlu0 %1888 }
 0x35b   :  { %1946 = vrot.lane.b32.xlu0 %v6876_v24, %s5357_s25  ;;  %4986 = vrot.lane.b32.xlu1 %v9405_v18, %s5358_s26 }
 0x35f   :  { %1974 = vrot.lane.b32.xlu0 %v6864_v33, %s5358_s26  ;;  %1976 = vrot.lane.b32.xlu1 %v6868_v30, %s5358_s26 }
 0x363   :  { %1978 = vrot.lane.b32.xlu0 %v6876_v24, %s5358_s26  ;;  %4991 = vrot.lane.b32.xlu1 %v9405_v18, %s5359_s12 }
 0x367   :  { %2006 = vrot.lane.b32.xlu0 %v6864_v33, %s5359_s12  ;;  %2008 = vrot.lane.b32.xlu1 %v6868_v30, %s5359_s12 }
 0x36b   :  { %2010 = vrot.lane.b32.xlu0 %v6876_v24, %s5359_s12  ;;  %4996 = vrot.lane.b32.xlu1 %v9405_v18, %s9015_s4 }
 0x36f   :  { %2038 = vrot.lane.b32.xlu0 %v6864_v33, %s9015_s4  ;;  %2040 = vrot.lane.b32.xlu1 %v6868_v30, %s9015_s4 }
 0x373   :  { %2042 = vrot.lane.b32.xlu0 %v6876_v24, %s9015_s4  ;;  %5001 = vrot.lane.b32.xlu1 %v9405_v18, %s9009_s16  ;;  %s5367_s4 = smov 22  }
 0x377   :  { %2070 = vrot.lane.b32.xlu0 %v6864_v33, %s9009_s16  ;;  %2072 = vrot.lane.b32.xlu1 %v6868_v30, %s9009_s16 }
 0x37b   :  { %2074 = vrot.lane.b32.xlu0 %v6876_v24, %s9009_s16  ;;  %5006 = vrot.lane.b32.xlu1 %v9405_v18, %s9011_s21  ;;  %s5364_s16 = smov 52  }
 0x37f   :  { %2102 = vrot.lane.b32.xlu0 %v6864_v33, %s9011_s21  ;;  %2104 = vrot.lane.b32.xlu1 %v6868_v30, %s9011_s21 }
 0x383   :  { %2106 = vrot.lane.b32.xlu0 %v6876_v24, %s9011_s21  ;;  %5011 = vrot.lane.b32.xlu1 %v9405_v18, %s9013_s23  ;;  %s5365_s21 = smov 28  }
 0x387   :  { %2134 = vrot.lane.b32.xlu0 %v6864_v33, %s9013_s23  ;;  %2136 = vrot.lane.b32.xlu1 %v6868_v30, %s9013_s23 }
 0x38b   :  { %2138 = vrot.lane.b32.xlu0 %v6876_v24, %s9013_s23  ;;  %5016 = vrot.lane.b32.xlu1 %v9405_v18, %s5364_s16  ;;  %s5366_s23 = smov 25  }
 0x38f   :  { %2166 = vrot.lane.b32.xlu0 %v6864_v33, %s5364_s16  ;;  %2168 = vrot.lane.b32.xlu1 %v6868_v30, %s5364_s16 }
 0x393   :  { %2170 = vrot.lane.b32.xlu0 %v6876_v24, %s5364_s16  ;;  %5021 = vrot.lane.b32.xlu1 %v9405_v18, %s5365_s21 }
 0x397   :  { %2198 = vrot.lane.b32.xlu0 %v6864_v33, %s5365_s21  ;;  %2200 = vrot.lane.b32.xlu1 %v6868_v30, %s5365_s21 }
 0x39b   :  { %2202 = vrot.lane.b32.xlu0 %v6876_v24, %s5365_s21  ;;  %5026 = vrot.lane.b32.xlu1 %v9405_v18, %s5366_s23  ;;  %s5372_s21 = smov 105  }
 0x39f   :  { %2230 = vrot.lane.b32.xlu0 %v6864_v33, %s5366_s23  ;;  %2232 = vrot.lane.b32.xlu1 %v6868_v30, %s5366_s23 }
 0x3a3   :  { %2234 = vrot.lane.b32.xlu0 %v6876_v24, %s5366_s23  ;;  %5031 = vrot.lane.b32.xlu1 %v9405_v18, %s5367_s4  ;;  %s5373_s23 = smov 102  }
 0x3a7   :  { %2262 = vrot.lane.b32.xlu0 %v6864_v33, %s5367_s4  ;;  %2264 = vrot.lane.b32.xlu1 %v6868_v30, %s5367_s4 }
 0x3ab   :  { %2266 = vrot.lane.b32.xlu0 %v6876_v24, %s5367_s4  ;;  %2292 = vrot.lane.b32.xlu1 %v9405_v18, %s5323_s20  ;;  %s5371_s4 = smov 108  }
 0x3af   :  { %2294 = vrot.lane.b32.xlu0 %v6864_v33, %s5323_s20  ;;  %2296 = vrot.lane.b32.xlu1 %v6868_v30, %s5323_s20 }
 0x3b3   :  { %2298 = vrot.lane.b32.xlu0 %v6876_v24, %s5323_s20  ;;  %2323 = vrot.lane.b32.xlu1 %v9405_v18, %s5324_s0  ;;  %s5368_s20 = smov 10  }
 0x3b7   :  { %2325 = vrot.lane.b32.xlu0 %v6864_v33, %s5324_s0  ;;  %2327 = vrot.lane.b32.xlu1 %v6868_v30, %s5324_s0 }
 0x3bb   :  { %2329 = vrot.lane.b32.xlu0 %v6876_v24, %s5324_s0  ;;  %2354 = vrot.lane.b32.xlu1 %v9405_v18, %s5329_s3  ;;  %s5369_s0 = smov 7  }
 0x3bf   :  { %2356 = vrot.lane.b32.xlu0 %v6864_v33, %s5329_s3  ;;  %2358 = vrot.lane.b32.xlu1 %v6868_v30, %s5329_s3 }
 0x3c1   :  { %v6984_v34 = vpop.permute.xlu0 %1910  ;;  %v6986_v51 = vpop.permute.xlu1 %1912 }
 0x3c3   :  { %2360 = vrot.lane.b32.xlu0 %v6876_v24, %s5329_s3  ;;  %5036 = vrot.lane.b32.xlu1 %v9405_v18, %s5368_s20  ;;  %s5370_s3 = smov 4  }
 0x3c5   :  { %v6991_v0 = vpop.permute.xlu0 %1914  ;;  %v6993_v44 = vpop.permute.xlu1 %4981 }
 0x3c7   :  { %2387 = vrot.lane.b32.xlu0 %v6864_v33, %s5368_s20  ;;  %2389 = vrot.lane.b32.xlu1 %v6868_v30, %s5368_s20 }
 0x3c9   :  { %v6997_v45 = vpop.permute.xlu0 %1942  ;;  %v6999_v5 = vpop.permute.xlu1 %1944 }
 0x3cb   :  { %2391 = vrot.lane.b32.xlu0 %v6876_v24, %s5368_s20  ;;  %5041 = vrot.lane.b32.xlu1 %v9405_v18, %s5369_s0  ;;  %s5377_s20 = smov 60  }
 0x3cd   :  { %v7003_v29 = vpop.permute.xlu0 %1946  ;;  %v7005_v57 = vpop.permute.xlu1 %4986 }
 0x3cf   :  { %2419 = vrot.lane.b32.xlu0 %v6864_v33, %s5369_s0  ;;  %2421 = vrot.lane.b32.xlu1 %v6868_v30, %s5369_s0 }
 0x3d1   :  { %v7009_v37 = vpop.permute.xlu0 %1974  ;;  %v7011_v17 = vpop.permute.xlu1 %1976 }
 0x3d3   :  { %2423 = vrot.lane.b32.xlu0 %v6876_v24, %s5369_s0  ;;  %5046 = vrot.lane.b32.xlu1 %v9405_v18, %s5370_s3  ;;  %s5378_s0 = smov 57  }
 0x3d5   :  { %v7015_v61 = vpop.permute.xlu0 %1978  ;;  %v7017_v9 = vpop.permute.xlu1 %4991 }
 0x3d7   :  { %2451 = vrot.lane.b32.xlu0 %v6864_v33, %s5370_s3  ;;  %2453 = vrot.lane.b32.xlu1 %v6868_v30, %s5370_s3 }
 0x3d9   :  { %v7022_v1 = vpop.permute.xlu0 %2006  ;;  %v7024_v54 = vpop.permute.xlu1 %2008 }
 0x3db   :  { %2455 = vrot.lane.b32.xlu0 %v6876_v24, %s5370_s3  ;;  %2481 = vrot.lane.b32.xlu1 %v9405_v18, %s5371_s4  ;;  %s5379_s3 = smov 54  }
 0x3dd   :  { %v7030_v53 = vpop.permute.xlu0 %2010  ;;  %v7032_v23 = vpop.permute.xlu1 %4996 }
 0x3df   :  { %2483 = vrot.lane.b32.xlu0 %v6864_v33, %s5371_s4  ;;  %2485 = vrot.lane.b32.xlu1 %v6868_v30, %s5371_s4 }
 0x3e1   :  { %v7036_v31 = vpop.permute.xlu0 %2038  ;;  %v7041_v11 = vpop.permute.xlu1 %2040 }
 0x3e3   :  { %2487 = vrot.lane.b32.xlu0 %v6876_v24, %s5371_s4  ;;  %2489 = vrot.lane.b32.xlu1 %v7039_v4, %s5371_s4  ;;  %s5383_s4 = smov 12  }
 0x3e5   :  { %v7045_v39 = vpop.permute.xlu0 %2042  ;;  %v7047_v10 = vpop.permute.xlu1 %5001 }
 0x3e7   :  { %2513 = vrot.lane.b32.xlu0 %v9405_v18, %s5372_s21  ;;  %2515 = vrot.lane.b32.xlu1 %v6864_v33, %s5372_s21 }
 0x3e9   :  { %v7051_v22 = vpop.permute.xlu0 %2070  ;;  %v7053_v21 = vpop.permute.xlu1 %2072 }
 0x3eb   :  { %2517 = vrot.lane.b32.xlu0 %v6868_v30, %s5372_s21  ;;  %2519 = vrot.lane.b32.xlu1 %v6876_v24, %s5372_s21 }
 0x3ed   :  { %v7057_v60 = vpop.permute.xlu0 %2074  ;;  %v7059_v48 = vpop.permute.xlu1 %5006 }
 0x3ef   :  { %2521 = vrot.lane.b32.xlu0 %v7039_v4, %s5372_s21  ;;  %2545 = vrot.lane.b32.xlu1 %v9405_v18, %s5373_s23  ;;  %s5384_s21 = smov 9  }
 0x3f1   :  { %v7063_v47 = vpop.permute.xlu0 %2102  ;;  %v7065_v46 = vpop.permute.xlu1 %2104 }
 0x3f3   :  { %2547 = vrot.lane.b32.xlu0 %v6864_v33, %s5373_s23  ;;  %2549 = vrot.lane.b32.xlu1 %v6868_v30, %s5373_s23 }
 0x3f5   :  { %v7069_v43 = vpop.permute.xlu0 %2106  ;;  %v7071_v28 = vpop.permute.xlu1 %5011 }
 0x3f7   :  { %2551 = vrot.lane.b32.xlu0 %v6876_v24, %s5373_s23  ;;  %2553 = vrot.lane.b32.xlu1 %v7039_v4, %s5373_s23  ;;  %s5385_s23 = smov 6  }
 0x3f9   :  { %v7075_v38 = vpop.permute.xlu0 %2134  ;;  %v7077_v55 = vpop.permute.xlu1 %2136 }
 0x3fb   :  { %2579 = vrot.lane.b32.xlu0 %v6864_v33, %s5342_s5  ;;  %2581 = vrot.lane.b32.xlu1 %v6868_v30, %s5342_s5 }
 0x3fd   :  { %v7083_v13 = vpop.permute.xlu0 %2138  ;;  %v7085_v25 = vpop.permute.xlu1 %5016 }
 0x3ff   :  { %2583 = vrot.lane.b32.xlu0 %v6876_v24, %s5342_s5  ;;  %2585 = vrot.lane.b32.xlu1 %v7039_v4, %s5342_s5  ;;  %s5374_s5 = smov 90  }
 0x401   :  { %v7091_v2 = vpop.permute.xlu0 %2166  ;;  %v7093_v20 = vpop.permute.xlu1 %2168 }
 0x403   :  { %2610 = vrot.lane.b32.xlu0 %v6864_v33, %s5345_s22  ;;  %2612 = vrot.lane.b32.xlu1 %v6868_v30, %s5345_s22 }
 0x405   :  { %v7099_v49 = vpop.permute.xlu0 %2170  ;;  %v7101_v6 = vpop.permute.xlu1 %5021 }
 0x407   :  { %2614 = vrot.lane.b32.xlu0 %v6876_v24, %s5345_s22  ;;  %2616 = vrot.lane.b32.xlu1 %v7039_v4, %s5345_s22  ;;  %s5375_s22 = smov 87  }
 0x409   :  { %v7107_v35 = vpop.permute.xlu0 %2198  ;;  %v7109_v32 = vpop.permute.xlu1 %2200 }
 0x40a   :  { %9407 = vst [vmem:[#allocation30_spill] sm:$0xff] %v7107_v35  ;;  %9408 = vst [vmem:[#allocation68_spill] sm:$0xff] %v7109_v32  ;;  %v4989_v35 = vunpack.i.h.bf16 %v7005_v57  ;;  %v1999_v32 = vld [vmem:[#allocation9 + $0x68] sm:$0xff] }
 0x40b   :  { %2641 = vrot.lane.b32.xlu0 %v6864_v33, %s5348_s27  ;;  %2643 = vrot.lane.b32.xlu1 %v6868_v30, %s5348_s27 }
 0x40d   :  { %v7115_v16 = vpop.permute.xlu0 %2202  ;;  %v7117_v3 = vpop.permute.xlu1 %5026 }
 0x40e   :  { %9409 = vst [vmem:[#allocation71_spill] sm:$0xff] %v7115_v16  ;;  %v1895_v16 = vld [vmem:[#allocation9 + $0x18] sm:$0xff] }
 0x40f   :  { %2645 = vrot.lane.b32.xlu0 %v6876_v24, %s5348_s27  ;;  %2647 = vrot.lane.b32.xlu1 %v7039_v4, %s5348_s27  ;;  %s5376_s27 = smov 84  }
 0x411   :  { %v7123_v58 = vpop.permute.xlu0 %2230  ;;  %v7125_v42 = vpop.permute.xlu1 %2232 }
 0x412   :  { %9410 = vst [vmem:[#allocation51_spill] sm:$0xff] %v7123_v58  ;;  %9411 = vst [vmem:[#allocation29_spill] sm:$0xff] %v7125_v42  ;;  %v4983_v42 = vunpack.i.l.bf16 %v6993_v44  ;;  %v2000_v58 = vld [vmem:[#allocation9 + $0x70] sm:$0xff] }
 0x413   :  { %2672 = vrot.lane.b32.xlu0 %v6864_v33, %s5374_s5  ;;  %2674 = vrot.lane.b32.xlu1 %v6868_v30, %s5374_s5 }
 0x415   :  { %v7129_v40 = vpop.permute.xlu0 %2234  ;;  %v7131_v63 = vpop.permute.xlu1 %5031 }
 0x416   :  { %9412 = vst [vmem:[#allocation54_spill] sm:$0xff] %v7129_v40  ;;  %9413 = vst [vmem:[#allocation32_spill] sm:$0xff] %v7131_v63  ;;  %v1894_v40 = vld [vmem:[#allocation9 + $0x10] sm:$0xff]  ;;  %v4988_v63 = vunpack.i.l.bf16 %v7005_v57  ;;  %v4994_v57 = vunpack.i.h.bf16 %v7017_v9 }
 0x417   :  { %2676 = vrot.lane.b32.xlu0 %v6876_v24, %s5374_s5  ;;  %2678 = vrot.lane.b32.xlu1 %v7039_v4, %s5374_s5 }
 0x419   :  { %v7135_v50 = vpop.permute.xlu0 %2262  ;;  %v7137_v59 = vpop.permute.xlu1 %2264 }
 0x41a   :  { %9414 = vst [vmem:[#allocation70_spill] sm:$0xff] %v7135_v50  ;;  %9415 = vst [vmem:[#allocation53_spill] sm:$0xff] %v7137_v59  ;;  %v1893_v50 = vld [vmem:[#allocation9 + $0x8] sm:$0xff] }
 0x41b   :  { %2670 = vrot.lane.b32.xlu0 %v9405_v18, %s5374_s5  ;;  %2704 = vrot.lane.b32.xlu1 %v6864_v33, %s5375_s22  ;;  %s5388_s5 = smov 116  }
 0x41d   :  { %v7141_v12 = vpop.permute.xlu0 %2266  ;;  %v7143_v36 = vpop.permute.xlu1 %2292 }
 0x41e   :  { %9416 = vst [vmem:[#allocation31_spill] sm:$0xff] %v7141_v12  ;;  %9417 = vst [vmem:[#allocation72_spill] sm:$0xff] %v7143_v36  ;;  %v1934_v12 = vld [vmem:[#allocation9 + $0x20] sm:$0xff] }
 0x41f   :  { %2706 = vrot.lane.b32.xlu0 %v6868_v30, %s5375_s22  ;;  %2708 = vrot.lane.b32.xlu1 %v6876_v24, %s5375_s22 }
 0x421   :  { %v7147_v62 = vpop.permute.xlu0 %2294  ;;  %v7149_v15 = vpop.permute.xlu1 %2296 }
 0x422   :  { %9418 = vst [vmem:[#allocation56_spill] sm:$0xff] %v7147_v62  ;;  %9419 = vst [vmem:[#allocation73_spill] sm:$0xff] %v7149_v15 }
 0x423   :  { %2710 = vrot.lane.b32.xlu0 %v7039_v4, %s5375_s22  ;;  %2702 = vrot.lane.b32.xlu1 %v9405_v18, %s5375_s22  ;;  %s5389_s22 = smov 92  }
 0x425   :  { %v7153_v19 = vpop.permute.xlu0 %2298  ;;  %v7155_v52 = vpop.permute.xlu1 %2323 }
 0x426   :  { %9420 = vst [vmem:[#allocation75_spill] sm:$0xff] %v7153_v19  ;;  %9421 = vst [vmem:[#allocation55_spill] sm:$0xff] %v7155_v52  ;;  %v1892_v52 = vld [vmem:[#allocation9] sm:$0xff] }
 0x427   :  { %2736 = vrot.lane.b32.xlu0 %v6864_v33, %s5376_s27  ;;  %2738 = vrot.lane.b32.xlu1 %v6868_v30, %s5376_s27 }
 0x429   :  { %v7159_v41 = vpop.permute.xlu0 %2325  ;;  %v7161_v56 = vpop.permute.xlu1 %2327 }
 0x42a   :  { %9422 = vst [vmem:[#allocation33_spill] sm:$0xff] %v7159_v41  ;;  %9423 = vst [vmem:[#allocation58_spill] sm:$0xff] %v7161_v56 }
 0x42b   :  { %2740 = vrot.lane.b32.xlu0 %v6876_v24, %s5376_s27  ;;  %2742 = vrot.lane.b32.xlu1 %v7039_v4, %s5376_s27 }
 0x42d   :  { %v7165_v14 = vpop.permute.xlu0 %2329  ;;  %v7167_v8 = vpop.permute.xlu1 %2354 }
 0x42e   :  { %9424 = vst [vmem:[#allocation38_spill] sm:$0xff] %v7165_v14  ;;  %9425 = vst [vmem:[#allocation74_spill] sm:$0xff] %v7167_v8 }
 0x42f   :  { %2734 = vrot.lane.b32.xlu0 %v9405_v18, %s5376_s27  ;;  %2768 = vrot.lane.b32.xlu1 %v6864_v33, %s5377_s20  ;;  %s5390_s27 = smov 89  }
 0x431   :  { %v7171_v7 = vpop.permute.xlu0 %2356  ;;  %v7173_v19 = vpop.permute.xlu1 %2358 }
 0x432   :  { %9426 = vst [vmem:[#allocation77_spill] sm:$0xff] %v7171_v7  ;;  %9427 = vst [vmem:[#allocation57_spill] sm:$0xff] %v7173_v19 }
 0x433   :  { %2770 = vrot.lane.b32.xlu0 %v6868_v30, %s5377_s20  ;;  %2772 = vrot.lane.b32.xlu1 %v6876_v24, %s5377_s20 }
 0x435   :  { %v7177_v56 = vpop.permute.xlu0 %2360  ;;  %v7179_v41 = vpop.permute.xlu1 %5036 }
 0x436   :  { %9428 = vst [vmem:[#allocation60_spill] sm:$0xff] %v7177_v56  ;;  %9429 = vst [vmem:[#allocation40_spill] sm:$0xff] %v7179_v41 }
 0x437   :  { %2774 = vrot.lane.b32.xlu0 %v7039_v4, %s5377_s20  ;;  %2766 = vrot.lane.b32.xlu1 %v9405_v18, %s5377_s20  ;;  %s5391_s20 = smov 86  }
 0x439   :  { %v7183_v8 = vpop.permute.xlu0 %2387  ;;  %v7185_v14 = vpop.permute.xlu1 %2389 }
 0x43a   :  { %9430 = vst [vmem:[#allocation76_spill] sm:$0xff] %v7183_v8  ;;  %9431 = vst [vmem:[#allocation59_spill] sm:$0xff] %v7185_v14 }
 0x43b   :  { %2800 = vrot.lane.b32.xlu0 %v6864_v33, %s5378_s0  ;;  %2802 = vrot.lane.b32.xlu1 %v6868_v30, %s5378_s0 }
 0x43d   :  { %v7189_v19 = vpop.permute.xlu0 %2391  ;;  %v7191_v7 = vpop.permute.xlu1 %5041 }
 0x43e   :  { %9432 = vst [vmem:[#allocation39_spill] sm:$0xff] %v7189_v19  ;;  %9433 = vst [vmem:[#allocation62_spill] sm:$0xff] %v7191_v7 }
 0x43f   :  { %2804 = vrot.lane.b32.xlu0 %v6876_v24, %s5378_s0  ;;  %2806 = vrot.lane.b32.xlu1 %v7039_v4, %s5378_s0 }
 0x441   :  { %v7195_v56 = vpop.permute.xlu0 %2419  ;;  %v7197_v41 = vpop.permute.xlu1 %2421 }
 0x442   :  { %9434 = vst [vmem:[#allocation61_spill] sm:$0xff] %v7195_v56  ;;  %9435 = vst [vmem:[#allocation63_spill] sm:$0xff] %v7197_v41 }
 0x443   :  { %2798 = vrot.lane.b32.xlu0 %v9405_v18, %s5378_s0  ;;  %2832 = vrot.lane.b32.xlu1 %v6864_v33, %s5379_s3  ;;  %s5395_s0 = smov 44  }
 0x445   :  { %v7201_v14 = vpop.permute.xlu0 %2423  ;;  %v7203_v8 = vpop.permute.xlu1 %5046 }
 0x446   :  { %9436 = vst [vmem:[#allocation44_spill] sm:$0xff] %v7201_v14  ;;  %9437 = vst [vmem:[#allocation78_spill] sm:$0xff] %v7203_v8 }
 0x447   :  { %2834 = vrot.lane.b32.xlu0 %v6868_v30, %s5379_s3  ;;  %2836 = vrot.lane.b32.xlu1 %v6876_v24, %s5379_s3 }
 0x449   :  { %v7207_v19 = vpop.permute.xlu0 %2451  ;;  %v7209_v7 = vpop.permute.xlu1 %2453 }
 0x44a   :  { %9438 = vst [vmem:[#allocation79_spill] sm:$0xff] %v7207_v19  ;;  %9439 = vst [vmem:[#allocation43_spill] sm:$0xff] %v7209_v7 }
 0x44b   :  { %2838 = vrot.lane.b32.xlu0 %v7039_v4, %s5379_s3  ;;  %2830 = vrot.lane.b32.xlu1 %v9405_v18, %s5379_s3  ;;  %s5396_s3 = smov 41  }
 0x44d   :  { %v7213_v41 = vpop.permute.xlu0 %2455  ;;  %v7215_v56 = vpop.permute.xlu1 %2481 }
 0x44e   :  { %9440 = vst [vmem:[#allocation80_spill] sm:$0xff] %v7213_v41  ;;  %9441 = vst [vmem:[#allocation64_spill] sm:$0xff] %v7215_v56 }
 0x44f   :  { %2864 = vrot.lane.b32.xlu0 %v6864_v33, %s5310_s9  ;;  %2866 = vrot.lane.b32.xlu1 %v6868_v30, %s5310_s9 }
 0x451   :  { %v7221_v14 = vpop.permute.xlu0 %2483  ;;  %v7223_v8 = vpop.permute.xlu1 %2485 }
 0x452   :  { %9442 = vst [vmem:[#allocation82_spill] sm:$0xff] %v7221_v14  ;;  %9443 = vst [vmem:[#allocation81_spill] sm:$0xff] %v7223_v8 }
 0x453   :  { %2868 = vrot.lane.b32.xlu0 %v6876_v24, %s5310_s9  ;;  %2870 = vrot.lane.b32.xlu1 %v7039_v4, %s5310_s9  ;;  %s5380_s9 = smov 42  }
 0x455   :  { %v7229_v7 = vpop.permute.xlu0 %2487  ;;  %v7231_v41 = vpop.permute.xlu1 %2489 }
 0x456   :  { %9444 = vst [vmem:[#allocation83_spill] sm:$0xff] %v7229_v7  ;;  %9445 = vst [vmem:[#allocation84_spill] sm:$0xff] %v7231_v41 }
 0x457   :  { %2895 = vrot.lane.b32.xlu0 %v6864_v33, %s5312_s30  ;;  %2897 = vrot.lane.b32.xlu1 %v6868_v30, %s5312_s30 }
 0x459   :  { %v7237_v56 = vpop.permute.xlu0 %2513  ;;  %v7239_v14 = vpop.permute.xlu1 %2515 }
 0x45a   :  { %9446 = vst [vmem:[#allocation86_spill] sm:$0xff] %v7237_v56  ;;  %9447 = vst [vmem:[#allocation85_spill] sm:$0xff] %v7239_v14 }
 0x45b   :  { %2899 = vrot.lane.b32.xlu0 %v6876_v24, %s5312_s30  ;;  %2901 = vrot.lane.b32.xlu1 %v7039_v4, %s5312_s30  ;;  %s5381_s30 = smov 39  }
 0x45d   :  { %v7245_v8 = vpop.permute.xlu0 %2517  ;;  %v7247_v7 = vpop.permute.xlu1 %2519 }
 0x45e   :  { %9448 = vst [vmem:[#allocation87_spill] sm:$0xff] %v7245_v8  ;;  %9449 = vst [vmem:[#allocation88_spill] sm:$0xff] %v7247_v7 }
 0x45f   :  { %2926 = vrot.lane.b32.xlu0 %v6864_v33, %s5316_s15  ;;  %2928 = vrot.lane.b32.xlu1 %v6868_v30, %s5316_s15 }
 0x461   :  { %v7253_v41 = vpop.permute.xlu0 %2521  ;;  %v7255_v56 = vpop.permute.xlu1 %2545 }
 0x462   :  { %9450 = vst [vmem:[#allocation90_spill] sm:$0xff] %v7253_v41  ;;  %9451 = vst [vmem:[#allocation89_spill] sm:$0xff] %v7255_v56 }
 0x463   :  { %2930 = vrot.lane.b32.xlu0 %v6876_v24, %s5316_s15  ;;  %2932 = vrot.lane.b32.xlu1 %v7039_v4, %s5316_s15  ;;  %s5382_s15 = smov 36  }
 0x465   :  { %v7261_v14 = vpop.permute.xlu0 %2547  ;;  %v7263_v8 = vpop.permute.xlu1 %2549 }
 0x466   :  { %9452 = vst [vmem:[#allocation91_spill] sm:$0xff] %v7261_v14  ;;  %9453 = vst [vmem:[#allocation92_spill] sm:$0xff] %v7263_v8 }
 0x467   :  { %2957 = vrot.lane.b32.xlu0 %v6864_v33, %s5380_s9  ;;  %2959 = vrot.lane.b32.xlu1 %v6868_v30, %s5380_s9 }
 0x469   :  { %v7267_v7 = vpop.permute.xlu0 %2551  ;;  %v7269_v41 = vpop.permute.xlu1 %2553 }
 0x46a   :  { %9454 = vst [vmem:[#allocation95_spill] sm:$0xff] %v7267_v7  ;;  %9455 = vst [vmem:[#allocation94_spill] sm:$0xff] %v7269_v41 }
 0x46b   :  { %2961 = vrot.lane.b32.xlu0 %v6876_v24, %s5380_s9  ;;  %2963 = vrot.lane.b32.xlu1 %v7039_v4, %s5380_s9 }
 0x46d   :  { %v7273_v56 = vpop.permute.xlu0 %2579  ;;  %v7275_v19 = vpop.permute.xlu1 %2581 }
 0x46e   :  { %9456 = vst [vmem:[#allocation96_spill] sm:$0xff] %v7273_v56  ;;  %9457 = vst [vmem:[#allocation97_spill] sm:$0xff] %v7275_v19 }
 0x46f   :  { %2955 = vrot.lane.b32.xlu0 %v9405_v18, %s5380_s9  ;;  %2989 = vrot.lane.b32.xlu1 %v6864_v33, %s5381_s30  ;;  %s5397_s9 = smov 38  }
 0x471   :  { %v7279_v14 = vpop.permute.xlu0 %2583  ;;  %v7281_v8 = vpop.permute.xlu1 %2585 }
 0x472   :  { %9458 = vst [vmem:[#allocation99_spill] sm:$0xff] %v7279_v14  ;;  %9459 = vst [vmem:[#allocation98_spill] sm:$0xff] %v7281_v8 }
 0x473   :  { %2991 = vrot.lane.b32.xlu0 %v6868_v30, %s5381_s30  ;;  %2993 = vrot.lane.b32.xlu1 %v6876_v24, %s5381_s30 }
 0x475   :  { %v7285_v41 = vpop.permute.xlu0 %2610  ;;  %v7287_v7 = vpop.permute.xlu1 %2612 }
 0x476   :  { %9460 = vst [vmem:[#allocation100_spill] sm:$0xff] %v7285_v41  ;;  %9461 = vst [vmem:[#allocation101_spill] sm:$0xff] %v7287_v7 }
 0x477   :  { %2995 = vrot.lane.b32.xlu0 %v7039_v4, %s5381_s30  ;;  %2987 = vrot.lane.b32.xlu1 %v9405_v18, %s5381_s30  ;;  %s5401_s30 = smov 124  }
 0x479   :  { %v7291_v56 = vpop.permute.xlu0 %2614  ;;  %v7293_v19 = vpop.permute.xlu1 %2616 }
 0x47a   :  { %9462 = vst [vmem:[#allocation103_spill] sm:$0xff] %v7291_v56  ;;  %9463 = vst [vmem:[#allocation102_spill] sm:$0xff] %v7293_v19 }
 0x47b   :  { %3021 = vrot.lane.b32.xlu0 %v6864_v33, %s5382_s15  ;;  %3023 = vrot.lane.b32.xlu1 %v6868_v30, %s5382_s15 }
 0x47d   :  { %v7297_v8 = vpop.permute.xlu0 %2641  ;;  %v7299_v14 = vpop.permute.xlu1 %2643 }
 0x47e   :  { %9464 = vst [vmem:[#allocation104_spill] sm:$0xff] %v7297_v8  ;;  %9465 = vst [vmem:[#allocation105_spill] sm:$0xff] %v7299_v14 }
 0x47f   :  { %3025 = vrot.lane.b32.xlu0 %v6876_v24, %s5382_s15  ;;  %3027 = vrot.lane.b32.xlu1 %v7039_v4, %s5382_s15 }
 0x481   :  { %v7303_v41 = vpop.permute.xlu0 %2645  ;;  %v7305_v7 = vpop.permute.xlu1 %2647 }
 0x482   :  { %9466 = vst [vmem:[#allocation107_spill] sm:$0xff] %v7303_v41  ;;  %9467 = vst [vmem:[#allocation106_spill] sm:$0xff] %v7305_v7 }
 0x483   :  { %3019 = vrot.lane.b32.xlu0 %v9405_v18, %s5382_s15  ;;  %3053 = vrot.lane.b32.xlu1 %v6864_v33, %s5383_s4  ;;  %s5402_s15 = smov 121  }
 0x485   :  { %v7309_v19 = vpop.permute.xlu0 %2672  ;;  %v7311_v56 = vpop.permute.xlu1 %2674 }
 0x486   :  { %9468 = vst [vmem:[#allocation108_spill] sm:$0xff] %v7309_v19  ;;  %9469 = vst [vmem:[#allocation109_spill] sm:$0xff] %v7311_v56 }
 0x487   :  { %3055 = vrot.lane.b32.xlu0 %v6868_v30, %s5383_s4  ;;  %3057 = vrot.lane.b32.xlu1 %v6876_v24, %s5383_s4 }
 0x489   :  { %v7315_v8 = vpop.permute.xlu0 %2676  ;;  %v7317_v14 = vpop.permute.xlu1 %2678 }
 0x48a   :  { %9470 = vst [vmem:[#allocation111_spill] sm:$0xff] %v7315_v8  ;;  %9471 = vst [vmem:[#allocation110_spill] sm:$0xff] %v7317_v14 }
 0x48b   :  { %3059 = vrot.lane.b32.xlu0 %v7039_v4, %s5383_s4  ;;  %3051 = vrot.lane.b32.xlu1 %v9405_v18, %s5383_s4  ;;  %s5403_s4 = smov 118  }
 0x48d   :  { %v7321_v7 = vpop.permute.xlu0 %2670  ;;  %v7323_v41 = vpop.permute.xlu1 %2704 }
 0x48e   :  { %9472 = vst [vmem:[#allocation112_spill] sm:$0xff] %v7321_v7  ;;  %9473 = vst [vmem:[#allocation113_spill] sm:$0xff] %v7323_v41 }
 0x48f   :  { %3085 = vrot.lane.b32.xlu0 %v6864_v33, %s5384_s21  ;;  %3087 = vrot.lane.b32.xlu1 %v6868_v30, %s5384_s21 }
 0x491   :  { %v7327_v19 = vpop.permute.xlu0 %2706  ;;  %v7329_v56 = vpop.permute.xlu1 %2708 }
 0x492   :  { %9474 = vst [vmem:[#allocation115_spill] sm:$0xff] %v7327_v19  ;;  %9475 = vst [vmem:[#allocation114_spill] sm:$0xff] %v7329_v56 }
 0x493   :  { %3089 = vrot.lane.b32.xlu0 %v6876_v24, %s5384_s21  ;;  %3091 = vrot.lane.b32.xlu1 %v7039_v4, %s5384_s21 }
 0x495   :  { %v7333_v14 = vpop.permute.xlu0 %2710  ;;  %v7335_v8 = vpop.permute.xlu1 %2702 }
 0x496   :  { %9476 = vst [vmem:[#allocation116_spill] sm:$0xff] %v7333_v14  ;;  %9477 = vst [vmem:[#allocation117_spill] sm:$0xff] %v7335_v8 }
 0x497   :  { %3083 = vrot.lane.b32.xlu0 %v9405_v18, %s5384_s21  ;;  %3117 = vrot.lane.b32.xlu1 %v6864_v33, %s5385_s23 }
 0x499   :  { %v7339_v41 = vpop.permute.xlu0 %2736  ;;  %v7341_v7 = vpop.permute.xlu1 %2738 }
 0x49a   :  { %9478 = vst [vmem:[#allocation119_spill] sm:$0xff] %v7339_v41  ;;  %9479 = vst [vmem:[#allocation118_spill] sm:$0xff] %v7341_v7 }
 0x49b   :  { %3119 = vrot.lane.b32.xlu0 %v6868_v30, %s5385_s23  ;;  %3121 = vrot.lane.b32.xlu1 %v6876_v24, %s5385_s23 }
 0x49d   :  { %v7345_v56 = vpop.permute.xlu0 %2740  ;;  %v7347_v19 = vpop.permute.xlu1 %2742 }
 0x49e   :  { %9480 = vst [vmem:[#allocation120_spill] sm:$0xff] %v7345_v56  ;;  %9481 = vst [vmem:[#allocation122_spill] sm:$0xff] %v7347_v19 }
 0x49f   :  { %3123 = vrot.lane.b32.xlu0 %v7039_v4, %s5385_s23  ;;  %3115 = vrot.lane.b32.xlu1 %v9405_v18, %s5385_s23 }
 0x4a1   :  { %v7351_v8 = vpop.permute.xlu0 %2734  ;;  %v7353_v14 = vpop.permute.xlu1 %2768 }
 0x4a2   :  { %9482 = vst [vmem:[#allocation121_spill] sm:$0xff] %v7351_v8  ;;  %9483 = vst [vmem:[#allocation46_spill] sm:$0xff] %v7353_v14 }
 0x4a3   :  { %3149 = vrot.lane.b32.xlu0 %v6864_v33, %s5328_s24  ;;  %3151 = vrot.lane.b32.xlu1 %v6868_v30, %s5328_s24 }
 0x4a5   :  { %v7359_v41 = vpop.permute.xlu0 %2770  ;;  %v7361_v7 = vpop.permute.xlu1 %2772 }
 0x4a6   :  { %9484 = vst [vmem:[#allocation24_spill] sm:$0xff] %v7359_v41  ;;  %9485 = vst [vmem:[#allocation65_spill] sm:$0xff] %v7361_v7 }
 0x4a7   :  { %3153 = vrot.lane.b32.xlu0 %v6876_v24, %s5328_s24  ;;  %3155 = vrot.lane.b32.xlu1 %v7039_v4, %s5328_s24  ;;  %s5386_s24 = smov 122  }
 0x4a9   :  { %v7367_v19 = vpop.permute.xlu0 %2774  ;;  %v7369_v8 = vpop.permute.xlu1 %2766 }
 0x4aa   :  { %9486 = vst [vmem:[#allocation45_spill] sm:$0xff] %v7367_v19  ;;  %9487 = vst [vmem:[#allocation28_spill] sm:$0xff] %v7369_v8 }
 0x4ab   :  { %3195 = vrot.lane.b32.xlu0 %v6868_v30, %s5334_s29  ;;  %3197 = vrot.lane.b32.xlu1 %v6876_v24, %s5334_s29 }
 0x4ad   :  { %v7375_v14 = vpop.permute.xlu0 %2800  ;;  %v7377_v41 = vpop.permute.xlu1 %2802 }
 0x4ae   :  { %9488 = vst [vmem:[#allocation50_spill] sm:$0xff] %v7375_v14  ;;  %9489 = vst [vmem:[#allocation66_spill] sm:$0xff] %v7377_v41 }
 0x4af   :  { %3199 = vrot.lane.b32.xlu0 %v7039_v4, %s5334_s29  ;;  %3193 = vrot.lane.b32.xlu1 %v6864_v33, %s5334_s29  ;;  %s5387_s29 = smov 119  }
 0x4b1   :  { %v7383_v7 = vpop.permute.xlu0 %2804  ;;  %v7385_v19 = vpop.permute.xlu1 %2806 }
 0x4b2   :  { %9490 = vst [vmem:[#allocation69_spill] sm:$0xff] %v7383_v7  ;;  %9491 = vst [vmem:[#allocation49_spill] sm:$0xff] %v7385_v19 }
 0x4b3   :  { %3226 = vrot.lane.b32.xlu0 %v6868_v30, %s5386_s24  ;;  %3228 = vrot.lane.b32.xlu1 %v6876_v24, %s5386_s24 }
 0x4b5   :  { %v7389_v8 = vpop.permute.xlu0 %2798  ;;  %v7391_v14 = vpop.permute.xlu1 %2832 }
 0x4b6   :  { %9492 = vst [vmem:[#allocation123_spill] sm:$0xff] %v7389_v8  ;;  %9493 = vst [vmem:[#allocation124_spill] sm:$0xff] %v7391_v14 }
 0x4b7   :  { %3230 = vrot.lane.b32.xlu0 %v7039_v4, %s5386_s24  ;;  %3232 = vrot.lane.b32.xlu1 %v9405_v18, %s5386_s24 }
 0x4b9   :  { %v7395_v41 = vpop.permute.xlu0 %2834  ;;  %v7397_v56 = vpop.permute.xlu1 %2836 }
 0x4ba   :  { %9494 = vst [vmem:[#allocation125_spill] sm:$0xff] %v7395_v41  ;;  %9495 = vst [vmem:[#allocation126_spill] sm:$0xff] %v7397_v56 }
 0x4bb   :  { %3224 = vrot.lane.b32.xlu0 %v6864_v33, %s5386_s24  ;;  %3258 = vrot.lane.b32.xlu1 %v6868_v30, %s5387_s29 }
 0x4bd   :  { %v7401_v19 = vpop.permute.xlu0 %2838  ;;  %v7403_v7 = vpop.permute.xlu1 %2830 }
 0x4be   :  { %9496 = vst [vmem:[#allocation127_spill] sm:$0xff] %v7401_v19  ;;  %9497 = vst [vmem:[#allocation128_spill] sm:$0xff] %v7403_v7 }
 0x4bf   :  { %3260 = vrot.lane.b32.xlu0 %v6876_v24, %s5387_s29  ;;  %3262 = vrot.lane.b32.xlu1 %v7039_v4, %s5387_s29 }
 0x4c1   :  { %v7407_v14 = vpop.permute.xlu0 %2864  ;;  %v7409_v8 = vpop.permute.xlu1 %2866 }
 0x4c2   :  { %9498 = vst [vmem:[#allocation129_spill] sm:$0xff] %v7407_v14  ;;  %9499 = vst [vmem:[#allocation130_spill] sm:$0xff] %v7409_v8 }
 0x4c3   :  { %3264 = vrot.lane.b32.xlu0 %v9405_v18, %s5387_s29  ;;  %3256 = vrot.lane.b32.xlu1 %v6864_v33, %s5387_s29 }
 0x4c5   :  { %v7413_v56 = vpop.permute.xlu0 %2868  ;;  %v7415_v41 = vpop.permute.xlu1 %2870 }
 0x4c6   :  { %9500 = vst [vmem:[#allocation131_spill] sm:$0xff] %v7413_v56  ;;  %9501 = vst [vmem:[#allocation132_spill] sm:$0xff] %v7415_v41 }
 0x4c7   :  { %3290 = vrot.lane.b32.xlu0 %v6868_v30, %s5388_s5  ;;  %3292 = vrot.lane.b32.xlu1 %v6876_v24, %s5388_s5 }
 0x4c9   :  { %v7419_v19 = vpop.permute.xlu0 %2895  ;;  %v7421_v7 = vpop.permute.xlu1 %2897 }
 0x4ca   :  { %9502 = vst [vmem:[#allocation133_spill] sm:$0xff] %v7419_v19  ;;  %9503 = vst [vmem:[#allocation134_spill] sm:$0xff] %v7421_v7 }
 0x4cb   :  { %3294 = vrot.lane.b32.xlu0 %v7039_v4, %s5388_s5  ;;  %3296 = vrot.lane.b32.xlu1 %v9405_v18, %s5388_s5 }
 0x4cd   :  { %v7425_v8 = vpop.permute.xlu0 %2899  ;;  %v7427_v14 = vpop.permute.xlu1 %2901 }
 0x4ce   :  { %9504 = vst [vmem:[#allocation135_spill] sm:$0xff] %v7425_v8  ;;  %9505 = vst [vmem:[#allocation136_spill] sm:$0xff] %v7427_v14 }
 0x4cf   :  { %3288 = vrot.lane.b32.xlu0 %v6864_v33, %s5388_s5  ;;  %3322 = vrot.lane.b32.xlu1 %v6868_v30, %s5389_s22 }
 0x4d1   :  { %v7431_v41 = vpop.permute.xlu0 %2926  ;;  %v7433_v56 = vpop.permute.xlu1 %2928 }
 0x4d2   :  { %9506 = vst [vmem:[#allocation137_spill] sm:$0xff] %v7431_v41  ;;  %9507 = vst [vmem:[#allocation138_spill] sm:$0xff] %v7433_v56 }
 0x4d3   :  { %3324 = vrot.lane.b32.xlu0 %v6876_v24, %s5389_s22  ;;  %3326 = vrot.lane.b32.xlu1 %v7039_v4, %s5389_s22 }
 0x4d5   :  { %v7437_v7 = vpop.permute.xlu0 %2930  ;;  %v7439_v19 = vpop.permute.xlu1 %2932 }
 0x4d6   :  { %9508 = vst [vmem:[#allocation139_spill] sm:$0xff] %v7437_v7  ;;  %9509 = vst [vmem:[#allocation140_spill] sm:$0xff] %v7439_v19 }
 0x4d7   :  { %3328 = vrot.lane.b32.xlu0 %v9405_v18, %s5389_s22  ;;  %3320 = vrot.lane.b32.xlu1 %v6864_v33, %s5389_s22 }
 0x4d9   :  { %v7443_v14 = vpop.permute.xlu0 %2957  ;;  %v7445_v8 = vpop.permute.xlu1 %2959 }
 0x4da   :  { %9510 = vst [vmem:[#allocation141_spill] sm:$0xff] %v7443_v14  ;;  %9511 = vst [vmem:[#allocation142_spill] sm:$0xff] %v7445_v8 }
 0x4db   :  { %3354 = vrot.lane.b32.xlu0 %v6868_v30, %s5390_s27  ;;  %3356 = vrot.lane.b32.xlu1 %v6876_v24, %s5390_s27 }
 0x4dd   :  { %v7449_v56 = vpop.permute.xlu0 %2961  ;;  %v7451_v41 = vpop.permute.xlu1 %2963 }
 0x4de   :  { %9512 = vst [vmem:[#allocation143_spill] sm:$0xff] %v7449_v56  ;;  %9513 = vst [vmem:[#allocation144_spill] sm:$0xff] %v7451_v41 }
 0x4df   :  { %3358 = vrot.lane.b32.xlu0 %v7039_v4, %s5390_s27  ;;  %3360 = vrot.lane.b32.xlu1 %v9405_v18, %s5390_s27 }
 0x4e1   :  { %v7455_v19 = vpop.permute.xlu0 %2955  ;;  %v7457_v7 = vpop.permute.xlu1 %2989 }
 0x4e2   :  { %9514 = vst [vmem:[#allocation145_spill] sm:$0xff] %v7455_v19  ;;  %9515 = vst [vmem:[#allocation146_spill] sm:$0xff] %v7457_v7 }
 0x4e3   :  { %3352 = vrot.lane.b32.xlu0 %v6864_v33, %s5390_s27  ;;  %3386 = vrot.lane.b32.xlu1 %v6868_v30, %s5391_s20 }
 0x4e5   :  { %v7461_v14 = vpop.permute.xlu0 %2991  ;;  %v7463_v8 = vpop.permute.xlu1 %2993 }
 0x4e6   :  { %9516 = vst [vmem:[#allocation147_spill] sm:$0xff] %v7461_v14  ;;  %9517 = vst [vmem:[#allocation148_spill] sm:$0xff] %v7463_v8 }
 0x4e7   :  { %3388 = vrot.lane.b32.xlu0 %v6876_v24, %s5391_s20  ;;  %3390 = vrot.lane.b32.xlu1 %v7039_v4, %s5391_s20 }
 0x4e9   :  { %v7467_v41 = vpop.permute.xlu0 %2995  ;;  %v7469_v56 = vpop.permute.xlu1 %2987 }
 0x4ea   :  { %9518 = vst [vmem:[#allocation149_spill] sm:$0xff] %v7467_v41  ;;  %9519 = vst [vmem:[#allocation150_spill] sm:$0xff] %v7469_v56  ;;  %v4978_v41 = vunpack.i.l.bf16 %v6978_v27 }
 0x4eb   :  { %3392 = vrot.lane.b32.xlu0 %v9405_v18, %s5391_s20  ;;  %3384 = vrot.lane.b32.xlu1 %v6864_v33, %s5391_s20 }
 0x4ed   :  { %v7473_v7 = vpop.permute.xlu0 %3021  ;;  %v7475_v19 = vpop.permute.xlu1 %3023 }
 0x4ee   :  { %9520 = vst [vmem:[#allocation151_spill] sm:$0xff] %v7473_v7  ;;  %9521 = vst [vmem:[#allocation152_spill] sm:$0xff] %v7475_v19 }
 0x4ef   :  { %3418 = vrot.lane.b32.xlu0 %v6868_v30, %s5349_s7  ;;  %3420 = vrot.lane.b32.xlu1 %v6876_v24, %s5349_s7 }
 0x4f1   :  { %v7481_v8 = vpop.permute.xlu0 %3025  ;;  %v7483_v14 = vpop.permute.xlu1 %3027 }
 0x4f2   :  { %9522 = vst [vmem:[#allocation153_spill] sm:$0xff] %v7481_v8  ;;  %9523 = vst [vmem:[#allocation154_spill] sm:$0xff] %v7483_v14 }
 0x4f3   :  { %3422 = vrot.lane.b32.xlu0 %v7039_v4, %s5349_s7  ;;  %3416 = vrot.lane.b32.xlu1 %v6864_v33, %s5349_s7  ;;  %s5392_s7 = smov 74  }
 0x4f5   :  { %v7489_v56 = vpop.permute.xlu0 %3019  ;;  %v7491_v7 = vpop.permute.xlu1 %3053 }
 0x4f6   :  { %9524 = vst [vmem:[#allocation155_spill] sm:$0xff] %v7489_v56  ;;  %9525 = vst [vmem:[#allocation156_spill] sm:$0xff] %v7491_v7 }
 0x4f7   :  { %3449 = vrot.lane.b32.xlu0 %v6868_v30, %s5352_s2  ;;  %3451 = vrot.lane.b32.xlu1 %v6876_v24, %s5352_s2 }
 0x4f9   :  { %v7497_v19 = vpop.permute.xlu0 %3055  ;;  %v7499_v8 = vpop.permute.xlu1 %3057 }
 0x4fa   :  { %9526 = vst [vmem:[#allocation157_spill] sm:$0xff] %v7497_v19  ;;  %9527 = vst [vmem:[#allocation158_spill] sm:$0xff] %v7499_v8 }
 0x4fb   :  { %3453 = vrot.lane.b32.xlu0 %v7039_v4, %s5352_s2  ;;  %3447 = vrot.lane.b32.xlu1 %v6864_v33, %s5352_s2  ;;  %s5393_s2 = smov 71  }
 0x4fd   :  { %v7505_v14 = vpop.permute.xlu0 %3059  ;;  %v7507_v56 = vpop.permute.xlu1 %3051 }
 0x4fe   :  { %9528 = vst [vmem:[#allocation159_spill] sm:$0xff] %v7505_v14  ;;  %9529 = vst [vmem:[#allocation160_spill] sm:$0xff] %v7507_v56  ;;  %v4979_v56 = vunpack.i.h.bf16 %v6978_v27 }
 0x4ff   :  { %3480 = vrot.lane.b32.xlu0 %v6868_v30, %s5355_s19  ;;  %3482 = vrot.lane.b32.xlu1 %v6876_v24, %s5355_s19 }
 0x501   :  { %v7513_v7 = vpop.permute.xlu0 %3085  ;;  %v7515_v19 = vpop.permute.xlu1 %3087 }
 0x502   :  { %9530 = vst [vmem:[#allocation161_spill] sm:$0xff] %v7513_v7  ;;  %9531 = vst [vmem:[#allocation162_spill] sm:$0xff] %v7515_v19 }
 0x503   :  { %3484 = vrot.lane.b32.xlu0 %v7039_v4, %s5355_s19  ;;  %3478 = vrot.lane.b32.xlu1 %v6864_v33, %s5355_s19  ;;  %s5394_s19 = smov 68  }
 0x505   :  { %v7521_v8 = vpop.permute.xlu0 %3089  ;;  %v7523_v14 = vpop.permute.xlu1 %3091 }
 0x506   :  { %9532 = vst [vmem:[#allocation163_spill] sm:$0xff] %v7521_v8  ;;  %9533 = vst [vmem:[#allocation164_spill] sm:$0xff] %v7523_v14  ;;  %v1917_v8 = vsel %vm1916_vm10, %v4978_v41, %v4979_v56  ;;  %v4984_v41 = vunpack.i.h.bf16 %v6993_v44 }
 0x507   :  { %3511 = vrot.lane.b32.xlu0 %v6868_v30, %s5392_s7  ;;  %3513 = vrot.lane.b32.xlu1 %v6876_v24, %s5392_s7 }
 0x509   :  { %v7529_v7 = vpop.permute.xlu0 %3083  ;;  %v7531_v19 = vpop.permute.xlu1 %3117 }
 0x50a   :  { %9534 = vst [vmem:[#allocation165_spill] sm:$0xff] %v7529_v7  ;;  %9535 = vst [vmem:[#allocation166_spill] sm:$0xff] %v7531_v19  ;;  %v1918_v19 = vsel %vm1916_vm10, %v4979_v56, %v6984_v34  ;;  %v1919_v7 = vsel %vm1916_vm10, %v6984_v34, %v6986_v51  ;;  %v1949_v56 = vsel %vm9115_vm11, %v4983_v42, %v4984_v41  ;;  %v1935_v42 = vld [vmem:[#allocation9 + $0x28] sm:$0xff] }
 0x50b   :  { %3515 = vrot.lane.b32.xlu0 %v7039_v4, %s5392_s7  ;;  %3517 = vrot.lane.b32.xlu1 %v9405_v18, %s5392_s7  ;;  %v1920_v34 = vsel %vm1916_vm10, %v6986_v51, %v6991_v0  ;;  %v1950_v51 = vsel %vm9115_vm11, %v4984_v41, %v6997_v45  ;;  %v1951_v0 = vsel %vm9115_vm11, %v6997_v45, %v6999_v5 }
 0x50c   :  { %v1981_v45 = vsel %vm9111_vm7, %v4988_v63, %v4989_v35  ;;  %v1998_v63 = vld [vmem:[#allocation9 + $0x60] sm:$0xff] }
 0x50d   :  { %v7539_v59 = vpop.permute.xlu0 %3119  ;;  %v7548_v15 = vpop.permute.xlu1 %3121 }
 0x50e   :  { %9539 = vst [vmem:[#allocation167_spill] sm:$0xff] %v7539_v59  ;;  %9540 = vst [vmem:[#allocation168_spill] sm:$0xff] %v7548_v15  ;;  %v1925_v59 = vmul.f32 %v1917_v8, %v1892_v52  ;;  %v1926_v8 = vmul.f32 %v1918_v19, %v1893_v50  ;;  %v1927_v52 = vmul.f32 %v1919_v7, %v1894_v40  ;;  %v1936_v40 = vld [vmem:[#allocation9 + $0x30] sm:$0xff]  ;;  %v4993_v50 = vunpack.i.l.bf16 %v7017_v9 }
 0x50f   :  { %3509 = vrot.lane.b32.xlu0 %v6864_v33, %s5392_s7  ;;  %3543 = vrot.lane.b32.xlu1 %v6868_v30, %s5393_s2  ;;  %v1928_v19 = vmul.f32 %v1920_v34, %v1895_v16  ;;  %v1952_v9 = vsel %vm9115_vm11, %v6999_v5, %v7003_v29  ;;  %v1959_v16 = vmul.f32 %v1951_v0, %v1936_v40  ;;  %v1968_v34 = vld [vmem:[#allocation9 + $0x50] sm:$0xff]  ;;  %v1969_v29 = vld [vmem:[#allocation9 + $0x58] sm:$0xff]  ;;  %vm2268_vm11 = vcmask 179200  }
 0x510   :  { %v1929_v7 = vadd.f32 %v1925_v59, %v6976_v26  ;;  %v1957_v59 = vmul.f32 %v1949_v56, %v1934_v12  ;;  %v1930_v62 = vadd.f32 %v1926_v8, %v6976_v26  ;;  %v1931_v41 = vadd.f32 %v1927_v52, %v6976_v26  ;;  %v1967_v56 = vld [vmem:[#allocation9 + $0x48] sm:$0xff] }
 0x511   :  { %v7561_v27 = vpop.permute.xlu0 %3123  ;;  %v7569_v14 = vpop.permute.xlu1 %3115  ;;  %v1958_v12 = vmul.f32 %v1950_v51, %v1935_v42  ;;  %v1983_v8 = vsel %vm9111_vm7, %v7009_v37, %v7011_v17  ;;  %v2013_v5 = vsel %vm9112_vm0, %v4993_v50, %v4994_v57  ;;  %v1984_v52 = vsel %vm9111_vm7, %v7011_v17, %v7015_v61 }
 0x512   :  { %9549 = vst [vmem:[#allocation169_spill] sm:$0xff] %v7561_v27  ;;  %9550 = vst [vmem:[#allocation170_spill] sm:$0xff] %v7569_v14  ;;  %v1966_v27 = vld [vmem:[#allocation9 + $0x40] sm:$0xff]  ;;  %v1937_v14 = vld [vmem:[#allocation9 + $0x38] sm:$0xff]  ;;  %v4999_v42 = vunpack.i.h.bf16 %v7032_v23  ;;  %v1932_v40 = vadd.f32 %v1928_v19, %v6976_v26  ;;  %v1991_v44 = vmul.f32 %v1983_v8, %v1968_v34  ;;  %v2014_v17 = vsel %vm9112_vm0, %v4994_v57, %v7022_v1 }
 0x513   :  { %3545 = vrot.lane.b32.xlu0 %v6876_v24, %s5393_s2  ;;  %3547 = vrot.lane.b32.xlu1 %v7039_v4, %s5393_s2  ;;  %v1989_v51 = vmul.f32 %v1981_v45, %v1966_v27  ;;  %v1960_v0 = vmul.f32 %v1952_v9, %v1937_v14  ;;  %v2015_v61 = vsel %vm9112_vm0, %v7022_v1, %v7024_v54  ;;  %v2001_v19 = vld [vmem:[#allocation9 + $0x78] sm:$0xff]  ;;  %v5004_v1 = vunpack.i.h.bf16 %v7047_v10 }
 0x514   :  { %v2021_v26 = vmul.f32 %v2013_v5, %v1998_v63  ;;  %v1992_v27 = vmul.f32 %v1984_v52, %v1969_v29  ;;  %v2016_v57 = vsel %vm9112_vm0, %v7024_v54, %v7030_v53  ;;  %v5003_v45 = vunpack.i.l.bf16 %v7047_v10  ;;  %v2031_v5 = vld [vmem:[#allocation9 + $0x88] sm:$0xff]  ;;  %v2032_v29 = vld [vmem:[#allocation9 + $0x90] sm:$0xff] }
 0x515   :  { %v7584_v36 = vpop.permute.xlu0 %3149  ;;  %v7592_v15 = vpop.permute.xlu1 %3151  ;;  %v2022_v9 = vmul.f32 %v2014_v17, %v1999_v32  ;;  %v5009_v8 = vunpack.i.h.bf16 %v7059_v48  ;;  %v5008_v54 = vunpack.i.l.bf16 %v7059_v48  ;;  %v2024_v10 = vmul.f32 %v2016_v57, %v2001_v19 }
 0x516   :  { %9552 = vst [vmem:[#allocation171_spill] sm:$0xff] %v7584_v36  ;;  %9553 = vst [vmem:[#allocation172_spill] sm:$0xff] %v7592_v15  ;;  %v1982_v36 = vsel %vm9111_vm7, %v4989_v35, %v7009_v37  ;;  %v4998_v35 = vunpack.i.l.bf16 %v7032_v23  ;;  %v1961_v37 = vadd.f32 %v1957_v59, %v1929_v7  ;;  %v1962_v7 = vadd.f32 %v1958_v12, %v1930_v62 }
 0x517   :  { %3549 = vrot.lane.b32.xlu0 %v9405_v18, %s5393_s2  ;;  %3541 = vrot.lane.b32.xlu1 %v6864_v33, %s5393_s2  ;;  %v1990_v50 = vmul.f32 %v1982_v36, %v1967_v56  ;;  %v1963_v59 = vadd.f32 %v1959_v16, %v1931_v41  ;;  %v2030_v36 = vld [vmem:[#allocation9 + $0x80] sm:$0xff]  ;;  %v1964_v41 = vadd.f32 %v1960_v0, %v1932_v40  ;;  %vm9117_vm7 = vcmask 449536   ;;  %v2064_v0 = vld [vmem:[#allocation9 + $0xb0] sm:$0xff] }
 0x518   :  { %v2045_v14 = vsel %vm9114_vm3, %v4998_v35, %v4999_v42  ;;  %v1993_v62 = vadd.f32 %v1989_v51, %v1961_v37  ;;  %v2023_v12 = vmul.f32 %v2015_v61, %v2000_v58  ;;  %v2046_v52 = vsel %vm9114_vm3, %v4999_v42, %v7036_v31  ;;  %v2062_v35 = vld [vmem:[#allocation9 + $0xa0] sm:$0xff]  ;;  %v2033_v37 = vld [vmem:[#allocation9 + $0x98] sm:$0xff] }
 0x519   :  { %v7610_v15 = vpop.permute.xlu0 %3153  ;;  %v7617_v23 = vpop.permute.xlu1 %3155  ;;  %v1994_v56 = vadd.f32 %v1990_v50, %v1962_v7  ;;  %v1995_v34 = vadd.f32 %v1991_v44, %v1963_v59  ;;  %v2053_v63 = vmul.f32 %v2045_v14, %v2030_v36  ;;  %v2047_v32 = vsel %vm9114_vm3, %v7036_v31, %v7041_v11  ;;  %v2063_v31 = vld [vmem:[#allocation9 + $0xa8] sm:$0xff] }
 0x51a   :  { %v2025_v58 = vadd.f32 %v2021_v26, %v1993_v62  ;;  %v1996_v44 = vadd.f32 %v1992_v27, %v1964_v41  ;;  %v2077_v48 = vsel %vm9113_vm15, %v5003_v45, %v5004_v1  ;;  %v2048_v40 = vsel %vm9114_vm3, %v7041_v11, %v7045_v39  ;;  %v2094_v11 = vld [vmem:[#allocation9 + $0xc0] sm:$0xff]  ;;  %v2065_v26 = vld [vmem:[#allocation9 + $0xb8] sm:$0xff] }
 0x51b   :  { %3575 = vrot.lane.b32.xlu0 %v6868_v30, %s5394_s19  ;;  %3577 = vrot.lane.b32.xlu1 %v6876_v24, %s5394_s19  ;;  %vm9116_vm0 = vcmask 424960   ;;  %v2026_v42 = vadd.f32 %v2022_v9, %v1994_v56  ;;  %v2027_v51 = vadd.f32 %v2023_v12, %v1995_v34  ;;  %v2078_v50 = vsel %vm9113_vm15, %v5004_v1, %v7051_v22  ;;  %v2095_v9 = vld [vmem:[#allocation9 + $0xc8] sm:$0xff]  ;;  %v2096_v12 = vld [vmem:[#allocation9 + $0xd0] sm:$0xff] }
 0x51c   :  { %v2079_v17 = vsel %vm9113_vm15, %v7051_v22, %v7053_v21  ;;  %v2054_v7 = vmul.f32 %v2046_v52, %v2031_v5  ;;  %v2055_v59 = vmul.f32 %v2047_v32, %v2032_v29  ;;  %v2109_v39 = vsel %vm2108_vm5, %v5008_v54, %v5009_v8 }
 0x51d   :  { %v7629_v16 = vpop.permute.xlu0 %3195  ;;  %v7633_v53 = vpop.permute.xlu1 %3197  ;;  %v2080_v27 = vsel %vm9113_vm15, %v7053_v21, %v7057_v60  ;;  %v2057_v14 = vadd.f32 %v2053_v63, %v2025_v58  ;;  %v2028_v19 = vadd.f32 %v2024_v10, %v1996_v44  ;;  %v2085_v57 = vmul.f32 %v2077_v48, %v2062_v35  ;;  %v2097_v35 = vld [vmem:[#allocation9 + $0xd8] sm:$0xff] }
 0x51e   :  { %v2056_v1 = vmul.f32 %v2048_v40, %v2033_v37  ;;  %v2086_v22 = vmul.f32 %v2078_v50, %v2063_v31  ;;  %v2087_v45 = vmul.f32 %v2079_v17, %v2064_v0  ;;  %v5014_v62 = vunpack.i.h.bf16 %v7071_v28  ;;  %v2127_v31 = vld [vmem:[#allocation9 + $0xe8] sm:$0xff]  ;;  %v2128_v0 = vld [vmem:[#allocation9 + $0xf0] sm:$0xff] }
 0x51f   :  { %3579 = vrot.lane.b32.xlu0 %v7039_v4, %s5394_s19  ;;  %3581 = vrot.lane.b32.xlu1 %v9405_v18, %s5394_s19  ;;  %v5013_v41 = vunpack.i.l.bf16 %v7071_v28  ;;  %v2117_v21 = vmul.f32 %v2109_v39, %v2094_v11  ;;  %v2088_v60 = vmul.f32 %v2080_v27, %v2065_v26  ;;  %v2110_v56 = vsel %vm2108_vm5, %v5009_v8, %v7063_v47  ;;  %v2158_v39 = vld [vmem:[#allocation9 + $0x100] sm:$0xff]  ;;  %v2129_v27 = vld [vmem:[#allocation9 + $0xf8] sm:$0xff] }
 0x520   :  { %v2111_v34 = vsel %vm2108_vm5, %v7063_v47, %v7065_v46  ;;  %v2058_v63 = vadd.f32 %v2054_v7, %v2026_v42  ;;  %v2059_v10 = vadd.f32 %v2055_v59, %v2027_v51  ;;  %vm2204_vm15 = vcmask 228352   ;;  %v2126_v47 = vld [vmem:[#allocation9 + $0xe0] sm:$0xff] }
 0x521   :  { %v7653_v61 = vpop.permute.xlu0 %3199  ;;  %v7659_v36 = vpop.permute.xlu1 %3193  ;;  %vm2236_vm3 = vcmask 203776   ;;  %v2089_v5 = vadd.f32 %v2085_v57, %v2057_v14  ;;  %v2060_v29 = vadd.f32 %v2056_v1, %v2028_v19  ;;  %v5019_v52 = vunpack.i.h.bf16 %v7085_v25  ;;  %v2159_v57 = vld [vmem:[#allocation9 + $0x108] sm:$0xff]  ;;  %v2160_v1 = vld [vmem:[#allocation9 + $0x110] sm:$0xff] }
 0x522   :  { %v5018_v32 = vunpack.i.l.bf16 %v7085_v25  ;;  %v2118_v8 = vmul.f32 %v2110_v56, %v2095_v9  ;;  %v2119_v58 = vmul.f32 %v2111_v34, %v2096_v12  ;;  %v2141_v44 = vsel %vm9117_vm7, %v5013_v41, %v5014_v62  ;;  %v2190_v9 = vld [vmem:[#allocation9 + $0x120] sm:$0xff]  ;;  %v2161_v56 = vld [vmem:[#allocation9 + $0x118] sm:$0xff] }
 0x523   :  { %3573 = vrot.lane.b32.xlu0 %v6864_v33, %s5394_s19  ;;  %3607 = vrot.lane.b32.xlu1 %v6868_v30, %s5395_s0  ;;  %v2112_v48 = vsel %vm2108_vm5, %v7065_v46, %v7069_v43  ;;  %v2090_v37 = vadd.f32 %v2086_v22, %v2058_v63  ;;  %v2091_v40 = vadd.f32 %v2087_v45, %v2059_v10  ;;  %v5024_v46 = vunpack.i.h.bf16 %v7101_v6 }
 0x524   :  { %v2121_v42 = vadd.f32 %v2117_v21, %v2089_v5  ;;  %v2092_v25 = vadd.f32 %v2088_v60, %v2060_v29  ;;  %v2142_v50 = vsel %vm9117_vm7, %v5014_v62, %v7075_v38  ;;  %v2143_v17 = vsel %vm9117_vm7, %v7075_v38, %v7077_v55 }
 0x525   :  { %v7672_v54 = vpop.permute.xlu0 %3226  ;;  %v7674_v28 = vpop.permute.xlu1 %3228  ;;  %v5023_v43 = vunpack.i.l.bf16 %v7101_v6  ;;  %v2149_v59 = vmul.f32 %v2141_v44, %v2126_v47  ;;  %v2120_v11 = vmul.f32 %v2112_v48, %v2097_v35  ;;  %v2173_v26 = vsel %vm9116_vm0, %v5018_v32, %v5019_v52  ;;  %v9554_v32 = vld [vmem:[#allocation30_spill] sm:$0xff] }
 0x526   :  { %v2144_v14 = vsel %vm9117_vm7, %v7077_v55, %v7083_v13  ;;  %v2122_v38 = vadd.f32 %v2118_v8, %v2090_v37  ;;  %v2123_v19 = vadd.f32 %v2119_v58, %v2091_v40  ;;  %v2174_v6 = vsel %vm9116_vm0, %v5019_v52, %v7091_v2  ;;  %v2192_v52 = vld [vmem:[#allocation9 + $0x130] sm:$0xff]  ;;  %v2222_v37 = vld [vmem:[#allocation9 + $0x140] sm:$0xff] }
 0x527   :  { %3609 = vrot.lane.b32.xlu0 %v6876_v24, %s5395_s0  ;;  %3611 = vrot.lane.b32.xlu1 %v7039_v4, %s5395_s0  ;;  %v2175_v22 = vsel %vm9116_vm0, %v7091_v2, %v7093_v20  ;;  %v2150_v45 = vmul.f32 %v2142_v50, %v2127_v31  ;;  %v2151_v62 = vmul.f32 %v2143_v17, %v2128_v0  ;;  %v5029_v55 = vunpack.i.h.bf16 %v7117_v3  ;;  %v9555_v58 = vld [vmem:[#allocation68_spill] sm:$0xff] }
 0x528   :  { %v5028_v13 = vunpack.i.l.bf16 %v7117_v3  ;;  %v2181_v21 = vmul.f32 %v2173_v26, %v2158_v39  ;;  %v2152_v60 = vmul.f32 %v2144_v14, %v2129_v27  ;;  %v2205_v12 = vsel %vm2204_vm15, %v5023_v43, %v5024_v46  ;;  %v2191_v3 = vld [vmem:[#allocation9 + $0x128] sm:$0xff]  ;;  %v2224_v27 = vld [vmem:[#allocation9 + $0x150] sm:$0xff] }
 0x529   :  { %v7686_v51 = vpop.permute.xlu0 %3230  ;;  %v7695_v7 = vpop.permute.xlu1 %3232  ;;  %v2176_v2 = vsel %vm9116_vm0, %v7093_v20, %v7099_v49  ;;  %v2153_v63 = vadd.f32 %v2149_v59, %v2121_v42  ;;  %v2124_v10 = vadd.f32 %v2120_v11, %v2092_v25  ;;  %v2182_v5 = vmul.f32 %v2174_v6, %v2159_v57  ;;  %v9556_v20 = vld [vmem:[#allocation32_spill] sm:$0xff]  ;;  %v2193_v42 = vld [vmem:[#allocation9 + $0x138] sm:$0xff]  ;;  %v9557_v25 = vld [vmem:[#allocation71_spill] sm:$0xff] }
 0x52a   :  { %v2183_v29 = vmul.f32 %v2175_v22, %v2160_v1  ;;  %v2206_v8 = vsel %vm2204_vm15, %v5024_v46, %v9554_v32  ;;  %v2207_v47 = vsel %vm2204_vm15, %v9554_v32, %v9555_v58  ;;  %v5034_v49 = vunpack.i.h.bf16 %v9556_v20  ;;  %v2223_v26 = vld [vmem:[#allocation9 + $0x148] sm:$0xff]  ;;  %v9559_v1 = vld [vmem:[#allocation29_spill] sm:$0xff]  ;;  %v2254_v22 = vld [vmem:[#allocation9 + $0x160] sm:$0xff] }
 0x52b   :  { %3613 = vrot.lane.b32.xlu0 %v9405_v18, %s5395_s0  ;;  %3605 = vrot.lane.b32.xlu1 %v6864_v33, %s5395_s0  ;;  %v5033_v44 = vunpack.i.l.bf16 %v9556_v20  ;;  %v2213_v35 = vmul.f32 %v2205_v12, %v2190_v9  ;;  %v2184_v48 = vmul.f32 %v2176_v2, %v2161_v56  ;;  %v2237_v40 = vsel %vm2236_vm3, %v5028_v13, %v5029_v55  ;;  %v9558_v14 = vld [vmem:[#allocation51_spill] sm:$0xff]  ;;  %v9560_v13 = vld [vmem:[#allocation54_spill] sm:$0xff] }
 0x52c   :  { %v2208_v31 = vsel %vm2204_vm15, %v9555_v58, %v9557_v25  ;;  %v2154_v50 = vadd.f32 %v2150_v45, %v2122_v38  ;;  %v2155_v17 = vadd.f32 %v2151_v62, %v2123_v19  ;;  %v2185_v46 = vadd.f32 %v2181_v21, %v2153_v63  ;;  %v2225_v62 = vld [vmem:[#allocation9 + $0x158] sm:$0xff] }
 0x52d   :  { %v7712_v41 = vpop.permute.xlu0 %3224  ;;  %v7718_v34 = vpop.permute.xlu1 %3258  ;;  %v2156_v43 = vadd.f32 %v2152_v60, %v2124_v10  ;;  %v2214_v11 = vmul.f32 %v2206_v8, %v2191_v3  ;;  %v2215_v39 = vmul.f32 %v2207_v47, %v2192_v52  ;;  %v2238_v57 = vsel %vm2236_vm3, %v5029_v55, %v9558_v14  ;;  %v2255_v10 = vld [vmem:[#allocation9 + $0x168] sm:$0xff]  ;;  %v2256_v3 = vld [vmem:[#allocation9 + $0x170] sm:$0xff]  ;;  %v9561_v52 = vld [vmem:[#allocation70_spill] sm:$0xff] }
 0x52e   :  { %v2239_v6 = vsel %vm2236_vm3, %v9558_v14, %v9559_v1  ;;  %v2245_v38 = vmul.f32 %v2237_v40, %v2222_v37  ;;  %v2216_v19 = vmul.f32 %v2208_v31, %v2193_v42  ;;  %v2269_v45 = vsel %vm2268_vm11, %v5033_v44, %v5034_v49  ;;  %v9562_v8 = vld [vmem:[#allocation53_spill] sm:$0xff]  ;;  %v9563_v44 = vld [vmem:[#allocation72_spill] sm:$0xff]  ;;  %v9567_v42 = vld [vmem:[#allocation31_spill] sm:$0xff] }
 0x52f   :  { %3639 = vrot.lane.b32.xlu0 %v6868_v30, %s5396_s3  ;;  %3641 = vrot.lane.b32.xlu1 %v6876_v24, %s5396_s3  ;;  %v2240_v21 = vsel %vm2236_vm3, %v9559_v1, %v9560_v13  ;;  %v2186_v55 = vadd.f32 %v2182_v5, %v2154_v50  ;;  %v2187_v60 = vadd.f32 %v2183_v29, %v2155_v17  ;;  %v2286_v29 = vld [vmem:[#allocation9 + $0x180] sm:$0xff]  ;;  %vm9566_vm3 = vcmask 154624   ;;  %v2257_v40 = vld [vmem:[#allocation9 + $0x178] sm:$0xff]  ;;  %v9568_v14 = vld [vmem:[#allocation56_spill] sm:$0xff] }
 0x530   :  { %v2217_v9 = vadd.f32 %v2213_v35, %v2185_v46  ;;  %v2188_v12 = vadd.f32 %v2184_v48, %v2156_v43  ;;  %v2246_v2 = vmul.f32 %v2238_v57, %v2223_v26  ;;  %v2247_v63 = vmul.f32 %v2239_v6, %v2224_v27  ;;  %v9564_v35 = vld [vmem:[#allocation34_spill] sm:$0xff]  ;;  %v2287_v26 = vld [vmem:[#allocation9 + $0x188] sm:$0xff]  ;;  %v2288_v27 = vld [vmem:[#allocation9 + $0x190] sm:$0xff] }
 0x531   :  { %v7735_v0 = vpop.permute.xlu0 %3260  ;;  %v7737_v59 = vpop.permute.xlu1 %3262  ;;  %v2270_v32 = vsel %vm2268_vm11, %v5034_v49, %v9561_v52  ;;  %v2271_v58 = vsel %vm2268_vm11, %v9561_v52, %v9562_v8  ;;  %v2277_v20 = vmul.f32 %v2269_v45, %v2254_v22  ;;  %v2248_v5 = vmul.f32 %v2240_v21, %v2225_v62  ;;  %vm9569_vm15 = vmmov %vm9566_vm3  ;;  %v9570_v1 = vld [vmem:[#allocation73_spill] sm:$0xff]  ;;  %v9572_v22 = vld [vmem:[#allocation55_spill] sm:$0xff] }
 0x532   :  { %v9565_v48 = vunpack.i.h.bf16 %v9564_v35  ;;  %v2272_v25 = vsel %vm2268_vm11, %v9562_v8, %v9567_v42  ;;  %v2218_v49 = vadd.f32 %v2214_v11, %v2186_v55  ;;  %v2219_v31 = vadd.f32 %v2215_v39, %v2187_v60  ;;  %vm9571_vm11 = vmmov %vm9566_vm3  ;;  %v9573_v45 = vld [vmem:[#allocation37_spill] sm:$0xff]  ;;  %v9576_v55 = vld [vmem:[#allocation75_spill] sm:$0xff] }
 0x533   :  { %3643 = vrot.lane.b32.xlu0 %v7039_v4, %s5396_s3  ;;  %3645 = vrot.lane.b32.xlu1 %v9405_v18, %s5396_s3  ;;  %v2249_v50 = vadd.f32 %v2245_v38, %v2217_v9  ;;  %v2220_v17 = vadd.f32 %v2216_v19, %v2188_v12  ;;  %v2278_v46 = vmul.f32 %v2270_v32, %v2255_v10  ;;  %v2317_v19 = vld [vmem:[#allocation9 + $0x1a0] sm:$0xff]  ;;  %v9574_v62 = vunpack.i.h.bf16 %v9573_v45  ;;  %v2289_v21 = vld [vmem:[#allocation9 + $0x198] sm:$0xff]  ;;  %vm9577_vm0 = vmmov %vm9571_vm11 }
 0x534   :  { %v2300_v37 = vsel %vm9566_vm3, %v9565_v48, %v9563_v44  ;;  %v2279_v43 = vmul.f32 %v2271_v58, %v2256_v3  ;;  %v2301_v57 = vsel %vm9569_vm15, %v9563_v44, %v9568_v14  ;;  %v2302_v6 = vsel %vm9571_vm11, %v9568_v14, %v9570_v1  ;;  %v2318_v58 = vld [vmem:[#allocation9 + $0x1a8] sm:$0xff]  ;;  %v9578_v44 = vld [vmem:[#allocation33_spill] sm:$0xff]  ;;  %v9580_v48 = vld [vmem:[#allocation58_spill] sm:$0xff] }
 0x535   :  { %v7752_v56 = vpop.permute.xlu0 %3264  ;;  %v7759_v47 = vpop.permute.xlu1 %3256  ;;  %v2308_v39 = vmul.f32 %v2300_v37, %v2286_v29  ;;  %v2280_v38 = vmul.f32 %v2272_v25, %v2257_v40  ;;  %vm9575_vm3 = vcmask 130048   ;;  %v2303_v60 = vsel %vm9577_vm0, %v9570_v1, %v9576_v55  ;;  %v2319_v29 = vld [vmem:[#allocation9 + $0x1b0] sm:$0xff]  ;;  %v2349_v14 = vld [vmem:[#allocation9 + $0x1c8] sm:$0xff]  ;;  %v9585_v1 = vld [vmem:[#allocation74_spill] sm:$0xff] }
 0x536   :  { %v2331_v13 = vsel %vm9575_vm3, %v9574_v62, %v9572_v22  ;;  %v2250_v12 = vadd.f32 %v2246_v2, %v2218_v49  ;;  %v2251_v10 = vadd.f32 %v2247_v63, %v2219_v31  ;;  %v2281_v3 = vadd.f32 %v2277_v20, %v2249_v50  ;;  %vm9579_vm15 = vmmov %vm9575_vm3  ;;  %v2348_v62 = vld [vmem:[#allocation9 + $0x1c0] sm:$0xff] }
 0x537   :  { %3637 = vrot.lane.b32.xlu0 %v6864_v33, %s5396_s3  ;;  %3671 = vrot.lane.b32.xlu1 %v6868_v30, %s5397_s9  ;;  %v2252_v52 = vadd.f32 %v2248_v5, %v2220_v17  ;;  %v2309_v32 = vmul.f32 %v2301_v57, %v2287_v26  ;;  %v2310_v8 = vmul.f32 %v2302_v6, %v2288_v27  ;;  %vm9581_vm0 = vmmov %vm9575_vm3  ;;  %vm2393_vm11 = vcmask 80896   ;;  %v2320_v17 = vld [vmem:[#allocation9 + $0x1b8] sm:$0xff]  ;;  %v9582_v26 = vld [vmem:[#allocation38_spill] sm:$0xff] }
 0x538   :  { %v2332_v35 = vsel %vm9579_vm15, %v9572_v22, %v9578_v44  ;;  %v2333_v37 = vsel %vm9581_vm0, %v9578_v44, %v9580_v48  ;;  %v2339_v2 = vmul.f32 %v2331_v13, %v2317_v19  ;;  %v2311_v63 = vmul.f32 %v2303_v60, %v2289_v21  ;;  %vm9583_vm15 = vmmov %vm9581_vm0  ;;  %v9584_v57 = vld [vmem:[#allocation77_spill] sm:$0xff]  ;;  %v9587_v13 = vld [vmem:[#allocation42_spill] sm:$0xff] }
 0x539   :  { %v7778_v11 = vpop.permute.xlu0 %3290  ;;  %v7787_v9 = vpop.permute.xlu1 %3292  ;;  %vm2425_vm3 = vcmask 56320   ;;  %v2282_v5 = vadd.f32 %v2278_v46, %v2250_v12  ;;  %v2283_v40 = vadd.f32 %v2279_v43, %v2251_v10  ;;  %v2312_v42 = vadd.f32 %v2308_v39, %v2281_v3  ;;  %v9586_v39 = vld [vmem:[#allocation40_spill] sm:$0xff]  ;;  %v9589_v12 = vld [vmem:[#allocation57_spill] sm:$0xff]  ;;  %v2380_v44 = vld [vmem:[#allocation9 + $0x1e8] sm:$0xff] }
 0x53a   :  { %v2284_v25 = vadd.f32 %v2280_v38, %v2252_v52  ;;  %v2340_v31 = vmul.f32 %v2332_v35, %v2318_v58  ;;  %v2341_v50 = vmul.f32 %v2333_v37, %v2319_v29  ;;  %v2334_v27 = vsel %vm9583_vm15, %v9580_v48, %v9582_v26  ;;  %v2350_v60 = vld [vmem:[#allocation9 + $0x1d0] sm:$0xff]  ;;  %v2379_v26 = vld [vmem:[#allocation9 + $0x1e0] sm:$0xff] }
 0x53b   :  { %3673 = vrot.lane.b32.xlu0 %v6876_v24, %s5397_s9  ;;  %3675 = vrot.lane.b32.xlu1 %v7039_v4, %s5397_s9  ;;  %v2363_v6 = vsel %vm985_vm14, %v9585_v1, %v9584_v57  ;;  %vm2457_vm0 = vcmask 31744   ;;  %v2313_v46 = vadd.f32 %v2309_v32, %v2282_v5  ;;  %v2314_v43 = vadd.f32 %v2310_v8, %v2283_v40  ;;  %v2351_v8 = vld [vmem:[#allocation9 + $0x1d8] sm:$0xff]  ;;  %v9590_v58 = vld [vmem:[#allocation60_spill] sm:$0xff]  ;;  %v9593_v5 = vld [vmem:[#allocation62_spill] sm:$0xff] }
 0x53c   :  { %v5039_v38 = vunpack.i.h.bf16 %v9586_v39  ;;  %v5038_v19 = vunpack.i.l.bf16 %v9586_v39  ;;  %vm2491_vm7 = vcmask 883712   ;;  %v2343_v22 = vadd.f32 %v2339_v2, %v2312_v42  ;;  %v9591_v35 = vld [vmem:[#allocation76_spill] sm:$0xff]  ;;  %v2412_v39 = vld [vmem:[#allocation9 + $0x208] sm:$0xff] }
 0x53d   :  { %v7799_v20 = vpop.permute.xlu0 %3294  ;;  %v7801_v49 = vpop.permute.xlu1 %3296  ;;  %v2315_v45 = vadd.f32 %v2311_v63, %v2284_v25  ;;  %v9588_v21 = vunpack.i.h.bf16 %v9587_v13  ;;  %v2364_v10 = vsel %vm985_vm14, %v9584_v57, %v9589_v12  ;;  %v2342_v52 = vmul.f32 %v2334_v27, %v2320_v17  ;;  %v9594_v57 = vld [vmem:[#allocation59_spill] sm:$0xff] }
 0x53e   :  { %v2371_v32 = vmul.f32 %v2363_v6, %v2349_v14  ;;  %v2365_v29 = vsel %vm985_vm14, %v9589_v12, %v9590_v58  ;;  %v2395_v48 = vsel %vm2393_vm11, %v5039_v38, %v9591_v35  ;;  %v2344_v2 = vadd.f32 %v2340_v31, %v2313_v46  ;;  %v2381_v14 = vld [vmem:[#allocation9 + $0x1f0] sm:$0xff]  ;;  %v2382_v6 = vld [vmem:[#allocation9 + $0x1f8] sm:$0xff]  ;;  %v9595_v46 = vld [vmem:[#allocation39_spill] sm:$0xff] }
 0x53f   :  { %3677 = vrot.lane.b32.xlu0 %v9405_v18, %s5397_s9  ;;  %3669 = vrot.lane.b32.xlu1 %v6864_v33, %s5397_s9  ;;  %v2362_v55 = vsel %vm985_vm14, %v9588_v21, %v9585_v1  ;;  %v2345_v63 = vadd.f32 %v2341_v50, %v2314_v43  ;;  %v5044_v40 = vunpack.i.h.bf16 %v9593_v5  ;;  %v5043_v42 = vunpack.i.l.bf16 %v9593_v5 }
 0x540   :  { %v2370_v25 = vmul.f32 %v2362_v55, %v2348_v62  ;;  %v2372_v17 = vmul.f32 %v2364_v10, %v2350_v60  ;;  %v2394_v27 = vsel %vm2393_vm11, %v5038_v19, %v5039_v38  ;;  %v2396_v1 = vsel %vm2393_vm11, %v9591_v35, %v9594_v57  ;;  %v9596_v62 = vld [vmem:[#allocation61_spill] sm:$0xff]  ;;  %v9598_v55 = vld [vmem:[#allocation78_spill] sm:$0xff]  ;;  %v2413_v35 = vld [vmem:[#allocation9 + $0x210] sm:$0xff] }
 0x541   :  { %v7822_v3 = vpop.permute.xlu0 %3288  ;;  %v7829_v37 = vpop.permute.xlu1 %3322  ;;  %v2373_v31 = vmul.f32 %v2365_v29, %v2351_v8  ;;  %v2403_v50 = vmul.f32 %v2395_v48, %v2380_v44  ;;  %v2397_v43 = vsel %vm2393_vm11, %v9594_v57, %v9595_v46  ;;  %v2427_v13 = vsel %vm2425_vm3, %v5044_v40, %v9596_v62  ;;  %v2411_v29 = vld [vmem:[#allocation9 + $0x200] sm:$0xff]  ;;  %v9600_v48 = vld [vmem:[#allocation63_spill] sm:$0xff] }
 0x542   :  { %9592 = vst [vmem:[#allocation30_spill] sm:$0xff] %v7829_v37  ;;  %vm2523_vm14 = vcmask 859136   ;;  %v2346_v19 = vadd.f32 %v2342_v52, %v2315_v45  ;;  %v2375_v21 = vadd.f32 %v2371_v32, %v2344_v2  ;;  %v5049_v60 = vunpack.i.h.bf16 %v9598_v55  ;;  %v2414_v32 = vld [vmem:[#allocation9 + $0x218] sm:$0xff]  ;;  %v9601_v2 = vld [vmem:[#allocation44_spill] sm:$0xff] }
 0x543   :  { %3703 = vrot.lane.b32.xlu0 %v6868_v30, %s5315_s14  ;;  %3705 = vrot.lane.b32.xlu1 %v6876_v24, %s5315_s14  ;;  %v5048_v12 = vunpack.i.l.bf16 %v9598_v55  ;;  %vm2555_vm15 = vcmask 834560   ;;  %v2402_v8 = vmul.f32 %v2394_v27, %v2379_v26  ;;  %v2404_v58 = vmul.f32 %v2396_v1, %v2381_v14  ;;  %v2444_v26 = vld [vmem:[#allocation9 + $0x228] sm:$0xff]  ;;  %v2445_v55 = vld [vmem:[#allocation9 + $0x230] sm:$0xff] }
 0x544   :  { %v2426_v44 = vsel %vm2425_vm3, %v5043_v42, %v5044_v40  ;;  %v2428_v5 = vsel %vm2425_vm3, %v9596_v62, %v9600_v48  ;;  %v2405_v45 = vmul.f32 %v2397_v43, %v2382_v6  ;;  %v2435_v52 = vmul.f32 %v2427_v13, %v2412_v39  ;;  %v9602_v27 = vld [vmem:[#allocation79_spill] sm:$0xff]  ;;  %v2443_v39 = vld [vmem:[#allocation9 + $0x220] sm:$0xff] }
 0x545   :  { %v7846_v38 = vpop.permute.xlu0 %3324  ;;  %v7850_v10 = vpop.permute.xlu1 %3326  ;;  %v2429_v57 = vsel %vm2425_vm3, %v9600_v48, %v9601_v2  ;;  %v2459_v14 = vsel %vm2457_vm0, %v5049_v60, %v9602_v27  ;;  %v2374_v40 = vadd.f32 %v2370_v25, %v2343_v22  ;;  %v2376_v42 = vadd.f32 %v2372_v17, %v2345_v63  ;;  %v9603_v48 = vld [vmem:[#allocation43_spill] sm:$0xff]  ;;  %v2446_v22 = vld [vmem:[#allocation9 + $0x238] sm:$0xff]  ;;  %v9604_v63 = vld [vmem:[#allocation80_spill] sm:$0xff] }
 0x546   :  { %9597 = vst [vmem:[#allocation68_spill] sm:$0xff] %v7846_v38  ;;  %9599 = vst [vmem:[#allocation32_spill] sm:$0xff] %v7850_v10  ;;  %v2377_v1 = vadd.f32 %v2373_v31, %v2346_v19  ;;  %v2407_v46 = vadd.f32 %v2403_v50, %v2375_v21  ;;  %v2434_v6 = vmul.f32 %v2426_v44, %v2411_v29  ;;  %v2476_v17 = vld [vmem:[#allocation9 + $0x248] sm:$0xff]  ;;  %v9605_v31 = vld [vmem:[#allocation81_spill] sm:$0xff]  ;;  %vm2712_vm11 = vcmask 711680  }
 0x547   :  { %3707 = vrot.lane.b32.xlu0 %v7039_v4, %s5315_s14  ;;  %3709 = vrot.lane.b32.xlu1 %v9405_v18, %s5315_s14  ;;  %v2436_v43 = vmul.f32 %v2428_v5, %v2413_v35  ;;  %v2458_v13 = vsel %vm2457_vm0, %v5048_v12, %v5049_v60  ;;  %v2460_v2 = vsel %vm2457_vm0, %v9602_v27, %v9603_v48  ;;  %v9606_v50 = vld [vmem:[#allocation82_spill] sm:$0xff]  ;;  %v9608_v27 = vld [vmem:[#allocation83_spill] sm:$0xff]  ;;  %vm2840_vm3 = vcmask 441344  }
 0x548   :  { %v2437_v37 = vmul.f32 %v2429_v57, %v2414_v32  ;;  %v2467_v38 = vmul.f32 %v2459_v14, %v2444_v26  ;;  %v2461_v25 = vsel %vm2457_vm0, %v9603_v48, %v9604_v63  ;;  %v2493_v19 = vsel %vm2491_vm7, %v9606_v50, %v9605_v31  ;;  %v2475_v5 = vld [vmem:[#allocation9 + $0x240] sm:$0xff]  ;;  %v9607_v32 = vld [vmem:[#allocation64_spill] sm:$0xff] }
 0x549   :  { %v7865_v62 = vpop.permute.xlu0 %3328  ;;  %v7871_v10 = vpop.permute.xlu1 %3320  ;;  %v2406_v21 = vadd.f32 %v2402_v8, %v2374_v40  ;;  %v2408_v60 = vadd.f32 %v2404_v58, %v2376_v42  ;;  %v2409_v12 = vadd.f32 %v2405_v45, %v2377_v1  ;;  %v2439_v29 = vadd.f32 %v2435_v52, %v2407_v46  ;;  %v2477_v26 = vld [vmem:[#allocation9 + $0x250] sm:$0xff]  ;;  %v2478_v45 = vld [vmem:[#allocation9 + $0x258] sm:$0xff]  ;;  %v2510_v42 = vld [vmem:[#allocation9 + $0x268] sm:$0xff] }
 0x54a   :  { %v2466_v44 = vmul.f32 %v2458_v13, %v2443_v39  ;;  %v2468_v35 = vmul.f32 %v2460_v2, %v2445_v55  ;;  %v2492_v57 = vsel %vm2491_vm7, %v9607_v32, %v9606_v50  ;;  %v2494_v14 = vsel %vm2491_vm7, %v9605_v31, %v9608_v27  ;;  %v9610_v52 = vld [vmem:[#allocation84_spill] sm:$0xff]  ;;  %v9611_v1 = vld [vmem:[#allocation87_spill] sm:$0xff]  ;;  %v9612_v46 = vld [vmem:[#allocation85_spill] sm:$0xff] }
 0x54b   :  { %3701 = vrot.lane.b32.xlu0 %v6864_v33, %s5315_s14  ;;  %3734 = vrot.lane.b32.xlu1 %v6868_v30, %s5303_s28  ;;  %v2469_v8 = vmul.f32 %v2461_v25, %v2446_v22  ;;  %v2501_v58 = vmul.f32 %v2493_v19, %v2476_v17  ;;  %v2495_v40 = vsel %vm2491_vm7, %v9608_v27, %v9610_v52  ;;  %v2509_v17 = vld [vmem:[#allocation9 + $0x260] sm:$0xff]  ;;  %v2511_v32 = vld [vmem:[#allocation9 + $0x270] sm:$0xff]  ;;  %vm2680_vm7 = vcmask 736256   ;;  %s5399_s14 = smov 23  }
 0x54c   :  { %v2525_v39 = vsel %vm2523_vm14, %v9612_v46, %v9611_v1  ;;  %v2438_v55 = vadd.f32 %v2434_v6, %v2406_v21  ;;  %v2440_v2 = vadd.f32 %v2436_v43, %v2408_v60  ;;  %v2441_v63 = vadd.f32 %v2437_v37, %v2409_v12  ;;  %v9614_v50 = vld [vmem:[#allocation86_spill] sm:$0xff]  ;;  %v9615_v27 = vld [vmem:[#allocation88_spill] sm:$0xff]  ;;  %v2512_v6 = vld [vmem:[#allocation9 + $0x278] sm:$0xff] }
 0x54d   :  { %v7889_v48 = vpop.permute.xlu0 %3354  ;;  %v7897_v13 = vpop.permute.xlu1 %3356  ;;  %v2471_v31 = vadd.f32 %v2467_v38, %v2439_v29  ;;  %v2500_v22 = vmul.f32 %v2492_v57, %v2475_v5  ;;  %v2502_v25 = vmul.f32 %v2494_v14, %v2477_v26  ;;  %v2524_v19 = vsel %vm2523_vm14, %v9614_v50, %v9612_v46  ;;  %v9616_v43 = vld [vmem:[#allocation90_spill] sm:$0xff]  ;;  %v2542_v60 = vld [vmem:[#allocation9 + $0x288] sm:$0xff]  ;;  %v9617_v12 = vld [vmem:[#allocation92_spill] sm:$0xff] }
 0x54e   :  { %9609 = vst [vmem:[#allocation71_spill] sm:$0xff] %v7889_v48  ;;  %9613 = vst [vmem:[#allocation51_spill] sm:$0xff] %v7897_v13  ;;  %v2526_v52 = vsel %vm2523_vm14, %v9611_v1, %v9615_v27  ;;  %v2503_v37 = vmul.f32 %v2495_v40, %v2478_v45  ;;  %v2533_v38 = vmul.f32 %v2525_v39, %v2510_v42  ;;  %v9618_v29 = vld [vmem:[#allocation91_spill] sm:$0xff]  ;;  %v2541_v42 = vld [vmem:[#allocation9 + $0x280] sm:$0xff]  ;;  %vm2965_vm0 = vcmask 343040  }
 0x54f   :  { %3736 = vrot.lane.b32.xlu0 %v6876_v24, %s5303_s28  ;;  %3738 = vrot.lane.b32.xlu1 %v7039_v4, %s5303_s28  ;;  %v2527_v21 = vsel %vm2523_vm14, %v9615_v27, %v9616_v43  ;;  %v2557_v5 = vsel %vm2555_vm15, %v9618_v29, %v9617_v12  ;;  %v2470_v26 = vadd.f32 %v2466_v44, %v2438_v55  ;;  %v9621_v39 = vld [vmem:[#allocation89_spill] sm:$0xff]  ;;  %v2543_v43 = vld [vmem:[#allocation9 + $0x290] sm:$0xff]  ;;  %v9622_v48 = vld [vmem:[#allocation95_spill] sm:$0xff]  ;;  %vm9698_vm14 = vcmask 392192  }
 0x550   :  { %v2472_v14 = vadd.f32 %v2468_v35, %v2440_v2  ;;  %v2473_v1 = vadd.f32 %v2469_v8, %v2441_v63  ;;  %v2505_v46 = vadd.f32 %v2501_v58, %v2471_v31  ;;  %v2532_v45 = vmul.f32 %v2524_v19, %v2509_v17  ;;  %v2544_v8 = vld [vmem:[#allocation9 + $0x298] sm:$0xff]  ;;  %v9623_v58 = vld [vmem:[#allocation94_spill] sm:$0xff]  ;;  %v2574_v2 = vld [vmem:[#allocation9 + $0x2a8] sm:$0xff] }
 0x551   :  { %v7915_v57 = vpop.permute.xlu0 %3358  ;;  %v7917_v50 = vpop.permute.xlu1 %3360  ;;  %v2534_v40 = vmul.f32 %v2526_v52, %v2511_v32  ;;  %v2556_v27 = vsel %vm2555_vm15, %v9621_v39, %v9618_v29  ;;  %v2558_v13 = vsel %vm2555_vm15, %v9617_v12, %v9622_v48  ;;  %v2535_v44 = vmul.f32 %v2527_v21, %v2512_v6  ;;  %v9624_v63 = vld [vmem:[#allocation97_spill] sm:$0xff]  ;;  %v9625_v31 = vld [vmem:[#allocation96_spill] sm:$0xff]  ;;  %v2573_v29 = vld [vmem:[#allocation9 + $0x2a0] sm:$0xff] }
 0x552   :  { %9619 = vst [vmem:[#allocation29_spill] sm:$0xff] %v7915_v57  ;;  %9620 = vst [vmem:[#allocation54_spill] sm:$0xff] %v7917_v50  ;;  %v2565_v35 = vmul.f32 %v2557_v5, %v2542_v60  ;;  %v2559_v55 = vsel %vm2555_vm15, %v9622_v48, %v9623_v58  ;;  %v2588_v17 = vsel %vm1448_vm4, %v9625_v31, %v9624_v63  ;;  %v9627_v48 = vld [vmem:[#allocation48_spill] sm:$0xff]  ;;  %v9629_v50 = vld [vmem:[#allocation99_spill] sm:$0xff] }
 0x553   :  { %3740 = vrot.lane.b32.xlu0 %v9405_v18, %s5303_s28  ;;  %3732 = vrot.lane.b32.xlu1 %v6864_v33, %s5303_s28  ;;  %v2504_v19 = vadd.f32 %v2500_v22, %v2470_v26  ;;  %v2506_v32 = vadd.f32 %v2502_v25, %v2472_v14  ;;  %v2507_v52 = vadd.f32 %v2503_v37, %v2473_v1  ;;  %v9628_v5 = vunpack.i.h.bf16 %v9627_v48  ;;  %v2575_v58 = vld [vmem:[#allocation9 + $0x2b0] sm:$0xff]  ;;  %v9631_v26 = vld [vmem:[#allocation98_spill] sm:$0xff]  ;;  %v2605_v14 = vld [vmem:[#allocation9 + $0x2c8] sm:$0xff]  ;;  %s5398_s28 = smov 26  }
 0x554   :  { %v2537_v12 = vadd.f32 %v2533_v38, %v2505_v46  ;;  %v2564_v21 = vmul.f32 %v2556_v27, %v2541_v42  ;;  %v2566_v60 = vmul.f32 %v2558_v13, %v2543_v43  ;;  %v2589_v57 = vsel %vm1448_vm4, %v9624_v63, %v9629_v50  ;;  %v2576_v38 = vld [vmem:[#allocation9 + $0x2b8] sm:$0xff]  ;;  %v9633_v46 = vld [vmem:[#allocation100_spill] sm:$0xff]  ;;  %vm9700_vm15 = vmmov %vm9698_vm14 }
 0x555   :  { %v7935_v6 = vpop.permute.xlu0 %3352  ;;  %v2587_v39 = vsel %vm1448_vm4, %v9628_v5, %v9625_v31  ;;  %v7944_v22 = vpop.permute.xlu1 %3386  ;;  %v2567_v25 = vmul.f32 %v2559_v55, %v2544_v8  ;;  %v2596_v37 = vmul.f32 %v2588_v17, %v2574_v2  ;;  %v2590_v13 = vsel %vm1448_vm4, %v9629_v50, %v9631_v26  ;;  %v9632_v1 = vld [vmem:[#allocation101_spill] sm:$0xff]  ;;  %v2604_v2 = vld [vmem:[#allocation9 + $0x2c0] sm:$0xff]  ;;  %v9634_v50 = vld [vmem:[#allocation67_spill] sm:$0xff] }
 0x556   :  { %9626 = vst [vmem:[#allocation70_spill] sm:$0xff] %v7935_v6  ;;  %9630 = vst [vmem:[#allocation53_spill] sm:$0xff] %v7944_v22  ;;  %v2619_v42 = vsel %vm1544_vm6, %v9633_v46, %v9632_v1  ;;  %v2536_v27 = vadd.f32 %v2532_v45, %v2504_v19  ;;  %v2538_v43 = vadd.f32 %v2534_v40, %v2506_v32  ;;  %v9635_v17 = vunpack.i.h.bf16 %v9634_v50  ;;  %v2606_v5 = vld [vmem:[#allocation9 + $0x2d0] sm:$0xff]  ;;  %v9636_v26 = vld [vmem:[#allocation103_spill] sm:$0xff] }
 0x557   :  { %3765 = vrot.lane.b32.xlu0 %v6868_v30, %s5320_s18  ;;  %v2539_v63 = vadd.f32 %v2535_v44, %v2507_v52  ;;  %v2569_v31 = vadd.f32 %v2565_v35, %v2537_v12  ;;  %3767 = vrot.lane.b32.xlu1 %v6876_v24, %s5320_s18  ;;  %v2595_v8 = vmul.f32 %v2587_v39, %v2573_v29  ;;  %vm2744_vm4 = vcmask 687104   ;;  %v2607_v35 = vld [vmem:[#allocation9 + $0x2d8] sm:$0xff]  ;;  %v9638_v19 = vld [vmem:[#allocation102_spill] sm:$0xff]  ;;  %v2636_v32 = vld [vmem:[#allocation9 + $0x2e8] sm:$0xff] }
 0x558   :  { %v2597_v55 = vmul.f32 %v2589_v57, %v2575_v58  ;;  %v2618_v48 = vsel %vm1544_vm6, %v9635_v17, %v9633_v46  ;;  %v2620_v22 = vsel %vm1544_vm6, %v9632_v1, %v9636_v26  ;;  %v2598_v40 = vmul.f32 %v2590_v13, %v2576_v38  ;;  %v9639_v52 = vld [vmem:[#allocation105_spill] sm:$0xff]  ;;  %v9640_v12 = vld [vmem:[#allocation104_spill] sm:$0xff] }
 0x559   :  { %v7963_v45 = vpop.permute.xlu0 %3388  ;;  %v2627_v44 = vmul.f32 %v2619_v42, %v2605_v14  ;;  %v2621_v57 = vsel %vm1544_vm6, %v9636_v26, %v9638_v19  ;;  %v2650_v29 = vsel %vm1640_vm12, %v9640_v12, %v9639_v52  ;;  %v7971_v39 = vpop.permute.xlu1 %3390  ;;  %v2568_v58 = vadd.f32 %v2564_v21, %v2536_v27  ;;  %v2635_v14 = vld [vmem:[#allocation9 + $0x2e0] sm:$0xff]  ;;  %v9642_v42 = vld [vmem:[#allocation47_spill] sm:$0xff]  ;;  %v2637_v19 = vld [vmem:[#allocation9 + $0x2f0] sm:$0xff] }
 0x55a   :  { %9637 = vst [vmem:[#allocation72_spill] sm:$0xff] %v7963_v45  ;;  %9641 = vst [vmem:[#allocation34_spill] sm:$0xff] %v7971_v39  ;;  %v2570_v46 = vadd.f32 %v2566_v60, %v2538_v43  ;;  %v2571_v1 = vadd.f32 %v2567_v25, %v2539_v63  ;;  %v2600_v50 = vadd.f32 %v2596_v37, %v2569_v31  ;;  %v9643_v17 = vunpack.i.h.bf16 %v9642_v42  ;;  %v9644_v45 = vld [vmem:[#allocation107_spill] sm:$0xff]  ;;  %v2638_v25 = vld [vmem:[#allocation9 + $0x2f8] sm:$0xff] }
 0x55b   :  { %3769 = vrot.lane.b32.xlu0 %v7039_v4, %s5320_s18  ;;  %v2626_v38 = vmul.f32 %v2618_v48, %v2604_v2  ;;  %v2628_v13 = vmul.f32 %v2620_v22, %v2606_v5  ;;  %v2651_v39 = vsel %vm1640_vm12, %v9639_v52, %v9644_v45  ;;  %vm2776_vm6 = vcmask 490496   ;;  %3771 = vrot.lane.b32.xlu1 %v9405_v18, %s5320_s18  ;;  %v9645_v37 = vld [vmem:[#allocation106_spill] sm:$0xff]  ;;  %v2667_v27 = vld [vmem:[#allocation9 + $0x308] sm:$0xff]  ;;  %v9646_v43 = vld [vmem:[#allocation109_spill] sm:$0xff] }
 0x55c   :  { %v2649_v26 = vsel %vm1640_vm12, %v9643_v17, %v9640_v12  ;;  %v2629_v21 = vmul.f32 %v2621_v57, %v2607_v35  ;;  %v2658_v60 = vmul.f32 %v2650_v29, %v2636_v32  ;;  %v2652_v22 = vsel %vm1640_vm12, %v9644_v45, %v9645_v37  ;;  %v9647_v63 = vld [vmem:[#allocation108_spill] sm:$0xff]  ;;  %v2669_v29 = vld [vmem:[#allocation9 + $0x318] sm:$0xff]  ;;  %v9650_v17 = vld [vmem:[#allocation111_spill] sm:$0xff] }
 0x55d   :  { %v2682_v31 = vsel %vm2680_vm7, %v9647_v63, %v9646_v43  ;;  %v7990_v2 = vpop.permute.xlu0 %3392  ;;  %v2599_v48 = vadd.f32 %v2595_v8, %v2568_v58  ;;  %v2601_v5 = vadd.f32 %v2597_v55, %v2570_v46  ;;  %v2602_v52 = vadd.f32 %v2598_v40, %v2571_v1  ;;  %v7992_v42 = vpop.permute.xlu1 %3384  ;;  %v2668_v32 = vld [vmem:[#allocation9 + $0x310] sm:$0xff]  ;;  %v9651_v37 = vld [vmem:[#allocation110_spill] sm:$0xff]  ;;  %v2699_v58 = vld [vmem:[#allocation9 + $0x328] sm:$0xff] }
 0x55e   :  { %9648 = vst [vmem:[#allocation31_spill] sm:$0xff] %v7990_v2  ;;  %v2631_v12 = vadd.f32 %v2627_v44, %v2600_v50  ;;  %9649 = vst [vmem:[#allocation56_spill] sm:$0xff] %v7992_v42  ;;  %v2657_v35 = vmul.f32 %v2649_v26, %v2635_v14  ;;  %v2659_v57 = vmul.f32 %v2651_v39, %v2637_v19  ;;  %vm2808_vm12 = vcmask 465920   ;;  %v2666_v40 = vld [vmem:[#allocation9 + $0x300] sm:$0xff]  ;;  %v9652_v44 = vld [vmem:[#allocation112_spill] sm:$0xff] }
 0x55f   :  { %v2683_v45 = vsel %vm2680_vm7, %v9646_v43, %v9650_v17  ;;  %v2684_v6 = vsel %vm2680_vm7, %v9650_v17, %v9651_v37  ;;  %3763 = vrot.lane.b32.xlu0 %v6864_v33, %s5320_s18  ;;  %v2660_v8 = vmul.f32 %v2652_v22, %v2638_v25  ;;  %v2690_v55 = vmul.f32 %v2682_v31, %v2667_v27  ;;  %v9653_v46 = vld [vmem:[#allocation115_spill] sm:$0xff]  ;;  %v9654_v1 = vld [vmem:[#allocation113_spill] sm:$0xff]  ;;  %v2700_v31 = vld [vmem:[#allocation9 + $0x330] sm:$0xff]  ;;  %s5400_s18 = smov 20  }
 0x560   :  { %v2681_v39 = vsel %vm2680_vm7, %v9652_v44, %v9647_v63  ;;  %v2714_v50 = vsel %vm2712_vm11, %v9654_v1, %v9653_v46  ;;  %3796 = vrot.lane.b32.xlu1 %v6868_v30, %s5398_s28  ;;  %v2630_v14 = vadd.f32 %v2626_v38, %v2599_v48  ;;  %v2632_v26 = vadd.f32 %v2628_v13, %v2601_v5  ;;  %v9656_v17 = vld [vmem:[#allocation114_spill] sm:$0xff]  ;;  %v2701_v37 = vld [vmem:[#allocation9 + $0x338] sm:$0xff]  ;;  %v9657_v44 = vld [vmem:[#allocation116_spill] sm:$0xff] }
 0x561   :  { %v2633_v19 = vadd.f32 %v2629_v21, %v2602_v52  ;;  %v2662_v43 = vadd.f32 %v2658_v60, %v2631_v12  ;;  %v8010_v25 = vpop.permute.xlu0 %3418  ;;  %v2691_v22 = vmul.f32 %v2683_v45, %v2668_v32  ;;  %v2692_v27 = vmul.f32 %v2684_v6, %v2669_v29  ;;  %v8018_v2 = vpop.permute.xlu1 %3420  ;;  %v2698_v60 = vld [vmem:[#allocation9 + $0x320] sm:$0xff]  ;;  %v9659_v48 = vld [vmem:[#allocation117_spill] sm:$0xff]  ;;  %v2731_v32 = vld [vmem:[#allocation9 + $0x348] sm:$0xff] }
 0x562   :  { %9655 = vst [vmem:[#allocation73_spill] sm:$0xff] %v8010_v25  ;;  %v2715_v63 = vsel %vm2712_vm11, %v9653_v46, %v9656_v17  ;;  %v2716_v42 = vsel %vm2712_vm11, %v9656_v17, %v9657_v44  ;;  %9658 = vst [vmem:[#allocation55_spill] sm:$0xff] %v8018_v2  ;;  %v2661_v38 = vadd.f32 %v2657_v35, %v2630_v14  ;;  %v9660_v29 = vld [vmem:[#allocation118_spill] sm:$0xff]  ;;  %v9661_v45 = vld [vmem:[#allocation119_spill] sm:$0xff] }
 0x563   :  { %v2689_v13 = vmul.f32 %v2681_v39, %v2666_v40  ;;  %v2722_v21 = vmul.f32 %v2714_v50, %v2699_v58  ;;  %v2713_v6 = vsel %vm2712_vm11, %v9659_v48, %v9654_v1  ;;  %3798 = vrot.lane.b32.xlu0 %v6876_v24, %s5398_s28  ;;  %v2663_v5 = vadd.f32 %v2659_v57, %v2632_v26  ;;  %v2732_v39 = vld [vmem:[#allocation9 + $0x350] sm:$0xff]  ;;  %v2733_v58 = vld [vmem:[#allocation9 + $0x358] sm:$0xff]  ;;  %v9663_v14 = vld [vmem:[#allocation122_spill] sm:$0xff] }
 0x564   :  { %v2664_v52 = vadd.f32 %v2660_v8, %v2633_v19  ;;  %v2694_v12 = vadd.f32 %v2690_v55, %v2662_v43  ;;  %v2746_v46 = vsel %vm2744_vm4, %v9661_v45, %v9660_v29  ;;  %3800 = vrot.lane.b32.xlu1 %v7039_v4, %s5398_s28  ;;  %v2723_v35 = vmul.f32 %v2715_v63, %v2700_v31  ;;  %v9662_v50 = vld [vmem:[#allocation120_spill] sm:$0xff]  ;;  %v2730_v43 = vld [vmem:[#allocation9 + $0x340] sm:$0xff]  ;;  %v9665_v17 = vld [vmem:[#allocation121_spill] sm:$0xff] }
 0x565   :  { %v2724_v40 = vmul.f32 %v2716_v42, %v2701_v37  ;;  %v2747_v1 = vsel %vm2744_vm4, %v9660_v29, %v9662_v50  ;;  %v2748_v57 = vsel %vm2744_vm4, %v9662_v50, %v9663_v14  ;;  %v8036_v8 = vpop.permute.xlu0 %3422  ;;  %v2695_v55 = vadd.f32 %v2691_v22, %v2663_v5  ;;  %v8041_v31 = vpop.permute.xlu1 %3416  ;;  %v2763_v48 = vld [vmem:[#allocation9 + $0x368] sm:$0xff]  ;;  %v9667_v29 = vld [vmem:[#allocation24_spill] sm:$0xff]  ;;  %v9668_v25 = vld [vmem:[#allocation46_spill] sm:$0xff] }
 0x566   :  { %9664 = vst [vmem:[#allocation37_spill] sm:$0xff] %v8036_v8  ;;  %v2696_v26 = vadd.f32 %v2692_v27, %v2664_v52  ;;  %v2721_v19 = vmul.f32 %v2713_v6, %v2698_v60  ;;  %v2745_v42 = vsel %vm2744_vm4, %v9665_v17, %v9661_v45  ;;  %9666 = vst [vmem:[#allocation75_spill] sm:$0xff] %v8041_v31  ;;  %v2764_v60 = vld [vmem:[#allocation9 + $0x370] sm:$0xff]  ;;  %v9669_v6 = vld [vmem:[#allocation65_spill] sm:$0xff]  ;;  %vm9709_vm11 = vcmask 367616  }
 0x567   :  { %v2693_v63 = vadd.f32 %v2689_v13, %v2661_v38  ;;  %v2726_v37 = vadd.f32 %v2722_v21, %v2694_v12  ;;  %v2754_v44 = vmul.f32 %v2746_v46, %v2731_v32  ;;  %v2778_v50 = vsel %vm2776_vm6, %v9668_v25, %v9667_v29  ;;  %3802 = vrot.lane.b32.xlu0 %v9405_v18, %s5398_s28  ;;  %v2765_v52 = vld [vmem:[#allocation9 + $0x378] sm:$0xff]  ;;  %v2762_v32 = vld [vmem:[#allocation9 + $0x360] sm:$0xff]  ;;  %v9671_v46 = vld [vmem:[#allocation28_spill] sm:$0xff] }
 0x568   :  { %v2755_v22 = vmul.f32 %v2747_v1, %v2732_v39  ;;  %v2756_v27 = vmul.f32 %v2748_v57, %v2733_v58  ;;  %v2779_v5 = vsel %vm2776_vm6, %v9667_v29, %v9669_v6  ;;  %v9670_v45 = vld [vmem:[#allocation45_spill] sm:$0xff]  ;;  %3794 = vrot.lane.b32.xlu1 %v6864_v33, %s5398_s28  ;;  %v2727_v13 = vadd.f32 %v2723_v35, %v2695_v55  ;;  %v2795_v57 = vld [vmem:[#allocation9 + $0x388] sm:$0xff]  ;;  %v9673_v17 = vld [vmem:[#allocation66_spill] sm:$0xff] }
 0x569   :  { %v2780_v38 = vsel %vm2776_vm6, %v9669_v6, %v9670_v45  ;;  %v2728_v21 = vadd.f32 %v2724_v40, %v2696_v26  ;;  %v2753_v12 = vmul.f32 %v2745_v42, %v2730_v43  ;;  %v2777_v39 = vsel %vm2776_vm6, %v9671_v46, %v9668_v25  ;;  %v8059_v58 = vpop.permute.xlu0 %3449  ;;  %v9674_v29 = vld [vmem:[#allocation50_spill] sm:$0xff]  ;;  %v2796_v45 = vld [vmem:[#allocation9 + $0x390] sm:$0xff]  ;;  %v9675_v31 = vld [vmem:[#allocation69_spill] sm:$0xff]  ;;  %v8067_v40 = vpop.permute.xlu1 %3451 }
 0x56a   :  { %9672 = vst [vmem:[#allocation33_spill] sm:$0xff] %v8059_v58  ;;  %v2725_v1 = vadd.f32 %v2721_v19, %v2693_v63  ;;  %v2786_v14 = vmul.f32 %v2778_v50, %v2763_v48  ;;  %v2810_v6 = vsel %vm2808_vm12, %v9674_v29, %v9673_v17  ;;  %v2811_v35 = vsel %vm2808_vm12, %v9673_v17, %v9675_v31  ;;  %v2797_v43 = vld [vmem:[#allocation9 + $0x398] sm:$0xff]  ;;  %v2794_v42 = vld [vmem:[#allocation9 + $0x380] sm:$0xff]  ;;  %v9678_v63 = vld [vmem:[#allocation123_spill] sm:$0xff] }
 0x56b   :  { %9676 = vst [vmem:[#allocation58_spill] sm:$0xff] %v8067_v40  ;;  %v2787_v55 = vmul.f32 %v2779_v5, %v2764_v60  ;;  %v2788_v26 = vmul.f32 %v2780_v38, %v2765_v52  ;;  %v9677_v25 = vld [vmem:[#allocation49_spill] sm:$0xff]  ;;  %v2809_v48 = vsel %vm2808_vm12, %v9678_v63, %v9674_v29  ;;  %3828 = vrot.lane.b32.xlu0 %v6868_v30, %s5399_s14  ;;  %v2828_v2 = vld [vmem:[#allocation9 + $0x3b0] sm:$0xff]  ;;  %vm9711_vm4 = vmmov %vm9709_vm11  ;;  %vm2997_vm6 = vcmask 318464  }
 0x56c   :  { %v2812_v19 = vsel %vm2808_vm12, %v9675_v31, %v9677_v25  ;;  %v2758_v50 = vadd.f32 %v2754_v44, %v2726_v37  ;;  %v2759_v46 = vadd.f32 %v2755_v22, %v2727_v13  ;;  %v2760_v17 = vadd.f32 %v2756_v27, %v2728_v21  ;;  %3830 = vrot.lane.b32.xlu1 %v6876_v24, %s5399_s14  ;;  %v2827_v31 = vld [vmem:[#allocation9 + $0x3a8] sm:$0xff]  ;;  %v9679_v38 = vld [vmem:[#allocation125_spill] sm:$0xff]  ;;  %v9680_v25 = vld [vmem:[#allocation124_spill] sm:$0xff] }
 0x56d   :  { %v2785_v58 = vmul.f32 %v2777_v39, %v2762_v32  ;;  %v2757_v60 = vadd.f32 %v2753_v12, %v2725_v1  ;;  %v2818_v5 = vmul.f32 %v2810_v6, %v2795_v57  ;;  %v2819_v52 = vmul.f32 %v2811_v35, %v2796_v45  ;;  %v8082_v29 = vpop.permute.xlu0 %3453  ;;  %v9682_v37 = vld [vmem:[#allocation126_spill] sm:$0xff]  ;;  %v9683_v27 = vld [vmem:[#allocation128_spill] sm:$0xff]  ;;  %v8090_v21 = vpop.permute.xlu1 %3447  ;;  %v2829_v35 = vld [vmem:[#allocation9 + $0x3b8] sm:$0xff] }
 0x56e   :  { %v2842_v40 = vsel %vm2840_vm3, %v9680_v25, %v9679_v38  ;;  %9681 = vst [vmem:[#allocation38_spill] sm:$0xff] %v8082_v29  ;;  %v2820_v63 = vmul.f32 %v2812_v19, %v2797_v43  ;;  %v2817_v8 = vmul.f32 %v2809_v48, %v2794_v42  ;;  %v2843_v44 = vsel %vm2840_vm3, %v9679_v38, %v9682_v37  ;;  %v2826_v22 = vld [vmem:[#allocation9 + $0x3a0] sm:$0xff]  ;;  %v9686_v43 = vld [vmem:[#allocation127_spill] sm:$0xff]  ;;  %v9687_v48 = vld [vmem:[#allocation129_spill] sm:$0xff] }
 0x56f   :  { %v2841_v13 = vsel %vm2840_vm3, %v9683_v27, %v9680_v25  ;;  %9684 = vst [vmem:[#allocation77_spill] sm:$0xff] %v8090_v21  ;;  %v2790_v39 = vadd.f32 %v2786_v14, %v2758_v50  ;;  %v2791_v1 = vadd.f32 %v2787_v55, %v2759_v46  ;;  %v2792_v57 = vadd.f32 %v2788_v26, %v2760_v17  ;;  %v2858_v42 = vld [vmem:[#allocation9 + $0x3c0] sm:$0xff]  ;;  %v2859_v26 = vld [vmem:[#allocation9 + $0x3c8] sm:$0xff]  ;;  %v2860_v50 = vld [vmem:[#allocation9 + $0x3d0] sm:$0xff] }
 0x570   :  { %3832 = vrot.lane.b32.xlu0 %v7039_v4, %s5399_s14  ;;  %v2789_v6 = vadd.f32 %v2785_v58, %v2757_v60  ;;  %v2850_v45 = vmul.f32 %v2842_v40, %v2827_v31  ;;  %v2844_v19 = vsel %vm2840_vm3, %v9682_v37, %v9686_v43  ;;  %v9688_v38 = vld [vmem:[#allocation22_spill] sm:$0xff]  ;;  %3834 = vrot.lane.b32.xlu1 %v9405_v18, %s5399_s14  ;;  %v9691_v46 = vld [vmem:[#allocation131_spill] sm:$0xff]  ;;  %v9695_v12 = vld [vmem:[#allocation133_spill] sm:$0xff] }
 0x571   :  { %v9689_v25 = vunpack.i.h.bf16 %v9688_v38  ;;  %v2851_v14 = vmul.f32 %v2843_v44, %v2828_v2  ;;  %v2849_v55 = vmul.f32 %v2841_v13, %v2826_v22  ;;  %v9690_v58 = vld [vmem:[#allocation130_spill] sm:$0xff]  ;;  %v8110_v60 = vpop.permute.xlu0 %3480  ;;  %v2822_v31 = vadd.f32 %v2818_v5, %v2790_v39  ;;  %v2861_v22 = vld [vmem:[#allocation9 + $0x3d8] sm:$0xff]  ;;  %v9694_v13 = vld [vmem:[#allocation132_spill] sm:$0xff] }
 0x572   :  { %v2873_v40 = vsel %vm345_vm1, %v9687_v48, %v9690_v58  ;;  %v2874_v17 = vsel %vm345_vm1, %v9690_v58, %v9691_v46  ;;  %9692 = vst [vmem:[#allocation74_spill] sm:$0xff] %v8110_v60  ;;  %v2823_v37 = vadd.f32 %v2819_v52, %v2791_v1  ;;  %v2824_v43 = vadd.f32 %v2820_v63, %v2792_v57  ;;  %v2889_v32 = vld [vmem:[#allocation9 + $0x3e0] sm:$0xff]  ;;  %v9696_v21 = vld [vmem:[#allocation23_spill] sm:$0xff]  ;;  %v2891_v1 = vld [vmem:[#allocation9 + $0x3f0] sm:$0xff] }
 0x573   :  { %v2872_v27 = vsel %vm345_vm1, %v9689_v25, %v9687_v48  ;;  %v2821_v38 = vadd.f32 %v2817_v8, %v2789_v6  ;;  %v8112_v25 = vpop.permute.xlu1 %3482  ;;  %v2852_v2 = vmul.f32 %v2844_v19, %v2829_v35  ;;  %v2875_v48 = vsel %vm345_vm1, %v9691_v46, %v9694_v13  ;;  %v2890_v52 = vld [vmem:[#allocation9 + $0x3e8] sm:$0xff]  ;;  %v9699_v63 = vld [vmem:[#allocation134_spill] sm:$0xff]  ;;  %vm9702_vm1 = vmmov %vm9698_vm14 }
 0x574   :  { %9693 = vst [vmem:[#allocation40_spill] sm:$0xff] %v8112_v25  ;;  %v2880_v44 = vmul.f32 %v2872_v27, %v2858_v42  ;;  %v9697_v29 = vunpack.i.h.bf16 %v9696_v21  ;;  %3826 = vrot.lane.b32.xlu0 %v6864_v33, %s5399_s14  ;;  %v2881_v5 = vmul.f32 %v2873_v40, %v2859_v26  ;;  %v2882_v8 = vmul.f32 %v2874_v17, %v2860_v50  ;;  %v9701_v57 = vld [vmem:[#allocation135_spill] sm:$0xff]  ;;  %v2892_v19 = vld [vmem:[#allocation9 + $0x3f8] sm:$0xff]  ;;  %v9703_v42 = vld [vmem:[#allocation136_spill] sm:$0xff] }
 0x575   :  { %v2904_v39 = vsel %vm9700_vm15, %v9695_v12, %v9699_v63  ;;  %v2905_v6 = vsel %vm9702_vm1, %v9699_v63, %v9701_v57  ;;  %3860 = vrot.lane.b32.xlu1 %v6868_v30, %s5400_s18  ;;  %v2855_v21 = vadd.f32 %v2851_v14, %v2823_v37  ;;  %v2853_v35 = vadd.f32 %v2849_v55, %v2821_v38  ;;  %vm9704_vm7 = vmmov %vm9702_vm1  ;;  %v8134_v26 = vpop.permute.xlu0 %3484  ;;  %v2920_v50 = vld [vmem:[#allocation9 + $0x400] sm:$0xff]  ;;  %v2921_v46 = vld [vmem:[#allocation9 + $0x408] sm:$0xff] }
 0x576   :  { %v2903_v58 = vsel %vm9698_vm14, %v9697_v29, %v9695_v12  ;;  %v2854_v29 = vadd.f32 %v2850_v45, %v2822_v31  ;;  %v2906_v27 = vsel %vm9704_vm7, %v9701_v57, %v9703_v42  ;;  %9705 = vst [vmem:[#allocation42_spill] sm:$0xff] %v8134_v26  ;;  %v2883_v12 = vmul.f32 %v2875_v48, %v2861_v22  ;;  %v9706_v17 = vld [vmem:[#allocation137_spill] sm:$0xff]  ;;  %v9707_v13 = vld [vmem:[#allocation26_spill] sm:$0xff]  ;;  %v2922_v42 = vld [vmem:[#allocation9 + $0x410] sm:$0xff] }
 0x577   :  { %v2911_v40 = vmul.f32 %v2903_v58, %v2889_v32  ;;  %v9708_v63 = vunpack.i.h.bf16 %v9707_v13  ;;  %v9710_v25 = vld [vmem:[#allocation138_spill] sm:$0xff]  ;;  %v8143_v14 = vpop.permute.xlu1 %3478  ;;  %v2856_v55 = vadd.f32 %v2852_v2, %v2824_v43  ;;  %v2912_v31 = vmul.f32 %v2904_v39, %v2890_v52  ;;  %v9713_v13 = vld [vmem:[#allocation139_spill] sm:$0xff]  ;;  %vm9714_vm12 = vmmov %vm9711_vm4 }
 0x578   :  { %v2935_v45 = vsel %vm9711_vm4, %v9706_v17, %v9710_v25  ;;  %9712 = vst [vmem:[#allocation57_spill] sm:$0xff] %v8143_v14  ;;  %v2913_v37 = vmul.f32 %v2905_v6, %v2891_v1  ;;  %3862 = vrot.lane.b32.xlu0 %v6876_v24, %s5400_s18  ;;  %v2884_v32 = vadd.f32 %v2880_v44, %v2853_v35  ;;  %v9715_v2 = vld [vmem:[#allocation140_spill] sm:$0xff]  ;;  %vm9716_vm3 = vmmov %vm9711_vm4  ;;  %vm3029_vm14 = vcmask 293888   ;;  %v2952_v6 = vld [vmem:[#allocation9 + $0x428] sm:$0xff] }
 0x579   :  { %v2934_v60 = vsel %vm9709_vm11, %v9708_v63, %v9706_v17  ;;  %v2885_v38 = vadd.f32 %v2881_v5, %v2854_v29  ;;  %v2886_v22 = vadd.f32 %v2882_v8, %v2855_v21  ;;  %v2914_v48 = vmul.f32 %v2906_v27, %v2892_v19  ;;  %3864 = vrot.lane.b32.xlu1 %v7039_v4, %s5400_s18  ;;  %v2923_v17 = vld [vmem:[#allocation9 + $0x418] sm:$0xff]  ;;  %v8155_v39 = vpop.permute.xlu0 %3511  ;;  %v9719_v29 = vld [vmem:[#allocation142_spill] sm:$0xff]  ;;  %v9721_v19 = vld [vmem:[#allocation143_spill] sm:$0xff] }
 0x57a   :  { %v2942_v58 = vmul.f32 %v2934_v60, %v2920_v50  ;;  %v2943_v57 = vmul.f32 %v2935_v45, %v2921_v46  ;;  %v2936_v43 = vsel %vm9714_vm12, %v9710_v25, %v9713_v13  ;;  %v2937_v52 = vsel %vm9716_vm3, %v9713_v13, %v9715_v2  ;;  %9717 = vst [vmem:[#allocation60_spill] sm:$0xff] %v8155_v39  ;;  %v9720_v21 = vld [vmem:[#allocation141_spill] sm:$0xff]  ;;  %v2953_v25 = vld [vmem:[#allocation9 + $0x430] sm:$0xff]  ;;  %v2951_v45 = vld [vmem:[#allocation9 + $0x420] sm:$0xff] }
 0x57b   :  { %v2887_v44 = vadd.f32 %v2883_v12, %v2856_v55  ;;  %v2915_v5 = vadd.f32 %v2911_v40, %v2884_v32  ;;  %vm3061_vm15 = vcmask 97280   ;;  %v8157_v8 = vpop.permute.xlu1 %3513  ;;  %v2916_v60 = vadd.f32 %v2912_v31, %v2885_v38  ;;  %v2954_v50 = vld [vmem:[#allocation9 + $0x438] sm:$0xff]  ;;  %v9722_v46 = vld [vmem:[#allocation144_spill] sm:$0xff]  ;;  %v9724_v13 = vld [vmem:[#allocation147_spill] sm:$0xff] }
 0x57c   :  { %9718 = vst [vmem:[#allocation76_spill] sm:$0xff] %v8157_v8  ;;  %v2917_v1 = vadd.f32 %v2913_v37, %v2886_v22  ;;  %v2967_v35 = vsel %vm2965_vm0, %v9720_v21, %v9719_v29  ;;  %v2968_v27 = vsel %vm2965_vm0, %v9719_v29, %v9721_v19  ;;  %vm3093_vm1 = vcmask 72704   ;;  %3866 = vrot.lane.b32.xlu0 %v9405_v18, %s5400_s18  ;;  %v9723_v55 = vld [vmem:[#allocation145_spill] sm:$0xff]  ;;  %v2984_v22 = vld [vmem:[#allocation9 + $0x448] sm:$0xff]  ;;  %v2985_v29 = vld [vmem:[#allocation9 + $0x450] sm:$0xff] }
 0x57d   :  { %v2944_v12 = vmul.f32 %v2936_v43, %v2922_v42  ;;  %v2945_v40 = vmul.f32 %v2937_v52, %v2923_v17  ;;  %v2969_v63 = vsel %vm2965_vm0, %v9721_v19, %v9722_v46  ;;  %v2966_v31 = vsel %vm2965_vm0, %v9723_v55, %v9720_v21  ;;  %3858 = vrot.lane.b32.xlu1 %v6864_v33, %s5400_s18  ;;  %v9725_v42 = vld [vmem:[#allocation146_spill] sm:$0xff]  ;;  %v8178_v43 = vpop.permute.xlu0 %3515  ;;  %v9727_v19 = vld [vmem:[#allocation148_spill] sm:$0xff]  ;;  %v2986_v46 = vld [vmem:[#allocation9 + $0x458] sm:$0xff] }
 0x57e   :  { %v2918_v37 = vadd.f32 %v2914_v48, %v2887_v44  ;;  %v2946_v32 = vadd.f32 %v2942_v58, %v2915_v5  ;;  %v2947_v38 = vadd.f32 %v2943_v57, %v2916_v60  ;;  %v2999_v17 = vsel %vm2997_vm6, %v9725_v42, %v9724_v13  ;;  %9726 = vst [vmem:[#allocation62_spill] sm:$0xff] %v8178_v43  ;;  %v9728_v55 = vld [vmem:[#allocation149_spill] sm:$0xff]  ;;  %v2983_v5 = vld [vmem:[#allocation9 + $0x440] sm:$0xff]  ;;  %v9731_v43 = vld [vmem:[#allocation152_spill] sm:$0xff] }
 0x57f   :  { %v2975_v2 = vmul.f32 %v2967_v35, %v2952_v6  ;;  %v2976_v52 = vmul.f32 %v2968_v27, %v2953_v25  ;;  %v3000_v21 = vsel %vm2997_vm6, %v9724_v13, %v9727_v19  ;;  %v3001_v48 = vsel %vm2997_vm6, %v9727_v19, %v9728_v55  ;;  %v8186_v58 = vpop.permute.xlu1 %3517  ;;  %v9730_v60 = vld [vmem:[#allocation150_spill] sm:$0xff]  ;;  %v3016_v13 = vld [vmem:[#allocation9 + $0x468] sm:$0xff]  ;;  %v9737_v14 = vld [vmem:[#allocation157_spill] sm:$0xff] }
 0x580   :  { %9729 = vst [vmem:[#allocation59_spill] sm:$0xff] %v8186_v58  ;;  %v2977_v57 = vmul.f32 %v2969_v63, %v2954_v50  ;;  %v2974_v44 = vmul.f32 %v2966_v31, %v2951_v45  ;;  %v2998_v6 = vsel %vm2997_vm6, %v9730_v60, %v9725_v42  ;;  %vm3125_vm0 = vcmask 48128   ;;  %3902 = vrot.lane.b32.xlu0 %v6876_v24, %s5401_s30  ;;  %v9732_v19 = vld [vmem:[#allocation151_spill] sm:$0xff]  ;;  %v3017_v45 = vld [vmem:[#allocation9 + $0x470] sm:$0xff]  ;;  %v3018_v31 = vld [vmem:[#allocation9 + $0x478] sm:$0xff] }
 0x581   :  { %v2948_v35 = vadd.f32 %v2944_v12, %v2917_v1  ;;  %v2949_v25 = vadd.f32 %v2945_v40, %v2918_v37  ;;  %v3007_v27 = vmul.f32 %v2999_v17, %v2984_v22  ;;  %v3031_v55 = vsel %vm3029_vm14, %v9732_v19, %v9731_v43  ;;  %3904 = vrot.lane.b32.xlu1 %v7039_v4, %s5401_s30  ;;  %v9733_v42 = vld [vmem:[#allocation153_spill] sm:$0xff]  ;;  %v9734_v58 = vld [vmem:[#allocation154_spill] sm:$0xff]  ;;  %v8204_v12 = vpop.permute.xlu0 %3509  ;;  %v9735_v39 = vld [vmem:[#allocation155_spill] sm:$0xff] }
 0x582   :  { %v3008_v50 = vmul.f32 %v3000_v21, %v2985_v29  ;;  %v3009_v63 = vmul.f32 %v3001_v48, %v2986_v46  ;;  %v3032_v60 = vsel %vm3029_vm14, %v9731_v43, %v9733_v42  ;;  %v3033_v1 = vsel %vm3029_vm14, %v9733_v42, %v9734_v58  ;;  %v3015_v17 = vld [vmem:[#allocation9 + $0x460] sm:$0xff]  ;;  %v3048_v43 = vld [vmem:[#allocation9 + $0x488] sm:$0xff]  ;;  %v9738_v26 = vld [vmem:[#allocation156_spill] sm:$0xff] }
 0x583   :  { %v2979_v40 = vadd.f32 %v2975_v2, %v2947_v38  ;;  %v2980_v37 = vadd.f32 %v2976_v52, %v2948_v35  ;;  %v3006_v22 = vmul.f32 %v2998_v6, %v2983_v5  ;;  %v3030_v29 = vsel %vm3029_vm14, %v9735_v39, %v9732_v19  ;;  %v8209_v21 = vpop.permute.xlu1 %3543  ;;  %v3049_v52 = vld [vmem:[#allocation9 + $0x490] sm:$0xff]  ;;  %v9739_v5 = vld [vmem:[#allocation158_spill] sm:$0xff]  ;;  %v9742_v42 = vld [vmem:[#allocation159_spill] sm:$0xff] }
 0x584   :  { %9736 = vst [vmem:[#allocation39_spill] sm:$0xff] %v8209_v21  ;;  %v2981_v46 = vadd.f32 %v2977_v57, %v2949_v25  ;;  %v2978_v48 = vadd.f32 %v2974_v44, %v2946_v32  ;;  %v3039_v8 = vmul.f32 %v3031_v55, %v3016_v13  ;;  %v3063_v58 = vsel %vm3061_vm15, %v9738_v26, %v9737_v14  ;;  %v3047_v6 = vld [vmem:[#allocation9 + $0x480] sm:$0xff]  ;;  %v9740_v57 = vld [vmem:[#allocation160_spill] sm:$0xff]  ;;  %v9744_v21 = vld [vmem:[#allocation161_spill] sm:$0xff] }
 0x585   :  { %5051 = vrot.lane.b32.xlu0 %v9405_v18, %s5401_s30  ;;  %v3040_v38 = vmul.f32 %v3032_v60, %v3017_v45  ;;  %v3041_v2 = vmul.f32 %v3033_v1, %v3018_v31  ;;  %v3064_v39 = vsel %vm3061_vm15, %v9737_v14, %v9739_v5  ;;  %v3062_v32 = vsel %vm3061_vm15, %v9740_v57, %v9738_v26  ;;  %v8224_v19 = vpop.permute.xlu0 %3545  ;;  %v3050_v31 = vld [vmem:[#allocation9 + $0x498] sm:$0xff]  ;;  %v3080_v60 = vld [vmem:[#allocation9 + $0x4a8] sm:$0xff]  ;;  %v9743_v1 = vld [vmem:[#allocation162_spill] sm:$0xff] }
 0x586   :  { %3900 = vrot.lane.b32.xlu1 %v6868_v30, %s5401_s30  ;;  %v3011_v44 = vadd.f32 %v3007_v27, %v2979_v40  ;;  %v3012_v35 = vadd.f32 %v3008_v50, %v2980_v37  ;;  %v3013_v25 = vadd.f32 %v3009_v63, %v2981_v46  ;;  %v3038_v13 = vmul.f32 %v3030_v29, %v3015_v17  ;;  %v3079_v63 = vld [vmem:[#allocation9 + $0x4a0] sm:$0xff]  ;;  %v9746_v40 = vld [vmem:[#allocation165_spill] sm:$0xff]  ;;  %v3081_v46 = vld [vmem:[#allocation9 + $0x4b0] sm:$0xff] }
 0x587   :  { %9741 = vst [vmem:[#allocation61_spill] sm:$0xff] %v8224_v19  ;;  %v3010_v55 = vadd.f32 %v3006_v22, %v2978_v48  ;;  %v3071_v45 = vmul.f32 %v3063_v58, %v3048_v43  ;;  %v3065_v14 = vsel %vm3061_vm15, %v9739_v5, %v9742_v42  ;;  %v3095_v26 = vsel %vm3093_vm1, %v9744_v21, %v9743_v1  ;;  %v8232_v57 = vpop.permute.xlu1 %3547  ;;  %v9747_v48 = vld [vmem:[#allocation163_spill] sm:$0xff]  ;;  %v3146_v19 = vld [vmem:[#allocation9 + $0x4f8] sm:$0xff] }
 0x588   :  { %9745 = vst [vmem:[#allocation78_spill] sm:$0xff] %v8232_v57  ;;  %v3072_v27 = vmul.f32 %v3064_v39, %v3049_v52  ;;  %v3070_v50 = vmul.f32 %v3062_v32, %v3047_v6  ;;  %v3094_v37 = vsel %vm3093_vm1, %v9746_v40, %v9744_v21  ;;  %v3043_v22 = vadd.f32 %v3039_v8, %v3011_v44  ;;  %v3111_v39 = vld [vmem:[#allocation9 + $0x4c0] sm:$0xff]  ;;  %v9754_v40 = vld [vmem:[#allocation171_spill] sm:$0xff]  ;;  %v3145_v57 = vld [vmem:[#allocation9 + $0x4f0] sm:$0xff] }
 0x589   :  { %3934 = vrot.lane.b32.xlu0 %v6876_v24, %s5402_s15  ;;  %v3044_v17 = vadd.f32 %v3040_v38, %v3012_v35  ;;  %v3045_v29 = vadd.f32 %v3041_v2, %v3013_v25  ;;  %v3096_v43 = vsel %vm3093_vm1, %v9743_v1, %v9747_v48  ;;  %v3042_v58 = vadd.f32 %v3038_v13, %v3010_v55  ;;  %v9748_v21 = vld [vmem:[#allocation166_spill] sm:$0xff]  ;;  %v8247_v42 = vpop.permute.xlu0 %3549  ;;  %v3082_v38 = vld [vmem:[#allocation9 + $0x4b8] sm:$0xff]  ;;  %v9751_v2 = vld [vmem:[#allocation164_spill] sm:$0xff] }
 0x58a   :  { %3936 = vrot.lane.b32.xlu1 %v7039_v4, %s5402_s15  ;;  %v3073_v52 = vmul.f32 %v3065_v14, %v3050_v31  ;;  %v3103_v5 = vmul.f32 %v3095_v26, %v3080_v60  ;;  %v9749_v6 = vld [vmem:[#allocation170_spill] sm:$0xff]  ;;  %9750 = vst [vmem:[#allocation63_spill] sm:$0xff] %v8247_v42  ;;  %v3075_v8 = vadd.f32 %v3071_v45, %v3043_v22  ;;  %v3112_v25 = vld [vmem:[#allocation9 + $0x4c8] sm:$0xff]  ;;  %vm9757_vm7 = vcmask 23552  }
 0x58b   :  { %v3126_v32 = vsel %vm3125_vm0, %v9749_v6, %v9748_v21  ;;  %v3097_v44 = vsel %vm3093_vm1, %v9747_v48, %v9751_v2  ;;  %v3102_v35 = vmul.f32 %v3094_v37, %v3079_v63  ;;  %v9752_v1 = vld [vmem:[#allocation167_spill] sm:$0xff]  ;;  %v8255_v55 = vpop.permute.xlu1 %3541  ;;  %v3076_v31 = vadd.f32 %v3072_v27, %v3044_v17  ;;  %v3143_v26 = vld [vmem:[#allocation9 + $0x4e0] sm:$0xff]  ;;  %v9755_v6 = vld [vmem:[#allocation41_spill] sm:$0xff] }
 0x58c   :  { %v3127_v13 = vsel %vm3125_vm0, %v9748_v21, %v9752_v1  ;;  %9753 = vst [vmem:[#allocation44_spill] sm:$0xff] %v8255_v55  ;;  %v3074_v14 = vadd.f32 %v3070_v50, %v3042_v58  ;;  %v3104_v60 = vmul.f32 %v3096_v43, %v3081_v46  ;;  %v9756_v45 = vunpack.i.h.bf16 %v9755_v6  ;;  %v3113_v63 = vld [vmem:[#allocation9 + $0x4d0] sm:$0xff]  ;;  %v3114_v2 = vld [vmem:[#allocation9 + $0x4d8] sm:$0xff]  ;;  %v3144_v50 = vld [vmem:[#allocation9 + $0x4e8] sm:$0xff] }
 0x58d   :  { %5056 = vrot.lane.b32.xlu0 %v9405_v18, %s5402_s15  ;;  %v9758_v37 = vld [vmem:[#allocation168_spill] sm:$0xff]  ;;  %v3134_v21 = vmul.f32 %v3126_v32, %v3111_v39  ;;  %v9759_v55 = vld [vmem:[#allocation169_spill] sm:$0xff]  ;;  %vm9761_vm11 = vmmov %vm9757_vm7  ;;  %v3077_v43 = vadd.f32 %v3073_v52, %v3045_v29  ;;  %v3107_v58 = vadd.f32 %v3103_v5, %v3075_v8  ;;  %v3105_v6 = vmul.f32 %v3097_v44, %v3082_v38 }
 0x58e   :  { %v3157_v22 = vsel %vm9757_vm7, %v9756_v45, %v9754_v40  ;;  %v3128_v48 = vsel %vm3125_vm0, %v9752_v1, %v9758_v37  ;;  %v3129_v27 = vsel %vm3125_vm0, %v9758_v37, %v9759_v55  ;;  %v9760_v17 = vld [vmem:[#allocation172_spill] sm:$0xff]  ;;  %3932 = vrot.lane.b32.xlu1 %v6868_v30, %s5402_s15  ;;  %v3135_v45 = vmul.f32 %v3127_v13, %v3112_v25  ;;  %v3174_v42 = vld [vmem:[#allocation9 + $0x500] sm:$0xff]  ;;  %v8274_v1 = vpop.permute.xlu0 %3575  ;;  %vm9762_vm4 = vmmov %vm9757_vm7 }
 0x58f   :  { %v3158_v46 = vsel %vm9761_vm11, %v9754_v40, %v9760_v17  ;;  %v3106_v39 = vadd.f32 %v3102_v35, %v3074_v14  ;;  %v3165_v32 = vmul.f32 %v3157_v22, %v3143_v26  ;;  %v3159_v55 = vsel %vm9762_vm4, %v9760_v17, %v7610_v15  ;;  %vm9763_vm6 = vmmov %vm9762_vm4  ;;  %v8282_v37 = vpop.permute.xlu1 %3577  ;;  %v3175_v5 = vld [vmem:[#allocation9 + $0x508] sm:$0xff]  ;;  %v3176_v38 = vld [vmem:[#allocation9 + $0x510] sm:$0xff] }
 0x590   :  { %v3160_v40 = vsel %vm9763_vm6, %v7610_v15, %v7617_v23  ;;  %v3136_v29 = vmul.f32 %v3128_v48, %v3113_v63  ;;  %v3137_v52 = vmul.f32 %v3129_v27, %v3114_v2  ;;  %v3166_v8 = vmul.f32 %v3158_v46, %v3144_v50  ;;  %v9764_v44 = vld [vmem:[#allocation52_spill] sm:$0xff]  ;;  %v3177_v63 = vld [vmem:[#allocation9 + $0x518] sm:$0xff] }
 0x591   :  { %3966 = vrot.lane.b32.xlu0 %v6876_v24, %s5403_s4  ;;  %v4974_v35 = vunpack.i.h.bf16 %v9764_v44  ;;  %v3108_v25 = vadd.f32 %v3104_v60, %v3076_v31  ;;  %v3138_v13 = vadd.f32 %v3134_v21, %v3106_v39  ;;  %v3178_v14 = vmul.f32 %v3174_v42, %v6864_v33  ;;  %v3188_v42 = vld [vmem:[#allocation9 + $0x528] sm:$0xff]  ;;  %v3189_v21 = vld [vmem:[#allocation9 + $0x530] sm:$0xff]  ;;  %v3190_v39 = vld [vmem:[#allocation9 + $0x538] sm:$0xff] }
 0x592   :  { %3968 = vrot.lane.b32.xlu1 %v7039_v4, %s5403_s4  ;;  %v3109_v26 = vadd.f32 %v3105_v6, %v3077_v43  ;;  %v3139_v15 = vadd.f32 %v3135_v45, %v3107_v58  ;;  %v3167_v23 = vmul.f32 %v3159_v55, %v3145_v57  ;;  %v3168_v22 = vmul.f32 %v3160_v40, %v3146_v19  ;;  %v8288_v48 = vpop.permute.xlu0 %3579  ;;  %v3187_v6 = vld [vmem:[#allocation9 + $0x520] sm:$0xff]  ;;  %v3506_v44 = vld [vmem:[#allocation9 + $0x668] sm:$0xff] }
 0x593   :  { %v3179_v2 = vmul.f32 %v3175_v5, %v6868_v30  ;;  %v3169_v27 = vadd.f32 %v3165_v32, %v3138_v13  ;;  %v3180_v50 = vmul.f32 %v3176_v38, %v6876_v24  ;;  %vm3234_vm12 = vcmask 998400   ;;  %v8292_v17 = vpop.permute.xlu1 %3581  ;;  %v9768_v32 = vld [vmem:[#allocation93_spill] sm:$0xff]  ;;  %v3221_v5 = vld [vmem:[#allocation9 + $0x548] sm:$0xff] }
 0x594   :  { %v3140_v31 = vadd.f32 %v3136_v29, %v3108_v25  ;;  %v3141_v60 = vadd.f32 %v3137_v52, %v3109_v26  ;;  %v3170_v33 = vadd.f32 %v3166_v8, %v3139_v15  ;;  %vm9765_vm3 = vcmask 1022976   ;;  %v3223_v26 = vld [vmem:[#allocation9 + $0x558] sm:$0xff] }
 0x595   :  { %v3204_v57 = vsel %vm9765_vm3, %v7629_v16, %v7633_v53  ;;  %5061 = vrot.lane.b32.xlu0 %v9405_v18, %s5403_s4  ;;  %v3181_v19 = vmul.f32 %v3177_v63, %v7039_v4  ;;  %vm9766_vm14 = vmmov %vm9765_vm3  ;;  %vm3266_vm15 = vcmask 973824   ;;  %vm3298_vm1 = vcmask 949248  }
 0x596   :  { %v3205_v46 = vsel %vm9766_vm14, %v7633_v53, %v7653_v61  ;;  %3964 = vrot.lane.b32.xlu1 %v6868_v30, %s5403_s4  ;;  %v3171_v43 = vadd.f32 %v3167_v23, %v3140_v31  ;;  %v3172_v58 = vadd.f32 %v3168_v22, %v3141_v60  ;;  %vm9767_vm0 = vmmov %vm9765_vm3  ;;  %v9769_v55 = vunpack.i.h.bf16 %v9768_v32  ;;  %v8310_v29 = vpop.permute.xlu0 %3573  ;;  %v3220_v23 = vld [vmem:[#allocation9 + $0x540] sm:$0xff]  ;;  %v3285_v32 = vld [vmem:[#allocation9 + $0x588] sm:$0xff] }
 0x597   :  { %v3203_v45 = vsel %vm9767_vm0, %v7659_v36, %v7629_v16  ;;  %vm9770_vm7 = vmmov %vm9767_vm0  ;;  %v3182_v53 = vadd.f32 %v3178_v14, %v3169_v27  ;;  %v3212_v52 = vmul.f32 %v3204_v57, %v3188_v42  ;;  %v3236_v8 = vsel %vm3234_vm12, %v7672_v54, %v7674_v28  ;;  %v8315_v38 = vpop.permute.xlu1 %3607  ;;  %v3222_v36 = vld [vmem:[#allocation9 + $0x550] sm:$0xff]  ;;  %v3253_v27 = vld [vmem:[#allocation9 + $0x568] sm:$0xff] }
 0x598   :  { %v3206_v40 = vsel %vm9770_vm7, %v7653_v61, %v9769_v55  ;;  %vm3330_vm11 = vcmask 752640   ;;  %v3183_v25 = vadd.f32 %v3179_v2, %v3170_v33  ;;  %v3213_v16 = vmul.f32 %v3205_v46, %v3189_v21  ;;  %v3254_v33 = vld [vmem:[#allocation9 + $0x570] sm:$0xff]  ;;  %v3252_v57 = vld [vmem:[#allocation9 + $0x560] sm:$0xff]  ;;  %v3255_v21 = vld [vmem:[#allocation9 + $0x578] sm:$0xff] }
 0x599   :  { %v3237_v13 = vsel %vm3234_vm12, %v7674_v28, %v7686_v51  ;;  %3998 = vrot.lane.b32.xlu0 %v6876_v24, %s5335_s1  ;;  %v3211_v61 = vmul.f32 %v3203_v45, %v3187_v6  ;;  %v3214_v14 = vmul.f32 %v3206_v40, %v3190_v39  ;;  %v3238_v15 = vsel %vm3234_vm12, %v7686_v51, %v7695_v7  ;;  %v3286_v55 = vld [vmem:[#allocation9 + $0x590] sm:$0xff]  ;;  %v3287_v40 = vld [vmem:[#allocation9 + $0x598] sm:$0xff] }
 0x59a   :  { %v3235_v22 = vsel %vm3234_vm12, %v7712_v41, %v7672_v54  ;;  %vm3362_vm4 = vcmask 728064   ;;  %4000 = vrot.lane.b32.xlu1 %v7039_v4, %s5335_s1  ;;  %v3184_v28 = vadd.f32 %v3180_v50, %v3171_v43  ;;  %v3185_v63 = vadd.f32 %v3181_v19, %v3172_v58  ;;  %v8333_v60 = vpop.permute.xlu0 %3609 }
 0x59b   :  { %v3244_v2 = vmul.f32 %v3236_v8, %v3221_v5  ;;  %v3268_v31 = vsel %vm3266_vm15, %v7718_v34, %v7735_v0  ;;  %v3216_v51 = vadd.f32 %v3212_v52, %v3183_v25  ;;  %v3245_v7 = vmul.f32 %v3237_v13, %v3222_v36  ;;  %v8338_v41 = vpop.permute.xlu1 %3611 }
 0x59c   :  { %v3269_v54 = vsel %vm3266_vm15, %v7735_v0, %v7737_v59  ;;  %v3246_v42 = vmul.f32 %v3238_v15, %v3223_v26  ;;  %v3243_v50 = vmul.f32 %v3235_v22, %v3220_v23  ;;  %v3267_v19 = vsel %vm3266_vm15, %v7759_v47, %v7718_v34  ;;  %v9771_v26 = vld [vmem:[#allocation68_spill] sm:$0xff]  ;;  %v9772_v15 = vld [vmem:[#allocation30_spill] sm:$0xff] }
 0x59d   :  { %v3270_v46 = vsel %vm3266_vm15, %v7737_v59, %v7752_v56  ;;  %vm3394_vm6 = vcmask 703488   ;;  %5066 = vrot.lane.b32.xlu0 %v9405_v18, %s5335_s1  ;;  %v3215_v43 = vadd.f32 %v3211_v61, %v3182_v53  ;;  %v3217_v0 = vadd.f32 %v3213_v16, %v3184_v28  ;;  %v3284_v61 = vld [vmem:[#allocation9 + $0x580] sm:$0xff]  ;;  %v3318_v22 = vld [vmem:[#allocation9 + $0x5b0] sm:$0xff] }
 0x59e   :  { %v3218_v58 = vadd.f32 %v3214_v14, %v3185_v63  ;;  %v3276_v6 = vmul.f32 %v3268_v31, %v3253_v27  ;;  %3996 = vrot.lane.b32.xlu1 %v6868_v30, %s5335_s1  ;;  %v3248_v45 = vadd.f32 %v3244_v2, %v3216_v51  ;;  %v3277_v39 = vmul.f32 %v3269_v54, %v3254_v33  ;;  %v8353_v47 = vpop.permute.xlu0 %3613  ;;  %v9773_v28 = vld [vmem:[#allocation32_spill] sm:$0xff]  ;;  %v3319_v2 = vld [vmem:[#allocation9 + $0x5b8] sm:$0xff]  ;;  %s5404_s1 = smov 106  }
 0x59f   :  { %v3300_v34 = vsel %vm3298_vm1, %v7778_v11, %v7787_v9  ;;  %v3275_v59 = vmul.f32 %v3267_v19, %v3252_v57  ;;  %v3278_v56 = vmul.f32 %v3270_v46, %v3255_v21  ;;  %v3301_v53 = vsel %vm3298_vm1, %v7787_v9, %v7799_v20  ;;  %v8361_v5 = vpop.permute.xlu1 %3605  ;;  %v3317_v9 = vld [vmem:[#allocation9 + $0x5a8] sm:$0xff] }
 0x5a0   :  { %v3302_v52 = vsel %vm3298_vm1, %v7799_v20, %v7801_v49  ;;  %v3249_v8 = vadd.f32 %v3245_v7, %v3217_v0  ;;  %v3250_v25 = vadd.f32 %v3246_v42, %v3218_v58  ;;  %v3247_v16 = vadd.f32 %v3243_v50, %v3215_v43  ;;  %v3316_v7 = vld [vmem:[#allocation9 + $0x5a0] sm:$0xff]  ;;  %v3349_v57 = vld [vmem:[#allocation9 + $0x5c8] sm:$0xff]  ;;  %v9776_v43 = vld [vmem:[#allocation29_spill] sm:$0xff] }
 0x5a1   :  { %4029 = vrot.lane.b32.xlu0 %v6876_v24, %s5338_s13  ;;  %v3280_v36 = vadd.f32 %v3276_v6, %v3248_v45  ;;  %v3308_v13 = vmul.f32 %v3300_v34, %v3285_v32  ;;  %v3299_v14 = vsel %vm3298_vm1, %v7822_v3, %v7778_v11  ;;  %v3332_v20 = vsel %vm3330_vm11, %v9772_v15, %v9771_v26  ;;  %v9774_v19 = vld [vmem:[#allocation51_spill] sm:$0xff]  ;;  %v3351_v45 = vld [vmem:[#allocation9 + $0x5d8] sm:$0xff] }
 0x5a2   :  { %4031 = vrot.lane.b32.xlu1 %v7039_v4, %s5338_s13  ;;  %v3309_v49 = vmul.f32 %v3301_v53, %v3286_v55  ;;  %v3310_v23 = vmul.f32 %v3302_v52, %v3287_v40  ;;  %v3333_v63 = vsel %vm3330_vm11, %v9771_v26, %v9773_v28  ;;  %v3334_v11 = vsel %vm3330_vm11, %v9773_v28, %v7865_v62  ;;  %v8379_v3 = vpop.permute.xlu0 %3639  ;;  %v9775_v21 = vld [vmem:[#allocation71_spill] sm:$0xff]  ;;  %v3350_v62 = vld [vmem:[#allocation9 + $0x5d0] sm:$0xff]  ;;  %v3348_v55 = vld [vmem:[#allocation9 + $0x5c0] sm:$0xff] }
 0x5a3   :  { %v3281_v27 = vadd.f32 %v3277_v39, %v3249_v8  ;;  %v3279_v31 = vadd.f32 %v3275_v59, %v3247_v16  ;;  %v3282_v51 = vadd.f32 %v3278_v56, %v3250_v25  ;;  %v3331_v33 = vsel %vm3330_vm11, %v7871_v10, %v9772_v15  ;;  %v8384_v54 = vpop.permute.xlu1 %3641  ;;  %v9777_v39 = vld [vmem:[#allocation54_spill] sm:$0xff]  ;;  %v3381_v16 = vld [vmem:[#allocation9 + $0x5e8] sm:$0xff] }
 0x5a4   :  { %v3307_v42 = vmul.f32 %v3299_v14, %v3284_v61  ;;  %v3340_v50 = vmul.f32 %v3332_v20, %v3317_v9  ;;  %v3364_v46 = vsel %vm3362_vm4, %v9775_v21, %v9774_v19  ;;  %v3365_v0 = vsel %vm3362_vm4, %v9774_v19, %v9776_v43  ;;  %v9778_v40 = vld [vmem:[#allocation70_spill] sm:$0xff]  ;;  %v9780_v61 = vld [vmem:[#allocation53_spill] sm:$0xff] }
 0x5a5   :  { %5071 = vrot.lane.b32.xlu0 %v9405_v18, %s5338_s13  ;;  %v3312_v58 = vadd.f32 %v3308_v13, %v3280_v36  ;;  %v3341_v6 = vmul.f32 %v3333_v63, %v3318_v22  ;;  %v3342_v10 = vmul.f32 %v3334_v11, %v3319_v2  ;;  %v3366_v32 = vsel %vm3362_vm4, %v9776_v43, %v9777_v39  ;;  %v3382_v36 = vld [vmem:[#allocation9 + $0x5f0] sm:$0xff]  ;;  %v9781_v9 = vld [vmem:[#allocation34_spill] sm:$0xff]  ;;  %v3383_v2 = vld [vmem:[#allocation9 + $0x5f8] sm:$0xff] }
 0x5a6   :  { %4027 = vrot.lane.b32.xlu1 %v6868_v30, %s5338_s13  ;;  %v3313_v34 = vadd.f32 %v3309_v49, %v3281_v27  ;;  %v3314_v59 = vadd.f32 %v3310_v23, %v3282_v51  ;;  %v3339_v56 = vmul.f32 %v3331_v33, %v3316_v7  ;;  %v3363_v53 = vsel %vm3362_vm4, %v9778_v40, %v9775_v21  ;;  %v8402_v52 = vpop.permute.xlu0 %3643  ;;  %v9779_v13 = vld [vmem:[#allocation72_spill] sm:$0xff]  ;;  %v9782_v11 = vld [vmem:[#allocation31_spill] sm:$0xff]  ;;  %v9785_v19 = vld [vmem:[#allocation73_spill] sm:$0xff]  ;;  %s5405_s13 = smov 103  }
 0x5a7   :  { %v3372_v8 = vmul.f32 %v3364_v46, %v3349_v57  ;;  %v3373_v25 = vmul.f32 %v3365_v0, %v3350_v62  ;;  %v3396_v14 = vsel %vm3394_vm6, %v9780_v61, %v9779_v13  ;;  %v3397_v26 = vsel %vm3394_vm6, %v9779_v13, %v9781_v9  ;;  %v8410_v15 = vpop.permute.xlu1 %3645  ;;  %v9783_v33 = vld [vmem:[#allocation56_spill] sm:$0xff]  ;;  %v9784_v57 = vld [vmem:[#allocation55_spill] sm:$0xff]  ;;  %v3415_v40 = vld [vmem:[#allocation9 + $0x618] sm:$0xff] }
 0x5a8   :  { %v3311_v20 = vadd.f32 %v3307_v42, %v3279_v31  ;;  %v3344_v49 = vadd.f32 %v3340_v50, %v3312_v58  ;;  %v3374_v23 = vmul.f32 %v3366_v32, %v3351_v45  ;;  %vm3519_vm12 = vcmask 605184   ;;  %v3380_v31 = vld [vmem:[#allocation9 + $0x5e0] sm:$0xff]  ;;  %v3413_v50 = vld [vmem:[#allocation9 + $0x608] sm:$0xff]  ;;  %v3414_v58 = vld [vmem:[#allocation9 + $0x610] sm:$0xff] }
 0x5a9   :  { %4060 = vrot.lane.b32.xlu0 %v6876_v24, %s5341_s17  ;;  %v3345_v22 = vadd.f32 %v3341_v6, %v3313_v34  ;;  %v3346_v28 = vadd.f32 %v3342_v10, %v3314_v59  ;;  %v3371_v63 = vmul.f32 %v3363_v53, %v3348_v55  ;;  %v3398_v27 = vsel %vm3394_vm6, %v9781_v9, %v9782_v11  ;;  %v9786_v6 = vld [vmem:[#allocation37_spill] sm:$0xff]  ;;  %v3412_v34 = vld [vmem:[#allocation9 + $0x600] sm:$0xff]  ;;  %v9787_v59 = vld [vmem:[#allocation75_spill] sm:$0xff] }
 0x5aa   :  { %4062 = vrot.lane.b32.xlu1 %v7039_v4, %s5341_s17  ;;  %v3404_v51 = vmul.f32 %v3396_v14, %v3381_v16  ;;  %v3405_v7 = vmul.f32 %v3397_v26, %v3382_v36  ;;  %v3395_v42 = vsel %vm3394_vm6, %v9783_v33, %v9780_v61  ;;  %v3427_v21 = vsel %vm1672_vm8, %v9785_v19, %v9784_v57  ;;  %v8425_v46 = vpop.permute.xlu0 %3637  ;;  %v9788_v53 = vld [vmem:[#allocation25_spill] sm:$0xff]  ;;  %v3444_v36 = vld [vmem:[#allocation9 + $0x628] sm:$0xff]  ;;  %v9790_v13 = vld [vmem:[#allocation58_spill] sm:$0xff] }
 0x5ab   :  { %v3343_v62 = vadd.f32 %v3339_v56, %v3311_v20  ;;  %v3376_v43 = vadd.f32 %v3372_v8, %v3344_v49  ;;  %v3377_v0 = vadd.f32 %v3373_v25, %v3345_v22  ;;  %v3428_v10 = vsel %vm1672_vm8, %v9784_v57, %v9786_v6  ;;  %v8430_v45 = vpop.permute.xlu1 %3671  ;;  %v9791_v61 = vld [vmem:[#allocation33_spill] sm:$0xff]  ;;  %v3445_v9 = vld [vmem:[#allocation9 + $0x630] sm:$0xff]  ;;  %v9792_v26 = vld [vmem:[#allocation38_spill] sm:$0xff] }
 0x5ac   :  { %vm3551_vm3 = vcmask 580608   ;;  %v3378_v39 = vadd.f32 %v3374_v23, %v3346_v28  ;;  %v3406_v32 = vmul.f32 %v3398_v27, %v3383_v2  ;;  %v3426_v55 = vsel %vm1672_vm8, %v9787_v59, %v9785_v19  ;;  %v9793_v33 = vld [vmem:[#allocation77_spill] sm:$0xff]  ;;  %v9794_v57 = vld [vmem:[#allocation27_spill] sm:$0xff] }
 0x5ad   :  { %v9789_v56 = vunpack.i.h.bf16 %v9788_v53  ;;  %5076 = vrot.lane.b32.xlu0 %v9405_v18, %s5341_s17  ;;  %v3403_v25 = vmul.f32 %v3395_v42, %v3380_v31  ;;  %v3435_v16 = vmul.f32 %v3427_v21, %v3413_v50  ;;  %v3458_v14 = vsel %vm1768_vm13, %v9791_v61, %v9790_v13  ;;  %v3443_v31 = vld [vmem:[#allocation9 + $0x620] sm:$0xff]  ;;  %v3446_v50 = vld [vmem:[#allocation9 + $0x638] sm:$0xff] }
 0x5ae   :  { %v3459_v20 = vsel %vm1768_vm13, %v9790_v13, %v9792_v26  ;;  %4058 = vrot.lane.b32.xlu1 %v6868_v30, %s5341_s17  ;;  %v3375_v49 = vadd.f32 %v3371_v63, %v3343_v62  ;;  %v3408_v23 = vadd.f32 %v3404_v51, %v3376_v43  ;;  %v3409_v22 = vadd.f32 %v3405_v7, %v3377_v0  ;;  %v8449_v2 = vpop.permute.xlu0 %3673  ;;  %v3475_v62 = vld [vmem:[#allocation9 + $0x648] sm:$0xff]  ;;  %v9796_v43 = vld [vmem:[#allocation40_spill] sm:$0xff]  ;;  %v9797_v0 = vld [vmem:[#allocation74_spill] sm:$0xff]  ;;  %s5406_s17 = smov 100  }
 0x5af   :  { %v3429_v8 = vsel %vm1672_vm8, %v9786_v6, %v9789_v56  ;;  %v3436_v28 = vmul.f32 %v3428_v10, %v3414_v58  ;;  %vm3583_vm8 = vcmask 556032   ;;  %v3434_v11 = vmul.f32 %v3426_v55, %v3412_v34  ;;  %v8458_v63 = vpop.permute.xlu1 %3675  ;;  %v3476_v6 = vld [vmem:[#allocation9 + $0x650] sm:$0xff]  ;;  %v9798_v10 = vld [vmem:[#allocation42_spill] sm:$0xff]  ;;  %v3477_v53 = vld [vmem:[#allocation9 + $0x658] sm:$0xff] }
 0x5b0   :  { %v3437_v27 = vmul.f32 %v3429_v8, %v3415_v40  ;;  %v3457_v42 = vsel %vm1768_vm13, %v9793_v33, %v9791_v61  ;;  %v9795_v19 = vunpack.i.h.bf16 %v9794_v57  ;;  %v3466_v51 = vmul.f32 %v3458_v14, %v3444_v36  ;;  %v3474_v61 = vld [vmem:[#allocation9 + $0x640] sm:$0xff]  ;;  %v9799_v14 = vld [vmem:[#allocation57_spill] sm:$0xff] }
 0x5b1   :  { %v3467_v7 = vmul.f32 %v3459_v20, %v3445_v9  ;;  %v3489_v58 = vsel %vm1864_vm9, %v9797_v0, %v9796_v43  ;;  %v3490_v34 = vsel %vm1864_vm9, %v9796_v43, %v9798_v10  ;;  %vm3615_vm14 = vcmask 359424   ;;  %4091 = vrot.lane.b32.xlu0 %v6876_v24, %s5404_s1  ;;  %v9801_v20 = vld [vmem:[#allocation60_spill] sm:$0xff] }
 0x5b2   :  { %v3460_v21 = vsel %vm1768_vm13, %v9792_v26, %v9795_v19  ;;  %v3407_v59 = vadd.f32 %v3403_v25, %v3375_v49  ;;  %v3410_v55 = vadd.f32 %v3406_v32, %v3378_v39  ;;  %v3439_v40 = vadd.f32 %v3435_v16, %v3408_v23  ;;  %4093 = vrot.lane.b32.xlu1 %v7039_v4, %s5404_s1  ;;  %v8477_v25 = vpop.permute.xlu0 %3677  ;;  %v9800_v26 = vld [vmem:[#allocation76_spill] sm:$0xff]  ;;  %v9803_v19 = vld [vmem:[#allocation59_spill] sm:$0xff] }
 0x5b3   :  { %v3491_v56 = vsel %vm1864_vm9, %v9798_v10, %v4974_v35  ;;  %v3440_v8 = vadd.f32 %v3436_v28, %v3409_v22  ;;  %v3465_v36 = vmul.f32 %v3457_v42, %v3443_v31  ;;  %v3468_v13 = vmul.f32 %v3460_v21, %v3446_v50  ;;  %v8482_v49 = vpop.permute.xlu1 %3669  ;;  %v3507_v42 = vld [vmem:[#allocation9 + $0x670] sm:$0xff]  ;;  %v3508_v50 = vld [vmem:[#allocation9 + $0x678] sm:$0xff] }
 0x5b4   :  { %v3488_v9 = vsel %vm1864_vm9, %v9799_v14, %v9797_v0  ;;  %v3441_v39 = vadd.f32 %v3437_v27, %v3410_v55  ;;  %v3497_v32 = vmul.f32 %v3489_v58, %v3475_v62  ;;  %v3498_v16 = vmul.f32 %v3490_v34, %v3476_v6  ;;  %v9802_v27 = vld [vmem:[#allocation62_spill] sm:$0xff]  ;;  %v3538_v0 = vld [vmem:[#allocation9 + $0x688] sm:$0xff]  ;;  %v9804_v58 = vld [vmem:[#allocation61_spill] sm:$0xff] }
 0x5b5   :  { %v3521_v35 = vsel %vm3519_vm12, %v9801_v20, %v9800_v26  ;;  %v3438_v23 = vadd.f32 %v3434_v11, %v3407_v59  ;;  %v3470_v22 = vadd.f32 %v3466_v51, %v3439_v40  ;;  %v3471_v28 = vadd.f32 %v3467_v7, %v3440_v8  ;;  %5081 = vrot.lane.b32.xlu0 %v9405_v18, %s5404_s1  ;;  %v3505_v62 = vld [vmem:[#allocation9 + $0x660] sm:$0xff]  ;;  %v9805_v6 = vld [vmem:[#allocation39_spill] sm:$0xff]  ;;  %v3539_v40 = vld [vmem:[#allocation9 + $0x690] sm:$0xff] }
 0x5b6   :  { %v3499_v31 = vmul.f32 %v3491_v56, %v3477_v53  ;;  %v3496_v33 = vmul.f32 %v3488_v9, %v3474_v61  ;;  %v3522_v57 = vsel %vm3519_vm12, %v9800_v26, %v9802_v27  ;;  %v3523_v21 = vsel %vm3519_vm12, %v9802_v27, %v9803_v19  ;;  %4089 = vrot.lane.b32.xlu1 %v6868_v30, %s5404_s1  ;;  %v8500_v34 = vpop.permute.xlu0 %3703  ;;  %v9806_v53 = vld [vmem:[#allocation78_spill] sm:$0xff]  ;;  %v3540_v56 = vld [vmem:[#allocation9 + $0x698] sm:$0xff]  ;;  %v9807_v8 = vld [vmem:[#allocation63_spill] sm:$0xff] }
 0x5b7   :  { %v3520_v11 = vsel %vm3519_vm12, %v8204_v12, %v9801_v20  ;;  %vm3647_vm13 = vcmask 334848   ;;  %v3469_v51 = vadd.f32 %v3465_v36, %v3438_v23  ;;  %v3472_v7 = vadd.f32 %v3468_v13, %v3441_v39  ;;  %v8508_v13 = vpop.permute.xlu1 %3705  ;;  %v3537_v39 = vld [vmem:[#allocation9 + $0x680] sm:$0xff] }
 0x5b8   :  { %v3529_v43 = vmul.f32 %v3521_v35, %v3506_v44  ;;  %v3553_v10 = vsel %vm3551_vm3, %v9805_v6, %v9804_v58  ;;  %v3501_v59 = vadd.f32 %v3497_v32, %v3470_v22  ;;  %v3502_v55 = vadd.f32 %v3498_v16, %v3471_v28  ;;  %v9808_v32 = vld [vmem:[#allocation44_spill] sm:$0xff]  ;;  %v3570_v35 = vld [vmem:[#allocation9 + $0x6a8] sm:$0xff] }
 0x5b9   :  { %v3554_v12 = vsel %vm3551_vm3, %v9804_v58, %v9806_v53  ;;  %v3555_v36 = vsel %vm3551_vm3, %v9806_v53, %v9807_v8  ;;  %vm3679_vm9 = vcmask 310272   ;;  %v3530_v61 = vmul.f32 %v3522_v57, %v3507_v42  ;;  %4123 = vrot.lane.b32.xlu0 %v6876_v24, %s5405_s13  ;;  %v3601_v53 = vld [vmem:[#allocation9 + $0x6c0] sm:$0xff] }
 0x5ba   :  { %v3531_v14 = vmul.f32 %v3523_v21, %v3508_v50  ;;  %v3528_v9 = vmul.f32 %v3520_v11, %v3505_v62  ;;  %v3552_v16 = vsel %vm3551_vm3, %v9808_v32, %v9805_v6  ;;  %v3500_v44 = vadd.f32 %v3496_v33, %v3469_v51  ;;  %4125 = vrot.lane.b32.xlu1 %v7039_v4, %s5405_s13  ;;  %v3571_v50 = vld [vmem:[#allocation9 + $0x6b0] sm:$0xff]  ;;  %v8523_v57 = vpop.permute.xlu0 %3707  ;;  %v3572_v33 = vld [vmem:[#allocation9 + $0x6b8] sm:$0xff]  ;;  %v3569_v21 = vld [vmem:[#allocation9 + $0x6a0] sm:$0xff] }
 0x5bb   :  { %v3503_v26 = vadd.f32 %v3499_v31, %v3472_v7  ;;  %v3561_v20 = vmul.f32 %v3553_v10, %v3538_v0  ;;  %v3585_v23 = vsel %vm3583_vm8, %v8274_v1, %v8282_v37  ;;  %v3533_v22 = vadd.f32 %v3529_v43, %v3501_v59  ;;  %v3602_v11 = vld [vmem:[#allocation9 + $0x6c8] sm:$0xff]  ;;  %v8534_v7 = vpop.permute.xlu1 %3709  ;;  %v3603_v6 = vld [vmem:[#allocation9 + $0x6d0] sm:$0xff] }
 0x5bc   :  { %v3562_v28 = vmul.f32 %v3554_v12, %v3539_v40  ;;  %v3563_v42 = vmul.f32 %v3555_v36, %v3540_v56  ;;  %v3586_v27 = vsel %vm3583_vm8, %v8282_v37, %v8288_v48  ;;  %v3560_v31 = vmul.f32 %v3552_v16, %v3537_v39 }
 0x5bd   :  { %v3587_v19 = vsel %vm3583_vm8, %v8288_v48, %v8292_v17  ;;  %v3584_v62 = vsel %vm3583_vm8, %v8310_v29, %v8274_v1  ;;  %v3617_v51 = vsel %vm3615_vm14, %v8315_v38, %v8333_v60  ;;  %v3534_v37 = vadd.f32 %v3530_v61, %v3502_v55  ;;  %5086 = vrot.lane.b32.xlu0 %v9405_v18, %s5405_s13  ;;  %v3604_v29 = vld [vmem:[#allocation9 + $0x6d8] sm:$0xff] }
 0x5be   :  { %v3535_v43 = vadd.f32 %v3531_v14, %v3503_v26  ;;  %v3532_v0 = vadd.f32 %v3528_v9, %v3500_v44  ;;  %v3593_v58 = vmul.f32 %v3585_v23, %v3570_v35  ;;  %v3565_v48 = vadd.f32 %v3561_v20, %v3533_v22  ;;  %4121 = vrot.lane.b32.xlu1 %v6868_v30, %s5405_s13  ;;  %v8549_v56 = vpop.permute.xlu0 %3701  ;;  %v3634_v9 = vld [vmem:[#allocation9 + $0x6e8] sm:$0xff]  ;;  %v3635_v22 = vld [vmem:[#allocation9 + $0x6f0] sm:$0xff] }
 0x5bf   :  { %v3594_v17 = vmul.f32 %v3586_v27, %v3571_v50  ;;  %v3618_v1 = vsel %vm3615_vm14, %v8333_v60, %v8338_v41  ;;  %v3619_v10 = vsel %vm3615_vm14, %v8338_v41, %v8353_v47  ;;  %v3595_v59 = vmul.f32 %v3587_v19, %v3572_v33  ;;  %v8551_v61 = vpop.permute.xlu1 %3734  ;;  %v3666_v26 = vld [vmem:[#allocation9 + $0x708] sm:$0xff]  ;;  %v3633_v27 = vld [vmem:[#allocation9 + $0x6e0] sm:$0xff] }
 0x5c0   :  { %v3592_v55 = vmul.f32 %v3584_v62, %v3569_v21  ;;  %v3625_v40 = vmul.f32 %v3617_v51, %v3602_v11  ;;  %v3616_v12 = vsel %vm3615_vm14, %v8361_v5, %v8315_v38  ;;  %v3566_v8 = vadd.f32 %v3562_v28, %v3534_v37  ;;  %v3636_v28 = vld [vmem:[#allocation9 + $0x6f8] sm:$0xff]  ;;  %v3698_v62 = vld [vmem:[#allocation9 + $0x728] sm:$0xff] }
 0x5c1   :  { %v3564_v60 = vadd.f32 %v3560_v31, %v3532_v0  ;;  %v3567_v36 = vadd.f32 %v3563_v42, %v3535_v43  ;;  %v3597_v14 = vadd.f32 %v3593_v58, %v3565_v48  ;;  %v3626_v41 = vmul.f32 %v3618_v1, %v3603_v6  ;;  %4155 = vrot.lane.b32.xlu0 %v6876_v24, %s5406_s17  ;;  %v3729_v48 = vld [vmem:[#allocation9 + $0x748] sm:$0xff] }
 0x5c2   :  { %v3627_v47 = vmul.f32 %v3619_v10, %v3604_v29  ;;  %v3649_v39 = vsel %vm3647_vm13, %v8379_v3, %v8384_v54  ;;  %v3598_v38 = vadd.f32 %v3594_v17, %v3566_v8  ;;  %v3624_v5 = vmul.f32 %v3616_v12, %v3601_v53  ;;  %4157 = vrot.lane.b32.xlu1 %v7039_v4, %s5406_s17  ;;  %v3737_v35 = vpop.permute.xlu0 %3736  ;;  %v3700_v12 = vld [vmem:[#allocation9 + $0x738] sm:$0xff] }
 0x5c3   :  { %v3599_v32 = vadd.f32 %v3595_v59, %v3567_v36  ;;  %v3596_v16 = vadd.f32 %v3592_v55, %v3564_v60  ;;  %v3629_v44 = vadd.f32 %v3625_v40, %v3597_v14  ;;  %v3681_v20 = vsel %vm3679_vm9, %v8430_v45, %v8449_v2  ;;  %v3739_v33 = vpop.permute.xlu1 %3738  ;;  %v3665_v55 = vld [vmem:[#allocation9 + $0x700] sm:$0xff] }
 0x5c4   :  { %v3657_v23 = vmul.f32 %v3649_v39, %v3634_v9  ;;  %v3650_v42 = vsel %vm3647_vm13, %v8384_v54, %v8402_v52  ;;  %v3651_v50 = vsel %vm3647_vm13, %v8402_v52, %v8410_v15  ;;  %v3648_v31 = vsel %vm3647_vm13, %v8425_v46, %v8379_v3  ;;  %v3667_v52 = vld [vmem:[#allocation9 + $0x710] sm:$0xff]  ;;  %v3668_v46 = vld [vmem:[#allocation9 + $0x718] sm:$0xff] }
 0x5c5   :  { %v3630_v19 = vadd.f32 %v3626_v41, %v3598_v38  ;;  %v3631_v21 = vadd.f32 %v3627_v47, %v3599_v32  ;;  %vm9809_vm15 = vcmask 285696   ;;  %vm9810_vm1 = vcmask 261120   ;;  %5091 = vrot.lane.b32.xlu0 %v9405_v18, %s5406_s17 }
 0x5c6   :  { %v3712_v11 = vsel %vm9809_vm15, %v8500_v34, %v8508_v13  ;;  %v3744_v51 = vsel %vm9810_vm1, %v3737_v35, %v3739_v33  ;;  %v3628_v54 = vadd.f32 %v3624_v5, %v3596_v16  ;;  %v3682_v15 = vsel %vm3679_vm9, %v8449_v2, %v8458_v63  ;;  %4153 = vrot.lane.b32.xlu1 %v6868_v30, %s5406_s17  ;;  %vm9811_vm0 = vmmov %vm9810_vm1  ;;  %v3741_v6 = vpop.permute.xlu0 %3740  ;;  %v3699_v2 = vld [vmem:[#allocation9 + $0x730] sm:$0xff] }
 0x5c7   :  { %v3689_v3 = vmul.f32 %v3681_v20, %v3666_v26  ;;  %v3683_v37 = vsel %vm3679_vm9, %v8458_v63, %v8477_v25  ;;  %v3658_v43 = vmul.f32 %v3650_v42, %v3635_v22  ;;  %v3659_v0 = vmul.f32 %v3651_v50, %v3636_v28  ;;  %vm9812_vm7 = vmmov %vm9809_vm15  ;;  %v3733_v59 = vpop.permute.xlu1 %3732  ;;  %v3728_v22 = vld [vmem:[#allocation9 + $0x740] sm:$0xff] }
 0x5c8   :  { %v3656_v58 = vmul.f32 %v3648_v31, %v3633_v27  ;;  %v3743_v17 = vsel %vm9811_vm0, %v8551_v61, %v3737_v35  ;;  %v3661_v1 = vadd.f32 %v3657_v23, %v3629_v44  ;;  %v3720_v29 = vmul.f32 %v3712_v11, %v3698_v62  ;;  %vm9813_vm11 = vmmov %vm9811_vm0  ;;  %v3762_v31 = vld [vmem:[#allocation9 + $0x778] sm:$0xff] }
 0x5c9   :  { %v3713_v10 = vsel %vm9812_vm7, %v8508_v13, %v8523_v57  ;;  %v3745_v63 = vsel %vm9813_vm11, %v3739_v33, %v3741_v6  ;;  %v3690_v25 = vmul.f32 %v3682_v15, %v3667_v52  ;;  %v3680_v40 = vsel %vm3679_vm9, %v8482_v49, %v8430_v45  ;;  %vm9814_vm4 = vmmov %vm9812_vm7  ;;  %4187 = vrot.lane.b32.xlu0 %v6876_v24, %s5356_s6  ;;  %v3730_v13 = vld [vmem:[#allocation9 + $0x750] sm:$0xff]  ;;  %v3731_v45 = vld [vmem:[#allocation9 + $0x758] sm:$0xff] }
 0x5ca   :  { %v3691_v53 = vmul.f32 %v3683_v37, %v3668_v46  ;;  %v3714_v8 = vsel %vm9814_vm4, %v8523_v57, %v8534_v7  ;;  %v3693_v60 = vadd.f32 %v3689_v3, %v3661_v1  ;;  %v3751_v36 = vmul.f32 %v3743_v17, %v3729_v48  ;;  %4189 = vrot.lane.b32.xlu1 %v7039_v4, %s5356_s6  ;;  %v3760_v49 = vld [vmem:[#allocation9 + $0x768] sm:$0xff]  ;;  %v3766_v39 = vpop.permute.xlu0 %3765  ;;  %v3697_v57 = vld [vmem:[#allocation9 + $0x720] sm:$0xff]  ;;  %vm9815_vm6 = vmmov %vm9814_vm4 }
 0x5cb   :  { %v3662_v14 = vadd.f32 %v3658_v43, %v3630_v19  ;;  %v3663_v41 = vadd.f32 %v3659_v0, %v3631_v21  ;;  %v3660_v47 = vadd.f32 %v3656_v58, %v3628_v54  ;;  %v3721_v9 = vmul.f32 %v3713_v10, %v3699_v2  ;;  %v3768_v16 = vpop.permute.xlu1 %3767  ;;  %vm9817_vm3 = vmmov %vm9811_vm0  ;;  %v3759_v37 = vld [vmem:[#allocation9 + $0x760] sm:$0xff]  ;;  %v3791_v2 = vld [vmem:[#allocation9 + $0x788] sm:$0xff] }
 0x5cc   :  { %v3688_v38 = vmul.f32 %v3680_v40, %v3665_v55  ;;  %v3724_v5 = vadd.f32 %v3720_v29, %v3693_v60  ;;  %v3722_v32 = vmul.f32 %v3714_v8, %v3700_v12  ;;  %v3711_v7 = vsel %vm9815_vm6, %v8549_v56, %v8500_v34  ;;  %v3761_v34 = vld [vmem:[#allocation9 + $0x770] sm:$0xff]  ;;  %v3793_v8 = vld [vmem:[#allocation9 + $0x798] sm:$0xff] }
 0x5cd   :  { %v3694_v44 = vadd.f32 %v3690_v25, %v3662_v14  ;;  %v3695_v26 = vadd.f32 %v3691_v53, %v3663_v41  ;;  %v3752_v20 = vmul.f32 %v3744_v51, %v3730_v13  ;;  %vm9816_vm12 = vcmask 236544   ;;  %5096 = vrot.lane.b32.xlu0 %v9405_v18, %s5356_s6  ;;  %v3790_v13 = vld [vmem:[#allocation9 + $0x780] sm:$0xff] }
 0x5ce   :  { %v3774_v35 = vsel %vm9816_vm12, %v3766_v39, %v3768_v16  ;;  %v3755_v23 = vadd.f32 %v3751_v36, %v3724_v5  ;;  %v3742_v28 = vsel %vm9817_vm3, %v3733_v59, %v8551_v61  ;;  %v3753_v42 = vmul.f32 %v3745_v63, %v3731_v45  ;;  %4185 = vrot.lane.b32.xlu1 %v6868_v30, %s5356_s6  ;;  %v3770_v33 = vpop.permute.xlu0 %3769  ;;  %vm9818_vm8 = vmmov %vm9816_vm12  ;;  %v3792_v59 = vld [vmem:[#allocation9 + $0x790] sm:$0xff]  ;;  %s9821_s6 = smov 64  }
 0x5cf   :  { %v3782_v50 = vmul.f32 %v3774_v35, %v3760_v49  ;;  %v3725_v56 = vadd.f32 %v3721_v9, %v3694_v44  ;;  %v3719_v27 = vmul.f32 %v3711_v7, %v3697_v57  ;;  %v3692_v19 = vadd.f32 %v3688_v38, %v3660_v47  ;;  %v3772_v11 = vpop.permute.xlu1 %3771  ;;  %vm9819_vm14 = vmmov %vm9818_vm8  ;;  %v3823_v38 = vld [vmem:[#allocation9 + $0x7a8] sm:$0xff]  ;;  %v3824_v44 = vld [vmem:[#allocation9 + $0x7b0] sm:$0xff] }
 0x5d0   :  { %v3726_v21 = vadd.f32 %v3722_v32, %v3695_v26  ;;  %v3775_v51 = vsel %vm9818_vm8, %v3768_v16, %v3770_v33  ;;  %v3750_v52 = vmul.f32 %v3742_v28, %v3728_v22  ;;  %v3776_v61 = vsel %vm9819_vm14, %v3770_v33, %v3772_v11  ;;  %vm9820_vm13 = vmmov %vm9818_vm8  ;;  %v3825_v26 = vld [vmem:[#allocation9 + $0x7b8] sm:$0xff] }
 0x5d1   :  { %v3786_v62 = vadd.f32 %v3782_v50, %v3755_v23  ;;  %v3756_v54 = vadd.f32 %v3752_v20, %v3725_v56  ;;  %v3783_v15 = vmul.f32 %v3775_v51, %v3761_v34  ;;  %4218 = vrot.lane.b32.xlu0 %v6876_v24, %s5357_s25  ;;  %v3784_v46 = vmul.f32 %v3776_v61, %v3762_v31  ;;  %v3822_v34 = vld [vmem:[#allocation9 + $0x7a0] sm:$0xff]  ;;  %v3856_v51 = vld [vmem:[#allocation9 + $0x7d0] sm:$0xff] }
 0x5d2   :  { %v3757_v3 = vadd.f32 %v3753_v42, %v3726_v21  ;;  %4220 = vrot.lane.b32.xlu1 %v7039_v4, %s5357_s25  ;;  %v3723_v43 = vadd.f32 %v3719_v27, %v3692_v19  ;;  %v3764_v58 = vpop.permute.xlu0 %3763  ;;  %vm3804_vm9 = vcmask 211968   ;;  %vm3836_vm15 = vcmask 187392  }
 0x5d3   :  { %v3787_v0 = vadd.f32 %v3783_v15, %v3756_v54  ;;  %v3797_v17 = vpop.permute.xlu1 %3796  ;;  %v3773_v6 = vsel %vm9820_vm13, %v3764_v58, %v3766_v39  ;;  %vm3868_vm1 = vcmask 162816   ;;  %vm3910_vm0 = vcmask 1014784  }
 0x5d4   :  { %v3788_v48 = vadd.f32 %v3784_v46, %v3757_v3  ;;  %v3754_v1 = vadd.f32 %v3750_v52, %v3723_v43  ;;  %v3781_v29 = vmul.f32 %v3773_v6, %v3759_v37  ;;  %v3857_v37 = vld [vmem:[#allocation9 + $0x7d8] sm:$0xff]  ;;  %vm3942_vm7 = vcmask 990208  }
 0x5d5   :  { %5101 = vrot.lane.b32.xlu0 %v9405_v18, %s5357_s25  ;;  %vm3974_vm11 = vcmask 965632   ;;  %vm9825_vm4 = vcmask 941056   ;;  %vm9829_vm8 = vcmask 916480  }
 0x5d6   :  { %4216 = vrot.lane.b32.xlu1 %v6868_v30, %s5357_s25  ;;  %v3785_v10 = vadd.f32 %v3781_v29, %v3754_v1  ;;  %v3799_v63 = vpop.permute.xlu0 %3798  ;;  %s9822_s25 = smov 61   ;;  %vm9826_vm6 = vmmov %vm9825_vm4 }
 0x5d7   :  { %v3801_v25 = vpop.permute.xlu1 %3800  ;;  %v3806_v55 = vsel %vm3804_vm9, %v3797_v17, %v3799_v63  ;;  %vm9827_vm12 = vmmov %vm9825_vm4 }
 0x5d8   :  { %v3807_v40 = vsel %vm3804_vm9, %v3799_v63, %v3801_v25  ;;  %v3814_v53 = vmul.f32 %v3806_v55, %v3791_v2  ;;  %vm9828_vm3 = vmmov %vm9825_vm4 }
 0x5d9   :  { %4249 = vrot.lane.b32.xlu0 %v6876_v24, %s5358_s26  ;;  %v3815_v12 = vmul.f32 %v3807_v40, %v3792_v59  ;;  %v3887_v59 = vld [vmem:[#allocation9 + $0x7e8] sm:$0xff]  ;;  %vm9830_vm14 = vmmov %vm9829_vm8 }
 0x5da   :  { %4251 = vrot.lane.b32.xlu1 %v7039_v4, %s5358_s26  ;;  %v3818_v60 = vadd.f32 %v3814_v53, %v3786_v62  ;;  %v3803_v36 = vpop.permute.xlu0 %3802  ;;  %v3855_v62 = vld [vmem:[#allocation9 + $0x7c8] sm:$0xff]  ;;  %vm9831_vm13 = vmmov %vm9829_vm8 }
 0x5db   :  { %v3819_v14 = vadd.f32 %v3815_v12, %v3787_v0  ;;  %v3795_v41 = vpop.permute.xlu1 %3794  ;;  %v3808_v47 = vsel %vm3804_vm9, %v3801_v25, %v3803_v36  ;;  %v3854_v0 = vld [vmem:[#allocation9 + $0x7c0] sm:$0xff]  ;;  %v3888_v36 = vld [vmem:[#allocation9 + $0x7f0] sm:$0xff] }
 0x5dc   :  { %v3805_v9 = vsel %vm3804_vm9, %v3795_v41, %v3797_v17  ;;  %v3816_v45 = vmul.f32 %v3808_v47, %v3793_v8  ;;  %v3886_v12 = vld [vmem:[#allocation9 + $0x7e0] sm:$0xff]  ;;  %vm9832_vm9 = vmmov %vm9829_vm8 }
 0x5dd   :  { %5106 = vrot.lane.b32.xlu0 %v9405_v18, %s5358_s26  ;;  %v3813_v49 = vmul.f32 %v3805_v9, %v3790_v13 }
 0x5de   :  { %4247 = vrot.lane.b32.xlu1 %v6868_v30, %s5358_s26  ;;  %v3820_v39 = vadd.f32 %v3816_v45, %v3788_v48  ;;  %v3829_v5 = vpop.permute.xlu0 %3828  ;;  %s9823_s26 = smov 58  }
 0x5df   :  { %v3817_v32 = vadd.f32 %v3813_v49, %v3785_v10  ;;  %v3831_v57 = vpop.permute.xlu1 %3830 }
 0x5e0   :  { %v3838_v7 = vsel %vm3836_vm15, %v3829_v5, %v3831_v57 }
 0x5e1   :  { %4280 = vrot.lane.b32.xlu0 %v6876_v24, %s5359_s12  ;;  %v3846_v16 = vmul.f32 %v3838_v7, %v3823_v38 }
 0x5e2   :  { %4282 = vrot.lane.b32.xlu1 %v7039_v4, %s5359_s12  ;;  %v3833_v20 = vpop.permute.xlu0 %3832 }
 0x5e3   :  { %v3850_v35 = vadd.f32 %v3846_v16, %v3818_v60  ;;  %v3835_v23 = vpop.permute.xlu1 %3834  ;;  %v3839_v22 = vsel %vm3836_vm15, %v3831_v57, %v3833_v20 }
 0x5e4   :  { %v3840_v28 = vsel %vm3836_vm15, %v3833_v20, %v3835_v23  ;;  %v3847_v42 = vmul.f32 %v3839_v22, %v3824_v44  ;;  %v3928_v23 = vld [vmem:[#allocation9 + $0x800] sm:$0xff] }
 0x5e5   :  { %5111 = vrot.lane.b32.xlu0 %v9405_v18, %s5359_s12  ;;  %v3848_v50 = vmul.f32 %v3840_v28, %v3825_v26 }
 0x5e6   :  { %4278 = vrot.lane.b32.xlu1 %v6868_v30, %s5359_s12  ;;  %v3851_v56 = vadd.f32 %v3847_v42, %v3819_v14  ;;  %v3827_v27 = vpop.permute.xlu0 %3826  ;;  %v3889_v14 = vld [vmem:[#allocation9 + $0x7f8] sm:$0xff]  ;;  %s9824_s12 = smov 55  }
 0x5e7   :  { %v3852_v31 = vadd.f32 %v3848_v50, %v3820_v39  ;;  %v3861_v33 = vpop.permute.xlu1 %3860  ;;  %v3837_v19 = vsel %vm3836_vm15, %v3827_v27, %v3829_v5  ;;  %v3930_v50 = vld [vmem:[#allocation9 + $0x810] sm:$0xff]  ;;  %vm4099_vm15 = vcmask 867328  }
 0x5e8   :  { %v3845_v21 = vmul.f32 %v3837_v19, %v3822_v34  ;;  %v3931_v34 = vld [vmem:[#allocation9 + $0x818] sm:$0xff] }
 0x5e9   :  { %4311 = vrot.lane.b32.xlu0 %v6876_v24, %s9821_s6 }
 0x5ea   :  { %4313 = vrot.lane.b32.xlu1 %v7039_v4, %s9821_s6  ;;  %v3849_v11 = vadd.f32 %v3845_v21, %v3817_v32  ;;  %v3863_v54 = vpop.permute.xlu0 %3862  ;;  %v3929_v32 = vld [vmem:[#allocation9 + $0x808] sm:$0xff] }
 0x5eb   :  { %v3865_v52 = vpop.permute.xlu1 %3864  ;;  %v3870_v61 = vsel %vm3868_vm1, %v3861_v33, %v3863_v54 }
 0x5ec   :  { %v3871_v15 = vsel %vm3868_vm1, %v3863_v54, %v3865_v52  ;;  %v3878_v3 = vmul.f32 %v3870_v61, %v3855_v62 }
 0x5ed   :  { %5116 = vrot.lane.b32.xlu0 %v9405_v18, %s9821_s6  ;;  %v3879_v46 = vmul.f32 %v3871_v15, %v3856_v51  ;;  %v3961_v51 = vld [vmem:[#allocation9 + $0x828] sm:$0xff] }
 0x5ee   :  { %4309 = vrot.lane.b32.xlu1 %v6868_v30, %s9821_s6  ;;  %v3882_v43 = vadd.f32 %v3878_v3, %v3850_v35  ;;  %v3867_v58 = vpop.permute.xlu0 %3866 }
 0x5ef   :  { %v3883_v48 = vadd.f32 %v3879_v46, %v3851_v56  ;;  %v3859_v17 = vpop.permute.xlu1 %3858  ;;  %v3872_v6 = vsel %vm3868_vm1, %v3865_v52, %v3867_v58 }
 0x5f0   :  { %v3869_v1 = vsel %vm3868_vm1, %v3859_v17, %v3861_v33  ;;  %v3880_v29 = vmul.f32 %v3872_v6, %v3857_v37  ;;  %v3962_v17 = vld [vmem:[#allocation9 + $0x830] sm:$0xff]  ;;  %v3963_v6 = vld [vmem:[#allocation9 + $0x838] sm:$0xff]  ;;  %vm4163_vm1 = vcmask 818176  }
 0x5f1   :  { %4342 = vrot.lane.b32.xlu0 %v6876_v24, %s9822_s25  ;;  %v3877_v2 = vmul.f32 %v3869_v1, %v3854_v0 }
 0x5f2   :  { %4344 = vrot.lane.b32.xlu1 %v7039_v4, %s9822_s25  ;;  %v3884_v10 = vadd.f32 %v3880_v29, %v3852_v31  ;;  %v3903_v63 = vpop.permute.xlu0 %3902 }
 0x5f3   :  { %v3881_v25 = vadd.f32 %v3877_v2, %v3849_v11  ;;  %v3905_v55 = vpop.permute.xlu1 %3904 }
 0x5f4   :  { %v3912_v40 = vsel %vm3910_vm0, %v3903_v63, %v3905_v55 }
 0x5f5   :  { %5121 = vrot.lane.b32.xlu0 %v9405_v18, %s9822_s25  ;;  %v3920_v53 = vmul.f32 %v3912_v40, %v3887_v59  ;;  %v3993_v40 = vld [vmem:[#allocation9 + $0x848] sm:$0xff] }
 0x5f6   :  { %4340 = vrot.lane.b32.xlu1 %v6868_v30, %s9822_s25 }
 0x5f7   :  { %v5052_v8 = vpop.permute.xlu0 %5051  ;;  %v3924_v60 = vadd.f32 %v3920_v53, %v3882_v43  ;;  %v3960_v43 = vld [vmem:[#allocation9 + $0x820] sm:$0xff] }
 0x5f8   :  { %v3901_v13 = vpop.permute.xlu1 %3900  ;;  %v5054_v41 = vunpack.i.h.bf16 %v5052_v8  ;;  %v5053_v47 = vunpack.i.l.bf16 %v5052_v8 }
 0x5f9   :  { %v3911_v9 = vsel %vm3910_vm0, %v3901_v13, %v3903_v63  ;;  %4373 = vrot.lane.b32.xlu0 %v6876_v24, %s9823_s26 }
 0x5fa   :  { %v3919_v45 = vmul.f32 %v3911_v9, %v3886_v12  ;;  %v3913_v49 = vsel %vm3910_vm0, %v3905_v55, %v5053_v47  ;;  %v3914_v39 = vsel %vm3910_vm0, %v5053_v47, %v5054_v41  ;;  %4375 = vrot.lane.b32.xlu1 %v7039_v4, %s9823_s26  ;;  %vm9833_vm0 = vcmask 596992  }
 0x5fb   :  { %v3921_v38 = vmul.f32 %v3913_v49, %v3888_v36  ;;  %v3922_v5 = vmul.f32 %v3914_v39, %v3889_v14  ;;  %v3935_v57 = vpop.permute.xlu0 %3934  ;;  %v3992_v14 = vld [vmem:[#allocation9 + $0x840] sm:$0xff]  ;;  %v3995_v49 = vld [vmem:[#allocation9 + $0x858] sm:$0xff] }
 0x5fc   :  { %v3923_v7 = vadd.f32 %v3919_v45, %v3881_v25  ;;  %v3937_v16 = vpop.permute.xlu1 %3936  ;;  %v3994_v45 = vld [vmem:[#allocation9 + $0x850] sm:$0xff] }
 0x5fd   :  { %v3925_v44 = vadd.f32 %v3921_v38, %v3883_v48  ;;  %v3926_v26 = vadd.f32 %v3922_v5, %v3884_v10  ;;  %v3944_v20 = vsel %vm3942_vm7, %v3935_v57, %v3937_v16  ;;  %5126 = vrot.lane.b32.xlu0 %v9405_v18, %s9823_s26 }
 0x5fe   :  { %v3952_v35 = vmul.f32 %v3944_v20, %v3929_v32  ;;  %4371 = vrot.lane.b32.xlu1 %v6868_v30, %s9823_s26 }
 0x5ff   :  { %v5057_v22 = vpop.permute.xlu0 %5056 }
 0x600   :  { %v3956_v28 = vadd.f32 %v3952_v35, %v3924_v60  ;;  %v3933_v42 = vpop.permute.xlu1 %3932  ;;  %v5059_v56 = vunpack.i.h.bf16 %v5057_v22  ;;  %v5058_v27 = vunpack.i.l.bf16 %v5057_v22 }
 0x601   :  { %v3943_v31 = vsel %vm3942_vm7, %v3933_v42, %v3935_v57  ;;  %4404 = vrot.lane.b32.xlu0 %v6876_v24, %s9824_s12 }
 0x602   :  { %v3951_v33 = vmul.f32 %v3943_v31, %v3928_v23  ;;  %v3945_v19 = vsel %vm3942_vm7, %v3937_v16, %v5058_v27  ;;  %v3946_v21 = vsel %vm3942_vm7, %v5058_v27, %v5059_v56  ;;  %4406 = vrot.lane.b32.xlu1 %v7039_v4, %s9824_s12  ;;  %v4025_v31 = vld [vmem:[#allocation9 + $0x870] sm:$0xff]  ;;  %vm9834_vm7 = vmmov %vm9833_vm0 }
 0x603   :  { %v3953_v62 = vmul.f32 %v3945_v19, %v3930_v50  ;;  %v3954_v11 = vmul.f32 %v3946_v21, %v3931_v34  ;;  %v3967_v54 = vpop.permute.xlu0 %3966  ;;  %v4023_v50 = vld [vmem:[#allocation9 + $0x860] sm:$0xff] }
 0x604   :  { %v3955_v52 = vadd.f32 %v3951_v33, %v3923_v7  ;;  %v3969_v61 = vpop.permute.xlu1 %3968  ;;  %v4026_v33 = vld [vmem:[#allocation9 + $0x878] sm:$0xff] }
 0x605   :  { %v3957_v15 = vadd.f32 %v3953_v62, %v3925_v44  ;;  %v3958_v3 = vadd.f32 %v3954_v11, %v3926_v26  ;;  %v3976_v46 = vsel %vm3974_vm11, %v3967_v54, %v3969_v61  ;;  %5131 = vrot.lane.b32.xlu0 %v9405_v18, %s9824_s12  ;;  %v4024_v44 = vld [vmem:[#allocation9 + $0x868] sm:$0xff] }
 0x606   :  { %v3984_v37 = vmul.f32 %v3976_v46, %v3961_v51  ;;  %4402 = vrot.lane.b32.xlu1 %v6868_v30, %s9824_s12 }
 0x607   :  { %v5062_v0 = vpop.permute.xlu0 %5061 }
 0x608   :  { %v3988_v58 = vadd.f32 %v3984_v37, %v3956_v28  ;;  %v3965_v48 = vpop.permute.xlu1 %3964  ;;  %v5064_v1 = vunpack.i.h.bf16 %v5062_v0  ;;  %v5063_v29 = vunpack.i.l.bf16 %v5062_v0 }
 0x609   :  { %v3975_v2 = vsel %vm3974_vm11, %v3965_v48, %v3967_v54  ;;  %4435 = vrot.lane.b32.xlu0 %v6876_v24, %s5364_s16 }
 0x60a   :  { %v3983_v10 = vmul.f32 %v3975_v2, %v3960_v43  ;;  %v3977_v59 = vsel %vm3974_vm11, %v3969_v61, %v5063_v29  ;;  %v3978_v63 = vsel %vm3974_vm11, %v5063_v29, %v5064_v1  ;;  %4437 = vrot.lane.b32.xlu1 %v7039_v4, %s5364_s16  ;;  %v4460_v4 = vld [vmem:[%s8882_s8] sm:$0xff]  ;;  %v4056_v2 = vld [vmem:[#allocation9 + $0x890] sm:$0xff]  ;;  %vm9836_vm11 = vmmov %vm9833_vm0 }
 0x60b   :  { %v3985_v25 = vmul.f32 %v3977_v59, %v3962_v17  ;;  %v3986_v55 = vmul.f32 %v3978_v63, %v3963_v6  ;;  %v3999_v53 = vpop.permute.xlu0 %3998  ;;  %v4054_v17 = vld [vmem:[#allocation9 + $0x880] sm:$0xff] }
 0x60c   :  { %v3987_v12 = vadd.f32 %v3983_v10, %v3955_v52  ;;  %v4001_v8 = vpop.permute.xlu1 %4000  ;;  %v4057_v10 = vld [vmem:[#allocation9 + $0x898] sm:$0xff] }
 0x60d   :  { %v3989_v60 = vadd.f32 %v3985_v25, %v3957_v15  ;;  %v3990_v13 = vadd.f32 %v3986_v55, %v3958_v3  ;;  %v4007_v36 = vsel %vm9825_vm4, %v3999_v53, %v4001_v8  ;;  %5136 = vrot.lane.b32.xlu0 %v9405_v18, %s5364_s16  ;;  %v4055_v15 = vld [vmem:[#allocation9 + $0x888] sm:$0xff]  ;;  %vm9837_vm4 = vcmask 572416  }
 0x60e   :  { %v4015_v24 = vmul.f32 %v4007_v36, %v3993_v40  ;;  %4433 = vrot.lane.b32.xlu1 %v6868_v30, %s5364_s16 }
 0x60f   :  { %v5067_v41 = vpop.permute.xlu0 %5066 }
 0x610   :  { %v4019_v47 = vadd.f32 %v4015_v24, %v3988_v58  ;;  %v3997_v9 = vpop.permute.xlu1 %3996  ;;  %v5069_v39 = vunpack.i.h.bf16 %v5067_v41  ;;  %v5068_v38 = vunpack.i.l.bf16 %v5067_v41 }
 0x611   :  { %v4006_v5 = vsel %vm9826_vm6, %v3997_v9, %v3999_v53  ;;  %4463 = vperm.xlu0 %4914, %v4460_v4   ;;  %v4085_v9 = vld [vmem:[#allocation9 + $0x8a0] sm:$0xff]  ;;  %vm9838_vm6 = vmmov %vm9837_vm4 }
 0x612   :  { %v4014_v32 = vmul.f32 %v4006_v5, %v3992_v14  ;;  %v4008_v57 = vsel %vm9827_vm12, %v4001_v8, %v5068_v38  ;;  %v4009_v30 = vsel %vm9828_vm3, %v5068_v38, %v5069_v39  ;;  %v4087_v38 = vld [vmem:[#allocation9 + $0x8b0] sm:$0xff]  ;;  %v4088_v5 = vld [vmem:[#allocation9 + $0x8b8] sm:$0xff]  ;;  %vm9839_vm12 = vmmov %vm9837_vm4 }
 0x613   :  { %v4016_v7 = vmul.f32 %v4008_v57, %v3994_v45  ;;  %v4017_v16 = vmul.f32 %v4009_v30, %v3995_v49  ;;  %v4030_v26 = vpop.permute.xlu0 %4029  ;;  %vm9840_vm3 = vmmov %vm9837_vm4 }
 0x614   :  { %v4018_v20 = vadd.f32 %v4014_v32, %v3987_v12  ;;  %v4032_v35 = vpop.permute.xlu1 %4031 }
 0x615   :  { %v4020_v23 = vadd.f32 %v4016_v7, %v3989_v60  ;;  %v4021_v22 = vadd.f32 %v4017_v16, %v3990_v13  ;;  %v4038_v28 = vsel %vm9829_vm8, %v4030_v26, %v4032_v35  ;;  %v4086_v60 = vld [vmem:[#allocation9 + $0x8a8] sm:$0xff]  ;;  %vm9841_vm8 = vcmask 547840  }
 0x616   :  { %v4046_v42 = vmul.f32 %v4038_v28, %v4024_v44 }
 0x617   :  { %v5072_v34 = vpop.permute.xlu0 %5071 }
 0x618   :  { %v4050_v56 = vadd.f32 %v4046_v42, %v4019_v47  ;;  %v4028_v27 = vpop.permute.xlu1 %4027  ;;  %v5074_v19 = vunpack.i.h.bf16 %v5072_v34  ;;  %v5073_v21 = vunpack.i.l.bf16 %v5072_v34 }
 0x619   :  { %v4037_v62 = vsel %vm9830_vm14, %v4028_v27, %v4030_v26  ;;  %v4119_v27 = vld [vmem:[#allocation9 + $0x8d0] sm:$0xff]  ;;  %vm9842_vm14 = vmmov %vm9841_vm8 }
 0x61a   :  { %v4045_v11 = vmul.f32 %v4037_v62, %v4023_v50  ;;  %v4039_v51 = vsel %vm9831_vm13, %v4032_v35, %v5073_v21  ;;  %v4040_v54 = vsel %vm9832_vm9, %v5073_v21, %v5074_v19  ;;  %v4117_v50 = vld [vmem:[#allocation9 + $0x8c0] sm:$0xff]  ;;  %vm9843_vm13 = vmmov %vm9841_vm8 }
 0x61b   :  { %v4047_v52 = vmul.f32 %v4039_v51, %v4025_v31  ;;  %v4048_v61 = vmul.f32 %v4040_v54, %v4026_v33  ;;  %v4061_v3 = vpop.permute.xlu0 %4060  ;;  %vm9844_vm9 = vmmov %vm9841_vm8 }
 0x61c   :  { %v4049_v46 = vadd.f32 %v4045_v11, %v4018_v20  ;;  %v4063_v37 = vpop.permute.xlu1 %4062 }
 0x61d   :  { %v4051_v43 = vadd.f32 %v4047_v52, %v4020_v23  ;;  %v4052_v0 = vadd.f32 %v4048_v61, %v4021_v22  ;;  %v4069_v58 = vsel %vm1416_vm2, %v4061_v3, %v4063_v37 }
 0x61e   :  { %v4077_v48 = vmul.f32 %v4069_v58, %v4055_v15 }
 0x61f   :  { %v5077_v6 = vpop.permute.xlu0 %5076 }
 0x620   :  { %v4081_v1 = vadd.f32 %v4077_v48, %v4050_v56  ;;  %v4059_v29 = vpop.permute.xlu1 %4058  ;;  %v5079_v59 = vunpack.i.h.bf16 %v5077_v6  ;;  %v5078_v63 = vunpack.i.l.bf16 %v5077_v6 }
 0x621   :  { %v4068_v25 = vsel %vm1416_vm2, %v4059_v29, %v4061_v3 }
 0x622   :  { %v4076_v55 = vmul.f32 %v4068_v25, %v4054_v17  ;;  %v4070_v40 = vsel %vm1416_vm2, %v4063_v37, %v5078_v63  ;;  %v4071_v53 = vsel %vm1416_vm2, %v5078_v63, %v5079_v59  ;;  %vm4131_vm2 = vcmask 842752  }
 0x623   :  { %v4078_v12 = vmul.f32 %v4070_v40, %v4056_v2  ;;  %v4079_v8 = vmul.f32 %v4071_v53, %v4057_v10  ;;  %v4092_v13 = vpop.permute.xlu0 %4091 }
 0x624   :  { %v4080_v36 = vadd.f32 %v4076_v55, %v4049_v46  ;;  %v4094_v24 = vpop.permute.xlu1 %4093 }
 0x625   :  { %v4082_v4 = vadd.f32 %v4078_v12, %v4051_v43  ;;  %v4083_v14 = vadd.f32 %v4079_v8, %v4052_v0  ;;  %v4101_v41 = vsel %vm4099_vm15, %v4092_v13, %v4094_v24  ;;  %v4118_v12 = vld [vmem:[#allocation9 + $0x8c8] sm:$0xff] }
 0x626   :  { %v4109_v47 = vmul.f32 %v4101_v41, %v4086_v60 }
 0x627   :  { %v5082_v45 = vpop.permute.xlu0 %5081 }
 0x628   :  { %v8719_v49 = vadd.f32 %v4109_v47, %v4081_v1  ;;  %v4090_v39 = vpop.permute.xlu1 %4089  ;;  %v5084_v32 = vunpack.i.h.bf16 %v5082_v45  ;;  %v5083_v57 = vunpack.i.l.bf16 %v5082_v45  ;;  %v4149_v47 = vld [vmem:[#allocation9 + $0x8e0] sm:$0xff]  ;;  %v4151_v45 = vld [vmem:[#allocation9 + $0x8f0] sm:$0xff] }
 0x629   :  { %v4100_v30 = vsel %vm4099_vm15, %v4090_v39, %v4092_v13 }
 0x62a   :  { %v4108_v7 = vmul.f32 %v4100_v30, %v4085_v9  ;;  %v4102_v16 = vsel %vm4099_vm15, %v4094_v24, %v5083_v57  ;;  %v4103_v44 = vsel %vm4099_vm15, %v5083_v57, %v5084_v32  ;;  %vm9845_vm15 = vcmask 523264  }
 0x62b   :  { %v4110_v26 = vmul.f32 %v4102_v16, %v4087_v38  ;;  %v4111_v20 = vmul.f32 %v4103_v44, %v4088_v5  ;;  %v4124_v35 = vpop.permute.xlu0 %4123  ;;  %v4152_v5 = vld [vmem:[#allocation9 + $0x8f8] sm:$0xff] }
 0x62c   :  { %v4112_v23 = vadd.f32 %v4108_v7, %v4080_v36  ;;  %v4126_v22 = vpop.permute.xlu1 %4125  ;;  %v4120_v36 = vld [vmem:[#allocation9 + $0x8d8] sm:$0xff] }
 0x62d   :  { %v4114_v28 = vadd.f32 %v4110_v26, %v4082_v4  ;;  %v8724_v42 = vadd.f32 %v4111_v20, %v4083_v14  ;;  %v4133_v8 = vsel %vm4131_vm2, %v4124_v35, %v4126_v22  ;;  %v4150_v4 = vld [vmem:[#allocation9 + $0x8e8] sm:$0xff] }
 0x62e   :  { %v4141_v41 = vmul.f32 %v4133_v8, %v4118_v12 }
 0x62f   :  { %v5087_v34 = vpop.permute.xlu0 %5086 }
 0x630   :  { %v4122_v56 = vpop.permute.xlu1 %4121  ;;  %v5088_v31 = vunpack.i.l.bf16 %v5087_v34  ;;  %v5089_v55 = vunpack.i.h.bf16 %v5087_v34  ;;  %v4181_v34 = vld [vmem:[#allocation9 + $0x900] sm:$0xff] }
 0x631   :  { %v4132_v33 = vsel %vm4131_vm2, %v4122_v56, %v4124_v35  ;;  %v4145_v35 = vadd.f32 %v4141_v41, %v8719_v49  ;;  %v4184_v49 = vld [vmem:[#allocation9 + $0x918] sm:$0xff] }
 0x632   :  { %v4140_v19 = vmul.f32 %v4132_v33, %v4117_v50  ;;  %v4134_v21 = vsel %vm4131_vm2, %v4126_v22, %v5088_v31  ;;  %v4135_v24 = vsel %vm4131_vm2, %v5088_v31, %v5089_v55  ;;  %vm9846_vm2 = vmmov %vm9845_vm15 }
 0x633   :  { %v4142_v62 = vmul.f32 %v4134_v21, %v4119_v27  ;;  %v4156_v11 = vpop.permute.xlu0 %4155  ;;  %v4143_v7 = vmul.f32 %v4135_v24, %v4120_v36  ;;  %v4183_v27 = vld [vmem:[#allocation9 + $0x910] sm:$0xff] }
 0x634   :  { %v8728_v51 = vadd.f32 %v4140_v19, %v4112_v23  ;;  %v4158_v54 = vpop.permute.xlu1 %4157 }
 0x635   :  { %v8730_v52 = vadd.f32 %v4142_v62, %v4114_v28  ;;  %v4165_v14 = vsel %vm4163_vm1, %v4156_v11, %v4158_v54  ;;  %v4182_v28 = vld [vmem:[#allocation9 + $0x908] sm:$0xff]  ;;  %v4147_v21 = vadd.f32 %v4143_v7, %v8724_v42 }
 0x636   :  { %v4173_v16 = vmul.f32 %v4165_v14, %v4150_v4  ;;  %v4215_v14 = vld [vmem:[#allocation9 + $0x938] sm:$0xff] }
 0x637   :  { %v5092_v61 = vpop.permute.xlu0 %5091 }
 0x638   :  { %v4154_v15 = vpop.permute.xlu1 %4153  ;;  %v5093_v40 = vunpack.i.l.bf16 %v5092_v61  ;;  %v5094_v60 = vunpack.i.h.bf16 %v5092_v61  ;;  %v4177_v62 = vadd.f32 %v4173_v16, %v4145_v35  ;;  %v4246_v35 = vld [vmem:[#allocation9 + $0x958] sm:$0xff] }
 0x639   :  { %v4164_v9 = vsel %vm4163_vm1, %v4154_v15, %v4156_v11 }
 0x63a   :  { %v4166_v39 = vsel %vm4163_vm1, %v4158_v54, %v5093_v40  ;;  %v4167_v32 = vsel %vm4163_vm1, %v5093_v40, %v5094_v60  ;;  %v4172_v26 = vmul.f32 %v4164_v9, %v4149_v47  ;;  %v4212_v40 = vld [vmem:[#allocation9 + $0x920] sm:$0xff]  ;;  %v4214_v60 = vld [vmem:[#allocation9 + $0x930] sm:$0xff]  ;;  %v4244_v47 = vld [vmem:[#allocation9 + $0x948] sm:$0xff]  ;;  %vm9847_vm1 = vcmask 498688  }
 0x63b   :  { %v4188_v3 = vpop.permute.xlu0 %4187  ;;  %v4174_v20 = vmul.f32 %v4166_v39, %v4151_v45  ;;  %v4175_v23 = vmul.f32 %v4167_v32, %v4152_v5  ;;  %v4243_v45 = vld [vmem:[#allocation9 + $0x940] sm:$0xff] }
 0x63c   :  { %v4190_v46 = vpop.permute.xlu1 %4189  ;;  %v4176_v61 = vadd.f32 %v4172_v26, %v8728_v51 }
 0x63d   :  { %v4196_v50 = vsel %vm1916_vm10, %v4188_v3, %v4190_v46  ;;  %v4178_v15 = vadd.f32 %v4174_v20, %v8730_v52 }
 0x63f   :  { %v5097_v37 = vpop.permute.xlu0 %5096 }
 0x640   :  { %v4186_v43 = vpop.permute.xlu1 %4185  ;;  %v5098_v57 = vunpack.i.l.bf16 %v5097_v37  ;;  %v5099_v44 = vunpack.i.h.bf16 %v5097_v37 }
 0x641   :  { %v4195_v56 = vsel %vm1916_vm10, %v4186_v43, %v4188_v3  ;;  %v4213_v3 = vld [vmem:[#allocation9 + $0x928] sm:$0xff]  ;;  %v4204_v43 = vmul.f32 %v4196_v50, %v4182_v28  ;;  %v4274_v50 = vld [vmem:[#allocation9 + $0x960] sm:$0xff] }
 0x642   :  { %v4197_v31 = vsel %vm1916_vm10, %v4190_v46, %v5098_v57  ;;  %v4198_v11 = vsel %vm1916_vm10, %v5098_v57, %v5099_v44  ;;  %v4203_v55 = vmul.f32 %v4195_v56, %v4181_v34  ;;  %vm9835_vm10 = vmmov %vm9833_vm0  ;;  %v4275_v28 = vld [vmem:[#allocation9 + $0x968] sm:$0xff]  ;;  %v4276_v56 = vld [vmem:[#allocation9 + $0x970] sm:$0xff] }
 0x643   :  { %v8732_v0 = vpop.permute.xlu0 %4218  ;;  %v4205_v42 = vmul.f32 %v4197_v31, %v4183_v27  ;;  %v4206_v51 = vmul.f32 %v4198_v11, %v4184_v49  ;;  %v4208_v32 = vadd.f32 %v4204_v43, %v4177_v62  ;;  %v4277_v62 = vld [vmem:[#allocation9 + $0x978] sm:$0xff] }
 0x644   :  { %v8734_v58 = vpop.permute.xlu1 %4220  ;;  %v4207_v57 = vadd.f32 %v4203_v55, %v4176_v61 }
 0x645   :  { %v4227_v46 = vsel %vm9833_vm0, %v8732_v0, %v8734_v58  ;;  %v4209_v7 = vadd.f32 %v4205_v42, %v4178_v15  ;;  %v4306_v15 = vld [vmem:[#allocation9 + $0x988] sm:$0xff]  ;;  %vm9848_vm0 = vmmov %vm9846_vm2 }
 0x646   :  { %v4235_v4 = vmul.f32 %v4227_v46, %v4213_v3 }
 0x647   :  { %v8736_v48 = vpop.permute.xlu0 %5101 }
 0x648   :  { %v4217_v17 = vpop.permute.xlu1 %4216  ;;  %v5103_v33 = vunpack.i.l.bf16 %v8736_v48  ;;  %v5104_v54 = vunpack.i.h.bf16 %v8736_v48  ;;  %v4179_v48 = vadd.f32 %v4175_v23, %v4147_v21 }
 0x649   :  { %v4226_v12 = vsel %vm9834_vm7, %v4217_v17, %v8732_v0  ;;  %vm9849_vm7 = vmmov %vm9848_vm0 }
 0x64a   :  { %v4228_v52 = vsel %vm9835_vm10, %v8734_v58, %v5103_v33  ;;  %v4229_v41 = vsel %vm9836_vm11, %v5103_v33, %v5104_v54  ;;  %v4234_v9 = vmul.f32 %v4226_v12, %v4212_v40  ;;  %v4210_v31 = vadd.f32 %v4206_v51, %v4179_v48  ;;  %v4305_v51 = vld [vmem:[#allocation9 + $0x980] sm:$0xff]  ;;  %vm9850_vm10 = vmmov %vm9847_vm1 }
 0x64b   :  { %v8738_v6 = vpop.permute.xlu0 %4249  ;;  %v4236_v16 = vmul.f32 %v4228_v52, %v4214_v60  ;;  %v4237_v26 = vmul.f32 %v4229_v41, %v4215_v14  ;;  %v4239_v33 = vadd.f32 %v4235_v4, %v4208_v32  ;;  %vm9851_vm11 = vmmov %vm9847_vm1 }
 0x64c   :  { %v8740_v1 = vpop.permute.xlu1 %4251  ;;  %v4238_v21 = vadd.f32 %v4234_v9, %v4207_v57 }
 0x64d   :  { %v4258_v0 = vsel %vm9837_vm4, %v8738_v6, %v8740_v1  ;;  %v4240_v11 = vadd.f32 %v4236_v16, %v4209_v7  ;;  %v4308_v7 = vld [vmem:[#allocation9 + $0x998] sm:$0xff]  ;;  %vm9852_vm4 = vcmask 449536  }
 0x64e   :  { %v4266_v20 = vmul.f32 %v4258_v0, %v4244_v47 }
 0x64f   :  { %v8742_v29 = vpop.permute.xlu0 %5106 }
 0x650   :  { %v8744_v2 = vpop.permute.xlu1 %4247  ;;  %v5108_v37 = vunpack.i.l.bf16 %v8742_v29  ;;  %v5109_v36 = vunpack.i.h.bf16 %v8742_v29  ;;  %v4245_v29 = vld [vmem:[#allocation9 + $0x950] sm:$0xff]  ;;  %v4270_v55 = vadd.f32 %v4266_v20, %v4239_v33 }
 0x651   :  { %v4257_v58 = vsel %vm9838_vm6, %v8744_v2, %v8738_v6  ;;  %vm9853_vm6 = vmmov %vm9847_vm1 }
 0x652   :  { %v4259_v39 = vsel %vm9839_vm12, %v8740_v1, %v5108_v37  ;;  %v4260_v23 = vsel %vm9840_vm3, %v5108_v37, %v5109_v36  ;;  %v4265_v1 = vmul.f32 %v4257_v58, %v4243_v45  ;;  %v4337_v36 = vld [vmem:[#allocation9 + $0x9a8] sm:$0xff]  ;;  %v4307_v45 = vld [vmem:[#allocation9 + $0x990] sm:$0xff]  ;;  %vm9854_vm12 = vmmov %vm9852_vm4 }
 0x653   :  { %v8746_v10 = vpop.permute.xlu0 %4280  ;;  %v4268_v54 = vmul.f32 %v4260_v23, %v4246_v35  ;;  %v4336_v23 = vld [vmem:[#allocation9 + $0x9a0] sm:$0xff]  ;;  %vm9855_vm3 = vmmov %vm9852_vm4 }
 0x654   :  { %v8748_v59 = vpop.permute.xlu1 %4282  ;;  %v4269_v42 = vadd.f32 %v4265_v1, %v4238_v21 }
 0x655   :  { %v4289_v6 = vsel %vm9841_vm8, %v8746_v10, %v8748_v59  ;;  %vm9856_vm8 = vmmov %vm9855_vm3 }
 0x656   :  { %v4297_v61 = vmul.f32 %v4289_v6, %v4275_v28  ;;  %v4399_v28 = vld [vmem:[#allocation9 + $0x9e8] sm:$0xff] }
 0x657   :  { %v8750_v63 = vpop.permute.xlu0 %5111 }
 0x658   :  { %v8752_v25 = vpop.permute.xlu1 %4278  ;;  %v5113_v17 = vunpack.i.l.bf16 %v8750_v63  ;;  %v5114_v5 = vunpack.i.h.bf16 %v8750_v63  ;;  %v4267_v63 = vmul.f32 %v4259_v39, %v4245_v29  ;;  %v4301_v41 = vadd.f32 %v4297_v61, %v4270_v55  ;;  %v4430_v55 = vld [vmem:[#allocation9 + $0xa08] sm:$0xff] }
 0x659   :  { %v4288_v34 = vsel %vm9842_vm14, %v8752_v25, %v8746_v10  ;;  %v4241_v10 = vadd.f32 %v4237_v26, %v4210_v31 }
 0x65a   :  { %v4290_v27 = vsel %vm9843_vm13, %v8748_v59, %v5113_v17  ;;  %v4291_v49 = vsel %vm9844_vm9, %v5113_v17, %v5114_v5  ;;  %v4296_v25 = vmul.f32 %v4288_v34, %v4274_v50  ;;  %v4271_v40 = vadd.f32 %v4267_v63, %v4240_v11  ;;  %v4368_v5 = vld [vmem:[#allocation9 + $0x9c8] sm:$0xff]  ;;  %v4338_v63 = vld [vmem:[#allocation9 + $0x9b0] sm:$0xff]  ;;  %v4339_v50 = vld [vmem:[#allocation9 + $0x9b8] sm:$0xff] }
 0x65b   :  { %v8754_v53 = vpop.permute.xlu0 %4311  ;;  %v4298_v37 = vmul.f32 %v4290_v27, %v4276_v56  ;;  %v4299_v12 = vmul.f32 %v4291_v49, %v4277_v62  ;;  %v4272_v14 = vadd.f32 %v4268_v54, %v4241_v10  ;;  %v4367_v11 = vld [vmem:[#allocation9 + $0x9c0] sm:$0xff]  ;;  %v4370_v54 = vld [vmem:[#allocation9 + $0x9d8] sm:$0xff] }
 0x65c   :  { %v8757_v13 = vpop.permute.xlu1 %4313  ;;  %v4300_v17 = vadd.f32 %v4296_v25, %v4269_v42 }
 0x65d   :  { %v4320_v3 = vsel %vm9845_vm15, %v8754_v53, %v8757_v13  ;;  %v4302_v9 = vadd.f32 %v4298_v37, %v4271_v40  ;;  %v4398_v37 = vld [vmem:[#allocation9 + $0x9e0] sm:$0xff]  ;;  %vm9861_vm15 = vcmask 64512  }
 0x65e   :  { %v4328_v48 = vmul.f32 %v4320_v3, %v4306_v15 }
 0x65f   :  { %v8763_v38 = vpop.permute.xlu0 %5116 }
 0x660   :  { %v8766_v30 = vpop.permute.xlu1 %4309  ;;  %v5118_v59 = vunpack.i.l.bf16 %v8763_v38  ;;  %v5119_v52 = vunpack.i.h.bf16 %v8763_v38  ;;  %v4303_v38 = vadd.f32 %v4299_v12, %v4272_v14  ;;  %v4332_v57 = vadd.f32 %v4328_v48, %v4301_v41 }
 0x661   :  { %v4319_v60 = vsel %vm9846_vm2, %v8766_v30, %v8754_v53  ;;  %vm9862_vm2 = vmmov %vm9861_vm15 }
 0x662   :  { %v4321_v58 = vsel %vm9848_vm0, %v8757_v13, %v5118_v59  ;;  %v4327_v29 = vmul.f32 %v4319_v60, %v4305_v51  ;;  %v4322_v16 = vsel %vm9849_vm7, %v5118_v59, %v5119_v52 }
 0x663   :  { %v8769_v22 = vpop.permute.xlu0 %4342  ;;  %v4329_v35 = vmul.f32 %v4321_v58, %v4307_v45  ;;  %v4330_v62 = vmul.f32 %v4322_v16, %v4308_v7  ;;  %v4432_v7 = vld [vmem:[#allocation9 + $0xa18] sm:$0xff] }
 0x664   :  { %v8775_v19 = vpop.permute.xlu1 %4344  ;;  %v4331_v21 = vadd.f32 %v4327_v29, %v4300_v17 }
 0x665   :  { %v4351_v4 = vsel %vm9847_vm1, %v8769_v22, %v8775_v19  ;;  %v4334_v60 = vadd.f32 %v4330_v62, %v4303_v38  ;;  %vm9867_vm1 = vmmov %vm9862_vm2 }
 0x666   :  { %v4359_v39 = vmul.f32 %v4351_v4, %v4337_v36  ;;  %vm9868_vm0 = vmmov %vm9867_vm1 }
 0x667   :  { %v8788_v8 = vpop.permute.xlu0 %5121 }
 0x668   :  { %v8793_v24 = vpop.permute.xlu1 %4340  ;;  %v5123_v47 = vunpack.i.l.bf16 %v8788_v8  ;;  %v5124_v53 = vunpack.i.h.bf16 %v8788_v8  ;;  %v4363_v49 = vadd.f32 %v4359_v39, %v4332_v57 }
 0x669   :  { %v4350_v13 = vsel %vm9850_vm10, %v8793_v24, %v8769_v22  ;;  %v4369_v24 = vld [vmem:[#allocation9 + $0x9d0] sm:$0xff] }
 0x66a   :  { %v4352_v8 = vsel %vm9851_vm11, %v8775_v19, %v5123_v47  ;;  %v4353_v34 = vsel %vm9853_vm6, %v5123_v47, %v5124_v53  ;;  %v4358_v19 = vmul.f32 %v4350_v13, %v4336_v23  ;;  %v4429_v53 = vld [vmem:[#allocation9 + $0xa00] sm:$0xff] }
 0x66b   :  { %v8806_v44 = vpop.permute.xlu0 %4373  ;;  %v4360_v10 = vmul.f32 %v4352_v8, %v4338_v63  ;;  %v4361_v25 = vmul.f32 %v4353_v34, %v4339_v50  ;;  %v4459_v34 = vld [vmem:[#allocation11] sm:$0xff] }
 0x66c   :  { %v8812_v2 = vpop.permute.xlu1 %4375  ;;  %v4362_v14 = vadd.f32 %v4358_v19, %v4331_v21 }
 0x66d   :  { %v4382_v32 = vsel %vm2108_vm5, %v8806_v44, %v8812_v2 }
 0x66e   :  { %v4390_v56 = vmul.f32 %v4382_v32, %v4368_v5  ;;  %v4431_v5 = vld [vmem:[#allocation9 + $0xa10] sm:$0xff] }
 0x66f   :  { %v5127_v46 = vpop.permute.xlu0 %5126 }
 0x670   :  { %v4372_v43 = vpop.permute.xlu1 %4371  ;;  %v5129_v26 = vunpack.i.h.bf16 %v5127_v46  ;;  %v5128_v20 = vunpack.i.l.bf16 %v5127_v46  ;;  %v4333_v46 = vadd.f32 %v4329_v35, %v4302_v9  ;;  %v4394_v40 = vadd.f32 %v4390_v56, %v4363_v49 }
 0x671   :  { %v4381_v22 = vsel %vm2108_vm5, %v4372_v43, %v8806_v44  ;;  %v4400_v44 = vld [vmem:[#allocation9 + $0x9f0] sm:$0xff]  ;;  %v4401_v43 = vld [vmem:[#allocation9 + $0x9f8] sm:$0xff]  ;;  %v4365_v9 = vadd.f32 %v4361_v25, %v4334_v60 }
 0x672   :  { %v4383_v61 = vsel %vm2108_vm5, %v8812_v2, %v5128_v20  ;;  %v4384_v15 = vsel %vm2108_vm5, %v5128_v20, %v5129_v26  ;;  %v4389_v12 = vmul.f32 %v4381_v22, %v4367_v11  ;;  %vm9857_vm5 = vcmask 424960  }
 0x673   :  { %v4405_v0 = vpop.permute.xlu0 %4404  ;;  %v4391_v52 = vmul.f32 %v4383_v61, %v4369_v24  ;;  %v4392_v36 = vmul.f32 %v4384_v15, %v4370_v54  ;;  %v4364_v17 = vadd.f32 %v4360_v10, %v4333_v46  ;;  %vm9858_vm14 = vmmov %vm9857_vm5  ;;  %v9863_v54 = vld [vmem:[#allocation35_spill] sm:$0xff] }
 0x674   :  { %v4407_v30 = vpop.permute.xlu1 %4406  ;;  %v4393_v39 = vadd.f32 %v4389_v12, %v4362_v14  ;;  %vm9859_vm13 = vmmov %vm9857_vm5  ;;  %v4615_v10 = vld [vmem:[#allocation12] sm:$0xff] }
 0x675   :  { %v4413_v6 = vsel %vm9852_vm4, %v4405_v0, %v4407_v30  ;;  %v4395_v16 = vadd.f32 %v4391_v52, %v4364_v17  ;;  %v4396_v20 = vadd.f32 %v4392_v36, %v4365_v9  ;;  %vm9860_vm9 = vmmov %vm9857_vm5 }
 0x676   :  { %v4421_v3 = vmul.f32 %v4413_v6, %v4399_v28 }
 0x677   :  { %v5132_v1 = vpop.permute.xlu0 %5131 }
 0x678   :  { %v4403_v27 = vpop.permute.xlu1 %4402  ;;  %v5134_v31 = vunpack.i.h.bf16 %v5132_v1  ;;  %v5133_v33 = vunpack.i.l.bf16 %v5132_v1  ;;  %v4425_v41 = vadd.f32 %v4421_v3, %v4394_v40  ;;  %v9864_v3 = vld [vmem:[#allocation20_spill] sm:$0xff] }
 0x679   :  { %v4412_v59 = vsel %vm9854_vm12, %v4403_v27, %v4405_v0 }
 0x67a   :  { %v4414_v48 = vsel %vm9855_vm3, %v4407_v30, %v5133_v33  ;;  %v4415_v51 = vsel %vm9856_vm8, %v5133_v33, %v5134_v31  ;;  %v4420_v47 = vmul.f32 %v4412_v59, %v4398_v37  ;;  %v4616_v31 = vld [vmem:[%s8884_s10] sm:$0xff]  ;;  %s5407_s10 = smov [#allocation14]  }
 0x67b   :  { %v4436_v42 = vpop.permute.xlu0 %4435  ;;  %v4422_v45 = vmul.f32 %v4414_v48, %v4400_v44  ;;  %v4423_v58 = vmul.f32 %v4415_v51, %v4401_v43  ;;  %4619 = vperm.xlu1 %5140, %v4616_v31   ;;  %v9866_v37 = vld [vmem:[#allocation21_spill] sm:$0xff]  ;;  %s4777_s24 = sshll.u32 %s5407_s10, 4  ;;  %s4778_s24 = int_to_ptr.vmem [resolvable:$true] %s4777_s24 }
 0x67c   :  { %v4438_v2 = vpop.permute.xlu1 %4437  ;;  %v4424_v35 = vadd.f32 %v4420_v47, %v4393_v39  ;;  %s5269_s29 = scalar_lea.vmem %s4778_s24, 512  ;;  %p5274_p3 = scmp.lt.s32.totalorder %s4778_s24, %s4778_s24 }
 0x67d   :  { %v4444_v4 = vsel %vm9857_vm5, %v4436_v42, %v4438_v2  ;;  %v4426_v28 = vadd.f32 %v4422_v45, %v4395_v16  ;;  %v4427_v1 = vadd.f32 %v4423_v58, %v4396_v20  ;;  %p5270_p2 = scmp.ne.s32.totalorder %s4778_s24, %s5269_s29  ;;  %p5275_p4 = scmp.lt.s32.totalorder %s5269_s29, %s5269_s29 }
 0x67e   :  { %v4452_v0 = vmul.f32 %v4444_v4, %v4430_v55 }
 0x67f   :  { %v5137_v29 = vpop.permute.xlu0 %5136  ;;  %p5276_p5 = por %p5275_p4, %p5274_p3 }
 0x680   :  { %v4434_v30 = vpop.permute.xlu1 %4433  ;;  %v5139_v32 = vunpack.i.h.bf16 %v5137_v29  ;;  %v5138_v57 = vunpack.i.l.bf16 %v5137_v29  ;;  %v4456_v38 = vadd.f32 %v4452_v0, %v4425_v41 }
 0x681   :  { %v4443_v26 = vsel %vm9858_vm14, %v4434_v30, %v4436_v42  ;;  %p5277_p6 = pnand %p5276_p5, %p5270_p2 }
 0x682   :  { %v4451_v23 = vmul.f32 %v4443_v26, %v4429_v53  ;;  %v4445_v13 = vsel %vm9859_vm13, %v4438_v2, %v5138_v57  ;;  %v4446_v8 = vsel %vm9860_vm9, %v5138_v57, %v5139_v32  ;;  %4499 = vmatprep.subr.mxu0 %v4456_v38 }
 0x683   :  { %v4453_v6 = vmul.f32 %v4445_v13, %v4431_v5  ;;  %v4454_v63 = vmul.f32 %v4446_v8, %v4432_v7 }
 0x684   :  { %v4455_v50 = vadd.f32 %v4451_v23, %v4424_v35 }
 0x685   :  { %v4458_v56 = vadd.f32 %v4454_v63, %v4427_v1  ;;  %v4457_v27 = vadd.f32 %v4453_v6, %v4426_v28 }
 0x686   :  { %4500 = vmatpush1.msra.mxu0 %v4455_v50 }
 0x687   :  { %4791 = vmatmul.mubr.msk.f32.vlgmr.msra.gmra.mxu0 %vm9861_vm15, %v4459_v34  ;;  %4570 = vmatprep.subr.mxu1 %v4458_v56 }
 0x688   :  { %4571 = vmatpush1.msra.mxu1 %v4457_v27  ;;  %4689 = vmatprep.mubr.f32.mxu0 %v9405_v18 }
 0x689   :  { %4792 = vmatmul.mubr.msk.f32.vlgmr.msra.gmra.mxu1 %vm9862_vm2, %v4459_v34 }
 0x68a   :  { %4760 = vmatprep.mubr.f32.mxu1 %v9405_v18  ;;  %v9865_v18 = vld [vmem:[#allocation36_spill] sm:$0xff] }
 0x68c   :  { %v4464_v21 = vpop.permute.xlu0 %4463 }
 0x6f6   :  { %v4620_v55 = vpop.permute.xlu1 %4619 }
 0x747   :  { %v4535_v33 = vpop.f32.mrf.mxu0 }
 0x748   :  { %v4536_v62 = vadd.f32 %v4535_v33, %v4464_v21 }
 0x749   :  { %v4537_v49 = vpop.f32.mrf.mxu0  ;;  %v4606_v11 = vpop.f32.mrf.mxu1 }
 0x74a   :  { %v4538_v22 = vadd.f32 %v4537_v49, %v4464_v21  ;;  %v4607_v19 = vadd.f32 %v4606_v11, %v4464_v21  ;;  %v4611_v46 = vmul.f32 %v4536_v62, %v9864_v3 }
 0x74b   :  { %v4608_v24 = vpop.f32.mrf.mxu1 }
 0x74c   :  { %v4612_v61 = vmul.f32 %v4538_v22, %v9863_v54  ;;  %v4609_v15 = vadd.f32 %v4608_v24, %v4464_v21  ;;  %v4613_v59 = vmul.f32 %v4607_v19, %v9866_v37 }
 0x74e   :  { %v4614_v25 = vmul.f32 %v4609_v15, %v9865_v18  ;;  %4655 = vmatprep.subr.mxu0 %v4612_v61 }
 0x74f   :  { %4656 = vmatpush1.msra.mxu0 %v4611_v46 }
 0x750   :  { %4726 = vmatprep.subr.mxu1 %v4614_v25  ;;  %4793 = vmatmul.mubr.msk.f32.vlgmr.msra.gmra.mxu0 %vm9867_vm1, %v4615_v10 }
 0x751   :  { %4727 = vmatpush1.msra.mxu1 %v4613_v59 }
 0x752   :  { %4794 = vmatmul.mubr.msk.f32.vlgmr.msra.gmra.mxu1 %vm9868_vm0, %v4615_v10 }
 0x810   :  { %v4691_v42 = vpop.f32.mrf.mxu0 }
 0x811   :  { %v4692_v40 = vadd.f32 %v4691_v42, %v4620_v55 }
 0x812   :  { %v4762_v12 = vpop.f32.mrf.mxu1  ;;  %v4693_v44 = vpop.f32.mrf.mxu0 }
 0x813   :  { %v4763_v43 = vadd.f32 %v4762_v12, %v4620_v55  ;;  %4767 = vst [vmem:[#allocation14] sm:$0xff] %v4692_v40  ;;  %v4694_v48 = vadd.f32 %v4693_v44, %v4620_v55 }
 0x814   :  { %v4764_v51 = vpop.f32.mrf.mxu1 }
 0x815   :  { %4769 = vst [vmem:[#allocation14 + $0x10] sm:$0xff] %v4763_v43  ;;  %4768 = vst [vmem:[#allocation14 + $0x8] sm:$0xff] %v4694_v48  ;;  %v4765_v2 = vadd.f32 %v4764_v51, %v4620_v55 }
 0x817   :  { %4770 = vst [vmem:[#allocation14 + $0x18] sm:$0xff] %v4765_v2 }
 0x818   :  { %5280 = shalt.err (!%p5277_p6)
}
 0x819   :  { %4780 = dma.vmem_to_hbm [thread:$0]  %s4778_s24, 512, %s8885_s11, [#allocation5]  }
 0x81a   :  { %5297 = dma.done.wait [#allocation5], 512  }
 0x81b   :  { %5298 = vsyncadd [#allocation5], 4294966784 }
 0x81c   :  { %4784 = vsyncpa [#allocation4], 1 }
 0x81d   :  { %4785 = vsyncpa [#allocation7], 1 }
 0x81e   :  { %4786 = vsyncpa [#allocation10], 1 }
 0x81f   :  { %4787 = vsyncpa [#allocation13], 1 }
 0x820   :  { %4788 = vsyncpa [#allocation5], 1 }

</bundles_post_ra>
